<compile_context>
chip_gen: v5e
topology: v5e:2x2
jax: 0.10.0
libtpu: 0.0.40
codegen_flags: <defaults>
</compile_context>

<pallas_src>
import functools

import numpy as np

import jax
import jax.numpy as jnp
from jax import lax
from jax.experimental import pallas as pl
from jax.experimental.pallas import tpu as pltpu

_EPS = 1e-5                      # BatchNorm2d default eps
_LANE = 128                      # lane width / channel padding target
_VMEM_LIMIT = 48 * 1024 * 1024   # safe under v7x's 64 MiB physical VMEM


# ---------------------------------------------------------------------------
# Canonical activation layout (host/trace-time helpers, static shapes).
#
# A feature map of logical size (H, W, C) is stored flat as
#   [ G zero guard rows | (H+2)*(W+2) rows of the zero-padded map | G guards ]
# with G = (W+2)+1, so every 3x3 conv tap is a *contiguous* row window of the
# flat buffer at offset (dh-1)*(W+2)+(dw-1) from the center: the in-VMEM
# im2col needs only plain slice loads (no reshapes, no strided access).
# ---------------------------------------------------------------------------
def _layout(h, w):
    wp = w + 2                       # padded row length
    npix = (h + 2) * wp              # rows of the zero-padded map
    g = wp + 1                       # guard rows on each side
    rtot = npix + 2 * g
    return wp, npix, g, rtot


def _valid_mask_np(h, w):
    """(npix, 1) f32: 1.0 on rows that are real (interior) conv outputs."""
    wp, npix, _, _ = _layout(h, w)
    m = np.zeros((npix, 1), np.float32)
    for hh in range(1, h + 1):
        m[hh * wp + 1: hh * wp + 1 + w, 0] = 1.0
    return m


def _pool_pad_matrix_np(h, w):
    """(rtot_out, npix_in) constant fusing the 2x2 avg-pool with the next
    block's spatial zero-padding and guard rows: out_flat = P @ act_flat."""
    ho, wo = h // 2, w // 2
    wp_in, npix_in, _, _ = _layout(h, w)
    wp_out, _, g_out, rtot_out = _layout(ho, wo)
    p = np.zeros((rtot_out, npix_in), np.float32)
    for i in range(ho):
        for j in range(wo):
            r = g_out + (i + 1) * wp_out + (j + 1)
            for dh in range(2):
                for dw in range(2):
                    p[r, (1 + 2 * i + dh) * wp_in + (1 + 2 * j + dw)] = 0.25
    return p


# ---------------------------------------------------------------------------
# Fused DownBlock2d kernel: conv3x3 -> BatchNorm(train) -> ReLU -> AvgPool2x2
# ---------------------------------------------------------------------------
def _down_block_kernel(xf_ref, w_ref, gamma_ref, beta_ref, mask_ref, pool_ref,
                       out_ref, col_ref, conv_ref, s_ref, ss_ref,
                       *, n, h, w, cin, cpad):
    """Grid is (batch,), sequential.  Steps 0..n-1: one whole-image conv
    matmul + BN stat accumulation; last step: fold stats, BN+ReLU+pool+pad for
    the whole batch, lane-dense bf16 store.  Conv stays in VMEM scratch."""
    wp = w + 2
    npix = (h + 2) * wp
    g = wp + 1
    b = pl.program_id(0)

    @pl.when(b == 0)
    def _init():
        s_ref[...] = jnp.zeros_like(s_ref)
        ss_ref[...] = jnp.zeros_like(ss_ref)

    # ---- in-VMEM im2col: 9 contiguous row-window loads, one store each ----
    for t in range(9):
        dh, dw = divmod(t, 3)
        off = (dh - 1) * wp + (dw - 1)
        col_ref[:, t * cin:(t + 1) * cin] = xf_ref[0, pl.ds(g + off, npix), :]

    # ---- one MXU matmul for the whole image: (npix, 9*cin) @ (9*cin, 128) --
    conv = jnp.dot(col_ref[...], w_ref[...],
                   preferred_element_type=jnp.float32)        # (npix, cpad) f32

    # ---- BatchNorm batch statistics (border/garbage rows masked out) -------
    cm = conv * mask_ref[...]                                  # (npix, cpad)
    s_ref[...] += jnp.sum(cm, axis=0, keepdims=True)
    ss_ref[...] += jnp.sum(cm * cm, axis=0, keepdims=True)
    conv_ref[b] = conv                                         # VMEM only

    # ---- last image: fold stats, BN + ReLU + pool + re-pad, store bf16 -----
    @pl.when(b == n - 1)
    def _finalize():
        inv_cnt = 1.0 / float(n * h * w)
        mean = s_ref[...] * inv_cnt                            # (1, cpad)
        var = jnp.maximum(ss_ref[...] * inv_cnt - mean * mean, 0.0)
        scale = gamma_ref[...] * lax.rsqrt(var + _EPS)
        shift = beta_ref[...] - mean * scale
        pmat = pool_ref[...]                                   # (rtot_out, npix)
        for i in range(n):                                     # small static batch
            y = jnp.maximum(conv_ref[i] * scale + shift, 0.0)  # BN + ReLU
            pooled = jnp.dot(pmat, y.astype(jnp.bfloat16),
                             preferred_element_type=jnp.float32)
            out_ref[i] = pooled.astype(out_ref.dtype)


def _down_block(xf, w_im2col, gamma_p, beta_p, h, w):
    """xf: (N, rtot_in, Cin) bf16 canonical layout -> (N, rtot_out, 128) bf16."""
    n, rtot_in, cin = xf.shape
    cpad = w_im2col.shape[-1]
    _, npix_in, _, rtot_chk = _layout(h, w)
    assert rtot_chk == rtot_in and w_im2col.shape[0] == 9 * cin
    ho, wo = h // 2, w // 2
    _, _, _, rtot_out = _layout(ho, wo)

    mask = jnp.asarray(_valid_mask_np(h, w))                        # (npix, 1) f32
    pmat = jnp.asarray(_pool_pad_matrix_np(h, w), jnp.bfloat16)     # constant

    kernel = functools.partial(_down_block_kernel,
                               n=n, h=h, w=w, cin=cin, cpad=cpad)

    return pl.pallas_call(
        kernel,
        grid=(n,),
        in_specs=[
            pl.BlockSpec((1, rtot_in, cin), lambda b: (b, 0, 0)),
            pl.BlockSpec((9 * cin, cpad), lambda b: (0, 0)),
            pl.BlockSpec((1, cpad), lambda b: (0, 0)),
            pl.BlockSpec((1, cpad), lambda b: (0, 0)),
            pl.BlockSpec((npix_in, 1), lambda b: (0, 0)),
            pl.BlockSpec((rtot_out, npix_in), lambda b: (0, 0)),
        ],
        out_specs=pl.BlockSpec((n, rtot_out, cpad), lambda b: (0, 0, 0)),
        out_shape=jax.ShapeDtypeStruct((n, rtot_out, cpad), jnp.bfloat16),
        scratch_shapes=[
            pltpu.VMEM((npix_in, 9 * cin), jnp.bfloat16),   # im2col tile
            pltpu.VMEM((n, npix_in, cpad), jnp.float32),    # whole-batch conv
            pltpu.VMEM((1, cpad), jnp.float32),             # BN sum
            pltpu.VMEM((1, cpad), jnp.float32),             # BN sum of squares
        ],
        compiler_params=pltpu.CompilerParams(
            # Batch axis carries the BatchNorm reduction + batched finalize,
            # so it runs sequentially ("arbitrary").
            dimension_semantics=("arbitrary",),
            vmem_limit_bytes=_VMEM_LIMIT),
    )(xf, w_im2col, gamma_p, beta_p, mask, pmat)


# ---------------------------------------------------------------------------
# Wrapper: canonical-layout conversion only at the network boundary.
# ---------------------------------------------------------------------------
def _to_canonical(x_nhwc):
    n, h, w, c = x_nhwc.shape
    _, _, g, _ = _layout(h, w)
    xp = jnp.pad(x_nhwc, ((0, 0), (1, 1), (1, 1), (0, 0)))
    xf = jnp.reshape(xp, (n, (h + 2) * (w + 2), c))
    xf = jnp.pad(xf, ((0, 0), (g, g), (0, 0)))
    return xf.astype(jnp.bfloat16)


def _from_canonical(yf, h, w, cout):
    n = yf.shape[0]
    wp, npix, g, _ = _layout(h, w)
    body = yf[:, g:g + npix, :]
    img = jnp.reshape(body, (n, h + 2, wp, yf.shape[-1]))
    img = img[:, 1:1 + h, 1:1 + w, :cout]
    return jnp.transpose(img, (0, 3, 1, 2)).astype(jnp.float32)    # NCHW


@functools.partial(jax.jit, static_argnums=(2,))
def _encoder_forward(params, x_nchw, couts):
    outs = [x_nchw]
    _, _, h, w = x_nchw.shape
    xf = _to_canonical(jnp.transpose(x_nchw, (0, 2, 3, 1)).astype(jnp.float32))
    for (w_im2col, g_p, b_p), cout in zip(params, couts):
        yf = _down_block(xf, w_im2col, g_p, b_p, h, w)
        h, w = h // 2, w // 2
        outs.append(_from_canonical(yf, h, w, cout))
        xf = yf          # next block consumes the padded bf16 output directly
    return outs


class EncoderPallas:
    """Hourglass Encoder (default config): 3 stacked DownBlock2d's.

    Default path only: Conv2d(3x3, pad=1) -> BatchNorm2d (training-mode batch
    statistics, affine) -> ReLU -> AvgPool2d(2x2) per block.
    """

    def __init__(self, block_expansion, in_features, num_blocks=3,
                 max_features=256, key=None):
        if key is None:
            key = jax.random.PRNGKey(0)
        params, couts = [], []
        for i in range(num_blocks):
            cin = in_features if i == 0 else min(max_features,
                                                 block_expansion * 2 ** i)
            cout = min(max_features, block_expansion * 2 ** (i + 1))
            key, kw = jax.random.split(key)
            wgt = 0.1 * jax.random.normal(kw, (cout, cin, 3, 3), jnp.float32)
            # NOTE: the Conv2d bias is intentionally omitted: under
            # training-mode BatchNorm it cancels exactly (the batch mean
            # absorbs it), so the block output is identical without it.
            gamma = jnp.ones((cout,), jnp.float32)    # BatchNorm2d default init
            beta = jnp.zeros((cout,), jnp.float32)

            # Blocks >0 consume the previous block's lane-padded (128 channel)
            # activations directly, so pad Cin up to 128 there as well; the
            # extra input channels are exact zeros and the padded weight rows
            # are zero, so the result is unchanged.
            cin_eff = cin if i == 0 else _LANE
            # (Cout, Cin, kh, kw) -> (kh, kw, Cin, Cout) -> pad -> (9*Cin_eff, 128)
            w9 = jnp.transpose(wgt, (2, 3, 1, 0))
            w9 = jnp.pad(w9, ((0, 0), (0, 0),
                              (0, cin_eff - cin), (0, _LANE - cout)))
            w_im2col = jnp.reshape(w9, (9 * cin_eff, _LANE)).astype(jnp.bfloat16)
            g_p = jnp.pad(gamma, (0, _LANE - cout)).reshape(1, _LANE)
            b_p = jnp.pad(beta, (0, _LANE - cout)).reshape(1, _LANE)

            params.append((w_im2col, g_p, b_p))
            couts.append(cout)
        self.params = tuple(params)
        self.couts = tuple(couts)

    def __call__(self, x_nchw, drv_exp=None):
        # drv_exp feeds only the ADAIN branch (AdaINc>0), which is not emitted.
        return _encoder_forward(self.params, x_nchw, self.couts)


if __name__ == "__main__":
    key = jax.random.PRNGKey(0)
    k_x, k_p = jax.random.split(key)

    # Small, default-consistent shapes: block_expansion=8, in_features=4
    # Channels per block: 4 -> 16 -> 32 -> 64 ; spatial 16 -> 8 -> 4 -> 2.
    x = jax.random.normal(k_x, (2, 4, 16, 16), jnp.float32)   # NCHW like PyTorch

    enc = EncoderPallas(block_expansion=8, in_features=4, num_blocks=3,
                        max_features=256, key=k_p)
    outs = enc(x)

    for o in outs:
        jax.block_until_ready(o)

    expected_shapes = [(2, 4, 16, 16), (2, 16, 8, 8), (2, 32, 4, 4), (2, 64, 2, 2)]
    assert [tuple(o.shape) for o in outs] == expected_shapes, \
        [tuple(o.shape) for o in outs]
    assert all(bool(jnp.all(jnp.isfinite(o))) for o in outs)

    print("KERNEL_OK")
</pallas_src>

<mosaic_0001>
module attributes {stable_mosaic.version = 11 : i64} {
  func.func @_down_block_kernel(%arg0: i32, %arg1: memref<1x362x4xbf16, #tpu.memory_space<vmem>>, %arg2: memref<36x128xbf16, #tpu.memory_space<vmem>>, %arg3: memref<1x128xf32, #tpu.memory_space<vmem>>, %arg4: memref<1x128xf32, #tpu.memory_space<vmem>>, %arg5: memref<324x1xf32, #tpu.memory_space<vmem>>, %arg6: memref<122x324xbf16, #tpu.memory_space<vmem>>, %arg7: memref<2x122x128xbf16, #tpu.memory_space<vmem>>, %arg8: memref<324x36xbf16, #tpu.memory_space<vmem>>, %arg9: memref<2x324x128xf32, #tpu.memory_space<vmem>>, %arg10: memref<1x128xf32, #tpu.memory_space<vmem>>, %arg11: memref<1x128xf32, #tpu.memory_space<vmem>>) attributes {dimension_semantics = [#tpu.dimension_semantics<arbitrary>], iteration_bounds = array<i64: 2>, scalar_prefetch = 0 : i64, scratch_operands = 4 : i64, tpu.core_type = #tpu.core_type<tc>, window_params = [{transform_indices = @transform_0, window_bounds = array<i64: 1, 362, 4>}, {pipeline_mode = #tpu.pipeline_mode<synchronous>, transform_indices = @transform_1, window_bounds = array<i64: 36, 128>}, {pipeline_mode = #tpu.pipeline_mode<synchronous>, transform_indices = @transform_2, window_bounds = array<i64: 1, 128>}, {pipeline_mode = #tpu.pipeline_mode<synchronous>, transform_indices = @transform_3, window_bounds = array<i64: 1, 128>}, {pipeline_mode = #tpu.pipeline_mode<synchronous>, transform_indices = @transform_4, window_bounds = array<i64: 324, 1>}, {pipeline_mode = #tpu.pipeline_mode<synchronous>, transform_indices = @transform_5, window_bounds = array<i64: 122, 324>}, {pipeline_mode = #tpu.pipeline_mode<synchronous>, transform_indices = @transform_6, window_bounds = array<i64: 2, 122, 128>}]} {
    %c0_i32 = arith.constant 0 : i32
    %0 = arith.cmpi eq, %arg0, %c0_i32 : i32
    %1 = arith.extui %0 : i1 to i32
    %c0_i32_0 = arith.constant 0 : i32
    %2 = arith.cmpi ne, %1, %c0_i32_0 : i32
    scf.if %2 {
      %cst_49 = arith.constant 0.000000e+00 : f32
      %54 = vector.broadcast %cst_49 : f32 to vector<1x128xf32>
      %c0_50 = arith.constant 0 : index
      %c0_51 = arith.constant 0 : index
      %55 = vector.load %arg10[%c0_50, %c0_51] : memref<1x128xf32, #tpu.memory_space<vmem>>, vector<1x128xf32>
      tpu.vector_store %arg10[%c0_50, %c0_51], %54 {strides = array<i32>} : memref<1x128xf32, #tpu.memory_space<vmem>>, vector<1x128xf32>,
      %cst_52 = arith.constant 0.000000e+00 : f32
      %56 = vector.broadcast %cst_52 : f32 to vector<1x128xf32>
      %c0_53 = arith.constant 0 : index
      %c0_54 = arith.constant 0 : index
      %57 = vector.load %arg11[%c0_53, %c0_54] : memref<1x128xf32, #tpu.memory_space<vmem>>, vector<1x128xf32>
      tpu.vector_store %arg11[%c0_53, %c0_54], %56 {strides = array<i32>} : memref<1x128xf32, #tpu.memory_space<vmem>>, vector<1x128xf32>,
    } else {
    }
    %c0 = arith.constant 0 : index
    %c0_1 = arith.constant 0 : index
    %c0_2 = arith.constant 0 : index
    %3 = vector.load %arg1[%c0, %c0_1, %c0_2] : memref<1x362x4xbf16, #tpu.memory_space<vmem>>, vector<1x324x4xbf16>
    %4 = vector.shape_cast %3 : vector<1x324x4xbf16> to vector<324x4xbf16>
    %c0_3 = arith.constant 0 : index
    %c0_4 = arith.constant 0 : index
    %5 = vector.load %arg8[%c0_3, %c0_4] : memref<324x36xbf16, #tpu.memory_space<vmem>>, vector<324x4xbf16>
    tpu.vector_store %arg8[%c0_3, %c0_4], %4 {strides = array<i32>} : memref<324x36xbf16, #tpu.memory_space<vmem>>, vector<324x4xbf16>,
    %c0_5 = arith.constant 0 : index
    %c1 = arith.constant 1 : index
    %c0_6 = arith.constant 0 : index
    %6 = vector.load %arg1[%c0_5, %c1, %c0_6] : memref<1x362x4xbf16, #tpu.memory_space<vmem>>, vector<1x324x4xbf16>
    %7 = vector.shape_cast %6 : vector<1x324x4xbf16> to vector<324x4xbf16>
    %c0_7 = arith.constant 0 : index
    %c4 = arith.constant 4 : index
    %8 = vector.load %arg8[%c0_7, %c4] : memref<324x36xbf16, #tpu.memory_space<vmem>>, vector<324x4xbf16>
    tpu.vector_store %arg8[%c0_7, %c4], %7 {strides = array<i32>} : memref<324x36xbf16, #tpu.memory_space<vmem>>, vector<324x4xbf16>,
    %c0_8 = arith.constant 0 : index
    %c2 = arith.constant 2 : index
    %c0_9 = arith.constant 0 : index
    %9 = vector.load %arg1[%c0_8, %c2, %c0_9] : memref<1x362x4xbf16, #tpu.memory_space<vmem>>, vector<1x324x4xbf16>
    %10 = vector.shape_cast %9 : vector<1x324x4xbf16> to vector<324x4xbf16>
    %c0_10 = arith.constant 0 : index
    %c8 = arith.constant 8 : index
    %11 = vector.load %arg8[%c0_10, %c8] : memref<324x36xbf16, #tpu.memory_space<vmem>>, vector<324x4xbf16>
    tpu.vector_store %arg8[%c0_10, %c8], %10 {strides = array<i32>} : memref<324x36xbf16, #tpu.memory_space<vmem>>, vector<324x4xbf16>,
    %c0_11 = arith.constant 0 : index
    %c18 = arith.constant 18 : index
    %c0_12 = arith.constant 0 : index
    %12 = vector.load %arg1[%c0_11, %c18, %c0_12] : memref<1x362x4xbf16, #tpu.memory_space<vmem>>, vector<1x324x4xbf16>
    %13 = vector.shape_cast %12 : vector<1x324x4xbf16> to vector<324x4xbf16>
    %c0_13 = arith.constant 0 : index
    %c12 = arith.constant 12 : index
    %14 = vector.load %arg8[%c0_13, %c12] : memref<324x36xbf16, #tpu.memory_space<vmem>>, vector<324x4xbf16>
    tpu.vector_store %arg8[%c0_13, %c12], %13 {strides = array<i32>} : memref<324x36xbf16, #tpu.memory_space<vmem>>, vector<324x4xbf16>,
    %c0_14 = arith.constant 0 : index
    %c19 = arith.constant 19 : index
    %c0_15 = arith.constant 0 : index
    %15 = vector.load %arg1[%c0_14, %c19, %c0_15] : memref<1x362x4xbf16, #tpu.memory_space<vmem>>, vector<1x324x4xbf16>
    %16 = vector.shape_cast %15 : vector<1x324x4xbf16> to vector<324x4xbf16>
    %c0_16 = arith.constant 0 : index
    %c16 = arith.constant 16 : index
    %17 = vector.load %arg8[%c0_16, %c16] : memref<324x36xbf16, #tpu.memory_space<vmem>>, vector<324x4xbf16>
    tpu.vector_store %arg8[%c0_16, %c16], %16 {strides = array<i32>} : memref<324x36xbf16, #tpu.memory_space<vmem>>, vector<324x4xbf16>,
    %c0_17 = arith.constant 0 : index
    %c20 = arith.constant 20 : index
    %c0_18 = arith.constant 0 : index
    %18 = vector.load %arg1[%c0_17, %c20, %c0_18] : memref<1x362x4xbf16, #tpu.memory_space<vmem>>, vector<1x324x4xbf16>
    %19 = vector.shape_cast %18 : vector<1x324x4xbf16> to vector<324x4xbf16>
    %c0_19 = arith.constant 0 : index
    %c20_20 = arith.constant 20 : index
    %20 = vector.load %arg8[%c0_19, %c20_20] : memref<324x36xbf16, #tpu.memory_space<vmem>>, vector<324x4xbf16>
    tpu.vector_store %arg8[%c0_19, %c20_20], %19 {strides = array<i32>} : memref<324x36xbf16, #tpu.memory_space<vmem>>, vector<324x4xbf16>,
    %c0_21 = arith.constant 0 : index
    %c36 = arith.constant 36 : index
    %c0_22 = arith.constant 0 : index
    %21 = vector.load %arg1[%c0_21, %c36, %c0_22] : memref<1x362x4xbf16, #tpu.memory_space<vmem>>, vector<1x324x4xbf16>
    %22 = vector.shape_cast %21 : vector<1x324x4xbf16> to vector<324x4xbf16>
    %c0_23 = arith.constant 0 : index
    %c24 = arith.constant 24 : index
    %23 = vector.load %arg8[%c0_23, %c24] : memref<324x36xbf16, #tpu.memory_space<vmem>>, vector<324x4xbf16>
    tpu.vector_store %arg8[%c0_23, %c24], %22 {strides = array<i32>} : memref<324x36xbf16, #tpu.memory_space<vmem>>, vector<324x4xbf16>,
    %c0_24 = arith.constant 0 : index
    %c37 = arith.constant 37 : index
    %c0_25 = arith.constant 0 : index
    %24 = vector.load %arg1[%c0_24, %c37, %c0_25] : memref<1x362x4xbf16, #tpu.memory_space<vmem>>, vector<1x324x4xbf16>
    %25 = vector.shape_cast %24 : vector<1x324x4xbf16> to vector<324x4xbf16>
    %c0_26 = arith.constant 0 : index
    %c28 = arith.constant 28 : index
    %26 = vector.load %arg8[%c0_26, %c28] : memref<324x36xbf16, #tpu.memory_space<vmem>>, vector<324x4xbf16>
    tpu.vector_store %arg8[%c0_26, %c28], %25 {strides = array<i32>} : memref<324x36xbf16, #tpu.memory_space<vmem>>, vector<324x4xbf16>,
    %c0_27 = arith.constant 0 : index
    %c38 = arith.constant 38 : index
    %c0_28 = arith.constant 0 : index
    %27 = vector.load %arg1[%c0_27, %c38, %c0_28] : memref<1x362x4xbf16, #tpu.memory_space<vmem>>, vector<1x324x4xbf16>
    %28 = vector.shape_cast %27 : vector<1x324x4xbf16> to vector<324x4xbf16>
    %c0_29 = arith.constant 0 : index
    %c32 = arith.constant 32 : index
    %29 = vector.load %arg8[%c0_29, %c32] : memref<324x36xbf16, #tpu.memory_space<vmem>>, vector<324x4xbf16>
    tpu.vector_store %arg8[%c0_29, %c32], %28 {strides = array<i32>} : memref<324x36xbf16, #tpu.memory_space<vmem>>, vector<324x4xbf16>,
    %c0_30 = arith.constant 0 : index
    %c0_31 = arith.constant 0 : index
    %30 = vector.load %arg8[%c0_30, %c0_31] : memref<324x36xbf16, #tpu.memory_space<vmem>>, vector<324x36xbf16>
    %c0_32 = arith.constant 0 : index
    %c0_33 = arith.constant 0 : index
    %31 = vector.load %arg2[%c0_32, %c0_33] : memref<36x128xbf16, #tpu.memory_space<vmem>>, vector<36x128xbf16>
    %cst = arith.constant dense<0.000000e+00> : vector<324x128xf32>
    %32 = tpu.matmul %30, %31, %cst {dimension_numbers = #tpu.dot_dimension_numbers<[1], [0], [0], [1], [0, 0, 1, 1], [], []>} : vector<324x36xbf16>, vector<36x128xbf16>, vector<324x128xf32> -> vector<324x128xf32>
    %c0_34 = arith.constant 0 : index
    %c0_35 = arith.constant 0 : index
    %33 = vector.load %arg5[%c0_34, %c0_35] : memref<324x1xf32, #tpu.memory_space<vmem>>, vector<324x1xf32>
    %34 = vector.broadcast %33 : vector<324x1xf32> to vector<324x128xf32>
    %35 = arith.mulf %32, %34 : vector<324x128xf32>
    %c0_36 = arith.constant 0 : index
    %c0_37 = arith.constant 0 : index
    %36 = vector.load %arg10[%c0_36, %c0_37] : memref<1x128xf32, #tpu.memory_space<vmem>>, vector<1x128xf32>
    %cst_38 = arith.constant dense<0.000000e+00> : vector<128xf32>
    %37 = vector.multi_reduction <add>, %35, %cst_38 [0] : vector<324x128xf32> to vector<128xf32>
    %38 = vector.shape_cast %37 : vector<128xf32> to vector<1x128xf32>
    %39 = arith.addf %36, %38 : vector<1x128xf32>
    %c0_39 = arith.constant 0 : index
    %c0_40 = arith.constant 0 : index
    %40 = vector.load %arg10[%c0_39, %c0_40] : memref<1x128xf32, #tpu.memory_space<vmem>>, vector<1x128xf32>
    tpu.vector_store %arg10[%c0_39, %c0_40], %39 {strides = array<i32>} : memref<1x128xf32, #tpu.memory_space<vmem>>, vector<1x128xf32>,
    %c0_41 = arith.constant 0 : index
    %c0_42 = arith.constant 0 : index
    %41 = vector.load %arg11[%c0_41, %c0_42] : memref<1x128xf32, #tpu.memory_space<vmem>>, vector<1x128xf32>
    %42 = arith.mulf %35, %35 : vector<324x128xf32>
    %cst_43 = arith.constant dense<0.000000e+00> : vector<128xf32>
    %43 = vector.multi_reduction <add>, %42, %cst_43 [0] : vector<324x128xf32> to vector<128xf32>
    %44 = vector.shape_cast %43 : vector<128xf32> to vector<1x128xf32>
    %45 = arith.addf %41, %44 : vector<1x128xf32>
    %c0_44 = arith.constant 0 : index
    %c0_45 = arith.constant 0 : index
    %46 = vector.load %arg11[%c0_44, %c0_45] : memref<1x128xf32, #tpu.memory_space<vmem>>, vector<1x128xf32>
    tpu.vector_store %arg11[%c0_44, %c0_45], %45 {strides = array<i32>} : memref<1x128xf32, #tpu.memory_space<vmem>>, vector<1x128xf32>,
    %47 = arith.index_cast %arg0 : i32 to index
    %c0_46 = arith.constant 0 : index
    %c0_47 = arith.constant 0 : index
    %48 = vector.load %arg9[%47, %c0_46, %c0_47] : memref<2x324x128xf32, #tpu.memory_space<vmem>>, vector<1x324x128xf32>
    %49 = vector.shape_cast %48 : vector<1x324x128xf32> to vector<324x128xf32>
    %50 = vector.shape_cast %32 : vector<324x128xf32> to vector<1x324x128xf32>
    tpu.vector_store %arg9[%47, %c0_46, %c0_47], %50 {strides = array<i32>} : memref<2x324x128xf32, #tpu.memory_space<vmem>>, vector<1x324x128xf32>,
    %c1_i32 = arith.constant 1 : i32
    %51 = arith.cmpi eq, %arg0, %c1_i32 : i32
    %52 = arith.extui %51 : i1 to i32
    %c0_i32_48 = arith.constant 0 : i32
    %53 = arith.cmpi ne, %52, %c0_i32_48 : i32
    scf.if %53 {
      %c0_49 = arith.constant 0 : index
      %c0_50 = arith.constant 0 : index
      %54 = vector.load %arg10[%c0_49, %c0_50] : memref<1x128xf32, #tpu.memory_space<vmem>>, vector<1x128xf32>
      %cst_51 = arith.constant 0.001953125 : f32
      %55 = vector.broadcast %cst_51 : f32 to vector<1x128xf32>
      %56 = arith.mulf %54, %55 : vector<1x128xf32>
      %c0_52 = arith.constant 0 : index
      %c0_53 = arith.constant 0 : index
      %57 = vector.load %arg11[%c0_52, %c0_53] : memref<1x128xf32, #tpu.memory_space<vmem>>, vector<1x128xf32>
      %cst_54 = arith.constant 0.001953125 : f32
      %58 = vector.broadcast %cst_54 : f32 to vector<1x128xf32>
      %59 = arith.mulf %57, %58 : vector<1x128xf32>
      %60 = arith.mulf %56, %56 : vector<1x128xf32>
      %61 = arith.subf %59, %60 : vector<1x128xf32>
      %cst_55 = arith.constant 0.000000e+00 : f32
      %62 = vector.broadcast %cst_55 : f32 to vector<1x128xf32>
      %63 = arith.maximumf %61, %62 : vector<1x128xf32>
      %c0_56 = arith.constant 0 : index
      %c0_57 = arith.constant 0 : index
      %64 = vector.load %arg3[%c0_56, %c0_57] : memref<1x128xf32, #tpu.memory_space<vmem>>, vector<1x128xf32>
      %cst_58 = arith.constant 9.99999974E-6 : f32
      %65 = vector.broadcast %cst_58 : f32 to vector<1x128xf32>
      %66 = arith.addf %63, %65 : vector<1x128xf32>
      %67 = math.rsqrt %66 : vector<1x128xf32>
      %68 = arith.mulf %64, %67 : vector<1x128xf32>
      %c0_59 = arith.constant 0 : index
      %c0_60 = arith.constant 0 : index
      %69 = vector.load %arg4[%c0_59, %c0_60] : memref<1x128xf32, #tpu.memory_space<vmem>>, vector<1x128xf32>
      %70 = arith.mulf %56, %68 : vector<1x128xf32>
      %71 = arith.subf %69, %70 : vector<1x128xf32>
      %c0_61 = arith.constant 0 : index
      %c0_62 = arith.constant 0 : index
      %72 = vector.load %arg6[%c0_61, %c0_62] : memref<122x324xbf16, #tpu.memory_space<vmem>>, vector<122x324xbf16>
      %c0_63 = arith.constant 0 : index
      %c0_64 = arith.constant 0 : index
      %c0_65 = arith.constant 0 : index
      %73 = vector.load %arg9[%c0_63, %c0_64, %c0_65] : memref<2x324x128xf32, #tpu.memory_space<vmem>>, vector<1x324x128xf32>
      %74 = vector.shape_cast %73 : vector<1x324x128xf32> to vector<324x128xf32>
      %75 = vector.broadcast %68 : vector<1x128xf32> to vector<324x128xf32>
      %76 = arith.mulf %74, %75 : vector<324x128xf32>
      %77 = vector.broadcast %71 : vector<1x128xf32> to vector<324x128xf32>
      %78 = arith.addf %76, %77 : vector<324x128xf32>
      %cst_66 = arith.constant 0.000000e+00 : f32
      %79 = vector.broadcast %cst_66 : f32 to vector<324x128xf32>
      %80 = arith.maximumf %78, %79 : vector<324x128xf32>
      %81 = arith.truncf %80 : vector<324x128xf32> to vector<324x128xbf16>
      %cst_67 = arith.constant dense<0.000000e+00> : vector<122x128xf32>
      %82 = tpu.matmul %72, %81, %cst_67 {dimension_numbers = #tpu.dot_dimension_numbers<[1], [0], [0], [1], [0, 0, 1, 1], [], []>} : vector<122x324xbf16>, vector<324x128xbf16>, vector<122x128xf32> -> vector<122x128xf32>
      %83 = arith.truncf %82 : vector<122x128xf32> to vector<122x128xbf16>
      %c0_68 = arith.constant 0 : index
      %c0_69 = arith.constant 0 : index
      %c0_70 = arith.constant 0 : index
      %84 = vector.load %arg7[%c0_68, %c0_69, %c0_70] : memref<2x122x128xbf16, #tpu.memory_space<vmem>>, vector<1x122x128xbf16>
      %85 = vector.shape_cast %84 : vector<1x122x128xbf16> to vector<122x128xbf16>
      %86 = vector.shape_cast %83 : vector<122x128xbf16> to vector<1x122x128xbf16>
      tpu.vector_store %arg7[%c0_68, %c0_69, %c0_70], %86 {strides = array<i32>} : memref<2x122x128xbf16, #tpu.memory_space<vmem>>, vector<1x122x128xbf16>,
      %c1_71 = arith.constant 1 : index
      %c0_72 = arith.constant 0 : index
      %c0_73 = arith.constant 0 : index
      %87 = vector.load %arg9[%c1_71, %c0_72, %c0_73] : memref<2x324x128xf32, #tpu.memory_space<vmem>>, vector<1x324x128xf32>
      %88 = vector.shape_cast %87 : vector<1x324x128xf32> to vector<324x128xf32>
      %89 = vector.broadcast %68 : vector<1x128xf32> to vector<324x128xf32>
      %90 = arith.mulf %88, %89 : vector<324x128xf32>
      %91 = vector.broadcast %71 : vector<1x128xf32> to vector<324x128xf32>
      %92 = arith.addf %90, %91 : vector<324x128xf32>
      %cst_74 = arith.constant 0.000000e+00 : f32
      %93 = vector.broadcast %cst_74 : f32 to vector<324x128xf32>
      %94 = arith.maximumf %92, %93 : vector<324x128xf32>
      %95 = arith.truncf %94 : vector<324x128xf32> to vector<324x128xbf16>
      %cst_75 = arith.constant dense<0.000000e+00> : vector<122x128xf32>
      %96 = tpu.matmul %72, %95, %cst_75 {dimension_numbers = #tpu.dot_dimension_numbers<[1], [0], [0], [1], [0, 0, 1, 1], [], []>} : vector<122x324xbf16>, vector<324x128xbf16>, vector<122x128xf32> -> vector<122x128xf32>
      %97 = arith.truncf %96 : vector<122x128xf32> to vector<122x128xbf16>
      %c1_76 = arith.constant 1 : index
      %c0_77 = arith.constant 0 : index
      %c0_78 = arith.constant 0 : index
      %98 = vector.load %arg7[%c1_76, %c0_77, %c0_78] : memref<2x122x128xbf16, #tpu.memory_space<vmem>>, vector<1x122x128xbf16>
      %99 = vector.shape_cast %98 : vector<1x122x128xbf16> to vector<122x128xbf16>
      %100 = vector.shape_cast %97 : vector<122x128xbf16> to vector<1x122x128xbf16>
      tpu.vector_store %arg7[%c1_76, %c0_77, %c0_78], %100 {strides = array<i32>} : memref<2x122x128xbf16, #tpu.memory_space<vmem>>, vector<1x122x128xbf16>,
    } else {
    }
    return
  }
  func.func @transform_0(%arg0: i32) -> (i32, i32, i32) {
    %c0_i32 = arith.constant 0 : i32
    %c0_i32_0 = arith.constant 0 : i32
    %c0_i32_1 = arith.constant 0 : i32
    return %arg0, %c0_i32, %c0_i32_0 : i32, i32, i32
  }
  func.func @transform_1(%arg0: i32) -> (i32, i32) {
    %c0_i32 = arith.constant 0 : i32
    %c0_i32_0 = arith.constant 0 : i32
    %c0_i32_1 = arith.constant 0 : i32
    return %c0_i32, %c0_i32_0 : i32, i32
  }
  func.func @transform_2(%arg0: i32) -> (i32, i32) {
    %c0_i32 = arith.constant 0 : i32
    %c0_i32_0 = arith.constant 0 : i32
    %c0_i32_1 = arith.constant 0 : i32
    return %c0_i32, %c0_i32_0 : i32, i32
  }
  func.func @transform_3(%arg0: i32) -> (i32, i32) {
    %c0_i32 = arith.constant 0 : i32
    %c0_i32_0 = arith.constant 0 : i32
    %c0_i32_1 = arith.constant 0 : i32
    return %c0_i32, %c0_i32_0 : i32, i32
  }
  func.func @transform_4(%arg0: i32) -> (i32, i32) {
    %c0_i32 = arith.constant 0 : i32
    %c0_i32_0 = arith.constant 0 : i32
    %c0_i32_1 = arith.constant 0 : i32
    return %c0_i32, %c0_i32_0 : i32, i32
  }
  func.func @transform_5(%arg0: i32) -> (i32, i32) {
    %c0_i32 = arith.constant 0 : i32
    %c0_i32_0 = arith.constant 0 : i32
    %c0_i32_1 = arith.constant 0 : i32
    return %c0_i32, %c0_i32_0 : i32, i32
  }
  func.func @transform_6(%arg0: i32) -> (i32, i32, i32) {
    %c0_i32 = arith.constant 0 : i32
    %c0_i32_0 = arith.constant 0 : i32
    %c0_i32_1 = arith.constant 0 : i32
    %c0_i32_2 = arith.constant 0 : i32
    return %c0_i32, %c0_i32_0, %c0_i32_1 : i32, i32, i32
  }
}

module attributes {stable_mosaic.version = 11 : i64} {
  func.func @_down_block_kernel(%arg0: i32, %arg1: memref<1x122x128xbf16, #tpu.memory_space<vmem>>, %arg2: memref<1152x128xbf16, #tpu.memory_space<vmem>>, %arg3: memref<1x128xf32, #tpu.memory_space<vmem>>, %arg4: memref<1x128xf32, #tpu.memory_space<vmem>>, %arg5: memref<100x1xf32, #tpu.memory_space<vmem>>, %arg6: memref<50x100xbf16, #tpu.memory_space<vmem>>, %arg7: memref<2x50x128xbf16, #tpu.memory_space<vmem>>, %arg8: memref<100x1152xbf16, #tpu.memory_space<vmem>>, %arg9: memref<2x100x128xf32, #tpu.memory_space<vmem>>, %arg10: memref<1x128xf32, #tpu.memory_space<vmem>>, %arg11: memref<1x128xf32, #tpu.memory_space<vmem>>) attributes {dimension_semantics = [#tpu.dimension_semantics<arbitrary>], iteration_bounds = array<i64: 2>, scalar_prefetch = 0 : i64, scratch_operands = 4 : i64, tpu.core_type = #tpu.core_type<tc>, window_params = [{transform_indices = @transform_0, window_bounds = array<i64: 1, 122, 128>}, {pipeline_mode = #tpu.pipeline_mode<synchronous>, transform_indices = @transform_1, window_bounds = array<i64: 1152, 128>}, {pipeline_mode = #tpu.pipeline_mode<synchronous>, transform_indices = @transform_2, window_bounds = array<i64: 1, 128>}, {pipeline_mode = #tpu.pipeline_mode<synchronous>, transform_indices = @transform_3, window_bounds = array<i64: 1, 128>}, {pipeline_mode = #tpu.pipeline_mode<synchronous>, transform_indices = @transform_4, window_bounds = array<i64: 100, 1>}, {pipeline_mode = #tpu.pipeline_mode<synchronous>, transform_indices = @transform_5, window_bounds = array<i64: 50, 100>}, {pipeline_mode = #tpu.pipeline_mode<synchronous>, transform_indices = @transform_6, window_bounds = array<i64: 2, 50, 128>}]} {
    %c0_i32 = arith.constant 0 : i32
    %0 = arith.cmpi eq, %arg0, %c0_i32 : i32
    %1 = arith.extui %0 : i1 to i32
    %c0_i32_0 = arith.constant 0 : i32
    %2 = arith.cmpi ne, %1, %c0_i32_0 : i32
    scf.if %2 {
      %cst_48 = arith.constant 0.000000e+00 : f32
      %54 = vector.broadcast %cst_48 : f32 to vector<1x128xf32>
      %c0_49 = arith.constant 0 : index
      %c0_50 = arith.constant 0 : index
      %55 = vector.load %arg10[%c0_49, %c0_50] : memref<1x128xf32, #tpu.memory_space<vmem>>, vector<1x128xf32>
      tpu.vector_store %arg10[%c0_49, %c0_50], %54 {strides = array<i32>} : memref<1x128xf32, #tpu.memory_space<vmem>>, vector<1x128xf32>,
      %cst_51 = arith.constant 0.000000e+00 : f32
      %56 = vector.broadcast %cst_51 : f32 to vector<1x128xf32>
      %c0_52 = arith.constant 0 : index
      %c0_53 = arith.constant 0 : index
      %57 = vector.load %arg11[%c0_52, %c0_53] : memref<1x128xf32, #tpu.memory_space<vmem>>, vector<1x128xf32>
      tpu.vector_store %arg11[%c0_52, %c0_53], %56 {strides = array<i32>} : memref<1x128xf32, #tpu.memory_space<vmem>>, vector<1x128xf32>,
    } else {
    }
    %c0 = arith.constant 0 : index
    %c0_1 = arith.constant 0 : index
    %c0_2 = arith.constant 0 : index
    %3 = vector.load %arg1[%c0, %c0_1, %c0_2] : memref<1x122x128xbf16, #tpu.memory_space<vmem>>, vector<1x100x128xbf16>
    %4 = vector.shape_cast %3 : vector<1x100x128xbf16> to vector<100x128xbf16>
    %c0_3 = arith.constant 0 : index
    %c0_4 = arith.constant 0 : index
    %5 = vector.load %arg8[%c0_3, %c0_4] : memref<100x1152xbf16, #tpu.memory_space<vmem>>, vector<100x128xbf16>
    tpu.vector_store %arg8[%c0_3, %c0_4], %4 {strides = array<i32>} : memref<100x1152xbf16, #tpu.memory_space<vmem>>, vector<100x128xbf16>,
    %c0_5 = arith.constant 0 : index
    %c1 = arith.constant 1 : index
    %c0_6 = arith.constant 0 : index
    %6 = vector.load %arg1[%c0_5, %c1, %c0_6] : memref<1x122x128xbf16, #tpu.memory_space<vmem>>, vector<1x100x128xbf16>
    %7 = vector.shape_cast %6 : vector<1x100x128xbf16> to vector<100x128xbf16>
    %c0_7 = arith.constant 0 : index
    %c128 = arith.constant 128 : index
    %8 = vector.load %arg8[%c0_7, %c128] : memref<100x1152xbf16, #tpu.memory_space<vmem>>, vector<100x128xbf16>
    tpu.vector_store %arg8[%c0_7, %c128], %7 {strides = array<i32>} : memref<100x1152xbf16, #tpu.memory_space<vmem>>, vector<100x128xbf16>,
    %c0_8 = arith.constant 0 : index
    %c2 = arith.constant 2 : index
    %c0_9 = arith.constant 0 : index
    %9 = vector.load %arg1[%c0_8, %c2, %c0_9] : memref<1x122x128xbf16, #tpu.memory_space<vmem>>, vector<1x100x128xbf16>
    %10 = vector.shape_cast %9 : vector<1x100x128xbf16> to vector<100x128xbf16>
    %c0_10 = arith.constant 0 : index
    %c256 = arith.constant 256 : index
    %11 = vector.load %arg8[%c0_10, %c256] : memref<100x1152xbf16, #tpu.memory_space<vmem>>, vector<100x128xbf16>
    tpu.vector_store %arg8[%c0_10, %c256], %10 {strides = array<i32>} : memref<100x1152xbf16, #tpu.memory_space<vmem>>, vector<100x128xbf16>,
    %c0_11 = arith.constant 0 : index
    %c10 = arith.constant 10 : index
    %c0_12 = arith.constant 0 : index
    %12 = vector.load %arg1[%c0_11, %c10, %c0_12] : memref<1x122x128xbf16, #tpu.memory_space<vmem>>, vector<1x100x128xbf16>
    %13 = vector.shape_cast %12 : vector<1x100x128xbf16> to vector<100x128xbf16>
    %c0_13 = arith.constant 0 : index
    %c384 = arith.constant 384 : index
    %14 = vector.load %arg8[%c0_13, %c384] : memref<100x1152xbf16, #tpu.memory_space<vmem>>, vector<100x128xbf16>
    tpu.vector_store %arg8[%c0_13, %c384], %13 {strides = array<i32>} : memref<100x1152xbf16, #tpu.memory_space<vmem>>, vector<100x128xbf16>,
    %c0_14 = arith.constant 0 : index
    %c11 = arith.constant 11 : index
    %c0_15 = arith.constant 0 : index
    %15 = vector.load %arg1[%c0_14, %c11, %c0_15] : memref<1x122x128xbf16, #tpu.memory_space<vmem>>, vector<1x100x128xbf16>
    %16 = vector.shape_cast %15 : vector<1x100x128xbf16> to vector<100x128xbf16>
    %c0_16 = arith.constant 0 : index
    %c512 = arith.constant 512 : index
    %17 = vector.load %arg8[%c0_16, %c512] : memref<100x1152xbf16, #tpu.memory_space<vmem>>, vector<100x128xbf16>
    tpu.vector_store %arg8[%c0_16, %c512], %16 {strides = array<i32>} : memref<100x1152xbf16, #tpu.memory_space<vmem>>, vector<100x128xbf16>,
    %c0_17 = arith.constant 0 : index
    %c12 = arith.constant 12 : index
    %c0_18 = arith.constant 0 : index
    %18 = vector.load %arg1[%c0_17, %c12, %c0_18] : memref<1x122x128xbf16, #tpu.memory_space<vmem>>, vector<1x100x128xbf16>
    %19 = vector.shape_cast %18 : vector<1x100x128xbf16> to vector<100x128xbf16>
    %c0_19 = arith.constant 0 : index
    %c640 = arith.constant 640 : index
    %20 = vector.load %arg8[%c0_19, %c640] : memref<100x1152xbf16, #tpu.memory_space<vmem>>, vector<100x128xbf16>
    tpu.vector_store %arg8[%c0_19, %c640], %19 {strides = array<i32>} : memref<100x1152xbf16, #tpu.memory_space<vmem>>, vector<100x128xbf16>,
    %c0_20 = arith.constant 0 : index
    %c20 = arith.constant 20 : index
    %c0_21 = arith.constant 0 : index
    %21 = vector.load %arg1[%c0_20, %c20, %c0_21] : memref<1x122x128xbf16, #tpu.memory_space<vmem>>, vector<1x100x128xbf16>
    %22 = vector.shape_cast %21 : vector<1x100x128xbf16> to vector<100x128xbf16>
    %c0_22 = arith.constant 0 : index
    %c768 = arith.constant 768 : index
    %23 = vector.load %arg8[%c0_22, %c768] : memref<100x1152xbf16, #tpu.memory_space<vmem>>, vector<100x128xbf16>
    tpu.vector_store %arg8[%c0_22, %c768], %22 {strides = array<i32>} : memref<100x1152xbf16, #tpu.memory_space<vmem>>, vector<100x128xbf16>,
    %c0_23 = arith.constant 0 : index
    %c21 = arith.constant 21 : index
    %c0_24 = arith.constant 0 : index
    %24 = vector.load %arg1[%c0_23, %c21, %c0_24] : memref<1x122x128xbf16, #tpu.memory_space<vmem>>, vector<1x100x128xbf16>
    %25 = vector.shape_cast %24 : vector<1x100x128xbf16> to vector<100x128xbf16>
    %c0_25 = arith.constant 0 : index
    %c896 = arith.constant 896 : index
    %26 = vector.load %arg8[%c0_25, %c896] : memref<100x1152xbf16, #tpu.memory_space<vmem>>, vector<100x128xbf16>
    tpu.vector_store %arg8[%c0_25, %c896], %25 {strides = array<i32>} : memref<100x1152xbf16, #tpu.memory_space<vmem>>, vector<100x128xbf16>,
    %c0_26 = arith.constant 0 : index
    %c22 = arith.constant 22 : index
    %c0_27 = arith.constant 0 : index
    %27 = vector.load %arg1[%c0_26, %c22, %c0_27] : memref<1x122x128xbf16, #tpu.memory_space<vmem>>, vector<1x100x128xbf16>
    %28 = vector.shape_cast %27 : vector<1x100x128xbf16> to vector<100x128xbf16>
    %c0_28 = arith.constant 0 : index
    %c1024 = arith.constant 1024 : index
    %29 = vector.load %arg8[%c0_28, %c1024] : memref<100x1152xbf16, #tpu.memory_space<vmem>>, vector<100x128xbf16>
    tpu.vector_store %arg8[%c0_28, %c1024], %28 {strides = array<i32>} : memref<100x1152xbf16, #tpu.memory_space<vmem>>, vector<100x128xbf16>,
    %c0_29 = arith.constant 0 : index
    %c0_30 = arith.constant 0 : index
    %30 = vector.load %arg8[%c0_29, %c0_30] : memref<100x1152xbf16, #tpu.memory_space<vmem>>, vector<100x1152xbf16>
    %c0_31 = arith.constant 0 : index
    %c0_32 = arith.constant 0 : index
    %31 = vector.load %arg2[%c0_31, %c0_32] : memref<1152x128xbf16, #tpu.memory_space<vmem>>, vector<1152x128xbf16>
    %cst = arith.constant dense<0.000000e+00> : vector<100x128xf32>
    %32 = tpu.matmul %30, %31, %cst {dimension_numbers = #tpu.dot_dimension_numbers<[1], [0], [0], [1], [0, 0, 1, 1], [], []>} : vector<100x1152xbf16>, vector<1152x128xbf16>, vector<100x128xf32> -> vector<100x128xf32>
    %c0_33 = arith.constant 0 : index
    %c0_34 = arith.constant 0 : index
    %33 = vector.load %arg5[%c0_33, %c0_34] : memref<100x1xf32, #tpu.memory_space<vmem>>, vector<100x1xf32>
    %34 = vector.broadcast %33 : vector<100x1xf32> to vector<100x128xf32>
    %35 = arith.mulf %32, %34 : vector<100x128xf32>
    %c0_35 = arith.constant 0 : index
    %c0_36 = arith.constant 0 : index
    %36 = vector.load %arg10[%c0_35, %c0_36] : memref<1x128xf32, #tpu.memory_space<vmem>>, vector<1x128xf32>
    %cst_37 = arith.constant dense<0.000000e+00> : vector<128xf32>
    %37 = vector.multi_reduction <add>, %35, %cst_37 [0] : vector<100x128xf32> to vector<128xf32>
    %38 = vector.shape_cast %37 : vector<128xf32> to vector<1x128xf32>
    %39 = arith.addf %36, %38 : vector<1x128xf32>
    %c0_38 = arith.constant 0 : index
    %c0_39 = arith.constant 0 : index
    %40 = vector.load %arg10[%c0_38, %c0_39] : memref<1x128xf32, #tpu.memory_space<vmem>>, vector<1x128xf32>
    tpu.vector_store %arg10[%c0_38, %c0_39], %39 {strides = array<i32>} : memref<1x128xf32, #tpu.memory_space<vmem>>, vector<1x128xf32>,
    %c0_40 = arith.constant 0 : index
    %c0_41 = arith.constant 0 : index
    %41 = vector.load %arg11[%c0_40, %c0_41] : memref<1x128xf32, #tpu.memory_space<vmem>>, vector<1x128xf32>
    %42 = arith.mulf %35, %35 : vector<100x128xf32>
    %cst_42 = arith.constant dense<0.000000e+00> : vector<128xf32>
    %43 = vector.multi_reduction <add>, %42, %cst_42 [0] : vector<100x128xf32> to vector<128xf32>
    %44 = vector.shape_cast %43 : vector<128xf32> to vector<1x128xf32>
    %45 = arith.addf %41, %44 : vector<1x128xf32>
    %c0_43 = arith.constant 0 : index
    %c0_44 = arith.constant 0 : index
    %46 = vector.load %arg11[%c0_43, %c0_44] : memref<1x128xf32, #tpu.memory_space<vmem>>, vector<1x128xf32>
    tpu.vector_store %arg11[%c0_43, %c0_44], %45 {strides = array<i32>} : memref<1x128xf32, #tpu.memory_space<vmem>>, vector<1x128xf32>,
    %47 = arith.index_cast %arg0 : i32 to index
    %c0_45 = arith.constant 0 : index
    %c0_46 = arith.constant 0 : index
    %48 = vector.load %arg9[%47, %c0_45, %c0_46] : memref<2x100x128xf32, #tpu.memory_space<vmem>>, vector<1x100x128xf32>
    %49 = vector.shape_cast %48 : vector<1x100x128xf32> to vector<100x128xf32>
    %50 = vector.shape_cast %32 : vector<100x128xf32> to vector<1x100x128xf32>
    tpu.vector_store %arg9[%47, %c0_45, %c0_46], %50 {strides = array<i32>} : memref<2x100x128xf32, #tpu.memory_space<vmem>>, vector<1x100x128xf32>,
    %c1_i32 = arith.constant 1 : i32
    %51 = arith.cmpi eq, %arg0, %c1_i32 : i32
    %52 = arith.extui %51 : i1 to i32
    %c0_i32_47 = arith.constant 0 : i32
    %53 = arith.cmpi ne, %52, %c0_i32_47 : i32
    scf.if %53 {
      %c0_48 = arith.constant 0 : index
      %c0_49 = arith.constant 0 : index
      %54 = vector.load %arg10[%c0_48, %c0_49] : memref<1x128xf32, #tpu.memory_space<vmem>>, vector<1x128xf32>
      %cst_50 = arith.constant 7.812500e-03 : f32
      %55 = vector.broadcast %cst_50 : f32 to vector<1x128xf32>
      %56 = arith.mulf %54, %55 : vector<1x128xf32>
      %c0_51 = arith.constant 0 : index
      %c0_52 = arith.constant 0 : index
      %57 = vector.load %arg11[%c0_51, %c0_52] : memref<1x128xf32, #tpu.memory_space<vmem>>, vector<1x128xf32>
      %cst_53 = arith.constant 7.812500e-03 : f32
      %58 = vector.broadcast %cst_53 : f32 to vector<1x128xf32>
      %59 = arith.mulf %57, %58 : vector<1x128xf32>
      %60 = arith.mulf %56, %56 : vector<1x128xf32>
      %61 = arith.subf %59, %60 : vector<1x128xf32>
      %cst_54 = arith.constant 0.000000e+00 : f32
      %62 = vector.broadcast %cst_54 : f32 to vector<1x128xf32>
      %63 = arith.maximumf %61, %62 : vector<1x128xf32>
      %c0_55 = arith.constant 0 : index
      %c0_56 = arith.constant 0 : index
      %64 = vector.load %arg3[%c0_55, %c0_56] : memref<1x128xf32, #tpu.memory_space<vmem>>, vector<1x128xf32>
      %cst_57 = arith.constant 9.99999974E-6 : f32
      %65 = vector.broadcast %cst_57 : f32 to vector<1x128xf32>
      %66 = arith.addf %63, %65 : vector<1x128xf32>
      %67 = math.rsqrt %66 : vector<1x128xf32>
      %68 = arith.mulf %64, %67 : vector<1x128xf32>
      %c0_58 = arith.constant 0 : index
      %c0_59 = arith.constant 0 : index
      %69 = vector.load %arg4[%c0_58, %c0_59] : memref<1x128xf32, #tpu.memory_space<vmem>>, vector<1x128xf32>
      %70 = arith.mulf %56, %68 : vector<1x128xf32>
      %71 = arith.subf %69, %70 : vector<1x128xf32>
      %c0_60 = arith.constant 0 : index
      %c0_61 = arith.constant 0 : index
      %72 = vector.load %arg6[%c0_60, %c0_61] : memref<50x100xbf16, #tpu.memory_space<vmem>>, vector<50x100xbf16>
      %c0_62 = arith.constant 0 : index
      %c0_63 = arith.constant 0 : index
      %c0_64 = arith.constant 0 : index
      %73 = vector.load %arg9[%c0_62, %c0_63, %c0_64] : memref<2x100x128xf32, #tpu.memory_space<vmem>>, vector<1x100x128xf32>
      %74 = vector.shape_cast %73 : vector<1x100x128xf32> to vector<100x128xf32>
      %75 = vector.broadcast %68 : vector<1x128xf32> to vector<100x128xf32>
      %76 = arith.mulf %74, %75 : vector<100x128xf32>
      %77 = vector.broadcast %71 : vector<1x128xf32> to vector<100x128xf32>
      %78 = arith.addf %76, %77 : vector<100x128xf32>
      %cst_65 = arith.constant 0.000000e+00 : f32
      %79 = vector.broadcast %cst_65 : f32 to vector<100x128xf32>
      %80 = arith.maximumf %78, %79 : vector<100x128xf32>
      %81 = arith.truncf %80 : vector<100x128xf32> to vector<100x128xbf16>
      %cst_66 = arith.constant dense<0.000000e+00> : vector<50x128xf32>
      %82 = tpu.matmul %72, %81, %cst_66 {dimension_numbers = #tpu.dot_dimension_numbers<[1], [0], [0], [1], [0, 0, 1, 1], [], []>} : vector<50x100xbf16>, vector<100x128xbf16>, vector<50x128xf32> -> vector<50x128xf32>
      %83 = arith.truncf %82 : vector<50x128xf32> to vector<50x128xbf16>
      %c0_67 = arith.constant 0 : index
      %c0_68 = arith.constant 0 : index
      %c0_69 = arith.constant 0 : index
      %84 = vector.load %arg7[%c0_67, %c0_68, %c0_69] : memref<2x50x128xbf16, #tpu.memory_space<vmem>>, vector<1x50x128xbf16>
      %85 = vector.shape_cast %84 : vector<1x50x128xbf16> to vector<50x128xbf16>
      %86 = vector.shape_cast %83 : vector<50x128xbf16> to vector<1x50x128xbf16>
      tpu.vector_store %arg7[%c0_67, %c0_68, %c0_69], %86 {strides = array<i32>} : memref<2x50x128xbf16, #tpu.memory_space<vmem>>, vector<1x50x128xbf16>,
      %c1_70 = arith.constant 1 : index
      %c0_71 = arith.constant 0 : index
      %c0_72 = arith.constant 0 : index
      %87 = vector.load %arg9[%c1_70, %c0_71, %c0_72] : memref<2x100x128xf32, #tpu.memory_space<vmem>>, vector<1x100x128xf32>
      %88 = vector.shape_cast %87 : vector<1x100x128xf32> to vector<100x128xf32>
      %89 = vector.broadcast %68 : vector<1x128xf32> to vector<100x128xf32>
      %90 = arith.mulf %88, %89 : vector<100x128xf32>
      %91 = vector.broadcast %71 : vector<1x128xf32> to vector<100x128xf32>
      %92 = arith.addf %90, %91 : vector<100x128xf32>
      %cst_73 = arith.constant 0.000000e+00 : f32
      %93 = vector.broadcast %cst_73 : f32 to vector<100x128xf32>
      %94 = arith.maximumf %92, %93 : vector<100x128xf32>
      %95 = arith.truncf %94 : vector<100x128xf32> to vector<100x128xbf16>
      %cst_74 = arith.constant dense<0.000000e+00> : vector<50x128xf32>
      %96 = tpu.matmul %72, %95, %cst_74 {dimension_numbers = #tpu.dot_dimension_numbers<[1], [0], [0], [1], [0, 0, 1, 1], [], []>} : vector<50x100xbf16>, vector<100x128xbf16>, vector<50x128xf32> -> vector<50x128xf32>
      %97 = arith.truncf %96 : vector<50x128xf32> to vector<50x128xbf16>
      %c1_75 = arith.constant 1 : index
      %c0_76 = arith.constant 0 : index
      %c0_77 = arith.constant 0 : index
      %98 = vector.load %arg7[%c1_75, %c0_76, %c0_77] : memref<2x50x128xbf16, #tpu.memory_space<vmem>>, vector<1x50x128xbf16>
      %99 = vector.shape_cast %98 : vector<1x50x128xbf16> to vector<50x128xbf16>
      %100 = vector.shape_cast %97 : vector<50x128xbf16> to vector<1x50x128xbf16>
      tpu.vector_store %arg7[%c1_75, %c0_76, %c0_77], %100 {strides = array<i32>} : memref<2x50x128xbf16, #tpu.memory_space<vmem>>, vector<1x50x128xbf16>,
    } else {
    }
    return
  }
  func.func @transform_0(%arg0: i32) -> (i32, i32, i32) {
    %c0_i32 = arith.constant 0 : i32
    %c0_i32_0 = arith.constant 0 : i32
    %c0_i32_1 = arith.constant 0 : i32
    return %arg0, %c0_i32, %c0_i32_0 : i32, i32, i32
  }
  func.func @transform_1(%arg0: i32) -> (i32, i32) {
    %c0_i32 = arith.constant 0 : i32
    %c0_i32_0 = arith.constant 0 : i32
    %c0_i32_1 = arith.constant 0 : i32
    return %c0_i32, %c0_i32_0 : i32, i32
  }
  func.func @transform_2(%arg0: i32) -> (i32, i32) {
    %c0_i32 = arith.constant 0 : i32
    %c0_i32_0 = arith.constant 0 : i32
    %c0_i32_1 = arith.constant 0 : i32
    return %c0_i32, %c0_i32_0 : i32, i32
  }
  func.func @transform_3(%arg0: i32) -> (i32, i32) {
    %c0_i32 = arith.constant 0 : i32
    %c0_i32_0 = arith.constant 0 : i32
    %c0_i32_1 = arith.constant 0 : i32
    return %c0_i32, %c0_i32_0 : i32, i32
  }
  func.func @transform_4(%arg0: i32) -> (i32, i32) {
    %c0_i32 = arith.constant 0 : i32
    %c0_i32_0 = arith.constant 0 : i32
    %c0_i32_1 = arith.constant 0 : i32
    return %c0_i32, %c0_i32_0 : i32, i32
  }
  func.func @transform_5(%arg0: i32) -> (i32, i32) {
    %c0_i32 = arith.constant 0 : i32
    %c0_i32_0 = arith.constant 0 : i32
    %c0_i32_1 = arith.constant 0 : i32
    return %c0_i32, %c0_i32_0 : i32, i32
  }
  func.func @transform_6(%arg0: i32) -> (i32, i32, i32) {
    %c0_i32 = arith.constant 0 : i32
    %c0_i32_0 = arith.constant 0 : i32
    %c0_i32_1 = arith.constant 0 : i32
    %c0_i32_2 = arith.constant 0 : i32
    return %c0_i32, %c0_i32_0, %c0_i32_1 : i32, i32, i32
  }
}

module attributes {stable_mosaic.version = 11 : i64} {
  func.func @_down_block_kernel(%arg0: i32, %arg1: memref<1x50x128xbf16, #tpu.memory_space<vmem>>, %arg2: memref<1152x128xbf16, #tpu.memory_space<vmem>>, %arg3: memref<1x128xf32, #tpu.memory_space<vmem>>, %arg4: memref<1x128xf32, #tpu.memory_space<vmem>>, %arg5: memref<36x1xf32, #tpu.memory_space<vmem>>, %arg6: memref<26x36xbf16, #tpu.memory_space<vmem>>, %arg7: memref<2x26x128xbf16, #tpu.memory_space<vmem>>, %arg8: memref<36x1152xbf16, #tpu.memory_space<vmem>>, %arg9: memref<2x36x128xf32, #tpu.memory_space<vmem>>, %arg10: memref<1x128xf32, #tpu.memory_space<vmem>>, %arg11: memref<1x128xf32, #tpu.memory_space<vmem>>) attributes {dimension_semantics = [#tpu.dimension_semantics<arbitrary>], iteration_bounds = array<i64: 2>, scalar_prefetch = 0 : i64, scratch_operands = 4 : i64, tpu.core_type = #tpu.core_type<tc>, window_params = [{transform_indices = @transform_0, window_bounds = array<i64: 1, 50, 128>}, {pipeline_mode = #tpu.pipeline_mode<synchronous>, transform_indices = @transform_1, window_bounds = array<i64: 1152, 128>}, {pipeline_mode = #tpu.pipeline_mode<synchronous>, transform_indices = @transform_2, window_bounds = array<i64: 1, 128>}, {pipeline_mode = #tpu.pipeline_mode<synchronous>, transform_indices = @transform_3, window_bounds = array<i64: 1, 128>}, {pipeline_mode = #tpu.pipeline_mode<synchronous>, transform_indices = @transform_4, window_bounds = array<i64: 36, 1>}, {pipeline_mode = #tpu.pipeline_mode<synchronous>, transform_indices = @transform_5, window_bounds = array<i64: 26, 36>}, {pipeline_mode = #tpu.pipeline_mode<synchronous>, transform_indices = @transform_6, window_bounds = array<i64: 2, 26, 128>}]} {
    %c0_i32 = arith.constant 0 : i32
    %0 = arith.cmpi eq, %arg0, %c0_i32 : i32
    %1 = arith.extui %0 : i1 to i32
    %c0_i32_0 = arith.constant 0 : i32
    %2 = arith.cmpi ne, %1, %c0_i32_0 : i32
    scf.if %2 {
      %cst_48 = arith.constant 0.000000e+00 : f32
      %54 = vector.broadcast %cst_48 : f32 to vector<1x128xf32>
      %c0_49 = arith.constant 0 : index
      %c0_50 = arith.constant 0 : index
      %55 = vector.load %arg10[%c0_49, %c0_50] : memref<1x128xf32, #tpu.memory_space<vmem>>, vector<1x128xf32>
      tpu.vector_store %arg10[%c0_49, %c0_50], %54 {strides = array<i32>} : memref<1x128xf32, #tpu.memory_space<vmem>>, vector<1x128xf32>,
      %cst_51 = arith.constant 0.000000e+00 : f32
      %56 = vector.broadcast %cst_51 : f32 to vector<1x128xf32>
      %c0_52 = arith.constant 0 : index
      %c0_53 = arith.constant 0 : index
      %57 = vector.load %arg11[%c0_52, %c0_53] : memref<1x128xf32, #tpu.memory_space<vmem>>, vector<1x128xf32>
      tpu.vector_store %arg11[%c0_52, %c0_53], %56 {strides = array<i32>} : memref<1x128xf32, #tpu.memory_space<vmem>>, vector<1x128xf32>,
    } else {
    }
    %c0 = arith.constant 0 : index
    %c0_1 = arith.constant 0 : index
    %c0_2 = arith.constant 0 : index
    %3 = vector.load %arg1[%c0, %c0_1, %c0_2] : memref<1x50x128xbf16, #tpu.memory_space<vmem>>, vector<1x36x128xbf16>
    %4 = vector.shape_cast %3 : vector<1x36x128xbf16> to vector<36x128xbf16>
    %c0_3 = arith.constant 0 : index
    %c0_4 = arith.constant 0 : index
    %5 = vector.load %arg8[%c0_3, %c0_4] : memref<36x1152xbf16, #tpu.memory_space<vmem>>, vector<36x128xbf16>
    tpu.vector_store %arg8[%c0_3, %c0_4], %4 {strides = array<i32>} : memref<36x1152xbf16, #tpu.memory_space<vmem>>, vector<36x128xbf16>,
    %c0_5 = arith.constant 0 : index
    %c1 = arith.constant 1 : index
    %c0_6 = arith.constant 0 : index
    %6 = vector.load %arg1[%c0_5, %c1, %c0_6] : memref<1x50x128xbf16, #tpu.memory_space<vmem>>, vector<1x36x128xbf16>
    %7 = vector.shape_cast %6 : vector<1x36x128xbf16> to vector<36x128xbf16>
    %c0_7 = arith.constant 0 : index
    %c128 = arith.constant 128 : index
    %8 = vector.load %arg8[%c0_7, %c128] : memref<36x1152xbf16, #tpu.memory_space<vmem>>, vector<36x128xbf16>
    tpu.vector_store %arg8[%c0_7, %c128], %7 {strides = array<i32>} : memref<36x1152xbf16, #tpu.memory_space<vmem>>, vector<36x128xbf16>,
    %c0_8 = arith.constant 0 : index
    %c2 = arith.constant 2 : index
    %c0_9 = arith.constant 0 : index
    %9 = vector.load %arg1[%c0_8, %c2, %c0_9] : memref<1x50x128xbf16, #tpu.memory_space<vmem>>, vector<1x36x128xbf16>
    %10 = vector.shape_cast %9 : vector<1x36x128xbf16> to vector<36x128xbf16>
    %c0_10 = arith.constant 0 : index
    %c256 = arith.constant 256 : index
    %11 = vector.load %arg8[%c0_10, %c256] : memref<36x1152xbf16, #tpu.memory_space<vmem>>, vector<36x128xbf16>
    tpu.vector_store %arg8[%c0_10, %c256], %10 {strides = array<i32>} : memref<36x1152xbf16, #tpu.memory_space<vmem>>, vector<36x128xbf16>,
    %c0_11 = arith.constant 0 : index
    %c6 = arith.constant 6 : index
    %c0_12 = arith.constant 0 : index
    %12 = vector.load %arg1[%c0_11, %c6, %c0_12] : memref<1x50x128xbf16, #tpu.memory_space<vmem>>, vector<1x36x128xbf16>
    %13 = vector.shape_cast %12 : vector<1x36x128xbf16> to vector<36x128xbf16>
    %c0_13 = arith.constant 0 : index
    %c384 = arith.constant 384 : index
    %14 = vector.load %arg8[%c0_13, %c384] : memref<36x1152xbf16, #tpu.memory_space<vmem>>, vector<36x128xbf16>
    tpu.vector_store %arg8[%c0_13, %c384], %13 {strides = array<i32>} : memref<36x1152xbf16, #tpu.memory_space<vmem>>, vector<36x128xbf16>,
    %c0_14 = arith.constant 0 : index
    %c7 = arith.constant 7 : index
    %c0_15 = arith.constant 0 : index
    %15 = vector.load %arg1[%c0_14, %c7, %c0_15] : memref<1x50x128xbf16, #tpu.memory_space<vmem>>, vector<1x36x128xbf16>
    %16 = vector.shape_cast %15 : vector<1x36x128xbf16> to vector<36x128xbf16>
    %c0_16 = arith.constant 0 : index
    %c512 = arith.constant 512 : index
    %17 = vector.load %arg8[%c0_16, %c512] : memref<36x1152xbf16, #tpu.memory_space<vmem>>, vector<36x128xbf16>
    tpu.vector_store %arg8[%c0_16, %c512], %16 {strides = array<i32>} : memref<36x1152xbf16, #tpu.memory_space<vmem>>, vector<36x128xbf16>,
    %c0_17 = arith.constant 0 : index
    %c8 = arith.constant 8 : index
    %c0_18 = arith.constant 0 : index
    %18 = vector.load %arg1[%c0_17, %c8, %c0_18] : memref<1x50x128xbf16, #tpu.memory_space<vmem>>, vector<1x36x128xbf16>
    %19 = vector.shape_cast %18 : vector<1x36x128xbf16> to vector<36x128xbf16>
    %c0_19 = arith.constant 0 : index
    %c640 = arith.constant 640 : index
    %20 = vector.load %arg8[%c0_19, %c640] : memref<36x1152xbf16, #tpu.memory_space<vmem>>, vector<36x128xbf16>
    tpu.vector_store %arg8[%c0_19, %c640], %19 {strides = array<i32>} : memref<36x1152xbf16, #tpu.memory_space<vmem>>, vector<36x128xbf16>,
    %c0_20 = arith.constant 0 : index
    %c12 = arith.constant 12 : index
    %c0_21 = arith.constant 0 : index
    %21 = vector.load %arg1[%c0_20, %c12, %c0_21] : memref<1x50x128xbf16, #tpu.memory_space<vmem>>, vector<1x36x128xbf16>
    %22 = vector.shape_cast %21 : vector<1x36x128xbf16> to vector<36x128xbf16>
    %c0_22 = arith.constant 0 : index
    %c768 = arith.constant 768 : index
    %23 = vector.load %arg8[%c0_22, %c768] : memref<36x1152xbf16, #tpu.memory_space<vmem>>, vector<36x128xbf16>
    tpu.vector_store %arg8[%c0_22, %c768], %22 {strides = array<i32>} : memref<36x1152xbf16, #tpu.memory_space<vmem>>, vector<36x128xbf16>,
    %c0_23 = arith.constant 0 : index
    %c13 = arith.constant 13 : index
    %c0_24 = arith.constant 0 : index
    %24 = vector.load %arg1[%c0_23, %c13, %c0_24] : memref<1x50x128xbf16, #tpu.memory_space<vmem>>, vector<1x36x128xbf16>
    %25 = vector.shape_cast %24 : vector<1x36x128xbf16> to vector<36x128xbf16>
    %c0_25 = arith.constant 0 : index
    %c896 = arith.constant 896 : index
    %26 = vector.load %arg8[%c0_25, %c896] : memref<36x1152xbf16, #tpu.memory_space<vmem>>, vector<36x128xbf16>
    tpu.vector_store %arg8[%c0_25, %c896], %25 {strides = array<i32>} : memref<36x1152xbf16, #tpu.memory_space<vmem>>, vector<36x128xbf16>,
    %c0_26 = arith.constant 0 : index
    %c14 = arith.constant 14 : index
    %c0_27 = arith.constant 0 : index
    %27 = vector.load %arg1[%c0_26, %c14, %c0_27] : memref<1x50x128xbf16, #tpu.memory_space<vmem>>, vector<1x36x128xbf16>
    %28 = vector.shape_cast %27 : vector<1x36x128xbf16> to vector<36x128xbf16>
    %c0_28 = arith.constant 0 : index
    %c1024 = arith.constant 1024 : index
    %29 = vector.load %arg8[%c0_28, %c1024] : memref<36x1152xbf16, #tpu.memory_space<vmem>>, vector<36x128xbf16>
    tpu.vector_store %arg8[%c0_28, %c1024], %28 {strides = array<i32>} : memref<36x1152xbf16, #tpu.memory_space<vmem>>, vector<36x128xbf16>,
    %c0_29 = arith.constant 0 : index
    %c0_30 = arith.constant 0 : index
    %30 = vector.load %arg8[%c0_29, %c0_30] : memref<36x1152xbf16, #tpu.memory_space<vmem>>, vector<36x1152xbf16>
    %c0_31 = arith.constant 0 : index
    %c0_32 = arith.constant 0 : index
    %31 = vector.load %arg2[%c0_31, %c0_32] : memref<1152x128xbf16, #tpu.memory_space<vmem>>, vector<1152x128xbf16>
    %cst = arith.constant dense<0.000000e+00> : vector<36x128xf32>
    %32 = tpu.matmul %30, %31, %cst {dimension_numbers = #tpu.dot_dimension_numbers<[1], [0], [0], [1], [0, 0, 1, 1], [], []>} : vector<36x1152xbf16>, vector<1152x128xbf16>, vector<36x128xf32> -> vector<36x128xf32>
    %c0_33 = arith.constant 0 : index
    %c0_34 = arith.constant 0 : index
    %33 = vector.load %arg5[%c0_33, %c0_34] : memref<36x1xf32, #tpu.memory_space<vmem>>, vector<36x1xf32>
    %34 = vector.broadcast %33 : vector<36x1xf32> to vector<36x128xf32>
    %35 = arith.mulf %32, %34 : vector<36x128xf32>
    %c0_35 = arith.constant 0 : index
    %c0_36 = arith.constant 0 : index
    %36 = vector.load %arg10[%c0_35, %c0_36] : memref<1x128xf32, #tpu.memory_space<vmem>>, vector<1x128xf32>
    %cst_37 = arith.constant dense<0.000000e+00> : vector<128xf32>
    %37 = vector.multi_reduction <add>, %35, %cst_37 [0] : vector<36x128xf32> to vector<128xf32>
    %38 = vector.shape_cast %37 : vector<128xf32> to vector<1x128xf32>
    %39 = arith.addf %36, %38 : vector<1x128xf32>
    %c0_38 = arith.constant 0 : index
    %c0_39 = arith.constant 0 : index
    %40 = vector.load %arg10[%c0_38, %c0_39] : memref<1x128xf32, #tpu.memory_space<vmem>>, vector<1x128xf32>
    tpu.vector_store %arg10[%c0_38, %c0_39], %39 {strides = array<i32>} : memref<1x128xf32, #tpu.memory_space<vmem>>, vector<1x128xf32>,
    %c0_40 = arith.constant 0 : index
    %c0_41 = arith.constant 0 : index
    %41 = vector.load %arg11[%c0_40, %c0_41] : memref<1x128xf32, #tpu.memory_space<vmem>>, vector<1x128xf32>
    %42 = arith.mulf %35, %35 : vector<36x128xf32>
    %cst_42 = arith.constant dense<0.000000e+00> : vector<128xf32>
    %43 = vector.multi_reduction <add>, %42, %cst_42 [0] : vector<36x128xf32> to vector<128xf32>
    %44 = vector.shape_cast %43 : vector<128xf32> to vector<1x128xf32>
    %45 = arith.addf %41, %44 : vector<1x128xf32>
    %c0_43 = arith.constant 0 : index
    %c0_44 = arith.constant 0 : index
    %46 = vector.load %arg11[%c0_43, %c0_44] : memref<1x128xf32, #tpu.memory_space<vmem>>, vector<1x128xf32>
    tpu.vector_store %arg11[%c0_43, %c0_44], %45 {strides = array<i32>} : memref<1x128xf32, #tpu.memory_space<vmem>>, vector<1x128xf32>,
    %47 = arith.index_cast %arg0 : i32 to index
    %c0_45 = arith.constant 0 : index
    %c0_46 = arith.constant 0 : index
    %48 = vector.load %arg9[%47, %c0_45, %c0_46] : memref<2x36x128xf32, #tpu.memory_space<vmem>>, vector<1x36x128xf32>
    %49 = vector.shape_cast %48 : vector<1x36x128xf32> to vector<36x128xf32>
    %50 = vector.shape_cast %32 : vector<36x128xf32> to vector<1x36x128xf32>
    tpu.vector_store %arg9[%47, %c0_45, %c0_46], %50 {strides = array<i32>} : memref<2x36x128xf32, #tpu.memory_space<vmem>>, vector<1x36x128xf32>,
    %c1_i32 = arith.constant 1 : i32
    %51 = arith.cmpi eq, %arg0, %c1_i32 : i32
    %52 = arith.extui %51 : i1 to i32
    %c0_i32_47 = arith.constant 0 : i32
    %53 = arith.cmpi ne, %52, %c0_i32_47 : i32
    scf.if %53 {
      %c0_48 = arith.constant 0 : index
      %c0_49 = arith.constant 0 : index
      %54 = vector.load %arg10[%c0_48, %c0_49] : memref<1x128xf32, #tpu.memory_space<vmem>>, vector<1x128xf32>
      %cst_50 = arith.constant 3.125000e-02 : f32
      %55 = vector.broadcast %cst_50 : f32 to vector<1x128xf32>
      %56 = arith.mulf %54, %55 : vector<1x128xf32>
      %c0_51 = arith.constant 0 : index
      %c0_52 = arith.constant 0 : index
      %57 = vector.load %arg11[%c0_51, %c0_52] : memref<1x128xf32, #tpu.memory_space<vmem>>, vector<1x128xf32>
      %cst_53 = arith.constant 3.125000e-02 : f32
      %58 = vector.broadcast %cst_53 : f32 to vector<1x128xf32>
      %59 = arith.mulf %57, %58 : vector<1x128xf32>
      %60 = arith.mulf %56, %56 : vector<1x128xf32>
      %61 = arith.subf %59, %60 : vector<1x128xf32>
      %cst_54 = arith.constant 0.000000e+00 : f32
      %62 = vector.broadcast %cst_54 : f32 to vector<1x128xf32>
      %63 = arith.maximumf %61, %62 : vector<1x128xf32>
      %c0_55 = arith.constant 0 : index
      %c0_56 = arith.constant 0 : index
      %64 = vector.load %arg3[%c0_55, %c0_56] : memref<1x128xf32, #tpu.memory_space<vmem>>, vector<1x128xf32>
      %cst_57 = arith.constant 9.99999974E-6 : f32
      %65 = vector.broadcast %cst_57 : f32 to vector<1x128xf32>
      %66 = arith.addf %63, %65 : vector<1x128xf32>
      %67 = math.rsqrt %66 : vector<1x128xf32>
      %68 = arith.mulf %64, %67 : vector<1x128xf32>
      %c0_58 = arith.constant 0 : index
      %c0_59 = arith.constant 0 : index
      %69 = vector.load %arg4[%c0_58, %c0_59] : memref<1x128xf32, #tpu.memory_space<vmem>>, vector<1x128xf32>
      %70 = arith.mulf %56, %68 : vector<1x128xf32>
      %71 = arith.subf %69, %70 : vector<1x128xf32>
      %c0_60 = arith.constant 0 : index
      %c0_61 = arith.constant 0 : index
      %72 = vector.load %arg6[%c0_60, %c0_61] : memref<26x36xbf16, #tpu.memory_space<vmem>>, vector<26x36xbf16>
      %c0_62 = arith.constant 0 : index
      %c0_63 = arith.constant 0 : index
      %c0_64 = arith.constant 0 : index
      %73 = vector.load %arg9[%c0_62, %c0_63, %c0_64] : memref<2x36x128xf32, #tpu.memory_space<vmem>>, vector<1x36x128xf32>
      %74 = vector.shape_cast %73 : vector<1x36x128xf32> to vector<36x128xf32>
      %75 = vector.broadcast %68 : vector<1x128xf32> to vector<36x128xf32>
      %76 = arith.mulf %74, %75 : vector<36x128xf32>
      %77 = vector.broadcast %71 : vector<1x128xf32> to vector<36x128xf32>
      %78 = arith.addf %76, %77 : vector<36x128xf32>
      %cst_65 = arith.constant 0.000000e+00 : f32
      %79 = vector.broadcast %cst_65 : f32 to vector<36x128xf32>
      %80 = arith.maximumf %78, %79 : vector<36x128xf32>
      %81 = arith.truncf %80 : vector<36x128xf32> to vector<36x128xbf16>
      %cst_66 = arith.constant dense<0.000000e+00> : vector<26x128xf32>
      %82 = tpu.matmul %72, %81, %cst_66 {dimension_numbers = #tpu.dot_dimension_numbers<[1], [0], [0], [1], [0, 0, 1, 1], [], []>} : vector<26x36xbf16>, vector<36x128xbf16>, vector<26x128xf32> -> vector<26x128xf32>
      %83 = arith.truncf %82 : vector<26x128xf32> to vector<26x128xbf16>
      %c0_67 = arith.constant 0 : index
      %c0_68 = arith.constant 0 : index
      %c0_69 = arith.constant 0 : index
      %84 = vector.load %arg7[%c0_67, %c0_68, %c0_69] : memref<2x26x128xbf16, #tpu.memory_space<vmem>>, vector<1x26x128xbf16>
      %85 = vector.shape_cast %84 : vector<1x26x128xbf16> to vector<26x128xbf16>
      %86 = vector.shape_cast %83 : vector<26x128xbf16> to vector<1x26x128xbf16>
      tpu.vector_store %arg7[%c0_67, %c0_68, %c0_69], %86 {strides = array<i32>} : memref<2x26x128xbf16, #tpu.memory_space<vmem>>, vector<1x26x128xbf16>,
      %c1_70 = arith.constant 1 : index
      %c0_71 = arith.constant 0 : index
      %c0_72 = arith.constant 0 : index
      %87 = vector.load %arg9[%c1_70, %c0_71, %c0_72] : memref<2x36x128xf32, #tpu.memory_space<vmem>>, vector<1x36x128xf32>
      %88 = vector.shape_cast %87 : vector<1x36x128xf32> to vector<36x128xf32>
      %89 = vector.broadcast %68 : vector<1x128xf32> to vector<36x128xf32>
      %90 = arith.mulf %88, %89 : vector<36x128xf32>
      %91 = vector.broadcast %71 : vector<1x128xf32> to vector<36x128xf32>
      %92 = arith.addf %90, %91 : vector<36x128xf32>
      %cst_73 = arith.constant 0.000000e+00 : f32
      %93 = vector.broadcast %cst_73 : f32 to vector<36x128xf32>
      %94 = arith.maximumf %92, %93 : vector<36x128xf32>
      %95 = arith.truncf %94 : vector<36x128xf32> to vector<36x128xbf16>
      %cst_74 = arith.constant dense<0.000000e+00> : vector<26x128xf32>
      %96 = tpu.matmul %72, %95, %cst_74 {dimension_numbers = #tpu.dot_dimension_numbers<[1], [0], [0], [1], [0, 0, 1, 1], [], []>} : vector<26x36xbf16>, vector<36x128xbf16>, vector<26x128xf32> -> vector<26x128xf32>
      %97 = arith.truncf %96 : vector<26x128xf32> to vector<26x128xbf16>
      %c1_75 = arith.constant 1 : index
      %c0_76 = arith.constant 0 : index
      %c0_77 = arith.constant 0 : index
      %98 = vector.load %arg7[%c1_75, %c0_76, %c0_77] : memref<2x26x128xbf16, #tpu.memory_space<vmem>>, vector<1x26x128xbf16>
      %99 = vector.shape_cast %98 : vector<1x26x128xbf16> to vector<26x128xbf16>
      %100 = vector.shape_cast %97 : vector<26x128xbf16> to vector<1x26x128xbf16>
      tpu.vector_store %arg7[%c1_75, %c0_76, %c0_77], %100 {strides = array<i32>} : memref<2x26x128xbf16, #tpu.memory_space<vmem>>, vector<1x26x128xbf16>,
    } else {
    }
    return
  }
  func.func @transform_0(%arg0: i32) -> (i32, i32, i32) {
    %c0_i32 = arith.constant 0 : i32
    %c0_i32_0 = arith.constant 0 : i32
    %c0_i32_1 = arith.constant 0 : i32
    return %arg0, %c0_i32, %c0_i32_0 : i32, i32, i32
  }
  func.func @transform_1(%arg0: i32) -> (i32, i32) {
    %c0_i32 = arith.constant 0 : i32
    %c0_i32_0 = arith.constant 0 : i32
    %c0_i32_1 = arith.constant 0 : i32
    return %c0_i32, %c0_i32_0 : i32, i32
  }
  func.func @transform_2(%arg0: i32) -> (i32, i32) {
    %c0_i32 = arith.constant 0 : i32
    %c0_i32_0 = arith.constant 0 : i32
    %c0_i32_1 = arith.constant 0 : i32
    return %c0_i32, %c0_i32_0 : i32, i32
  }
  func.func @transform_3(%arg0: i32) -> (i32, i32) {
    %c0_i32 = arith.constant 0 : i32
    %c0_i32_0 = arith.constant 0 : i32
    %c0_i32_1 = arith.constant 0 : i32
    return %c0_i32, %c0_i32_0 : i32, i32
  }
  func.func @transform_4(%arg0: i32) -> (i32, i32) {
    %c0_i32 = arith.constant 0 : i32
    %c0_i32_0 = arith.constant 0 : i32
    %c0_i32_1 = arith.constant 0 : i32
    return %c0_i32, %c0_i32_0 : i32, i32
  }
  func.func @transform_5(%arg0: i32) -> (i32, i32) {
    %c0_i32 = arith.constant 0 : i32
    %c0_i32_0 = arith.constant 0 : i32
    %c0_i32_1 = arith.constant 0 : i32
    return %c0_i32, %c0_i32_0 : i32, i32
  }
  func.func @transform_6(%arg0: i32) -> (i32, i32, i32) {
    %c0_i32 = arith.constant 0 : i32
    %c0_i32_0 = arith.constant 0 : i32
    %c0_i32_1 = arith.constant 0 : i32
    %c0_i32_2 = arith.constant 0 : i32
    return %c0_i32, %c0_i32_0, %c0_i32_1 : i32, i32, i32
  }
}

</mosaic_0001>

<bundles_post_ra>
// kernel: _encoder_forward.5
= control target key start
LH: loop header
LB: loop body
LE: loop exit
PB: predicated region body
PF: predicated region fallthrough
CT: control target
= control target key end

     0   :  { %11 = vsyncpa [#allocation7], 0  ;;  %s2483_s21 = smov 0   ;;  %s3012_s0 = inlined_call_operand.vmem [shape: bf16[2,50,128], index: 0, kind: input, shape index: {}]   ;;  %s3013_s1 = inlined_call_operand.vmem [shape: bf16[1152,128], index: 1, kind: input, shape index: {}]   ;;  %s3014_s2 = inlined_call_operand.vmem [shape: f32[1,128], index: 2, kind: input, shape index: {}]   ;;  %s3015_s3 = inlined_call_operand.vmem [shape: f32[1,128], index: 3, kind: input, shape index: {}]   ;;  %s3016_s4 = inlined_call_operand.vmem [shape: f32[36,1], index: 4, kind: input, shape index: {}]   ;;  %s3017_s5 = inlined_call_operand.hbm [shape: bf16[26,36], index: 5, kind: input, shape index: {}]   ;;  %s3018_s6 = inlined_call_operand.vmem [shape: bf16[2,26,128], index: 6, kind: output, shape index: {}]  }
   0x1 LB: > { %s197_s24 = sshll.u32 %s3017_s5, 4  ;;  %s2492_s25 = sadd.s32 4294967295, %s2441_s21   ;;  %s2441_s21 = sphi %s2483_s21, %s17_s21   ;;  %s198_s24 = int_to_ptr.hbm [resolvable:$true] %s197_s24 }
   0x2   : > { %p1856_p0 = scmp.ge.s32.totalorder %s2441_s21, 1  ;;  %p174_p1 = scmp.lt.s32.totalorder %s2441_s21, 3 }
   0x3   : > { %p1857_p2 = scmp.ne.s32.totalorder %s2492_s25, 0  ;;  %p2381_p3 = scmp.eq.s32.totalorder %s2492_s25, 0 }
   0x4   : > { %p175_p4 = pnand %p1856_p0, %p174_p1  ;;  %s2443_s26 = smov [#allocation6]  }
   0x5   : > { %s199_s27 = sshll.u32 %s2443_s26, 4  ;;  %s2444_s28 = smov 64   ;;  %s200_s27 = int_to_ptr.vmem [resolvable:$true] %s199_s27 }
   0x6   : > { %p2377_p5 = pneg %p175_p4  ;;  %s2445_s29 = smov 4  }
   0x7   : > { %223 = sbr.rel (%p175_p4) target bundleno = 527 (0x20f), region = 44 }
   0x8   : > { %p2378_p6 = pnand %p2381_p3, %p2377_p5 }
   0xa   : > { %2380 = dma.hbm_to_vmem [thread:$0]  (!%p2378_p6), %s198_s24, 256, %s200_s27, [#allocation7], %s2444_s28, %s2444_s28, %s2445_s29  }
   0xc   : > { %2436 = dma.done.wait (%p2381_p3), [#allocation7], 256  }
   0xd   : > { %2438 = vsyncadd (%p2381_p3), [#allocation7], 4294967040  ;;  %p249_p7 = scmp.lt.s32.totalorder %s2492_s25, 1 }
   0xf   : > { %s250_s30 = scalar_select %p249_p7, %s2492_s25, 1 }
  0x10   : > { %258 = sbr.rel (%p1857_p2) target bundleno = 24 (0x18), region = 52 }
  0x11   : > { %s2372_s7 = smul.u32 28, %s250_s30 }
  0x13   : > { %s2503_s10 = scalar_lea.vmem %s3012_s0, %s2372_s7 }
  0x15   : > { %v2446_v0 = vmov 0.0  }
  0x16   : > { %259 = vst [vmem:[#allocation4] sm:$0x1] %v2446_v0 }
  0x17   : > { %260 = vst [vmem:[#allocation5] sm:$0x1] %v2446_v0 }
  0x18 PF: > { %v2272_v1 = vld [vmem:[%s3013_s1 + $0x38] sm:$0xff]  ;;  %v2271_v3 = vld [vmem:[%s3013_s1 + $0x30] sm:$0xff]  ;;  %v2270_v7 = vld [vmem:[%s3013_s1 + $0x28] sm:$0xff]  ;;  %vm348_vm0 = vcmask 1042432   ;;  %vm349_vm1 = vcmask 1046532   ;;  %vm387_vm3 = vcmask 1040384  }
  0x19   : > { %v2288_v2 = vld [vmem:[%s3013_s1 + $0xb8] sm:$0xff]  ;;  %2350 = vmatpush.bf16.msra.mxu1 %v2272_v1  ;;  %1367 = vmatpush.bf16.msra.mxu0 %v2272_v1  ;;  %v2287_v4 = vld [vmem:[%s3013_s1 + $0xb0] sm:$0xff]  ;;  %v261_v8 = vld [vmem:[%s2503_s10] sm:$0xf]  ;;  %vm388_vm4 = vcmask 1044484   ;;  %vm504_vm12 = vcmask 1041408  }
  0x1a   : > { %1413 = vmatpush.bf16.msra.mxu2 %v2288_v2  ;;  %v2296_v5 = vld [vmem:[%s3013_s1 + $0xf8] sm:$0xff]  ;;  %v2295_v6 = vld [vmem:[%s3013_s1 + $0xf0] sm:$0xff]  ;;  %v2286_v9 = vld [vmem:[%s3013_s1 + $0xa8] sm:$0xff]  ;;  %266 = vst [vmem:[#allocation2] sm:$0xf] %v261_v8  ;;  %vm505_vm13 = vcmask 1045508  }
  0x1b   : > { %1436 = vmatpush.bf16.msra.mxu3 %v2296_v5  ;;  %v262_v10 = vld [vmem:[%s2503_s10 + $0x4] sm:$0xf]  ;;  %v2294_v12 = vld [vmem:[%s3013_s1 + $0xe8] sm:$0xff]  ;;  %v265_v13 = vld [vmem:[%s2503_s10 + $0x10] sm:$0x3]  ;;  %s1643_s17 = smul.u32 40, %s2492_s25 }
  0x1c   : > { %v2269_v11 = vld [vmem:[%s3013_s1 + $0x20] sm:$0xff]  ;;  %267 = vst [vmem:[#allocation2 + $0x24] sm:$0xf] %v262_v10  ;;  %v275_v14 = vld [vmem:[%s2503_s10 + $0x10] sm:$0x7]  ;;  %vm2546_vm2 = vmor %vm348_vm0, %vm349_vm1  ;;  %p2228_p8 = scmp.ne.s32.totalorder %s2492_s25, 1 }
  0x1d   : > { %2351 = vmatpush.bf16.msra.mxu1 %v2271_v3  ;;  %1368 = vmatpush.bf16.msra.mxu0 %v2271_v3  ;;  %270 = vst [vmem:[#allocation2 + $0x90] sm:$0x3] %v265_v13  ;;  %v338_v15 = vld [vmem:[%s2503_s10] sm:$0xe]  ;;  %v319_v16 = vshll.u32 %v275_v14, 16  ;;  %v323_v17 = vshrl.u32 %v275_v14, 16  ;;  %vm2579_vm5 = vmor %vm387_vm3, %vm388_vm4 }
  0x1e   : > { %1414 = vmatpush.bf16.msra.mxu2 %v2287_v4  ;;  %v339_v18 = vld [vmem:[%s2503_s10 + $0x4] sm:$0xf]  ;;  %v340_v19 = vld [vmem:[%s2503_s10 + $0x8] sm:$0xf]  ;;  %v1863_v22 = vrot.slane %v338_v15, 9  ;;  %v2268_v27 = vld [vmem:[%s3013_s1 + $0x18] sm:$0xff] }
  0x1f   : > { %1437 = vmatpush.bf16.msra.mxu3 %v2295_v6  ;;  %v2285_v21 = vld [vmem:[%s3013_s1 + $0xa0] sm:$0xff]  ;;  %v353_v23 = vrot.slane %v339_v18, 5  ;;  %v356_v24 = vrot.slane %v340_v19, 5  ;;  %v2553_v25 = vrot.slane %v319_v16, 5  ;;  %v325_v26 = vrot.slane %v323_v17, 4  ;;  %v2284_v33 = vld [vmem:[%s3013_s1 + $0x98] sm:$0xff]  ;;  %vm2769_vm14 = vmor %vm504_vm12, %vm505_vm13 }
  0x20   : > { %v2293_v28 = vld [vmem:[%s3013_s1 + $0xe0] sm:$0xff]  ;;  %v263_v32 = vld [vmem:[%s2503_s10 + $0x8] sm:$0xf]  ;;  %v264_v35 = vld [vmem:[%s2503_s10 + $0xc] sm:$0xf]  ;;  %s2973_s18 = scalar_lea.vmem [#allocation3], %s1643_s17 }
  0x21   : > { %2352 = vmatpush.bf16.msra.mxu1 %v2270_v7  ;;  %1369 = vmatpush.bf16.msra.mxu0 %v2270_v7  ;;  %v354_v29 = vsel %vm2546_vm2, %v1863_v22, %v353_v23  ;;  %v355_v30 = vrot.slane %v353_v23, 4  ;;  %v326_v31 = vor.u32 %v325_v26, %v2553_v25  ;;  %v2267_v36 = vld [vmem:[%s3013_s1 + $0x10] sm:$0xff]  ;;  %v375_v38 = vld [vmem:[%s2503_s10] sm:$0x8]  ;;  %v2292_v39 = vld [vmem:[%s3013_s1 + $0xd8] sm:$0xff]  ;;  %v358_v45 = vrot.slane %v356_v24, 4 }
  0x22   : > { %1415 = vmatpush.bf16.msra.mxu2 %v2286_v9  ;;  %370 = vst [vmem:[#allocation2 + $0x8] sm:$0xf] %v354_v29  ;;  %v376_v40 = vld [vmem:[%s2503_s10 + $0x4] sm:$0xf]  ;;  %v1864_v42 = vrot.slane %v375_v38, 11  ;;  %v2283_v46 = vld [vmem:[%s3013_s1 + $0x90] sm:$0xff] }
  0x23   : > { %1438 = vmatpush.bf16.msra.mxu3 %v2294_v12  ;;  %v357_v34 = vsel %vm2546_vm2, %v355_v30, %v356_v24  ;;  %v327_v37 = vrot.slane %v326_v31, 4  ;;  %268 = vst [vmem:[#allocation2 + $0x48] sm:$0xf] %v263_v32  ;;  %v2584_v43 = vld [vmem:[%s2503_s10 + $0x8] sm:$0xf]  ;;  %v392_v44 = vrot.slane %v376_v40, 7 }
  0x24   : > { %371 = vst [vmem:[#allocation2 + $0x2c] sm:$0xf] %v357_v34  ;;  %v395_v47 = vrot.slane %v2584_v43, 7  ;;  %v341_v48 = vld [vmem:[%s2503_s10 + $0xc] sm:$0xf]  ;;  %v2291_v53 = vld [vmem:[%s3013_s1 + $0xd0] sm:$0xff] }
  0x25   : > { %2353 = vmatpush.bf16.msra.mxu1 %v2269_v11  ;;  %1370 = vmatpush.bf16.msra.mxu0 %v2269_v11  ;;  %337 = vst [vmem:[#allocation2 + $0x94] sm:$0x3] %v327_v37  ;;  %v393_v49 = vsel %vm2579_vm5, %v1864_v42, %v392_v44  ;;  %v394_v50 = vrot.slane %v392_v44, 4  ;;  %v2594_v51 = vld [vmem:[%s2503_s10 + $0x10] sm:$0x7]  ;;  %v359_v52 = vrot.slane %v341_v48, 5 }
  0x26   : > { %1416 = vmatpush.bf16.msra.mxu2 %v2285_v21  ;;  %269 = vst [vmem:[#allocation2 + $0x6c] sm:$0xf] %v264_v35  ;;  %v362_v54 = vrot.slane %v2594_v51, 5  ;;  %v2266_v55 = vld [vmem:[%s3013_s1 + $0x8] sm:$0xff]  ;;  %v2612_v60 = vld [vmem:[#allocation2] sm:$0xf] }
  0x27   : > { %1439 = vmatpush.bf16.msra.mxu3 %v2293_v28  ;;  %411 = vst [vmem:[#allocation2 + $0xc] sm:$0xf] %v393_v49  ;;  %v2282_v56 = vld [vmem:[%s3013_s1 + $0x88] sm:$0xff]  ;;  %v396_v57 = vsel %vm2579_vm5, %v394_v50, %v395_v47  ;;  %v360_v58 = vsel %vm2546_vm2, %v358_v45, %v359_v52  ;;  %v361_v59 = vrot.slane %v359_v52, 4  ;;  %v271_v62 = vld [vmem:[%s2503_s10] sm:$0xf] }
  0x28   : > { %v2290_v61 = vld [vmem:[%s3013_s1 + $0xc8] sm:$0xff]  ;;  %412 = vst [vmem:[#allocation2 + $0x30] sm:$0xf] %v396_v57  ;;  %v2265_v63 = vld [vmem:[%s3013_s1] sm:$0xff]  ;;  %v2280_v3 = vld [vmem:[%s3013_s1 + $0x78] sm:$0xff]  ;;  %v280_v11 = vshrl.u32 %v271_v62, 16 }
  0x29   : > { %2354 = vmatpush.bf16.msra.mxu1 %v2268_v27  ;;  %1371 = vmatpush.bf16.msra.mxu0 %v2268_v27  ;;  %v2251_v0 = vld [vmem:[#allocation2 + $0x20] sm:$0xf0]  ;;  %v363_v1 = vsel %vm2546_vm2, %v361_v59, %v362_v54  ;;  %372 = vst [vmem:[#allocation2 + $0x50] sm:$0xf] %v360_v58  ;;  %v1878_v6 = vld [vmem:[#allocation2 + $0x8] sm:$0xf] }
  0x2a   : > { %1417 = vmatpush.bf16.msra.mxu2 %v2284_v33  ;;  %v272_v2 = vld [vmem:[%s2503_s10 + $0x4] sm:$0xf]  ;;  %373 = vst [vmem:[#allocation2 + $0x74] sm:$0xf] %v363_v1  ;;  %v2635_v7 = vld [vmem:[%s2503_s10 + $0x8] sm:$0xf]  ;;  %v1871_v12 = vor.u32 %v2251_v0, %v2612_v60 }
  0x2b   : > { %1440 = vmatpush.bf16.msra.mxu3 %v2292_v39  ;;  %v2281_v4 = vld [vmem:[%s3013_s1 + $0x80] sm:$0xff]  ;;  %v2304_v8 = vld [vmem:[%s3013_s1 + $0x138] sm:$0xff]  ;;  %v2252_v10 = vld [vmem:[#allocation2 + $0x28] sm:$0xf0]  ;;  %vm276_vm6 = vsmask.f32 3328 }
  0x2c   : > { %v2632_v5 = vld [vmem:[#allocation2 + $0x90] sm:$0x33]  ;;  %v2320_v13 = vld [vmem:[%s3013_s1 + $0x1b8] sm:$0xff]  ;;  %v283_v14 = vshll.u32 %v271_v62, 16  ;;  %v289_v15 = vshll.u32 %v272_v2, 16  ;;  %v293_v16 = vshrl.u32 %v272_v2, 16  ;;  %v1879_v29 = vor.u32 %v2252_v10, %v1878_v6 }
  0x2d   : > { %2355 = vmatpush.bf16.msra.mxu1 %v2267_v36  ;;  %1372 = vmatpush.bf16.msra.mxu0 %v2267_v36  ;;  %v872_v9 = vunpack.c.l.b16 %v2632_v5  ;;  %v416_v17 = vld [vmem:[%s2503_s10] sm:$0x8]  ;;  %vm277_vm7 = vsmask.f32 7440  ;;  %v282_v19 = vrot.slane %v280_v11, 4  ;;  %v299_v20 = vshll.u32 %v2635_v7, 16 }
  0x2e   : > { %1418 = vmatpush.bf16.msra.mxu2 %v2283_v46  ;;  %v417_v21 = vld [vmem:[%s2503_s10 + $0x4] sm:$0xf]  ;;  %v2248_v22 = vld [vmem:[#allocation2 + $0xc] sm:$0xf]  ;;  %v285_v23 = vrot.slane %v283_v14, 5  ;;  %v291_v24 = vrot.slane %v289_v15, 5  ;;  %vm2668_vm9 = vmor %vm276_vm6, %vm277_vm7 }
  0x2f   : > { %1441 = vmatpush.bf16.msra.mxu3 %v2291_v53  ;;  %v899_v18 = vpack.c.b16 %v872_v9, %v872_v9  ;;  %v295_v26 = vrot.slane %v293_v16, 4  ;;  %v426_v27 = vshrl.u32 %v416_v17, 16  ;;  %v2279_v28 = vld [vmem:[%s3013_s1 + $0x70] sm:$0xff]  ;;  %v2289_v30 = vld [vmem:[%s3013_s1 + $0xc0] sm:$0xff]  ;;  %v431_v32 = vshrl.u32 %v417_v21, 16  ;;  %v2328_v33 = vld [vmem:[%s3013_s1 + $0x1f8] sm:$0xff] }
  0x30   : > { %v1880_v31 = vld [vmem:[#allocation2 + $0x2c] sm:$0xf0]  ;;  %v286_v34 = vor.u32 %v285_v23, %v282_v19  ;;  %v2657_v36 = vrot.slane %v299_v20, 5  ;;  %v418_v37 = vld [vmem:[%s2503_s10 + $0x8] sm:$0xf]  ;;  %v434_v50 = vshll.u32 %v417_v21, 16 }
  0x31   : > { %2356 = vmatpush.bf16.msra.mxu1 %v2266_v55  ;;  %1373 = vmatpush.bf16.msra.mxu0 %v2266_v55  ;;  %v296_v35 = vor.u32 %v295_v26, %v291_v24  ;;  %vm422_vm8 = vsmask.f32 256  ;;  %v2303_v38 = vld [vmem:[%s3013_s1 + $0x130] sm:$0xff]  ;;  %v1883_v39 = vor.u32 %v2248_v22, %v1880_v31  ;;  %vm423_vm10 = vsmask.f32 4368  ;;  %v2278_v45 = vld [vmem:[%s3013_s1 + $0x68] sm:$0xff] }
  0x32   : > { %1419 = vmatpush.bf16.msra.mxu2 %v2282_v56  ;;  %v2319_v40 = vld [vmem:[%s3013_s1 + $0x1b0] sm:$0xff]  ;;  %v433_v44 = vrot.slane %v431_v32, 7  ;;  %v287_v46 = vrot.slane %v286_v34, 4  ;;  %v1865_v49 = vrot.slane %v426_v27, 11  ;;  %v378_v52 = vld [vmem:[%s2503_s10 + $0xc] sm:$0xf]  ;;  %vm2680_vm11 = vmor %vm422_vm8, %vm423_vm10 }
  0x33   : > { %1442 = vmatpush.bf16.msra.mxu3 %v2290_v61  ;;  %v297_v48 = vrot.slane %v296_v35, 4  ;;  %v2302_v53 = vld [vmem:[%s3013_s1 + $0x128] sm:$0xff]  ;;  %v440_v56 = vshrl.u32 %v418_v37, 16  ;;  %v443_v57 = vshll.u32 %v418_v37, 16  ;;  %v379_v58 = vld [vmem:[%s2503_s10 + $0x10] sm:$0xf] }
  0x34   : > { %v397_v59 = vrot.slane %v395_v47, 4  ;;  %v2318_v60 = vld [vmem:[%s3013_s1 + $0x1a8] sm:$0xff]  ;;  %v292_v61 = vsel %vm2668_vm9, %v287_v46, %v291_v24  ;;  %v436_v0 = vor.u32 %v434_v50, %v433_v44  ;;  %v398_v43 = vrot.slane %v378_v52, 7  ;;  %v380_v47 = vld [vmem:[%s2503_s10 + $0x14] sm:$0x1]  ;;  %v2277_v6 = vld [vmem:[%s3013_s1 + $0x60] sm:$0xff] }
  0x35   : > { %2357 = vmatpush.bf16.msra.mxu1 %v2265_v63  ;;  %1374 = vmatpush.bf16.msra.mxu0 %v2265_v63  ;;  %v302_v62 = vsel %vm2668_vm9, %v297_v48, %v2657_v36  ;;  %v2327_v63 = vld [vmem:[%s3013_s1 + $0x1f0] sm:$0xff]  ;;  %333 = vst [vmem:[#allocation2 + $0x4] sm:$0xf] %v292_v61  ;;  %v438_v1 = vrot.slane %v433_v44, 4  ;;  %v2699_v2 = vrot.slane %v440_v56, 7  ;;  %v364_v11 = vrot.slane %v362_v54, 4 }
  0x36   : > { %1420 = vmatpush.bf16.msra.mxu2 %v2281_v4  ;;  %v404_v4 = vrot.slane %v380_v47, 7  ;;  %334 = vst [vmem:[#allocation2 + $0x28] sm:$0xf] %v302_v62  ;;  %v399_v9 = vsel %vm2579_vm5, %v397_v59, %v398_v43  ;;  %v400_v10 = vrot.slane %v398_v43, 4  ;;  %v274_v16 = vld [vmem:[%s2503_s10 + $0xc] sm:$0xf] }
  0x37   : > { %1443 = vmatpush.bf16.msra.mxu3 %v2289_v30  ;;  %v445_v14 = vor.u32 %v443_v57, %v2699_v2  ;;  %v303_v17 = vshrl.u32 %v2635_v7, 16  ;;  %v2721_v51 = vld [vmem:[#allocation2 + $0x68] sm:$0xf0]  ;;  %413 = vst [vmem:[#allocation2 + $0x54] sm:$0xf] %v399_v9  ;;  %v309_v19 = vshll.u32 %v274_v16, 16 }
  0x38   : > { %1375 = vmatmul.bf16.vlgmr.msra.gmra.mxu0 %v1871_v12  ;;  %1385 = vmatmul.bf16.vlgmr.msra.gmra.mxu1 %v899_v18  ;;  %v2326_v12 = vld [vmem:[%s3013_s1 + $0x1e8] sm:$0xff]  ;;  %v313_v20 = vshrl.u32 %v274_v16, 16  ;;  %v2726_v22 = vld [vmem:[#allocation2 + $0x50] sm:$0xf]  ;;  %v2317_v7 = vld [vmem:[%s3013_s1 + $0x1a0] sm:$0xff]  ;;  %vm1613_vm2 = vcmask 1043456  }
  0x39   : > { %1390 = vmatpush.bf16.msrb.mxu1 %v2280_v3  ;;  %1459 = vmatpush.bf16.msrb.mxu0 %v2304_v8  ;;  %v401_v3 = vrot.slane %v379_v58, 7  ;;  %v437_v8 = vsel %vm2680_vm11, %v1865_v49, %v436_v0  ;;  %v2719_v18 = vld [vmem:[#allocation2 + $0x48] sm:$0xf]  ;;  %v419_v21 = vld [vmem:[%s2503_s10 + $0xc] sm:$0xf]  ;;  %v446_v23 = vsel %vm2680_vm11, %v438_v1, %v445_v14  ;;  %v305_v26 = vrot.slane %v303_v17, 4 }
  0x3a   : > { %1505 = vmatpush.bf16.msrb.mxu2 %v2320_v13  ;;  %1444 = vmatmul.bf16.vlgmr.msra.gmra.mxu3 %v1883_v39  ;;  %v2301_v13 = vld [vmem:[%s3013_s1 + $0x120] sm:$0xff]  ;;  %479 = vst [vmem:[#allocation2 + $0x10] sm:$0xf] %v437_v8  ;;  %v420_v27 = vld [vmem:[%s2503_s10 + $0x10] sm:$0xf]  ;;  %v315_v30 = vrot.slane %v313_v20, 4  ;;  %v1907_v46 = vor.u32 %v2721_v51, %v2719_v18 }
  0x3b   : > { %1421 = vmatmul.bf16.vlgmr.msra.gmra.mxu2 %v1879_v29  ;;  %1528 = vmatpush.bf16.msrb.mxu3 %v2328_v33  ;;  %v403_v15 = vrot.slane %v401_v3, 4  ;;  %v402_v54 = vsel %vm2579_vm5, %v400_v10, %v401_v3  ;;  %480 = vst [vmem:[#allocation2 + $0x34] sm:$0xf] %v446_v23  ;;  %v311_v29 = vrot.slane %v309_v19, 5  ;;  %v449_v31 = vshrl.u32 %v419_v21, 16  ;;  %v2300_v33 = vld [vmem:[%s3013_s1 + $0x118] sm:$0xff] }
  0x3c   : > { %414 = vst [vmem:[#allocation2 + $0x78] sm:$0xf] %v402_v54  ;;  %v452_v32 = vshll.u32 %v419_v21, 16  ;;  %v2261_v34 = vld [vmem:[#allocation2 + $0x70] sm:$0xf0]  ;;  %v306_v35 = vor.u32 %v305_v26, %v2657_v36  ;;  %v458_v37 = vshrl.u32 %v420_v27, 16 }
  0x3d   : > { %1391 = vmatpush.bf16.msrb.mxu1 %v2279_v28  ;;  %1460 = vmatpush.bf16.msrb.mxu0 %v2303_v38  ;;  %v405_v24 = vsel %vm2579_vm5, %v403_v15, %v404_v4  ;;  %v2276_v28 = vld [vmem:[%s3013_s1 + $0x58] sm:$0xff]  ;;  %374 = vst [vmem:[#allocation2 + $0x98] sm:$0x3] %v364_v11  ;;  %v461_v38 = vshll.u32 %v420_v27, 16  ;;  %v316_v39 = vor.u32 %v315_v30, %v311_v29  ;;  %v451_v44 = vrot.slane %v449_v31, 7  ;;  %v2299_v3 = vld [vmem:[%s3013_s1 + $0x110] sm:$0xff] }
  0x3e   : > { %1506 = vmatpush.bf16.msrb.mxu2 %v2319_v40  ;;  %415 = vst [vmem:[#allocation2 + $0x9c] sm:$0x3] %v405_v24  ;;  %v447_v40 = vrot.slane %v2699_v2, 4  ;;  %v2316_v36 = vld [vmem:[%s3013_s1 + $0x198] sm:$0xff]  ;;  %v307_v48 = vrot.slane %v306_v35, 4  ;;  %v2750_v49 = vrot.slane %v458_v37, 7  ;;  %v1915_v52 = vor.u32 %v2261_v34, %v2726_v22 }
  0x3f   : > { %1529 = vmatpush.bf16.msrb.mxu3 %v2327_v63  ;;  %v495_v50 = vld [vmem:[%s2503_s10 + $0x8] sm:$0xf]  ;;  %v454_v56 = vor.u32 %v452_v32, %v451_v44  ;;  %v456_v57 = vrot.slane %v451_v44, 4  ;;  %v2257_v58 = vld [vmem:[#allocation2 + $0x54] sm:$0xf]  ;;  %v2273_v54 = vld [vmem:[%s3013_s1 + $0x40] sm:$0xff] }
  0x40   : > { %v312_v59 = vsel %vm2668_vm9, %v307_v48, %v311_v29  ;;  %v463_v61 = vor.u32 %v461_v38, %v2750_v49  ;;  %v2275_v63 = vld [vmem:[%s3013_s1 + $0x50] sm:$0xff]  ;;  %v509_v2 = vrot.slane %v495_v50, 6  ;;  %v2782_v4 = vld [vmem:[%s2503_s10 + $0xc] sm:$0xf]  ;;  %v2796_v14 = vld [vmem:[#allocation2 + $0x4] sm:$0xf] }
  0x41   : > { %1392 = vmatpush.bf16.msrb.mxu1 %v2278_v45  ;;  %1461 = vmatpush.bf16.msrb.mxu0 %v2302_v53  ;;  %v494_v45 = vld [vmem:[%s2503_s10 + $0x4] sm:$0xc]  ;;  %v317_v53 = vrot.slane %v316_v39, 4  ;;  %335 = vst [vmem:[#allocation2 + $0x4c] sm:$0xf] %v312_v59  ;;  %v455_v47 = vsel %vm2680_vm11, %v447_v40, %v454_v56  ;;  %v2274_v10 = vld [vmem:[%s3013_s1 + $0x48] sm:$0xff] }
  0x42   : > { %1507 = vmatpush.bf16.msrb.mxu2 %v2318_v60  ;;  %v2325_v60 = vld [vmem:[%s3013_s1 + $0x1e0] sm:$0xff]  ;;  %v1866_v62 = vrot.slane %v494_v45, 10  ;;  %v464_v42 = vsel %vm2680_vm11, %v456_v57, %v463_v61  ;;  %481 = vst [vmem:[#allocation2 + $0x58] sm:$0xf] %v455_v47  ;;  %v511_v9 = vrot.slane %v509_v2, 4  ;;  %v2298_v11 = vld [vmem:[%s3013_s1 + $0x108] sm:$0xff] }
  0x43   : > { %1530 = vmatpush.bf16.msrb.mxu3 %v2326_v12  ;;  %v1916_v0 = vld [vmem:[#allocation2 + $0x74] sm:$0xf0]  ;;  %v322_v43 = vsel %vm2668_vm9, %v317_v53, %v2553_v25  ;;  %v2315_v25 = vld [vmem:[%s3013_s1 + $0x190] sm:$0xff]  ;;  %482 = vst [vmem:[#allocation2 + $0x7c] sm:$0xf] %v464_v42  ;;  %v2314_v16 = vld [vmem:[%s3013_s1 + $0x188] sm:$0xff] }
  0x44   : > { %336 = vst [vmem:[#allocation2 + $0x70] sm:$0xf] %v322_v43  ;;  %v510_v8 = vsel %vm2769_vm14, %v1866_v62, %v509_v2  ;;  %v2324_v12 = vld [vmem:[%s3013_s1 + $0x1d8] sm:$0xff]  ;;  %v2798_v15 = vld [vmem:[#allocation2 + $0x24] sm:$0xf0]  ;;  %v465_v23 = vrot.slane %v2750_v49, 4 }
  0x45   : > { %1393 = vmatpush.bf16.msrb.mxu1 %v2277_v6  ;;  %1462 = vmatpush.bf16.msrb.mxu0 %v2301_v13  ;;  %v1919_v6 = vor.u32 %v2257_v58, %v1916_v0  ;;  %v512_v13 = vrot.slane %v2782_v4, 6  ;;  %526 = vst [vmem:[#allocation2 + $0x18] sm:$0xf] %v510_v8  ;;  %v421_v18 = vld [vmem:[%s2503_s10 + $0x14] sm:$0x3]  ;;  %v2312_v22 = vld [vmem:[%s3013_s1 + $0x178] sm:$0xff]  ;;  %v1875_v30 = vor.u32 %v2796_v14, %v2798_v15 }
  0x46   : > { %1508 = vmatpush.bf16.msrb.mxu2 %v2317_v7  ;;  %v531_v51 = vld [vmem:[%s2503_s10 + $0x4] sm:$0xc]  ;;  %v2812_v19 = vld [vmem:[#allocation2 + $0x98] sm:$0x33]  ;;  %v467_v20 = vshrl.u32 %v421_v18, 16  ;;  %v470_v21 = vshll.u32 %v421_v18, 16 }
  0x47   : > { %1531 = vmatpush.bf16.msrb.mxu3 %v2325_v60  ;;  %v513_v17 = vsel %vm2769_vm14, %v511_v9, %v512_v13  ;;  %v2323_v7 = vld [vmem:[%s3013_s1 + $0x1d0] sm:$0xff]  ;;  %v532_v26 = vld [vmem:[%s2503_s10 + $0x8] sm:$0xf]  ;;  %v541_v29 = vshrl.u32 %v531_v51, 16  ;;  %v2297_v31 = vld [vmem:[%s3013_s1 + $0x100] sm:$0xff]  ;;  %v544_v40 = vshll.u32 %v531_v51, 16  ;;  %v875_v55 = vunpack.c.h.b16 %v2812_v19 }
  0x48   : > { %1380 = vmatmul.bf16.gmra.mxu0 %v1907_v46  ;;  %527 = vst [vmem:[#allocation2 + $0x3c] sm:$0xf] %v513_v17  ;;  %v488_v24 = vld [vmem:[%s2503_s10 + $0x14] sm:$0x3]  ;;  %v469_v27 = vrot.slane %v467_v20, 7  ;;  %v2336_v34 = vld [vmem:[%s3013_s1 + $0x238] sm:$0xff] }
  0x49   : > { %1394 = vmatpush.bf16.msrb.mxu1 %v2276_v28  ;;  %1463 = vmatpush.bf16.msrb.mxu0 %v2300_v33  ;;  %493 = vst [vmem:[#allocation2 + $0xa4] sm:$0x3] %v488_v24  ;;  %v533_v28 = vld [vmem:[%s2503_s10 + $0xc] sm:$0xf]  ;;  %v1886_v32 = vld [vmem:[#allocation2 + $0x10] sm:$0xf]  ;;  %v874_v33 = vunpack.c.l.b16 %v2812_v19  ;;  %v902_v14 = vpack.c.b16 %v875_v55, %v875_v55 }
  0x4a   : > { %1509 = vmatpush.bf16.msrb.mxu2 %v2316_v36  ;;  %1449 = vmatmul.bf16.gmra.mxu3 %v1919_v6  ;;  %vm537_vm15 = vsmask.f32 1280  ;;  %v2253_v35 = vld [vmem:[#allocation2 + $0x30] sm:$0xf0]  ;;  %v2313_v37 = vld [vmem:[%s3013_s1 + $0x180] sm:$0xff]  ;;  %v472_v38 = vor.u32 %v470_v21, %v469_v27  ;;  %v543_v39 = vrot.slane %v541_v29, 6 }
  0x4b   : > { %1426 = vmatmul.bf16.gmra.mxu2 %v1915_v52  ;;  %1532 = vmatpush.bf16.msrb.mxu3 %v2324_v12  ;;  %v550_v44 = vshrl.u32 %v532_v26, 16  ;;  %v2322_v45 = vld [vmem:[%s3013_s1 + $0x1c8] sm:$0xff]  ;;  %vm538_vm0 = vsmask.f32 5392  ;;  %v553_v46 = vshll.u32 %v532_v26, 16  ;;  %v560_v36 = vshrl.u32 %v533_v28, 16 }
  0x4c   : > { %v563_v48 = vshll.u32 %v533_v28, 16  ;;  %v473_v49 = vsel %vm2680_vm11, %v465_v23, %v472_v38  ;;  %v546_v50 = vrot.slane %v544_v40, 7  ;;  %v497_v53 = vld [vmem:[%s2503_s10 + $0x10] sm:$0xf]  ;;  %v2843_v56 = vld [vmem:[%s2503_s10 + $0x14] sm:$0xf]  ;;  %v1887_v57 = vor.u32 %v2253_v35, %v1886_v32  ;;  %vm2856_vm1 = vmor %vm537_vm15, %vm538_vm0 }
  0x4d   : > { %1395 = vmatpush.bf16.msrb.mxu1 %v2275_v63  ;;  %1464 = vmatpush.bf16.msrb.mxu0 %v2299_v3  ;;  %v552_v52 = vrot.slane %v550_v44, 6  ;;  %v2311_v58 = vld [vmem:[%s3013_s1 + $0x170] sm:$0xff]  ;;  %483 = vst [vmem:[#allocation2 + $0xa0] sm:$0x3] %v473_v49  ;;  %v555_v59 = vrot.slane %v553_v46, 7  ;;  %v562_v60 = vrot.slane %v560_v36, 6  ;;  %v901_v0 = vpack.c.b16 %v874_v33, %v874_v33 }
  0x4e   : > { %1510 = vmatpush.bf16.msrb.mxu2 %v2315_v25  ;;  %v547_v61 = vor.u32 %v546_v50, %v543_v39  ;;  %v565_v62 = vrot.slane %v563_v48, 7  ;;  %v514_v63 = vrot.slane %v512_v13, 4  ;;  %v2335_v43 = vld [vmem:[%s3013_s1 + $0x230] sm:$0xff]  ;;  %v515_v3 = vrot.slane %v497_v53, 6  ;;  %v2310_v42 = vld [vmem:[%s3013_s1 + $0x168] sm:$0xff]  ;;  %v2321_v4 = vld [vmem:[%s3013_s1 + $0x1c0] sm:$0xff] }
  0x4f   : > { %1533 = vmatpush.bf16.msrb.mxu3 %v2323_v7  ;;  %v556_v2 = vor.u32 %v555_v59, %v552_v52  ;;  %v518_v25 = vrot.slane %v2843_v56, 6  ;;  %v534_v12 = vld [vmem:[%s2503_s10 + $0x10] sm:$0xf]  ;;  %v535_v13 = vld [vmem:[%s2503_s10 + $0x14] sm:$0xf]  ;;  %v2334_v17 = vld [vmem:[%s3013_s1 + $0x228] sm:$0xff] }
  0x50   : > { %v548_v6 = vrot.slane %v547_v61, 4  ;;  %v2867_v8 = vor.u32 %v565_v62, %v562_v60  ;;  %v573_v19 = vshll.u32 %v534_v12, 16  ;;  %v484_v20 = vld [vmem:[%s2503_s10 + $0x4] sm:$0xf]  ;;  %v580_v21 = vshrl.u32 %v535_v13, 16  ;;  %v2308_v39 = vld [vmem:[%s3013_s1 + $0x158] sm:$0xff] }
  0x51   : > { %1396 = vmatpush.bf16.msrb.mxu1 %v2274_v10  ;;  %1465 = vmatpush.bf16.msrb.mxu0 %v2298_v11  ;;  %v558_v9 = vrot.slane %v556_v2, 4  ;;  %v516_v10 = vsel %vm2769_vm14, %v514_v63, %v515_v3  ;;  %v517_v11 = vrot.slane %v515_v3, 4  ;;  %v485_v7 = vld [vmem:[%s2503_s10 + $0x8] sm:$0xf]  ;;  %v2256_v24 = vld [vmem:[#allocation2 + $0x4c] sm:$0xf] }
  0x52   : > { %1511 = vmatpush.bf16.msrb.mxu2 %v2314_v16  ;;  %v557_v15 = vsel %vm2856_vm1, %v548_v6, %v556_v2  ;;  %528 = vst [vmem:[#allocation2 + $0x60] sm:$0xf] %v516_v10  ;;  %v2309_v16 = vld [vmem:[%s3013_s1 + $0x160] sm:$0xff]  ;;  %v605_v23 = vld [vmem:[%s2503_s10 + $0x8] sm:$0xf]  ;;  %v568_v32 = vrot.slane %v2867_v8, 4 }
  0x53   : > { %1534 = vmatpush.bf16.msrb.mxu3 %v2322_v45  ;;  %v567_v18 = vsel %vm2856_vm1, %v558_v9, %v2867_v8  ;;  %599 = vst [vmem:[#allocation2 + $0x1c] sm:$0xf] %v557_v15  ;;  %v519_v51 = vsel %vm2769_vm14, %v517_v11, %v518_v25  ;;  %v1908_v26 = vld [vmem:[#allocation2 + $0x6c] sm:$0xf0]  ;;  %v604_v1 = vld [vmem:[%s2503_s10 + $0x4] sm:$0x8] }
  0x54   : > { %600 = vst [vmem:[#allocation2 + $0x40] sm:$0xf] %v567_v18  ;;  %v2891_v27 = vld [vmem:[%s2503_s10 + $0xc] sm:$0xf]  ;;  %v2333_v28 = vld [vmem:[%s3013_s1 + $0x220] sm:$0xff]  ;;  %v1867_v29 = vrot.slane %v604_v1, 11  ;;  %v1911_v50 = vor.u32 %v2256_v24, %v1908_v26 }
  0x55   : > { %1397 = vmatpush.bf16.msrb.mxu1 %v2273_v54  ;;  %1466 = vmatpush.bf16.msrb.mxu0 %v2297_v31  ;;  %v570_v54 = vshrl.u32 %v534_v12, 16  ;;  %529 = vst [vmem:[#allocation2 + $0x84] sm:$0xf] %v519_v51  ;;  %v621_v31 = vrot.slane %v2891_v27, 7  ;;  %v582_v35 = vrot.slane %v580_v21, 6  ;;  %v520_v46 = vrot.slane %v518_v25, 4 }
  0x56   : > { %1512 = vmatpush.bf16.msrb.mxu2 %v2313_v37  ;;  %489 = vst [vmem:[#allocation2 + $0x14] sm:$0xf] %v484_v20  ;;  %v536_v37 = vld [vmem:[%s2503_s10 + $0x18] sm:$0x1]  ;;  %v2262_v36 = vld [vmem:[#allocation2 + $0x78] sm:$0xf0] }
  0x57   : > { %1535 = vmatpush.bf16.msrb.mxu3 %v2321_v4  ;;  %490 = vst [vmem:[#allocation2 + $0x38] sm:$0xf] %v485_v7  ;;  %v572_v33 = vrot.slane %v570_v54, 6  ;;  %v1922_v38 = vld [vmem:[#allocation2 + $0x58] sm:$0xf]  ;;  %v590_v49 = vshll.u32 %v536_v37, 16 }
  0x58   : > { %1398 = vmatmul.bf16.vlgmr.msrb.gmra.mxu1 %v1875_v30  ;;  %1467 = vmatmul.bf16.vlgmr.msrb.gmra.mxu0 %v1887_v57  ;;  %v618_v30 = vrot.slane %v605_v23, 7  ;;  %v1894_v52 = vld [vmem:[#allocation2 + $0x18] sm:$0xf]  ;;  %530 = vst [vmem:[#allocation2 + $0xa8] sm:$0x3] %v520_v46  ;;  %v2307_v61 = vld [vmem:[%s3013_s1 + $0x150] sm:$0xff]  ;;  %v1923_v63 = vor.u32 %v2262_v36, %v1922_v38 }
  0x59   : > { %1482 = vmatpush.bf16.msra.mxu1 %v2312_v22  ;;  %1551 = vmatpush.bf16.msra.mxu0 %v2336_v34  ;;  %v583_v22 = vshll.u32 %v535_v13, 16  ;;  %v2332_v53 = vld [vmem:[%s3013_s1 + $0x218] sm:$0xff]  ;;  %v592_v55 = vrot.slane %v590_v49, 7  ;;  %v2306_v4 = vld [vmem:[%s3013_s1 + $0x148] sm:$0xff]  ;;  %v487_v10 = vld [vmem:[%s2503_s10 + $0x10] sm:$0xf] }
  0x5a   : > { %2358 = vmatpush.bf16.msra.mxu2 %v2336_v34  ;;  %1454 = vmatmul.bf16.gmra.mxu3 %v902_v14  ;;  %v575_v34 = vrot.slane %v573_v19, 7  ;;  %v619_v40 = vsel %vm2579_vm5, %v1867_v29, %v618_v30  ;;  %v620_v44 = vrot.slane %v618_v30, 4  ;;  %v2250_v3 = vld [vmem:[#allocation2 + $0x1c] sm:$0xf]  ;;  %v2330_v8 = vld [vmem:[%s3013_s1 + $0x208] sm:$0xff]  ;;  %v2305_v11 = vld [vmem:[%s3013_s1 + $0x140] sm:$0xff] }
  0x5b   : > { %1431 = vmatmul.bf16.gmra.mxu2 %v901_v0  ;;  %v585_v45 = vrot.slane %v583_v22, 7  ;;  %637 = vst [vmem:[#allocation2 + $0x20] sm:$0xf] %v619_v40  ;;  %v2331_v0 = vld [vmem:[%s3013_s1 + $0x210] sm:$0xff]  ;;  %v1896_v25 = vld [vmem:[#allocation2 + $0x3c] sm:$0xf0] }
  0x5c   : > { %v576_v48 = vor.u32 %v575_v34, %v572_v33  ;;  %v622_v56 = vsel %vm2579_vm5, %v620_v44, %v621_v31  ;;  %v1899_v6 = vor.u32 %v2250_v3, %v1896_v25  ;;  %v486_v9 = vld [vmem:[%s2503_s10 + $0xc] sm:$0xf]  ;;  %v607_v47 = vld [vmem:[%s2503_s10 + $0x10] sm:$0xf]  ;;  %492 = vst [vmem:[#allocation2 + $0x80] sm:$0xf] %v487_v10 }
  0x5d   : > { %1483 = vmatpush.bf16.msra.mxu1 %v2311_v58  ;;  %1552 = vmatpush.bf16.msra.mxu0 %v2335_v43  ;;  %v586_v57 = vor.u32 %v585_v45, %v582_v35  ;;  %v2254_v58 = vld [vmem:[#allocation2 + $0x38] sm:$0xf0]  ;;  %638 = vst [vmem:[#allocation2 + $0x44] sm:$0xf] %v622_v56  ;;  %v608_v12 = vld [vmem:[%s2503_s10 + $0x14] sm:$0xf] }
  0x5e   : > { %2359 = vmatpush.bf16.msra.mxu2 %v2335_v43  ;;  %v577_v59 = vsel %vm2856_vm1, %v568_v32, %v576_v48  ;;  %v578_v60 = vrot.slane %v576_v48, 4  ;;  %v1895_v2 = vor.u32 %v2254_v58, %v1894_v52  ;;  %491 = vst [vmem:[#allocation2 + $0x5c] sm:$0xf] %v486_v9  ;;  %v624_v13 = vrot.slane %v607_v47, 7  ;;  %v2936_v14 = vld [vmem:[#allocation2 + $0xa0] sm:$0x33] }
  0x5f   : > { %601 = vst [vmem:[#allocation2 + $0x64] sm:$0xf] %v577_v59  ;;  %v588_v62 = vrot.slane %v586_v57, 4  ;;  %v627_v15 = vrot.slane %v608_v12, 7  ;;  %v623_v18 = vrot.slane %v621_v31, 4  ;;  %v876_v22 = vunpack.c.l.b16 %v2936_v14  ;;  %v1574_v30 = vld [vmem:[%s3016_s4] sm:$0xff] }
  0x60   : > { %v587_v43 = vsel %vm2856_vm1, %v578_v60, %v586_v57  ;;  %v626_v51 = vrot.slane %v624_v13, 4  ;;  %v609_v54 = vld [vmem:[%s2503_s10 + $0x18] sm:$0x1]  ;;  %v1930_v24 = vld [vmem:[#allocation2 + $0x60] sm:$0xf]  ;;  %v2447_v31 = vmov 0  }
  0x61   : > { %1484 = vmatpush.bf16.msra.mxu1 %v2310_v42  ;;  %1553 = vmatpush.bf16.msra.mxu0 %v2334_v17  ;;  %602 = vst [vmem:[#allocation2 + $0x88] sm:$0xf] %v587_v43  ;;  %v593_v42 = vsel %vm2856_vm1, %v588_v62, %v592_v55  ;;  %v629_v19 = vrot.slane %v627_v15, 4  ;;  %v630_v20 = vrot.slane %v609_v54, 7  ;;  %v625_v21 = vsel %vm2579_vm5, %v623_v18, %v624_v13  ;;  %v2263_v26 = vld [vmem:[#allocation2 + $0x80] sm:$0xf0] }
  0x62   : > { %2360 = vmatpush.bf16.msra.mxu2 %v2334_v17  ;;  %603 = vst [vmem:[#allocation2 + $0xac] sm:$0x3] %v593_v42  ;;  %v2329_v17 = vld [vmem:[%s3013_s1 + $0x200] sm:$0xff]  ;;  %v903_v1 = vpack.c.b16 %v876_v22, %v876_v22  ;;  %v1931_v27 = vor.u32 %v2263_v26, %v1930_v24  ;;  %2396 = vset.pattern.permute.xlu0 %v2447_v31  ;;  %v1575_v32 = vld [vmem:[%s3016_s4 + $0x8] sm:$0xff]  ;;  %v2249_v33 = vld [vmem:[#allocation2 + $0x14] sm:$0xf] }
  0x63   : > { %639 = vst [vmem:[#allocation2 + $0x68] sm:$0xf] %v625_v21  ;;  %v631_v7 = vsel %vm2579_vm5, %v629_v19, %v630_v20  ;;  %2397 = vset.pattern.permute.xlu1 %v2447_v31  ;;  %1581 = vperm.xlu0 %2396, %v1574_v30   ;;  %v1888_v34 = vld [vmem:[#allocation2 + $0x34] sm:$0xf0]  ;;  %v1902_v38 = vld [vmem:[#allocation2 + $0x20] sm:$0xf] }
  0x64   : > { %641 = vst [vmem:[#allocation2 + $0xb0] sm:$0x3] %v631_v7  ;;  %2398 = vset.pattern.permute.xlu2 %v2447_v31  ;;  %v1891_v37 = vor.u32 %v2249_v33, %v1888_v34  ;;  %v1576_v36 = vld [vmem:[%s3016_s4 + $0x10] sm:$0xff]  ;;  %v1577_v49 = vld [vmem:[%s3016_s4 + $0x18] sm:$0xff]  ;;  %v1924_v52 = vld [vmem:[#allocation2 + $0x7c] sm:$0xf0] }
  0x65   : > { %1485 = vmatpush.bf16.msra.mxu1 %v2309_v16  ;;  %1554 = vmatpush.bf16.msra.mxu0 %v2333_v28  ;;  %v873_v16 = vunpack.c.h.b16 %v2632_v5  ;;  %v628_v5 = vsel %vm2579_vm5, %v626_v51, %v627_v15 }
  0x66   : > { %2361 = vmatpush.bf16.msra.mxu2 %v2333_v28  ;;  %640 = vst [vmem:[#allocation2 + $0x8c] sm:$0xf] %v628_v5  ;;  %v2259_v28 = vld [vmem:[#allocation2 + $0x64] sm:$0xf]  ;;  %1591 = vperm.xlu1 %2397, %v1576_v36  }
  0x67   : > { %v900_v23 = vpack.c.b16 %v873_v16, %v873_v16 }
  0x68   : > { %1403 = vmatmul.bf16.gmra.mxu1 %v1911_v50  ;;  %1472 = vmatmul.bf16.gmra.mxu0 %v1923_v63  ;;  %v1932_v29 = vld [vmem:[#allocation2 + $0x84] sm:$0xf0]  ;;  %v2258_v50 = vld [vmem:[#allocation2 + $0x5c] sm:$0xf]  ;;  %v1578_v63 = vld [vmem:[%s3016_s4 + $0x20] sm:$0xf] }
  0x69   : > { %1486 = vmatpush.bf16.msra.mxu1 %v2308_v39  ;;  %1555 = vmatpush.bf16.msra.mxu0 %v2332_v53  ;;  %v1935_v41 = vor.u32 %v2259_v28, %v1932_v29  ;;  %v665_v35 = vld [vmem:[#allocation2 + $0xa8] sm:$0x33]  ;;  %v2255_v39 = vld [vmem:[#allocation2 + $0x40] sm:$0xf0]  ;;  %v1927_v56 = vor.u32 %v2258_v50, %v1924_v52 }
  0x6a   : > { %2362 = vmatpush.bf16.msra.mxu2 %v2332_v53  ;;  %1536 = vmatmul.bf16.vlgmr.msrb.gmra.mxu3 %v1899_v6  ;;  %v878_v40 = vunpack.c.l.b16 %v665_v35  ;;  %v1903_v44 = vor.u32 %v2255_v39, %v1902_v38  ;;  %v879_v45 = vunpack.c.h.b16 %v665_v35  ;;  %v1938_v57 = vld [vmem:[#allocation2 + $0x68] sm:$0xf] }
  0x6b   : > { %1513 = vmatmul.bf16.vlgmr.msrb.gmra.mxu2 %v1895_v2  ;;  %1586 = vperm.xlu0 %2396, %v1575_v32   ;;  %v666_v53 = vld [vmem:[#allocation2 + $0xb0] sm:$0x3] }
  0x6c   : > { %v905_v46 = vpack.c.b16 %v878_v40, %v878_v40  ;;  %v906_v48 = vpack.c.b16 %v879_v45, %v879_v45  ;;  %v880_v59 = vunpack.c.l.b16 %v666_v53  ;;  %1601 = vperm.xlu2 %2398, %v1578_v63  }
  0x6d   : > { %1487 = vmatpush.bf16.msra.mxu1 %v2307_v61  ;;  %1556 = vmatpush.bf16.msra.mxu0 %v2331_v0  ;;  %v2264_v58 = vld [vmem:[#allocation2 + $0x88] sm:$0xf0]  ;;  %v877_v61 = vunpack.c.h.b16 %v2936_v14 }
  0x6e   : > { %2363 = vmatpush.bf16.msra.mxu2 %v2331_v0  ;;  %1596 = vperm.xlu1 %2397, %v1577_v49   ;;  %v1939_v60 = vor.u32 %v2264_v58, %v1938_v57  ;;  %v907_v55 = vpack.c.b16 %v880_v59, %v880_v59 }
  0x6f   : > { %v904_v62 = vpack.c.b16 %v877_v61, %v877_v61 }
  0x71   : > { %1488 = vmatpush.bf16.msra.mxu1 %v2306_v4  ;;  %1557 = vmatpush.bf16.msra.mxu0 %v2330_v8 }
  0x72   : > { %2364 = vmatpush.bf16.msra.mxu2 %v2330_v8 }
  0x75   : > { %1489 = vmatpush.bf16.msra.mxu1 %v2305_v11  ;;  %1558 = vmatpush.bf16.msra.mxu0 %v2329_v17 }
  0x76   : > { %2365 = vmatpush.bf16.msra.mxu2 %v2329_v17 }
  0x78   : > { %1408 = vmatmul.bf16.gmra.mxu1 %v900_v23  ;;  %1477 = vmatmul.bf16.gmra.mxu0 %v903_v1 }
  0x7a   : > { %1541 = vmatmul.bf16.gmra.mxu3 %v1935_v41 }
  0x7b   : > { %1518 = vmatmul.bf16.gmra.mxu2 %v1931_v27 }
  0x88   : > { %1490 = vmatmul.bf16.vlgmr.msra.gmra.mxu1 %v1891_v37  ;;  %1559 = vmatmul.bf16.vlgmr.msra.gmra.mxu0 %v1903_v44 }
  0x8a   : > { %1546 = vmatmul.bf16.gmra.mxu3 %v906_v48 }
  0x8b   : > { %1523 = vmatmul.bf16.gmra.mxu2 %v905_v46 }
  0x98   : > { %1495 = vmatmul.bf16.gmra.mxu1 %v1927_v56  ;;  %1564 = vmatmul.bf16.gmra.mxu0 %v1939_v60 }
  0x9b   : > { %1569 = vmatmul.bf16.vlgmr.msra.gmra.mxu2 %v907_v55 }
  0xa8   : > { %1500 = vmatmul.bf16.gmra.mxu1 %v904_v62 }
  0xb5   : > { %v1376_v0 = vpop.f32.mrf.mxu0  ;;  %v1386_v43 = vpop.f32.mrf.mxu1 }
  0xbd   : > { %v1378_v3 = vpop.f32.mrf.mxu0  ;;  %v1388_v25 = vpop.f32.mrf.mxu1 }
  0xbe   : > { %v1422_v2 = vpop.f32.mrf.mxu2  ;;  %v1445_v42 = vpop.f32.mrf.mxu3 }
  0xc5   : > { %v1381_v6 = vpop.f32.mrf.mxu0 }
  0xc6   : > { %v1424_v4 = vpop.f32.mrf.mxu2  ;;  %v1447_v8 = vpop.f32.mrf.mxu3 }
  0xcd   : > { %v1383_v10 = vpop.f32.mrf.mxu0 }
  0xce   : > { %v1427_v9 = vpop.f32.mrf.mxu2  ;;  %v1450_v47 = vpop.f32.mrf.mxu3 }
  0xd5   : > { %v1399_v11 = vpop.f32.mrf.mxu1  ;;  %v1468_v15 = vpop.f32.mrf.mxu0 }
  0xd6   : > { %v1400_v12 = vadd.f32 %v1399_v11, %v1376_v0  ;;  %v1429_v13 = vpop.f32.mrf.mxu2  ;;  %v1452_v16 = vpop.f32.mrf.mxu3 }
  0xd7   : > { %v1582_v53 = vpop.permute.xlu0 %1581 }
  0xd8   : > { %v1423_v14 = vadd.f32 %v1422_v2, %v1400_v12 }
  0xda   : > { %v1446_v39 = vadd.f32 %v1445_v42, %v1423_v14 }
  0xdc   : > { %v1469_v45 = vadd.f32 %v1468_v15, %v1446_v39 }
  0xdd   : > { %v1401_v17 = vpop.f32.mrf.mxu1  ;;  %v1470_v19 = vpop.f32.mrf.mxu0 }
  0xde   : > { %v1402_v18 = vadd.f32 %v1401_v17, %v1378_v3  ;;  %v1432_v51 = vpop.f32.mrf.mxu2  ;;  %v2968_v20 = vpop.f32.mrf.mxu3 }
  0xdf   : > { %v1587_v3 = vpop.permute.xlu0 %1586  ;;  %v1592_v17 = vpop.permute.xlu1 %1591 }
  0xe0   : > { %v1425_v54 = vadd.f32 %v1424_v4, %v1402_v18 }
  0xe2   : > { %v1448_v49 = vadd.f32 %v1447_v8, %v1425_v54 }
  0xe4   : > { %v1471_v58 = vadd.f32 %v1470_v19, %v1448_v49 }
  0xe5   : > { %v1404_v21 = vpop.f32.mrf.mxu1  ;;  %v1473_v23 = vpop.f32.mrf.mxu0 }
  0xe6   : > { %v1405_v5 = vadd.f32 %v1404_v21, %v1381_v6  ;;  %v1434_v22 = vpop.f32.mrf.mxu2  ;;  %v1457_v24 = vpop.f32.mrf.mxu3 }
  0xe8   : > { %v1428_v7 = vadd.f32 %v1427_v9, %v1405_v5 }
  0xea   : > { %v1451_v62 = vadd.f32 %v1450_v47, %v1428_v7 }
  0xec   : > { %v1474_v25 = vadd.f32 %v1473_v23, %v1451_v62 }
  0xed   : > { %v1406_v26 = vpop.f32.mrf.mxu1  ;;  %v1475_v29 = vpop.f32.mrf.mxu0 }
  0xee   : > { %v1407_v1 = vadd.f32 %v1406_v26, %v1383_v10  ;;  %v1514_v27 = vpop.f32.mrf.mxu2  ;;  %v1537_v30 = vpop.f32.mrf.mxu3 }
  0xf0   : > { %v1430_v28 = vadd.f32 %v1429_v13, %v1407_v1 }
  0xf2   : > { %v1453_v10 = vadd.f32 %v1452_v16, %v1430_v28 }
  0xf4   : > { %v1476_v19 = vadd.f32 %v1475_v29, %v1453_v10 }
  0xf5   : > { %v1409_v31 = vpop.f32.mrf.mxu1  ;;  %v2970_v34 = vpop.f32.mrf.mxu0 }
  0xf6   : > { %v1410_v41 = vadd.f32 %v1409_v31, %v1386_v43  ;;  %v1516_v32 = vpop.f32.mrf.mxu2  ;;  %v1539_v35 = vpop.f32.mrf.mxu3 }
  0xf7   : > { %v1597_v31 = vpop.permute.xlu1 %1596 }
  0xf8   : > { %v1433_v33 = vadd.f32 %v1432_v51, %v1410_v41 }
  0xfa   : > { %v1456_v16 = vadd.f32 %v2968_v20, %v1433_v33 }
  0xfc   : > { %v1479_v41 = vadd.f32 %v2970_v34, %v1456_v16 }
  0xfd   : > { %v1411_v37 = vpop.f32.mrf.mxu1  ;;  %v1480_v40 = vpop.f32.mrf.mxu0 }
  0xfe   : > { %v1519_v38 = vpop.f32.mrf.mxu2  ;;  %v1542_v44 = vpop.f32.mrf.mxu3 }
 0x105   : > { %v1491_v46 = vpop.f32.mrf.mxu1  ;;  %v1560_v52 = vpop.f32.mrf.mxu0 }
 0x106   : > { %v1492_v36 = vadd.f32 %v1491_v46, %v1469_v45  ;;  %v1521_v48 = vpop.f32.mrf.mxu2  ;;  %v1544_v57 = vpop.f32.mrf.mxu3 }
 0x107   : > { %v1602_v45 = vpop.permute.xlu2 %1601 }
 0x108   : > { %v1515_v50 = vadd.f32 %v1514_v27, %v1492_v36 }
 0x10a   : > { %v1538_v56 = vadd.f32 %v1537_v30, %v1515_v50 }
 0x10c   : > { %v1561_v59 = vadd.f32 %v1560_v52, %v1538_v56 }
 0x10d   : > { %v1493_v60 = vpop.f32.mrf.mxu1  ;;  %v1562_v0 = vpop.f32.mrf.mxu0 }
 0x10e   : > { %1645 = vst [vmem:[%s2973_s18] sm:$0xff] %v1561_v59  ;;  %v1494_v55 = vadd.f32 %v1493_v60, %v1471_v58  ;;  %v1524_v61 = vpop.f32.mrf.mxu2  ;;  %v1547_v2 = vpop.f32.mrf.mxu3  ;;  %v1604_v42 = vmul.f32 %v1582_v53, %v1561_v59 }
 0x110   : > { %v1517_v63 = vadd.f32 %v1516_v32, %v1494_v55  ;;  %v1625_v12 = vmul.f32 %v1604_v42, %v1604_v42 }
 0x112   : > { %v1540_v43 = vadd.f32 %v1539_v35, %v1517_v63 }
 0x114   : > { %v1563_v4 = vadd.f32 %v1562_v0, %v1540_v43  ;;  %v1609_v0 = vld [vmem:[#allocation4] sm:$0x1] }
 0x115   : > { %v1496_v6 = vpop.f32.mrf.mxu1  ;;  %v1565_v47 = vpop.f32.mrf.mxu0 }
 0x116   : > { %1646 = vst [vmem:[%s2973_s18 + $0x8] sm:$0xff] %v1563_v4  ;;  %v1605_v8 = vmul.f32 %v1587_v3, %v1563_v4  ;;  %v1497_v9 = vadd.f32 %v1496_v6, %v1474_v25  ;;  %v1526_v11 = vpop.f32.mrf.mxu2  ;;  %v1549_v54 = vpop.f32.mrf.mxu3  ;;  %v1624_v3 = vld [vmem:[#allocation5] sm:$0x1] }
 0x118   : > { %v1610_v13 = vadd.f32 %v1605_v8, %v1604_v42  ;;  %v1626_v14 = vmul.f32 %v1605_v8, %v1605_v8  ;;  %v1520_v15 = vadd.f32 %v1519_v38, %v1497_v9 }
 0x11a   : > { %v1630_v18 = vadd.f32 %v1626_v14, %v1625_v12  ;;  %v1543_v51 = vadd.f32 %v1542_v44, %v1520_v15 }
 0x11c   : > { %v1566_v21 = vadd.f32 %v1565_v47, %v1543_v51 }
 0x11d   : > { %v1498_v5 = vpop.f32.mrf.mxu1  ;;  %v1567_v27 = vpop.f32.mrf.mxu0 }
 0x11e   : > { %1647 = vst [vmem:[%s2973_s18 + $0x10] sm:$0xff] %v1566_v21  ;;  %v1606_v22 = vmul.f32 %v1592_v17, %v1566_v21  ;;  %v1499_v7 = vadd.f32 %v1498_v5, %v1476_v19  ;;  %v1570_v23 = vpop.f32.mrf.mxu2 }
 0x120   : > { %v1611_v24 = vadd.f32 %v1610_v13, %v1606_v22  ;;  %v1627_v26 = vmul.f32 %v1606_v22, %v1606_v22  ;;  %v1522_v1 = vadd.f32 %v1521_v48, %v1499_v7 }
 0x122   : > { %v1631_v28 = vadd.f32 %v1630_v18, %v1627_v26  ;;  %v1545_v30 = vadd.f32 %v1544_v57, %v1522_v1 }
 0x124   : > { %v1568_v32 = vadd.f32 %v1567_v27, %v1545_v30 }
 0x125   : > { %v1501_v29 = vpop.f32.mrf.mxu1 }
 0x126   : > { %1648 = vst [vmem:[%s2973_s18 + $0x18] sm:$0xff] %v1568_v32  ;;  %v1607_v35 = vmul.f32 %v1597_v31, %v1568_v32  ;;  %v1502_v37 = vadd.f32 %v1501_v29, %v1479_v41  ;;  %v1572_v38 = vpop.f32.mrf.mxu2 }
 0x128   : > { %v1612_v39 = vadd.f32 %v1611_v24, %v1607_v35  ;;  %v1628_v40 = vmul.f32 %v1607_v35, %v1607_v35  ;;  %v1525_v44 = vadd.f32 %v1524_v61, %v1502_v37 }
 0x12a   : > { %v1632_v20 = vadd.f32 %v1631_v28, %v1628_v40  ;;  %v1548_v33 = vadd.f32 %v1547_v2, %v1525_v44 }
 0x12c   : > { %v1571_v46 = vadd.f32 %v1570_v23, %v1548_v33 }
 0x12d   : > { %v1503_v36 = vpop.f32.mrf.mxu1 }
 0x12e   : > { %v1608_v48 = vmul.f32 %v1602_v45, %v1571_v46  ;;  %1649 = vst [vmem:[%s2973_s18 + $0x20] sm:$0xf] %v1571_v46 }
 0x130   : > { %v1614_v49 = vsel %vm1613_vm2, %v1608_v48, 0.0  ;;  %v1629_v34 = vmul.f32 %v1608_v48, %v1608_v48 }
 0x131   : > { %v1615_v50 = vadd.f32 %v1614_v49, %v1612_v39 }
 0x132   : > { %v1633_v52 = vsel %vm1613_vm2, %v1629_v34, 0.0 }
 0x133   : > { %v1616_v53 = vrot.slane %v1615_v50, 4  ;;  %v1634_v56 = vadd.f32 %v1633_v52, %v1632_v20 }
 0x135   : > { %v1617_v57 = vadd.f32 %v1616_v53, %v1615_v50  ;;  %v1635_v58 = vrot.slane %v1634_v56, 4 }
 0x137   : > { %v1618_v59 = vrot.slane %v1617_v57, 2  ;;  %v1636_v60 = vadd.f32 %v1635_v58, %v1634_v56 }
 0x139   : > { %v1619_v55 = vadd.f32 %v1618_v59, %v1617_v57  ;;  %v1637_v61 = vrot.slane %v1636_v60, 2 }
 0x13b   : > { %v1620_v62 = vrot.slane %v1619_v55, 1  ;;  %v1638_v63 = vadd.f32 %v1637_v61, %v1636_v60 }
 0x13d   : > { %v1621_v43 = vadd.f32 %v1620_v62, %v1619_v55  ;;  %v1639_v2 = vrot.slane %v1638_v63, 1 }
 0x13f   : > { %v1622_v25 = vadd.f32 %v1621_v43, %v1609_v0  ;;  %v1640_v42 = vadd.f32 %v1639_v2, %v1638_v63  ;;  %1653 = sbr.rel (%p2228_p8) target bundleno = 527 (0x20f), region = 56 }
 0x141   : > { %1623 = vst [vmem:[#allocation4] sm:$0x1] %v1622_v25  ;;  %v1641_v4 = vadd.f32 %v1640_v42, %v1624_v3 }
 0x143   : > { %1642 = vst [vmem:[#allocation5] sm:$0x1] %v1641_v4 }
 0x144   : > { %v1661_v54 = vld [vmem:[%s3014_s2] sm:$0x1]  ;;  %v1685_v7 = vld [vmem:[#allocation3 + $0x20] sm:$0xf]  ;;  %v1763_v23 = vld [vmem:[#allocation3 + $0x48] sm:$0xf] }
 0x145   : > { %v1674_v22 = vld [vmem:[%s3015_s3] sm:$0x1]  ;;  %v1683_v16 = vld [vmem:[#allocation3 + $0x10] sm:$0xff]  ;;  %v1684_v1 = vld [vmem:[#allocation3 + $0x18] sm:$0xff]  ;;  %vm1720_vm6 = vcmask 293888  }
 0x146   : > { %v1761_v27 = vld [vmem:[#allocation3 + $0x38] sm:$0xff]  ;;  %v1762_v28 = vld [vmem:[#allocation3 + $0x40] sm:$0xff]  ;;  %v1682_v35 = vld [vmem:[#allocation3 + $0x8] sm:$0xff] }
 0x147   : > { %v1681_v30 = vld [vmem:[#allocation3] sm:$0xff]  ;;  %v1759_v37 = vld [vmem:[#allocation3 + $0x28] sm:$0xff]  ;;  %v1760_v33 = vld [vmem:[#allocation3 + $0x30] sm:$0xff] }
 0x148   : > { %v1654_v6 = vld [vmem:[#allocation4] sm:$0x1] }
 0x149   : > { %v1655_v9 = vmul.f32 0.03125, %v1654_v6 }
 0x14a   : > { %v1656_v8 = vld [vmem:[#allocation5] sm:$0x1] }
 0x14b   : > { %v1657_v10 = vmul.f32 0.03125, %v1656_v8  ;;  %v1658_v11 = vmul.f32 %v1655_v9, %v1655_v9 }
 0x14d   : > { %v1659_v12 = vsub.f32 %v1657_v10, %v1658_v11 }
 0x14f   : > { %v1660_v13 = vmax.f32 %v1659_v12, 0.0  ;;  %v2235_v12 = vld [vmem:[#allocation6 + $0x8] sm:$0xf] }
 0x151   : > { %v1662_v14 = vadd.f32 1e-05, %v1660_v13  ;;  %v2338_v13 = vld [vmem:[#allocation6 + $0x8] sm:$0x10] }
 0x153   : > { %2399 = vrsqrt.f32 %v1662_v14  ;;  %vm1669_vm3 = vweird.f32 %v1662_v14 }
 0x159   : > { %v2400_v15 = vpop.eup %2399 }
 0x15a   : > { %v1664_v47 = vmul.f32 %v2400_v15, %v1662_v14  ;;  %vm1670_vm4 = vweird.f32 %v2400_v15 }
 0x15b   : > { %vm1671_vm5 = vmor %vm1669_vm3, %vm1670_vm4 }
 0x15c   : > { %v1665_v17 = vmul.f32 %v2400_v15, %v1664_v47  ;;  %v2236_v47 = vor.u32 %v2338_v13, %v2235_v12 }
 0x15e   : > { %v1666_v18 = vmul.f32 0.5, %v1665_v17 }
 0x160   : > { %v1667_v51 = vsub.f32 1.5, %v1666_v18 }
 0x162   : > { %v1668_v19 = vmul.f32 %v2400_v15, %v1667_v51 }
 0x164   : > { %v1672_v21 = vsel %vm1671_vm5, %v2400_v15, %v1668_v19  ;;  %v2337_v15 = vld [vmem:[#allocation6] sm:$0xff] }
 0x165   : > { %v1673_v5 = vmul.f32 %v1672_v21, %v1661_v54 }
 0x167   : > { %v1675_v24 = vmul.f32 %v1673_v5, %v1655_v9  ;;  %v1687_v26 = vperm.slane %v1673_v5, 0 }
 0x169   : > { %v1676_v31 = vsub.f32 %v1674_v22, %v1675_v24  ;;  %v1693_v41 = vmul.f32 %v1687_v26, %v1685_v7  ;;  %v1768_v32 = vmul.f32 %v1763_v23, %v1687_v26  ;;  %v1691_v29 = vmul.f32 %v1687_v26, %v1683_v16 }
 0x16a   : > { %v1692_v38 = vmul.f32 %v1687_v26, %v1684_v1  ;;  %v1766_v39 = vmul.f32 %v1761_v27, %v1687_v26  ;;  %v1767_v40 = vmul.f32 %v1762_v28, %v1687_v26  ;;  %v1689_v20 = vmul.f32 %v1687_v26, %v1681_v30 }
 0x16b   : > { %v1695_v44 = vperm.slane %v1676_v31, 0  ;;  %v1690_v45 = vmul.f32 %v1687_v26, %v1682_v35  ;;  %v1764_v46 = vmul.f32 %v1759_v37, %v1687_v26  ;;  %v1765_v53 = vmul.f32 %v1760_v33, %v1687_v26 }
 0x16d   : > { %v1701_v36 = vadd.f32 %v1695_v44, %v1693_v41  ;;  %v1773_v48 = vadd.f32 %v1768_v32, %v1695_v44  ;;  %v1699_v49 = vadd.f32 %v1695_v44, %v1691_v29  ;;  %v1700_v34 = vadd.f32 %v1695_v44, %v1692_v38 }
 0x16e   : > { %v1771_v50 = vadd.f32 %v1766_v39, %v1695_v44  ;;  %v1772_v52 = vadd.f32 %v1767_v40, %v1695_v44  ;;  %v1697_v58 = vadd.f32 %v1695_v44, %v1689_v20  ;;  %v1698_v61 = vadd.f32 %v1695_v44, %v1690_v45 }
 0x16f   : > { %v1706_v56 = vmax.f32 %v1701_v36, 0.0  ;;  %v1778_v57 = vmax.f32 %v1773_v48, 0.0  ;;  %v1704_v59 = vmax.f32 %v1699_v49, 0.0  ;;  %v1705_v60 = vmax.f32 %v1700_v34, 0.0 }
 0x170   : > { %v1776_v55 = vmax.f32 %v1771_v50, 0.0  ;;  %v1777_v0 = vmax.f32 %v1772_v52, 0.0  ;;  %v1769_v43 = vadd.f32 %v1764_v46, %v1695_v44  ;;  %v1770_v2 = vadd.f32 %v1765_v53, %v1695_v44 }
 0x171   : > { %v1709_v62 = vpack.c.bf16 %v1706_v56, %v1706_v56  ;;  %v1781_v63 = vpack.c.bf16 %v1778_v57, %v1778_v57  ;;  %v1708_v42 = vpack.c.bf16 %v1705_v60, %v1704_v59  ;;  %v1702_v4 = vmax.f32 %v1697_v58, 0.0 }
 0x172   : > { %v1703_v6 = vmax.f32 %v1698_v61, 0.0  ;;  %v1780_v8 = vpack.c.bf16 %v1777_v0, %v1776_v55  ;;  %v1774_v9 = vmax.f32 %v1769_v43, 0.0  ;;  %v1775_v10 = vmax.f32 %v1770_v2, 0.0 }
 0x173   : > { %v1729_v3 = vsel %vm504_vm12, %v1709_v62, 0  ;;  %v1783_v25 = vsel %vm504_vm12, %v1781_v63, 0 }
 0x174   : > { %1736 = vmatpush.bf16.msra.mxu0 %v1729_v3  ;;  %2366 = vmatpush.bf16.msra.mxu2 %v1729_v3  ;;  %v1707_v11 = vpack.c.bf16 %v1703_v6, %v1702_v4  ;;  %v1779_v14 = vpack.c.bf16 %v1775_v10, %v1774_v9 }
 0x175   : > { %1790 = vmatpush.bf16.msra.mxu1 %v1783_v25  ;;  %2369 = vmatpush.bf16.msra.mxu3 %v1783_v25 }
 0x178   : > { %1737 = vmatpush.bf16.msra.mxu0 %v1708_v42  ;;  %2367 = vmatpush.bf16.msra.mxu2 %v1708_v42 }
 0x179   : > { %1791 = vmatpush.bf16.msra.mxu1 %v1780_v8  ;;  %2370 = vmatpush.bf16.msra.mxu3 %v1780_v8 }
 0x17c   : > { %1738 = vmatpush.bf16.msra.mxu0 %v1707_v11  ;;  %2368 = vmatpush.bf16.msra.mxu2 %v1707_v11 }
 0x17d   : > { %1792 = vmatpush.bf16.msra.mxu1 %v1779_v14  ;;  %2371 = vmatpush.bf16.msra.mxu3 %v1779_v14 }
 0x17f   : > { %2237 = vmatmul.msk.bf16.vlgmr.msra.gmra.mxu0 %vm1720_vm6, %v2337_v15  ;;  %2238 = vmatmul.msk.bf16.vlgmr.msra.gmra.mxu2 %vm1720_vm6, %v2236_v47 }
 0x180   : > { %2239 = vmatmul.msk.bf16.vlgmr.msra.gmra.mxu1 %vm1720_vm6, %v2337_v15  ;;  %2240 = vmatmul.msk.bf16.vlgmr.msra.gmra.mxu3 %vm1720_vm6, %v2236_v47 }
 0x1fc   : > { %v1740_v17 = vpop.f32.mrf.mxu0 }
 0x1fd   : > { %v1794_v18 = vpop.f32.mrf.mxu1 }
 0x202   : > { %v1745_v51 = vpop.f32.mrf.mxu2 }
 0x203   : > { %v1752_v54 = vpack.c.bf16 %v1745_v51, %v1745_v51  ;;  %v1799_v19 = vpop.f32.mrf.mxu3 }
 0x204   : > { %v1806_v21 = vpack.c.bf16 %v1799_v19, %v1799_v19  ;;  %v1742_v5 = vpop.f32.mrf.mxu0 }
 0x205   : > { %1756 = vst [vmem:[%s3018_s6 + $0x8] sm:$0xf] %v1752_v54  ;;  %v2342_v22 = vpack.c.bf16 %v1742_v5, %v1740_v17  ;;  %v1796_v7 = vpop.f32.mrf.mxu1 }
 0x206   : > { %2243 = vst [vmem:[%s3018_s6 + $0x18] sm:$0xf] %v1806_v21  ;;  %v2347_v23 = vpack.c.bf16 %v1796_v7, %v1794_v18 }
 0x207   : > { %2343 = vst [vmem:[%s3018_s6] sm:$0xff] %v2342_v22  }
 0x208   : > { %2349 = vst [vmem:[%s3018_s6 + $0x10] sm:$0xff] %v2347_v23  }
 0x20a   : > { %v1747_v16 = vpop.f32.mrf.mxu2 }
 0x20b   : > { %v1753_v24 = vpack.c.bf16 %v1747_v16, %v1747_v16  ;;  %v1801_v26 = vpop.f32.mrf.mxu3 }
 0x20c   : > { %v1807_v1 = vpack.c.bf16 %v1801_v26, %v1801_v26 }
 0x20d   : > { %1757 = vst [vmem:[%s3018_s6 + $0xc] sm:$0x1] %v1753_v24 }
 0x20e   : > { %2244 = vst [vmem:[%s3018_s6 + $0x1c] sm:$0x1] %v1807_v1 }
 0x20f PF: > { %s17_s21 = sadd.s32 1, %s2441_s21  }
 0x210   : > { %p14_p9 = scmp.ge.s32.totalorder %s17_s21, 4  }
 0x212   :  { %16 = sbr.rel (!%p14_p9) target bundleno = 1 (0x1), region = 86 }
 0x217   :  { %1824 = vsyncpa [#allocation7], 1 }
 0x218   :  { %1826 = vsyncpa [#allocation7 + $0x1], 1 }

// kernel: _encoder_forward.4
= control target key start
LH: loop header
LB: loop body
LE: loop exit
PB: predicated region body
PF: predicated region fallthrough
CT: control target
= control target key end

     0   :  { %11 = vsyncpa [#allocation7], 0  ;;  %s3949_s21 = smov 0   ;;  %s5016_s0 = inlined_call_operand.vmem [shape: bf16[2,122,128], index: 0, kind: input, shape index: {}]   ;;  %s5017_s1 = inlined_call_operand.vmem [shape: bf16[1152,128], index: 1, kind: input, shape index: {}]   ;;  %s5018_s2 = inlined_call_operand.vmem [shape: f32[1,128], index: 2, kind: input, shape index: {}]   ;;  %s5019_s3 = inlined_call_operand.vmem [shape: f32[1,128], index: 3, kind: input, shape index: {}]   ;;  %s5020_s4 = inlined_call_operand.hbm [shape: f32[100,1], index: 4, kind: input, shape index: {}]   ;;  %s5021_s5 = inlined_call_operand.vmem [shape: bf16[50,100], index: 5, kind: input, shape index: {}]   ;;  %s5022_s6 = inlined_call_operand.vmem [shape: bf16[2,50,128], index: 6, kind: output, shape index: {}]  }
   0x1 LB: > { %s194_s24 = sshll.u32 %s5020_s4, 4  ;;  %s3958_s25 = sadd.s32 4294967295, %s3907_s21   ;;  %s3907_s21 = sphi %s3949_s21, %s17_s21   ;;  %s195_s24 = int_to_ptr.hbm [resolvable:$true] %s194_s24 }
   0x2   : > { %p3094_p0 = scmp.ge.s32.totalorder %s3907_s21, 1  ;;  %p174_p1 = scmp.lt.s32.totalorder %s3907_s21, 3 }
   0x3   : > { %p3095_p2 = scmp.ne.s32.totalorder %s3958_s25, 0  ;;  %p3846_p3 = scmp.eq.s32.totalorder %s3958_s25, 0 }
   0x4   : > { %p175_p4 = pnand %p3094_p0, %p174_p1  ;;  %s3909_s26 = smov [#allocation6]  }
   0x5   : > { %s196_s27 = sshll.u32 %s3909_s26, 4  ;;  %s3910_s28 = smov 128   ;;  %s197_s27 = int_to_ptr.vmem [resolvable:$true] %s196_s27 }
   0x6   : > { %p3842_p5 = pneg %p175_p4  ;;  %s3911_s29 = smov 8  }
   0x7   : > { %223 = sbr.rel (%p175_p4) target bundleno = 686 (0x2ae), region = 44 }
   0x8   : > { %p3843_p6 = pnand %p3846_p3, %p3842_p5 }
   0xa   : > { %3845 = dma.hbm_to_vmem [thread:$0]  (!%p3843_p6), %s195_s24, 1664, %s197_s27, [#allocation7], %s3910_s28, %s3910_s28, %s3911_s29  }
   0xc   : > { %3902 = dma.done.wait (%p3846_p3), [#allocation7], 1664  }
   0xd   : > { %3904 = vsyncadd (%p3846_p3), [#allocation7], 4294965632  ;;  %p249_p7 = scmp.lt.s32.totalorder %s3958_s25, 1 }
   0xe   : > { %258 = sbr.rel (%p3095_p2) target bundleno = 22 (0x16), region = 52 }
   0xf   : > { %s250_s30 = scalar_select %p249_p7, %s3958_s25, 1 }
  0x11   : > { %s3641_s7 = sshll.u32 %s250_s30, 6 }
  0x12   : > { %s3969_s10 = scalar_lea.vmem %s5016_s0, %s3641_s7 }
  0x13   : > { %v3912_v0 = vmov 0.0  }
  0x14   : > { %259 = vst [vmem:[#allocation4] sm:$0x1] %v3912_v0 }
  0x15   : > { %260 = vst [vmem:[#allocation5] sm:$0x1] %v3912_v0 }
  0x16 PF: > { %v3703_v1 = vld [vmem:[%s5017_s1 + $0x38] sm:$0xff]  ;;  %v3702_v2 = vld [vmem:[%s5017_s1 + $0x30] sm:$0xff]  ;;  %v269_v5 = vld [vmem:[%s3969_s10 + $0x20] sm:$0xf]  ;;  %vm484_vm0 = vcmask 1042432   ;;  %vm485_vm1 = vcmask 1046532  }
  0x17   : > { %3800 = vmatpush.bf16.msra.mxu1 %v3703_v1  ;;  %3801 = vmatpush.bf16.msra.mxu2 %v3703_v1  ;;  %v265_v3 = vld [vmem:[%s3969_s10 + $0x10] sm:$0xf]  ;;  %v266_v4 = vld [vmem:[%s3969_s10 + $0x14] sm:$0xf]  ;;  %v270_v6 = vld [vmem:[%s3969_s10 + $0x24] sm:$0xf] }
  0x18   : > { %3802 = vmatpush.bf16.msra.mxu3 %v3703_v1  ;;  %2218 = vmatpush.bf16.msra.mxu0 %v3703_v1  ;;  %278 = vst [vmem:[#allocation2 + $0x90] sm:$0xf] %v265_v3  ;;  %v261_v7 = vld [vmem:[%s3969_s10] sm:$0xf]  ;;  %v3701_v8 = vld [vmem:[%s5017_s1 + $0x28] sm:$0xff]  ;;  %v3699_v20 = vld [vmem:[%s5017_s1 + $0x18] sm:$0xff] }
  0x19   : > { %279 = vst [vmem:[#allocation2 + $0xb4] sm:$0xf] %v266_v4  ;;  %v262_v9 = vld [vmem:[%s3969_s10 + $0x4] sm:$0xf]  ;;  %v273_v10 = vld [vmem:[%s3969_s10 + $0x30] sm:$0x3]  ;;  %vm4009_vm2 = vmor %vm484_vm0, %vm485_vm1 }
  0x1a   : > { %282 = vst [vmem:[#allocation2 + $0x120] sm:$0xf] %v269_v5  ;;  %v3700_v11 = vld [vmem:[%s5017_s1 + $0x20] sm:$0xff]  ;;  %v299_v12 = vld [vmem:[%s3969_s10 + $0x30] sm:$0x7]  ;;  %v3697_v31 = vld [vmem:[%s5017_s1 + $0x8] sm:$0xff] }
  0x1b   : > { %3803 = vmatpush.bf16.msra.mxu1 %v3702_v2  ;;  %3804 = vmatpush.bf16.msra.mxu2 %v3702_v2  ;;  %283 = vst [vmem:[#allocation2 + $0x144] sm:$0xf] %v270_v6  ;;  %v423_v13 = vshll.u32 %v299_v12, 16  ;;  %v427_v14 = vshrl.u32 %v299_v12, 16  ;;  %v267_v15 = vld [vmem:[%s3969_s10 + $0x18] sm:$0xf] }
  0x1c   : > { %3805 = vmatpush.bf16.msra.mxu3 %v3702_v2  ;;  %2219 = vmatpush.bf16.msra.mxu0 %v3702_v2  ;;  %274 = vst [vmem:[#allocation2] sm:$0xf] %v261_v7  ;;  %v268_v16 = vld [vmem:[%s3969_s10 + $0x1c] sm:$0xf]  ;;  %v271_v19 = vld [vmem:[%s3969_s10 + $0x28] sm:$0xf] }
  0x1d   : > { %275 = vst [vmem:[#allocation2 + $0x24] sm:$0xf] %v262_v9  ;;  %v3995_v17 = vrot.slane %v423_v13, 5  ;;  %v429_v18 = vrot.slane %v427_v14, 4  ;;  %v272_v22 = vld [vmem:[%s3969_s10 + $0x2c] sm:$0xf] }
  0x1e   : > { %286 = vst [vmem:[#allocation2 + $0x1b0] sm:$0x3] %v273_v10  ;;  %v263_v24 = vld [vmem:[%s3969_s10 + $0x8] sm:$0xf]  ;;  %v3698_v25 = vld [vmem:[%s5017_s1 + $0x10] sm:$0xff]  ;;  %v3696_v37 = vld [vmem:[%s5017_s1] sm:$0xff] }
  0x1f   : > { %3806 = vmatpush.bf16.msra.mxu1 %v3701_v8  ;;  %3807 = vmatpush.bf16.msra.mxu2 %v3701_v8  ;;  %280 = vst [vmem:[#allocation2 + $0xd8] sm:$0xf] %v267_v15  ;;  %v430_v21 = vor.u32 %v429_v18, %v3995_v17  ;;  %v264_v26 = vld [vmem:[%s3969_s10 + $0xc] sm:$0xf]  ;;  %v551_v27 = vld [vmem:[%s3969_s10 + $0x4] sm:$0xe] }
  0x20   : > { %3808 = vmatpush.bf16.msra.mxu3 %v3701_v8  ;;  %2220 = vmatpush.bf16.msra.mxu0 %v3701_v8  ;;  %281 = vst [vmem:[#allocation2 + $0xfc] sm:$0xf] %v268_v16  ;;  %v552_v29 = vld [vmem:[%s3969_s10 + $0x8] sm:$0xf]  ;;  %v3103_v30 = vrot.slane %v551_v27, 9  ;;  %v3727_v45 = vld [vmem:[%s5017_s1 + $0xf8] sm:$0xff] }
  0x21   : > { %v431_v23 = vrot.slane %v430_v21, 4  ;;  %284 = vst [vmem:[#allocation2 + $0x168] sm:$0xf] %v271_v19  ;;  %v4018_v32 = vld [vmem:[%s3969_s10 + $0xc] sm:$0xf]  ;;  %v579_v33 = vrot.slane %v552_v29, 5 }
  0x22   : > { %285 = vst [vmem:[#allocation2 + $0x18c] sm:$0xf] %v272_v22  ;;  %v287_v34 = vld [vmem:[%s3969_s10] sm:$0xf]  ;;  %v3181_v35 = vld [vmem:[#allocation2 + $0x90] sm:$0xf] }
  0x23   : > { %3809 = vmatpush.bf16.msra.mxu1 %v3700_v11  ;;  %3810 = vmatpush.bf16.msra.mxu2 %v3700_v11  ;;  %457 = vst [vmem:[#allocation2 + $0x1b4] sm:$0x3] %v431_v23  ;;  %v582_v36 = vrot.slane %v4018_v32, 5  ;;  %v3664_v38 = vld [vmem:[#allocation2 + $0xb0] sm:$0xf0]  ;;  %v580_v40 = vsel %vm4009_vm2, %v3103_v30, %v579_v33  ;;  %v581_v41 = vrot.slane %v579_v33, 4 }
  0x24   : > { %3811 = vmatpush.bf16.msra.mxu3 %v3700_v11  ;;  %2221 = vmatpush.bf16.msra.mxu0 %v3700_v11  ;;  %276 = vst [vmem:[#allocation2 + $0x48] sm:$0xf] %v263_v24  ;;  %v3253_v39 = vld [vmem:[#allocation2 + $0x120] sm:$0xf]  ;;  %v304_v42 = vshrl.u32 %v287_v34, 16  ;;  %v307_v53 = vshll.u32 %v287_v34, 16  ;;  %v3182_v54 = vor.u32 %v3664_v38, %v3181_v35 }
  0x25   : > { %277 = vst [vmem:[#allocation2 + $0x6c] sm:$0xf] %v264_v26  ;;  %v288_v44 = vld [vmem:[%s3969_s10 + $0x4] sm:$0xf]  ;;  %v3109_v47 = vld [vmem:[#allocation2] sm:$0xf]  ;;  %v583_v48 = vsel %vm4009_vm2, %v581_v41, %v582_v36 }
  0x26   : > { %628 = vst [vmem:[#allocation2 + $0xc] sm:$0xf] %v580_v40  ;;  %v3682_v46 = vld [vmem:[#allocation2 + $0x140] sm:$0xf0]  ;;  %v4036_v49 = vld [vmem:[%s3969_s10 + $0x8] sm:$0xf] }
  0x27   : > { %3812 = vmatpush.bf16.msra.mxu1 %v3699_v20  ;;  %3813 = vmatpush.bf16.msra.mxu2 %v3699_v20  ;;  %v3646_v50 = vld [vmem:[#allocation2 + $0x20] sm:$0xf0]  ;;  %629 = vst [vmem:[#allocation2 + $0x30] sm:$0xf] %v583_v48  ;;  %v306_v52 = vrot.slane %v304_v42, 4  ;;  %v3719_v55 = vld [vmem:[%s5017_s1 + $0xb8] sm:$0xff]  ;;  %v3254_v57 = vor.u32 %v3682_v46, %v3253_v39 }
  0x28   : > { %3814 = vmatpush.bf16.msra.mxu3 %v3699_v20  ;;  %2222 = vmatpush.bf16.msra.mxu0 %v3699_v20  ;;  %vm300_vm3 = vsmask.f32 3328  ;;  %vm301_vm4 = vsmask.f32 7440  ;;  %v313_v56 = vshll.u32 %v288_v44, 16  ;;  %v3711_v58 = vld [vmem:[%s5017_s1 + $0x78] sm:$0xff]  ;;  %v3110_v63 = vor.u32 %v3646_v50, %v3109_v47 }
  0x29   : > { %v309_v59 = vrot.slane %v307_v53, 5  ;;  %v317_v60 = vshrl.u32 %v288_v44, 16  ;;  %v323_v61 = vshll.u32 %v4036_v49, 16  ;;  %v458_v62 = vld [vmem:[%s3969_s10] sm:$0xe]  ;;  %v3735_v4 = vld [vmem:[%s5017_s1 + $0x138] sm:$0xff]  ;;  %vm4062_vm5 = vmor %vm300_vm3, %vm301_vm4 }
  0x2a   : > { %v1329_v43 = vld [vmem:[#allocation2 + $0x1b0] sm:$0x33]  ;;  %v315_v0 = vrot.slane %v313_v56, 5  ;;  %v459_v1 = vld [vmem:[%s3969_s10 + $0x4] sm:$0xf]  ;;  %v3102_v3 = vrot.slane %v458_v62, 9 }
  0x2b   : > { %3815 = vmatpush.bf16.msra.mxu1 %v3698_v25  ;;  %3816 = vmatpush.bf16.msra.mxu2 %v3698_v25  ;;  %v1651_v51 = vunpack.c.l.b16 %v1329_v43  ;;  %v4048_v2 = vld [vmem:[%s3969_s10 + $0x8] sm:$0xf]  ;;  %v310_v6 = vor.u32 %v309_v59, %v306_v52  ;;  %v319_v7 = vrot.slane %v317_v60, 4  ;;  %v489_v8 = vrot.slane %v459_v1, 5  ;;  %v641_v9 = vld [vmem:[%s3969_s10 + $0x4] sm:$0xe] }
  0x2c   : > { %3817 = vmatpush.bf16.msra.mxu3 %v3698_v25  ;;  %2223 = vmatpush.bf16.msra.mxu0 %v3698_v25  ;;  %v3726_v10 = vld [vmem:[%s5017_s1 + $0xf0] sm:$0xff]  ;;  %v4066_v13 = vrot.slane %v323_v61, 5  ;;  %v492_v14 = vrot.slane %v4048_v2, 5  ;;  %v658_v15 = vshrl.u32 %v641_v9, 16  ;;  %v642_v22 = vld [vmem:[%s3969_s10 + $0x8] sm:$0xf] }
  0x2d   : > { %v1714_v5 = vpack.c.b16 %v1651_v51, %v1651_v51  ;;  %v3718_v11 = vld [vmem:[%s5017_s1 + $0xb0] sm:$0xff]  ;;  %v311_v18 = vrot.slane %v310_v6, 4  ;;  %v320_v19 = vor.u32 %v319_v7, %v315_v0  ;;  %v490_v20 = vsel %vm4009_vm2, %v3102_v3, %v489_v8  ;;  %v643_v23 = vld [vmem:[%s3969_s10 + $0xc] sm:$0xf]  ;;  %v3724_v41 = vld [vmem:[%s5017_s1 + $0xe0] sm:$0xff]  ;;  %p3611_p8 = scmp.ne.s32.totalorder %s3958_s25, 1 }
  0x2e   : > { %v3710_v16 = vld [vmem:[%s5017_s1 + $0x70] sm:$0xff]  ;;  %v491_v21 = vrot.slane %v489_v8, 4  ;;  %538 = vst [vmem:[#allocation2 + $0x8] sm:$0xf] %v490_v20  ;;  %v3725_v24 = vld [vmem:[%s5017_s1 + $0xe8] sm:$0xff]  ;;  %v660_v33 = vrot.slane %v658_v15, 5 }
  0x2f   : > { %3818 = vmatpush.bf16.msra.mxu1 %v3697_v31  ;;  %3819 = vmatpush.bf16.msra.mxu2 %v3697_v31  ;;  %v3734_v25 = vld [vmem:[%s5017_s1 + $0x130] sm:$0xff]  ;;  %v3717_v26 = vld [vmem:[%s5017_s1 + $0xa8] sm:$0xff]  ;;  %v316_v27 = vsel %vm4062_vm5, %v311_v18, %v315_v0  ;;  %v321_v29 = vrot.slane %v320_v19, 4  ;;  %vm654_vm6 = vsmask.f32 2304  ;;  %v661_v34 = vshll.u32 %v641_v9, 16 }
  0x30   : > { %3820 = vmatpush.bf16.msra.mxu3 %v3697_v31  ;;  %2224 = vmatpush.bf16.msra.mxu0 %v3697_v31  ;;  %v493_v30 = vsel %vm4009_vm2, %v491_v21, %v492_v14  ;;  %v3709_v31 = vld [vmem:[%s5017_s1 + $0x68] sm:$0xff]  ;;  %445 = vst [vmem:[#allocation2 + $0x4] sm:$0xf] %v316_v27  ;;  %vm655_vm7 = vsmask.f32 6416  ;;  %v667_v38 = vshrl.u32 %v642_v22, 16 }
  0x31   : > { %v3733_v35 = vld [vmem:[%s5017_s1 + $0x128] sm:$0xff]  ;;  %539 = vst [vmem:[#allocation2 + $0x2c] sm:$0xf] %v493_v30  ;;  %v670_v39 = vshll.u32 %v642_v22, 16  ;;  %v677_v40 = vshrl.u32 %v643_v23, 16  ;;  %v3716_v42 = vld [vmem:[%s5017_s1 + $0xa0] sm:$0xff]  ;;  %vm4130_vm8 = vmor %vm654_vm6, %vm655_vm7 }
  0x32   : > { %v4106_v43 = vld [vmem:[#allocation2 + $0xd8] sm:$0xf]  ;;  %v4108_v44 = vld [vmem:[#allocation2 + $0xf8] sm:$0xf0]  ;;  %v680_v46 = vshll.u32 %v643_v23, 16  ;;  %v669_v48 = vrot.slane %v667_v38, 5 }
  0x33   : > { %3821 = vmatpush.bf16.msra.mxu1 %v3696_v37  ;;  %3822 = vmatpush.bf16.msra.mxu2 %v3696_v37  ;;  %v554_v47 = vld [vmem:[%s3969_s10 + $0x10] sm:$0xf]  ;;  %v672_v50 = vrot.slane %v670_v39, 6  ;;  %v679_v51 = vrot.slane %v677_v40, 5  ;;  %v4112_v52 = vld [vmem:[%s3969_s10 + $0x14] sm:$0xf]  ;;  %v3218_v9 = vor.u32 %v4108_v44, %v4106_v43 }
  0x34   : > { %3823 = vmatpush.bf16.msra.mxu3 %v3696_v37  ;;  %2225 = vmatpush.bf16.msra.mxu0 %v3696_v37  ;;  %v326_v37 = vsel %vm4062_vm5, %v321_v29, %v4066_v13  ;;  %v584_v53 = vrot.slane %v582_v36, 4  ;;  %v588_v59 = vrot.slane %v4112_v52, 5  ;;  %v290_v60 = vld [vmem:[%s3969_s10 + $0xc] sm:$0xf]  ;;  %v3732_v32 = vld [vmem:[%s5017_s1 + $0x120] sm:$0xff]  ;;  %v327_v0 = vshrl.u32 %v4036_v49, 16 }
  0x35   : > { %446 = vst [vmem:[#allocation2 + $0x28] sm:$0xf] %v326_v37  ;;  %v3691_v36 = vld [vmem:[#allocation2 + $0x188] sm:$0xf0]  ;;  %v4126_v61 = vld [vmem:[#allocation2 + $0x48] sm:$0xf] }
  0x36   : > { %2236 = vmatmul.bf16.vlgmr.msra.gmra.mxu1 %v3182_v54  ;;  %2246 = vmatmul.bf16.vlgmr.msra.gmra.mxu2 %v3254_v57  ;;  %v3708_v54 = vld [vmem:[%s5017_s1 + $0x60] sm:$0xff]  ;;  %v682_v57 = vrot.slane %v680_v46, 6  ;;  %v333_v1 = vshll.u32 %v290_v60, 16  ;;  %v3655_v3 = vld [vmem:[#allocation2 + $0x68] sm:$0xf0]  ;;  %v329_v49 = vrot.slane %v327_v0, 4 }
  0x37   : > { %2304 = vmatpush.bf16.msrb.mxu2 %v3719_v55  ;;  %2261 = vmatpush.bf16.msrb.mxu1 %v3711_v58  ;;  %v4119_v55 = vld [vmem:[#allocation2 + $0x168] sm:$0xf]  ;;  %v585_v58 = vrot.slane %v554_v47, 5  ;;  %v4140_v8 = vld [vmem:[%s3969_s10 + $0x10] sm:$0xf]  ;;  %v3723_v15 = vld [vmem:[%s5017_s1 + $0xd8] sm:$0xff]  ;;  %v3146_v30 = vor.u32 %v3655_v3, %v4126_v61 }
  0x38   : > { %2347 = vmatpush.bf16.msrb.mxu3 %v3727_v45  ;;  %2226 = vmatmul.bf16.vlgmr.msra.gmra.mxu0 %v3110_v63  ;;  %v663_v45 = vrot.slane %v661_v34, 6  ;;  %v673_v63 = vor.u32 %v672_v50, %v669_v48  ;;  %v335_v20 = vrot.slane %v333_v1, 5  ;;  %v337_v21 = vshrl.u32 %v290_v60, 16  ;;  %v4158_v22 = vld [vmem:[%s3969_s10 + $0x10] sm:$0xf]  ;;  %v3707_v29 = vld [vmem:[%s5017_s1 + $0x58] sm:$0xff] }
  0x39   : > { %2390 = vmatpush.bf16.msrb.mxu0 %v3735_v4  ;;  %2256 = vmatmul.bf16.vlgmr.msra.gmra.mxu3 %v1714_v5  ;;  %v4135_v5 = vor.u32 %v682_v57, %v679_v51  ;;  %v586_v6 = vsel %vm4009_vm2, %v584_v53, %v585_v58  ;;  %v587_v7 = vrot.slane %v585_v58, 4  ;;  %v3290_v23 = vor.u32 %v3691_v36, %v4119_v55  ;;  %v644_v27 = vld [vmem:[%s3969_s10 + $0x10] sm:$0xf]  ;;  %v556_v53 = vld [vmem:[%s3969_s10 + $0x18] sm:$0xf]  ;;  %v3721_v58 = vld [vmem:[%s5017_s1 + $0xc8] sm:$0xff] }
  0x3a   : > { %v664_v56 = vor.u32 %v663_v45, %v660_v33  ;;  %630 = vst [vmem:[#allocation2 + $0x54] sm:$0xf] %v586_v6  ;;  %v494_v33 = vrot.slane %v492_v14, 4  ;;  %v3722_v38 = vld [vmem:[%s5017_s1 + $0xd0] sm:$0xff]  ;;  %v687_v46 = vshrl.u32 %v644_v27, 16  ;;  %v690_v47 = vshll.u32 %v644_v27, 16 }
  0x3b   : > { %2305 = vmatpush.bf16.msrb.mxu2 %v3718_v11  ;;  %2262 = vmatpush.bf16.msrb.mxu1 %v3710_v16  ;;  %v461_v11 = vld [vmem:[%s3969_s10 + $0xc] sm:$0xf]  ;;  %v3715_v16 = vld [vmem:[%s5017_s1 + $0x98] sm:$0xff]  ;;  %v589_v19 = vsel %vm4009_vm2, %v587_v7, %v588_v59  ;;  %v3714_v2 = vld [vmem:[%s5017_s1 + $0x90] sm:$0xff]  ;;  %v347_v1 = vshrl.u32 %v4140_v8, 16  ;;  %vm838_vm12 = vcmask 1041408  }
  0x3c   : > { %2348 = vmatpush.bf16.msrb.mxu3 %v3726_v10  ;;  %v665_v4 = vrot.slane %v664_v56, 4  ;;  %v675_v10 = vrot.slane %v673_v63, 4  ;;  %v495_v34 = vrot.slane %v461_v11, 5  ;;  %631 = vst [vmem:[#allocation2 + $0x78] sm:$0xf] %v589_v19  ;;  %v3706_v43 = vld [vmem:[%s5017_s1 + $0x50] sm:$0xff] }
  0x3d   : > { %2391 = vmatpush.bf16.msrb.mxu0 %v3734_v25  ;;  %v330_v25 = vor.u32 %v329_v49, %v4066_v13  ;;  %v3731_v13 = vld [vmem:[%s5017_s1 + $0x118] sm:$0xff]  ;;  %v3730_v44 = vld [vmem:[%s5017_s1 + $0x110] sm:$0xff]  ;;  %v689_v55 = vrot.slane %v687_v46, 5  ;;  %v692_v56 = vrot.slane %v690_v47, 6  ;;  %v3713_v60 = vld [vmem:[%s5017_s1 + $0x88] sm:$0xff]  ;;  %vm839_vm13 = vcmask 1045508  }
  0x3e   : > { %v674_v18 = vsel %vm4130_vm8, %v665_v4, %v673_v63  ;;  %v496_v39 = vsel %vm4009_vm2, %v494_v33, %v495_v34  ;;  %v497_v40 = vrot.slane %v495_v34, 4  ;;  %v590_v63 = vrot.slane %v588_v59, 4  ;;  %v3729_v0 = vld [vmem:[%s5017_s1 + $0x108] sm:$0xff]  ;;  %v3720_v6 = vld [vmem:[%s5017_s1 + $0xc0] sm:$0xff]  ;;  %v3119_v7 = vld [vmem:[#allocation2 + $0x2c] sm:$0xf0] }
  0x3f   : > { %2306 = vmatpush.bf16.msrb.mxu2 %v3717_v26  ;;  %2263 = vmatpush.bf16.msrb.mxu1 %v3709_v31  ;;  %799 = vst [vmem:[#allocation2 + $0x10] sm:$0xf] %v674_v18  ;;  %v343_v26 = vshll.u32 %v4140_v8, 16  ;;  %v339_v31 = vrot.slane %v337_v21, 4  ;;  %v693_v3 = vor.u32 %v692_v56, %v689_v55  ;;  %v3712_v52 = vld [vmem:[%s5017_s1 + $0x80] sm:$0xff]  ;;  %v3751_v11 = vld [vmem:[%s5017_s1 + $0x1b8] sm:$0xff]  ;;  %vm4551_vm14 = vmor %vm838_vm12, %vm839_vm13 }
  0x40   : > { %2349 = vmatpush.bf16.msrb.mxu3 %v3725_v24  ;;  %v684_v24 = vsel %vm4130_vm8, %v675_v10, %v4135_v5  ;;  %540 = vst [vmem:[#allocation2 + $0x50] sm:$0xf] %v496_v39  ;;  %v4226_v59 = vld [vmem:[#allocation2 + $0xc] sm:$0xf]  ;;  %v292_v8 = vld [vmem:[%s3969_s10 + $0x14] sm:$0xf] }
  0x41   : > { %2392 = vmatpush.bf16.msrb.mxu0 %v3733_v35  ;;  %800 = vst [vmem:[#allocation2 + $0x34] sm:$0xf] %v684_v24  ;;  %v331_v35 = vrot.slane %v330_v25, 4  ;;  %v4176_v37 = vrot.slane %v343_v26, 5  ;;  %v340_v14 = vor.u32 %v339_v31, %v335_v20  ;;  %v4232_v10 = vld [vmem:[#allocation2 + $0x8] sm:$0xf]  ;;  %v3122_v39 = vor.u32 %v4226_v59, %v3119_v7 }
  0x42   : > { %v4234_v49 = vld [vmem:[#allocation2 + $0x28] sm:$0xf0]  ;;  %v695_v18 = vrot.slane %v693_v3, 4  ;;  %v3704_v21 = vld [vmem:[%s5017_s1 + $0x40] sm:$0xff]  ;;  %v3111_v24 = vld [vmem:[#allocation2 + $0x24] sm:$0xf0] }
  0x43   : > { %2307 = vmatpush.bf16.msrb.mxu2 %v3716_v42  ;;  %2264 = vmatpush.bf16.msrb.mxu1 %v3708_v54  ;;  %v645_v42 = vld [vmem:[%s3969_s10 + $0x14] sm:$0xf]  ;;  %v336_v45 = vsel %vm4062_vm5, %v331_v35, %v335_v20  ;;  %v341_v48 = vrot.slane %v340_v14, 4  ;;  %v685_v54 = vrot.slane %v4135_v5, 4  ;;  %v591_v5 = vrot.slane %v556_v53, 5  ;;  %v3743_v46 = vld [vmem:[%s5017_s1 + $0x178] sm:$0xff] }
  0x44   : > { %2350 = vmatpush.bf16.msrb.mxu3 %v3724_v41  ;;  %v498_v41 = vrot.slane %v4158_v22, 5  ;;  %447 = vst [vmem:[#allocation2 + $0x4c] sm:$0xf] %v336_v45  ;;  %v697_v51 = vshrl.u32 %v645_v42, 16  ;;  %v700_v57 = vshll.u32 %v645_v42, 16  ;;  %v349_v33 = vrot.slane %v347_v1, 4 }
  0x45   : > { %2393 = vmatpush.bf16.msrb.mxu0 %v3732_v32  ;;  %v3705_v32 = vld [vmem:[%s5017_s1 + $0x48] sm:$0xff]  ;;  %v346_v36 = vsel %vm4062_vm5, %v341_v48, %v4176_v37  ;;  %v4247_v20 = vld [vmem:[%s3969_s10 + $0x18] sm:$0xf]  ;;  %v592_v26 = vsel %vm4009_vm2, %v590_v63, %v591_v5  ;;  %v593_v27 = vrot.slane %v591_v5, 4  ;;  %v353_v34 = vshll.u32 %v292_v8, 16  ;;  %v3750_v55 = vld [vmem:[%s5017_s1 + $0x1b0] sm:$0xff] }
  0x46   : > { %2241 = vmatmul.bf16.gmra.mxu1 %v3218_v9  ;;  %2251 = vmatmul.bf16.gmra.mxu2 %v3290_v23  ;;  %v499_v50 = vsel %vm4009_vm2, %v497_v40, %v498_v41  ;;  %v699_v61 = vrot.slane %v697_v51, 5  ;;  %448 = vst [vmem:[#allocation2 + $0x70] sm:$0xf] %v346_v36  ;;  %v702_v4 = vrot.slane %v700_v57, 6  ;;  %v4229_v9 = vld [vmem:[%s3969_s10 + $0x1c] sm:$0xf]  ;;  %v350_v40 = vor.u32 %v349_v33, %v4176_v37 }
  0x47   : > { %2308 = vmatpush.bf16.msrb.mxu2 %v3715_v16  ;;  %2265 = vmatpush.bf16.msrb.mxu1 %v3707_v29  ;;  %541 = vst [vmem:[#allocation2 + $0x74] sm:$0xf] %v499_v50  ;;  %v694_v16 = vsel %vm4130_vm8, %v685_v54, %v693_v3  ;;  %v3642_v23 = vld [vmem:[#allocation2 + $0x4] sm:$0xf]  ;;  %v4252_v25 = vld [vmem:[#allocation2 + $0x10] sm:$0xf]  ;;  %v3118_v45 = vor.u32 %v4234_v49, %v4232_v10 }
  0x48   : > { %2351 = vmatpush.bf16.msrb.mxu3 %v3723_v15  ;;  %2231 = vmatmul.bf16.gmra.mxu0 %v3146_v30  ;;  %v3759_v15 = vld [vmem:[%s5017_s1 + $0x1f8] sm:$0xff]  ;;  %v4244_v19 = vor.u32 %v702_v4, %v699_v61  ;;  %801 = vst [vmem:[#allocation2 + $0x58] sm:$0xf] %v694_v16  ;;  %v594_v29 = vrot.slane %v4229_v9, 5  ;;  %v3728_v30 = vld [vmem:[%s5017_s1 + $0x100] sm:$0xff]  ;;  %v363_v14 = vshll.u32 %v4247_v20, 16  ;;  %v3114_v22 = vor.u32 %v3642_v23, %v3111_v24 }
  0x49   : > { %2394 = vmatpush.bf16.msrb.mxu0 %v3731_v13  ;;  %632 = vst [vmem:[#allocation2 + $0x9c] sm:$0xf] %v592_v26  ;;  %v463_v13 = vld [vmem:[%s3969_s10 + $0x14] sm:$0xf]  ;;  %v355_v42 = vrot.slane %v353_v34, 5  ;;  %v3767_v37 = vld [vmem:[%s5017_s1 + $0x238] sm:$0xff] }
  0x4a   : > { %v704_v31 = vsel %vm4130_vm8, %v695_v18, %v4244_v19  ;;  %v3648_v35 = vld [vmem:[#allocation2 + $0x30] sm:$0xf0]  ;;  %v501_v48 = vrot.slane %v463_v13, 5  ;;  %v351_v51 = vrot.slane %v350_v40, 4  ;;  %v4286_v53 = vrot.slane %v363_v14, 5  ;;  %v3749_v1 = vld [vmem:[%s5017_s1 + $0x1a8] sm:$0xff] }
  0x4b   : > { %2309 = vmatpush.bf16.msrb.mxu2 %v3714_v2  ;;  %2266 = vmatpush.bf16.msrb.mxu1 %v3706_v43  ;;  %802 = vst [vmem:[#allocation2 + $0x7c] sm:$0xf] %v704_v31  ;;  %v357_v2 = vshrl.u32 %v292_v8, 16  ;;  %v4272_v43 = vld [vmem:[%s3969_s10 + $0x18] sm:$0xf]  ;;  %v3742_v63 = vld [vmem:[%s5017_s1 + $0x170] sm:$0xff] }
  0x4c   : > { %2352 = vmatpush.bf16.msrb.mxu3 %v3722_v38  ;;  %v595_v38 = vsel %vm4009_vm2, %v593_v27, %v594_v29  ;;  %v504_v50 = vrot.slane %v4272_v43, 5  ;;  %v646_v54 = vld [vmem:[%s3969_s10 + $0x18] sm:$0xf]  ;;  %v356_v36 = vsel %vm4062_vm5, %v351_v51, %v355_v42  ;;  %v647_v61 = vld [vmem:[%s3969_s10 + $0x1c] sm:$0xf]  ;;  %v367_v5 = vshrl.u32 %v4247_v20, 16 }
  0x4d   : > { %2395 = vmatpush.bf16.msrb.mxu0 %v3730_v44  ;;  %633 = vst [vmem:[#allocation2 + $0xc0] sm:$0xf] %v595_v38  ;;  %v500_v44 = vrot.slane %v498_v41, 4  ;;  %v359_v47 = vrot.slane %v357_v2, 4  ;;  %v3126_v41 = vor.u32 %v3648_v35, %v4252_v25  ;;  %v710_v59 = vshll.u32 %v646_v54, 16  ;;  %v3757_v7 = vld [vmem:[%s5017_s1 + $0x1e8] sm:$0xff] }
  0x4e   : > { %449 = vst [vmem:[#allocation2 + $0x94] sm:$0xf] %v356_v36  ;;  %v3741_v10 = vld [vmem:[%s5017_s1 + $0x168] sm:$0xff]  ;;  %v717_v49 = vshrl.u32 %v647_v61, 16  ;;  %v4330_v23 = vld [vmem:[%s3969_s10 + $0x24] sm:$0xf] }
  0x4f   : > { %2310 = vmatpush.bf16.msrb.mxu2 %v3713_v60  ;;  %2267 = vmatpush.bf16.msrb.mxu1 %v3705_v32  ;;  %v360_v56 = vor.u32 %v359_v47, %v355_v42  ;;  %v502_v57 = vsel %vm4009_vm2, %v500_v44, %v501_v48  ;;  %v707_v60 = vshrl.u32 %v646_v54, 16  ;;  %v3758_v32 = vld [vmem:[%s5017_s1 + $0x1f0] sm:$0xff]  ;;  %v712_v16 = vrot.slane %v710_v59, 6  ;;  %v3765_v18 = vld [vmem:[%s5017_s1 + $0x228] sm:$0xff]  ;;  %v3155_v13 = vld [vmem:[#allocation2 + $0x74] sm:$0xf0] }
  0x50   : > { %2353 = vmatpush.bf16.msrb.mxu3 %v3721_v58  ;;  %v503_v58 = vrot.slane %v501_v48, 4  ;;  %542 = vst [vmem:[#allocation2 + $0x98] sm:$0xf] %v502_v57  ;;  %v719_v20 = vrot.slane %v717_v49, 5  ;;  %v596_v24 = vrot.slane %v594_v29, 4  ;;  %v600_v27 = vrot.slane %v4330_v23, 5 }
  0x51   : > { %2396 = vmatpush.bf16.msrb.mxu0 %v3729_v0  ;;  %v3766_v0 = vld [vmem:[%s5017_s1 + $0x230] sm:$0xff]  ;;  %v361_v3 = vrot.slane %v360_v56, 4  ;;  %v369_v31 = vrot.slane %v367_v5, 4  ;;  %v3748_v9 = vld [vmem:[%s5017_s1 + $0x1a0] sm:$0xff]  ;;  %v3651_v47 = vld [vmem:[#allocation2 + $0x4c] sm:$0xf] }
  0x52   : > { %v505_v4 = vsel %vm4009_vm2, %v503_v58, %v504_v50  ;;  %v3652_v34 = vld [vmem:[#allocation2 + $0x54] sm:$0xf]  ;;  %v4338_v35 = vld [vmem:[#allocation2 + $0x50] sm:$0xf]  ;;  %v3756_v29 = vld [vmem:[%s5017_s1 + $0x1e0] sm:$0xff]  ;;  %v506_v57 = vrot.slane %v504_v50, 4 }
  0x53   : > { %2311 = vmatpush.bf16.msrb.mxu2 %v3712_v52  ;;  %2268 = vmatpush.bf16.msrb.mxu1 %v3704_v21  ;;  %543 = vst [vmem:[#allocation2 + $0xbc] sm:$0xf] %v505_v4  ;;  %v709_v52 = vrot.slane %v707_v60, 5  ;;  %v366_v8 = vsel %vm4062_vm5, %v361_v3, %v4286_v53  ;;  %v4340_v38 = vld [vmem:[#allocation2 + $0x70] sm:$0xf0]  ;;  %v3737_v62 = vld [vmem:[%s5017_s1 + $0x148] sm:$0xff] }
  0x54   : > { %2354 = vmatpush.bf16.msrb.mxu3 %v3720_v6  ;;  %v705_v6 = vrot.slane %v4244_v19, 4  ;;  %450 = vst [vmem:[#allocation2 + $0xb8] sm:$0xf] %v366_v8  ;;  %v558_v19 = vld [vmem:[%s3969_s10 + $0x20] sm:$0xf]  ;;  %v3762_v12 = vld [vmem:[%s5017_s1 + $0x210] sm:$0xff] }
  0x55   : > { %2397 = vmatpush.bf16.msrb.mxu0 %v3728_v30  ;;  %v597_v25 = vrot.slane %v558_v19, 5  ;;  %v713_v26 = vor.u32 %v712_v16, %v709_v52  ;;  %v4336_v30 = vld [vmem:[%s3969_s10 + $0x20] sm:$0xf]  ;;  %v3147_v48 = vld [vmem:[#allocation2 + $0x6c] sm:$0xf0]  ;;  %vm1200_vm15 = vcmask 1040384  }
  0x56   : > { %2269 = vmatmul.bf16.vlgmr.msrb.gmra.mxu1 %v3114_v22  ;;  %2312 = vmatmul.bf16.vlgmr.msrb.gmra.mxu2 %v3118_v45  ;;  %v370_v45 = vor.u32 %v369_v31, %v4286_v53  ;;  %v383_v51 = vshll.u32 %v4336_v30, 16  ;;  %v3161_v54 = vld [vmem:[#allocation2 + $0x58] sm:$0xf]  ;;  %v4365_v56 = vld [vmem:[%s3969_s10 + $0x20] sm:$0xf]  ;;  %v3150_v52 = vor.u32 %v3651_v47, %v3147_v48  ;;  %vm1201_vm0 = vcmask 1044484  }
  0x57   : > { %2476 = vmatpush.bf16.msra.mxu2 %v3751_v11  ;;  %2355 = vmatmul.bf16.vlgmr.msrb.gmra.mxu3 %v3122_v39  ;;  %v720_v11 = vshll.u32 %v647_v61, 16  ;;  %v598_v14 = vsel %vm4009_vm2, %v596_v24, %v597_v25  ;;  %v599_v39 = vrot.slane %v597_v25, 4  ;;  %v714_v42 = vsel %vm4130_vm8, %v705_v6, %v713_v26  ;;  %v3657_v58 = vld [vmem:[#allocation2 + $0x78] sm:$0xf0]  ;;  %v648_v3 = vld [vmem:[%s3969_s10 + $0x20] sm:$0xf]  ;;  %vm4576_vm1 = vmor %vm1200_vm15, %vm1201_vm0 }
  0x58   : > { %2519 = vmatpush.bf16.msra.mxu3 %v3759_v15  ;;  %2433 = vmatpush.bf16.msra.mxu1 %v3743_v46  ;;  %v294_v15 = vld [vmem:[%s3969_s10 + $0x1c] sm:$0xf]  ;;  %v715_v44 = vrot.slane %v713_v26, 4  ;;  %634 = vst [vmem:[#allocation2 + $0xe4] sm:$0xf] %v598_v14  ;;  %v3158_v61 = vor.u32 %v3652_v34, %v3155_v13  ;;  %v727_v6 = vshrl.u32 %v648_v3, 16 }
  0x59   : > { %2562 = vmatpush.bf16.msra.mxu0 %v3767_v37  ;;  %v722_v21 = vrot.slane %v720_v11, 6  ;;  %v373_v33 = vshll.u32 %v294_v15, 16  ;;  %v377_v40 = vshrl.u32 %v294_v15, 16  ;;  %v465_v37 = vld [vmem:[%s3969_s10 + $0x1c] sm:$0xf]  ;;  %v601_v22 = vsel %vm4009_vm2, %v599_v39, %v600_v27  ;;  %v3740_v16 = vld [vmem:[%s5017_s1 + $0x160] sm:$0xff] }
  0x5a   : > { %2398 = vmatmul.bf16.vlgmr.msrb.gmra.mxu0 %v3126_v41  ;;  %803 = vst [vmem:[#allocation2 + $0xa0] sm:$0xf] %v714_v42  ;;  %v507_v36 = vrot.slane %v465_v37, 5  ;;  %v649_v4 = vld [vmem:[%s3969_s10 + $0x24] sm:$0xf]  ;;  %v730_v59 = vshll.u32 %v648_v3, 16 }
  0x5b   : > { %2477 = vmatpush.bf16.msra.mxu2 %v3750_v55  ;;  %v4342_v2 = vor.u32 %v722_v21, %v719_v20  ;;  %v375_v46 = vrot.slane %v373_v33, 5  ;;  %v379_v41 = vrot.slane %v377_v40, 4  ;;  %635 = vst [vmem:[#allocation2 + $0x108] sm:$0xf] %v601_v22  ;;  %v371_v55 = vrot.slane %v370_v45, 4  ;;  %v3747_v34 = vld [vmem:[%s5017_s1 + $0x198] sm:$0xff] }
  0x5c   : > { %2520 = vmatpush.bf16.msra.mxu3 %v3758_v32  ;;  %2434 = vmatpush.bf16.msra.mxu1 %v3742_v63  ;;  %v385_v32 = vrot.slane %v383_v51, 5  ;;  %v3154_v63 = vor.u32 %v4340_v38, %v4338_v35  ;;  %v508_v50 = vsel %vm4009_vm2, %v506_v57, %v507_v36  ;;  %v509_v5 = vrot.slane %v507_v36, 4  ;;  %v296_v24 = vld [vmem:[%s3969_s10 + $0x24] sm:$0xf]  ;;  %v560_v26 = vld [vmem:[%s3969_s10 + $0x28] sm:$0xf] }
  0x5d   : > { %2563 = vmatpush.bf16.msra.mxu0 %v3766_v0  ;;  %v724_v53 = vsel %vm4130_vm8, %v715_v44, %v4342_v2  ;;  %v380_v60 = vor.u32 %v379_v41, %v375_v46  ;;  %v376_v0 = vsel %vm4062_vm5, %v371_v55, %v375_v46  ;;  %544 = vst [vmem:[#allocation2 + $0xe0] sm:$0xf] %v508_v50  ;;  %v740_v8 = vshll.u32 %v649_v4, 16  ;;  %v3755_v13 = vld [vmem:[%s5017_s1 + $0x1d8] sm:$0xff]  ;;  %v4415_v44 = vld [vmem:[%s3969_s10 + $0x28] sm:$0xf] }
  0x5e   : > { %804 = vst [vmem:[#allocation2 + $0xc4] sm:$0xf] %v724_v53  ;;  %v729_v15 = vrot.slane %v727_v6, 5  ;;  %v725_v19 = vrot.slane %v4342_v2, 4  ;;  %v732_v20 = vrot.slane %v730_v59, 6  ;;  %v602_v35 = vrot.slane %v600_v27, 4 }
  0x5f   : > { %2478 = vmatpush.bf16.msra.mxu2 %v3749_v1  ;;  %v510_v1 = vrot.slane %v4365_v56, 5  ;;  %v381_v43 = vrot.slane %v380_v60, 4  ;;  %451 = vst [vmem:[#allocation2 + $0xdc] sm:$0xf] %v376_v0  ;;  %v742_v25 = vrot.slane %v740_v8, 6  ;;  %v603_v38 = vrot.slane %v560_v26, 5 }
  0x60   : > { %2521 = vmatpush.bf16.msra.mxu3 %v3757_v7  ;;  %2435 = vmatpush.bf16.msra.mxu1 %v3741_v10  ;;  %v737_v7 = vshrl.u32 %v649_v4, 16  ;;  %v3162_v10 = vor.u32 %v3657_v58, %v3161_v54  ;;  %v733_v33 = vor.u32 %v732_v20, %v729_v15  ;;  %v393_v39 = vshll.u32 %v296_v24, 16  ;;  %v3661_v45 = vld [vmem:[#allocation2 + $0x9c] sm:$0xf]  ;;  %v3191_v22 = vld [vmem:[#allocation2 + $0xbc] sm:$0xf0] }
  0x61   : > { %2564 = vmatpush.bf16.msra.mxu0 %v3765_v18  ;;  %v386_v49 = vsel %vm4062_vm5, %v381_v43, %v385_v32  ;;  %v511_v11 = vsel %vm4009_vm2, %v509_v5, %v510_v1  ;;  %v387_v18 = vshrl.u32 %v4336_v30, 16  ;;  %v3764_v30 = vld [vmem:[%s5017_s1 + $0x220] sm:$0xff]  ;;  %v604_v23 = vsel %vm4009_vm2, %v602_v35, %v603_v38  ;;  %v3660_v54 = vld [vmem:[#allocation2 + $0x94] sm:$0xf]  ;;  %v3189_v53 = vld [vmem:[#allocation2 + $0x98] sm:$0xf] }
  0x62   : > { %452 = vst [vmem:[#allocation2 + $0x100] sm:$0xf] %v386_v49  ;;  %v739_v21 = vrot.slane %v737_v7, 5  ;;  %v734_v40 = vsel %vm4130_vm8, %v725_v19, %v733_v33  ;;  %v735_v42 = vrot.slane %v733_v33, 4  ;;  %v605_v27 = vrot.slane %v603_v38, 4 }
  0x63   : > { %2479 = vmatpush.bf16.msra.mxu2 %v3748_v9  ;;  %545 = vst [vmem:[#allocation2 + $0x104] sm:$0xf] %v511_v11  ;;  %v389_v31 = vrot.slane %v387_v18, 4  ;;  %v3739_v9 = vld [vmem:[%s5017_s1 + $0x158] sm:$0xff]  ;;  %v395_v47 = vrot.slane %v393_v39, 5  ;;  %v397_v48 = vshrl.u32 %v296_v24, 16  ;;  %v3194_v50 = vor.u32 %v3661_v45, %v3191_v22 }
  0x64   : > { %2522 = vmatpush.bf16.msra.mxu3 %v3756_v29  ;;  %2436 = vmatpush.bf16.msra.mxu1 %v3740_v16  ;;  %v4402_v2 = vor.u32 %v742_v25, %v739_v21  ;;  %v4408_v29 = vld [vmem:[%s3969_s10 + $0x2c] sm:$0xf]  ;;  %805 = vst [vmem:[#allocation2 + $0xe8] sm:$0xf] %v734_v40  ;;  %v403_v51 = vshll.u32 %v4415_v44, 16 }
  0x65   : > { %v390_v14 = vor.u32 %v389_v31, %v385_v32  ;;  %2565 = vmatpush.bf16.msra.mxu0 %v3764_v30  ;;  %v606_v46 = vrot.slane %v4408_v29, 5  ;;  %636 = vst [vmem:[#allocation2 + $0x12c] sm:$0xf] %v604_v23  ;;  %v3665_v55 = vld [vmem:[#allocation2 + $0xb8] sm:$0xf0]  ;;  %v399_v60 = vrot.slane %v397_v48, 4 }
  0x66   : > { %2274 = vmatmul.bf16.gmra.mxu1 %v3150_v52  ;;  %2317 = vmatmul.bf16.gmra.mxu2 %v3154_v63  ;;  %v744_v41 = vsel %vm4130_vm8, %v735_v42, %v4402_v2  ;;  %v512_v32 = vrot.slane %v510_v1, 4  ;;  %v3183_v36 = vld [vmem:[#allocation2 + $0xb4] sm:$0xf0]  ;;  %v3197_v63 = vld [vmem:[#allocation2 + $0xa0] sm:$0xf]  ;;  %v4431_v3 = vrot.slane %v403_v51, 5  ;;  %v3190_v49 = vor.u32 %v3665_v55, %v3189_v53 }
  0x67   : > { %2360 = vmatmul.bf16.gmra.mxu3 %v3158_v61  ;;  %2480 = vmatpush.bf16.msra.mxu2 %v3747_v34  ;;  %v391_v37 = vrot.slane %v390_v14, 4  ;;  %806 = vst [vmem:[#allocation2 + $0x10c] sm:$0xf] %v744_v41  ;;  %v607_v57 = vsel %vm4009_vm2, %v605_v27, %v606_v46  ;;  %v467_v61 = vld [vmem:[%s3969_s10 + $0x24] sm:$0xf]  ;;  %v400_v0 = vor.u32 %v399_v60, %v395_v47  ;;  %v745_v24 = vrot.slane %v4402_v2, 4 }
  0x68   : > { %2523 = vmatpush.bf16.msra.mxu3 %v3755_v13  ;;  %2437 = vmatpush.bf16.msra.mxu1 %v3739_v9  ;;  %637 = vst [vmem:[#allocation2 + $0x150] sm:$0xf] %v607_v57  ;;  %v4434_v4 = vld [vmem:[%s3969_s10 + $0x28] sm:$0xf]  ;;  %v513_v43 = vrot.slane %v467_v61, 5  ;;  %v407_v31 = vshrl.u32 %v4415_v44, 16 }
  0x69   : > { %v396_v58 = vsel %vm4062_vm5, %v391_v37, %v395_v47  ;;  %v516_v5 = vrot.slane %v4434_v4, 5  ;;  %v650_v6 = vld [vmem:[%s3969_s10 + $0x28] sm:$0xf]  ;;  %v651_v52 = vld [vmem:[%s3969_s10 + $0x2c] sm:$0xf]  ;;  %v401_v7 = vrot.slane %v400_v0, 4 }
  0x6a   : > { %2403 = vmatmul.bf16.gmra.mxu0 %v3162_v10  ;;  %453 = vst [vmem:[#allocation2 + $0x124] sm:$0xf] %v396_v58  ;;  %v3666_v59 = vld [vmem:[#allocation2 + $0xc0] sm:$0xf0]  ;;  %v514_v56 = vsel %vm4009_vm2, %v512_v32, %v513_v43  ;;  %v515_v1 = vrot.slane %v513_v43, 4  ;;  %v747_v8 = vshrl.u32 %v650_v6, 16  ;;  %v3186_v10 = vor.u32 %v3660_v54, %v3183_v36 }
  0x6b   : > { %546 = vst [vmem:[#allocation2 + $0x128] sm:$0xf] %v514_v56  ;;  %v750_v11 = vshll.u32 %v650_v6, 16  ;;  %v757_v15 = vshrl.u32 %v651_v52, 16  ;;  %v406_v16 = vsel %vm4062_vm5, %v401_v7, %v4431_v3  ;;  %v760_v20 = vshll.u32 %v651_v52, 16  ;;  %v3763_v42 = vld [vmem:[%s5017_s1 + $0x218] sm:$0xff] }
  0x6c   : > { %v517_v18 = vsel %vm4009_vm2, %v515_v1, %v516_v5  ;;  %v749_v19 = vrot.slane %v747_v8, 5  ;;  %v3198_v21 = vor.u32 %v3666_v59, %v3197_v63  ;;  %454 = vst [vmem:[#allocation2 + $0x148] sm:$0xf] %v406_v16  ;;  %v562_v34 = vld [vmem:[%s3969_s10 + $0x30] sm:$0xf]  ;;  %v409_v14 = vrot.slane %v407_v31, 4  ;;  %2566 = vmatpush.bf16.msra.mxu0 %v3763_v42 }
  0x6d   : > { %v752_v25 = vrot.slane %v750_v11, 6  ;;  %v759_v26 = vrot.slane %v757_v15, 5  ;;  %547 = vst [vmem:[#allocation2 + $0x14c] sm:$0xf] %v517_v18  ;;  %v762_v33 = vrot.slane %v760_v20, 6  ;;  %v609_v9 = vrot.slane %v562_v34, 5 }
  0x6e   : > { %v298_v13 = vld [vmem:[%s3969_s10 + $0x2c] sm:$0xf]  ;;  %v4453_v38 = vld [vmem:[%s3969_s10 + $0x34] sm:$0x7]  ;;  %v608_v44 = vrot.slane %v606_v46, 4  ;;  %v410_v48 = vor.u32 %v409_v14, %v4431_v3  ;;  %v518_v58 = vrot.slane %v516_v5, 4 }
  0x6f   : > { %v753_v30 = vor.u32 %v752_v25, %v749_v19  ;;  %v4450_v35 = vor.u32 %v762_v33, %v759_v26  ;;  %v413_v39 = vshll.u32 %v298_v13, 16  ;;  %v3746_v23 = vld [vmem:[%s5017_s1 + $0x190] sm:$0xff]  ;;  %v612_v45 = vrot.slane %v4453_v38, 5  ;;  %v469_v51 = vld [vmem:[%s3969_s10 + $0x2c] sm:$0xf] }
  0x70   : > { %v3754_v27 = vld [vmem:[%s5017_s1 + $0x1d0] sm:$0xff]  ;;  %v611_v47 = vrot.slane %v609_v9, 4  ;;  %2481 = vmatpush.bf16.msra.mxu2 %v3746_v23  ;;  %v610_v29 = vsel %vm4009_vm2, %v608_v44, %v609_v9  ;;  %v417_v41 = vshrl.u32 %v298_v13, 16  ;;  %v3670_v53 = vld [vmem:[#allocation2 + $0xe4] sm:$0xf]  ;;  %v411_v57 = vrot.slane %v410_v48, 4  ;;  %2567 = vmatpush.bf16.msra.mxu0 %v3762_v12 }
  0x71   : > { %v754_v2 = vsel %vm4130_vm8, %v745_v24, %v753_v30  ;;  %v755_v40 = vrot.slane %v753_v30, 4  ;;  %v3738_v37 = vld [vmem:[%s5017_s1 + $0x150] sm:$0xff]  ;;  %v415_v46 = vrot.slane %v413_v39, 5  ;;  %2524 = vmatpush.bf16.msra.mxu3 %v3754_v27  ;;  %v3227_v60 = vld [vmem:[#allocation2 + $0x104] sm:$0xf0]  ;;  %v519_v36 = vrot.slane %v469_v51, 5 }
  0x72   : > { %807 = vst [vmem:[#allocation2 + $0x130] sm:$0xf] %v754_v2  ;;  %v470_v54 = vld [vmem:[%s3969_s10 + $0x30] sm:$0x7]  ;;  %2438 = vmatpush.bf16.msra.mxu1 %v3738_v37  ;;  %v613_v55 = vsel %vm4009_vm2, %v611_v47, %v612_v45  ;;  %v419_v32 = vrot.slane %v417_v41, 4  ;;  %v765_v19 = vrot.slane %v4450_v35, 4 }
  0x73   : > { %v764_v22 = vsel %vm4130_vm8, %v755_v40, %v4450_v35  ;;  %638 = vst [vmem:[#allocation2 + $0x174] sm:$0xf] %v610_v29  ;;  %v416_v61 = vsel %vm4062_vm5, %v411_v57, %v415_v46  ;;  %v522_v63 = vrot.slane %v470_v54, 5  ;;  %v652_v0 = vld [vmem:[%s3969_s10 + $0x30] sm:$0xf]  ;;  %v520_v5 = vsel %vm4009_vm2, %v518_v58, %v519_v36  ;;  %v3745_v14 = vld [vmem:[%s5017_s1 + $0x188] sm:$0xff] }
  0x74   : > { %808 = vst [vmem:[#allocation2 + $0x154] sm:$0xf] %v764_v22  ;;  %v3669_v3 = vld [vmem:[#allocation2 + $0xdc] sm:$0xf]  ;;  %v3219_v4 = vld [vmem:[#allocation2 + $0xfc] sm:$0xf0]  ;;  %v420_v6 = vor.u32 %v419_v32, %v415_v46  ;;  %2482 = vmatpush.bf16.msra.mxu2 %v3745_v14 }
  0x75   : > { %639 = vst [vmem:[#allocation2 + $0x198] sm:$0xf] %v613_v55  ;;  %v3225_v43 = vld [vmem:[#allocation2 + $0xe0] sm:$0xf]  ;;  %v521_v52 = vrot.slane %v519_v36, 4  ;;  %v767_v7 = vshrl.u32 %v652_v0, 16  ;;  %v3222_v26 = vor.u32 %v3669_v3, %v3219_v4 }
  0x76   : > { %2279 = vmatmul.bf16.gmra.mxu1 %v3186_v10  ;;  %2322 = vmatmul.bf16.gmra.mxu2 %v3190_v49  ;;  %455 = vst [vmem:[#allocation2 + $0x16c] sm:$0xf] %v416_v61  ;;  %v653_v59 = vld [vmem:[%s3969_s10 + $0x34] sm:$0xf]  ;;  %v770_v56 = vshll.u32 %v652_v0, 16  ;;  %v3230_v10 = vor.u32 %v3670_v53, %v3227_v60  ;;  %v421_v15 = vrot.slane %v420_v6, 4 }
  0x77   : > { %2365 = vmatmul.bf16.gmra.mxu3 %v3194_v50  ;;  %v3674_v50 = vld [vmem:[#allocation2 + $0x100] sm:$0xf0]  ;;  %548 = vst [vmem:[#allocation2 + $0x170] sm:$0xf] %v520_v5  ;;  %v777_v1 = vshrl.u32 %v653_v59, 16  ;;  %v780_v8 = vshll.u32 %v653_v59, 16  ;;  %v523_v16 = vsel %vm4009_vm2, %v521_v52, %v522_v63  ;;  %2439 = vmatpush.bf16.msra.mxu1 %v3737_v62 }
  0x78   : > { %v3233_v49 = vld [vmem:[#allocation2 + $0xe8] sm:$0xf]  ;;  %v3675_v11 = vld [vmem:[#allocation2 + $0x108] sm:$0xf0]  ;;  %v769_v18 = vrot.slane %v767_v7, 5  ;;  %v772_v20 = vrot.slane %v770_v56, 6  ;;  %v426_v25 = vsel %vm4062_vm5, %v421_v15, %v3995_v17  ;;  %v3226_v31 = vor.u32 %v3674_v50, %v3225_v43 }
  0x79   : > { %549 = vst [vmem:[#allocation2 + $0x194] sm:$0xf] %v523_v16  ;;  %v782_v24 = vrot.slane %v780_v8, 6  ;;  %v3234_v34 = vor.u32 %v3675_v11, %v3233_v49  ;;  %v524_v35 = vrot.slane %v522_v63, 4  ;;  %v614_v9 = vrot.slane %v612_v45, 4  ;;  %v3753_v39 = vld [vmem:[%s5017_s1 + $0x1c8] sm:$0xff] }
  0x7a   : > { %2408 = vmatmul.bf16.gmra.mxu0 %v3198_v21  ;;  %v779_v21 = vrot.slane %v777_v1, 5  ;;  %456 = vst [vmem:[#allocation2 + $0x190] sm:$0xf] %v426_v25  ;;  %v773_v33 = vor.u32 %v772_v20, %v769_v18  ;;  %v4515_v2 = vld [vmem:[%s3969_s10 + $0x34] sm:$0xf]  ;;  %2525 = vmatpush.bf16.msra.mxu3 %v3753_v39  ;;  %v3761_v61 = vld [vmem:[%s5017_s1 + $0x208] sm:$0xff] }
  0x7b   : > { %550 = vst [vmem:[#allocation2 + $0x1b8] sm:$0x3] %v524_v35  ;;  %v876_v38 = vrot.slane %v4515_v2, 6  ;;  %v3679_v23 = vld [vmem:[#allocation2 + $0x12c] sm:$0xf]  ;;  %v3744_v5 = vld [vmem:[%s5017_s1 + $0x180] sm:$0xff]  ;;  %2568 = vmatpush.bf16.msra.mxu0 %v3761_v61 }
  0x7c   : > { %v783_v30 = vor.u32 %v782_v24, %v779_v21  ;;  %v774_v28 = vsel %vm4130_vm8, %v765_v19, %v773_v33  ;;  %v775_v13 = vrot.slane %v773_v33, 4  ;;  %640 = vst [vmem:[#allocation2 + $0x1bc] sm:$0x3] %v614_v9  ;;  %v3263_v27 = vld [vmem:[#allocation2 + $0x14c] sm:$0xf0]  ;;  %2483 = vmatpush.bf16.msra.mxu2 %v3744_v5  ;;  %v3736_v25 = vld [vmem:[%s5017_s1 + $0x140] sm:$0xff] }
  0x7d   : > { %809 = vst [vmem:[#allocation2 + $0x178] sm:$0xf] %v774_v28  ;;  %v878_v42 = vrot.slane %v876_v38, 4  ;;  %v3678_v44 = vld [vmem:[#allocation2 + $0x124] sm:$0xf]  ;;  %v3266_v22 = vor.u32 %v3679_v23, %v3263_v27  ;;  %2440 = vmatpush.bf16.msra.mxu1 %v3736_v25  ;;  %vm2708_vm2 = vcmask 1043456  }
  0x7e   : > { %v784_v17 = vsel %vm4130_vm8, %v775_v13, %v783_v30  ;;  %v785_v40 = vrot.slane %v783_v30, 4  ;;  %v3261_v45 = vld [vmem:[#allocation2 + $0x128] sm:$0xf]  ;;  %v3683_v47 = vld [vmem:[#allocation2 + $0x148] sm:$0xf0] }
  0x7f   : > { %810 = vst [vmem:[#allocation2 + $0x19c] sm:$0xf] %v784_v17  ;;  %v3255_v37 = vld [vmem:[#allocation2 + $0x144] sm:$0xf0]  ;;  %v3269_v48 = vld [vmem:[#allocation2 + $0x130] sm:$0xf]  ;;  %v3262_v57 = vor.u32 %v3683_v47, %v3261_v45 }
  0x80   : > { %811 = vst [vmem:[#allocation2 + $0x1c0] sm:$0x3] %v785_v40  ;;  %v3684_v29 = vld [vmem:[#allocation2 + $0x150] sm:$0xf0]  ;;  %v995_v46 = vld [vmem:[%s3969_s10 + $0x8] sm:$0xc]  ;;  %v3258_v55 = vor.u32 %v3678_v44, %v3255_v37 }
  0x81   : > { %904 = vst [vmem:[#allocation2 + $0x1c4] sm:$0x3] %v878_v42  ;;  %v996_v41 = vld [vmem:[%s3969_s10 + $0xc] sm:$0xf]  ;;  %v1013_v51 = vshrl.u32 %v995_v46, 16  ;;  %v1016_v54 = vshll.u32 %v995_v46, 16  ;;  %v3270_v32 = vor.u32 %v3684_v29, %v3269_v48 }
  0x82   : > { %v1022_v53 = vshrl.u32 %v996_v41, 16  ;;  %v997_v58 = vld [vmem:[%s3969_s10 + $0x10] sm:$0xf]  ;;  %v1025_v60 = vshll.u32 %v996_v41, 16  ;;  %vm1009_vm9 = vsmask.f32 1280 }
  0x83   : > { %v1015_v36 = vrot.slane %v1013_v51, 6  ;;  %v1018_v63 = vrot.slane %v1016_v54, 7  ;;  %v1032_v4 = vshrl.u32 %v997_v58, 16  ;;  %v1035_v43 = vshll.u32 %v997_v58, 16  ;;  %v813_v8 = vld [vmem:[%s3969_s10 + $0x8] sm:$0xf] }
  0x84   : > { %v1024_v0 = vrot.slane %v1022_v53, 6  ;;  %v1027_v3 = vrot.slane %v1025_v60, 7  ;;  %vm1010_vm10 = vsmask.f32 5392  ;;  %v812_v49 = vld [vmem:[%s3969_s10 + $0x4] sm:$0xc] }
  0x85   : > { %v1019_v50 = vor.u32 %v1018_v63, %v1015_v36  ;;  %v1034_v52 = vrot.slane %v1032_v4, 6  ;;  %vm4529_vm11 = vmor %vm1009_vm9, %vm1010_vm10  ;;  %v1037_v1 = vrot.slane %v1035_v43, 7  ;;  %v4539_v11 = vld [vmem:[%s3969_s10 + $0xc] sm:$0xf]  ;;  %v843_v15 = vrot.slane %v813_v8, 6  ;;  %v3760_v53 = vld [vmem:[%s5017_s1 + $0x200] sm:$0xff] }
  0x86   : > { %2284 = vmatmul.bf16.gmra.mxu1 %v3222_v26  ;;  %2327 = vmatmul.bf16.gmra.mxu2 %v3226_v31  ;;  %v1028_v6 = vor.u32 %v1027_v3, %v1024_v0  ;;  %v905_v19 = vld [vmem:[%s3969_s10 + $0x8] sm:$0xc]  ;;  %v906_v20 = vld [vmem:[%s3969_s10 + $0xc] sm:$0xf]  ;;  %v3688_v21 = vld [vmem:[#allocation2 + $0x174] sm:$0xf] }
  0x87   : > { %2370 = vmatmul.bf16.gmra.mxu3 %v3230_v10  ;;  %v1020_v7 = vrot.slane %v1019_v50, 4  ;;  %v3752_v10 = vld [vmem:[%s5017_s1 + $0x1c0] sm:$0xff]  ;;  %v4543_v18 = vor.u32 %v1037_v1, %v1034_v52  ;;  %v3299_v24 = vld [vmem:[#allocation2 + $0x194] sm:$0xf0]  ;;  %v3104_v31 = vrot.slane %v812_v49, 10  ;;  %v845_v33 = vrot.slane %v843_v15, 4  ;;  %2569 = vmatpush.bf16.msra.mxu0 %v3760_v53 }
  0x88   : > { %v1030_v56 = vrot.slane %v1028_v6, 4  ;;  %2526 = vmatpush.bf16.msra.mxu3 %v3752_v10  ;;  %v846_v30 = vrot.slane %v4539_v11, 6  ;;  %v4560_v28 = vld [vmem:[%s3969_s10 + $0x10] sm:$0xf]  ;;  %v3105_v13 = vrot.slane %v905_v19, 10  ;;  %v933_v12 = vrot.slane %v906_v20, 6 }
  0x89   : > { %v1029_v16 = vsel %vm4529_vm11, %v1020_v7, %v1028_v6  ;;  %v1172_v17 = vld [vmem:[%s3969_s10 + $0x8] sm:$0x8]  ;;  %v3687_v35 = vld [vmem:[#allocation2 + $0x16c] sm:$0xf]  ;;  %v3291_v9 = vld [vmem:[#allocation2 + $0x18c] sm:$0xf0]  ;;  %v844_v42 = vsel %vm4551_vm14, %v3104_v31, %v843_v15  ;;  %v3302_v41 = vor.u32 %v3688_v21, %v3299_v24 }
  0x8a   : > { %2413 = vmatmul.bf16.gmra.mxu0 %v3234_v34  ;;  %1159 = vst [vmem:[#allocation2 + $0x1c] sm:$0xf] %v1029_v16  ;;  %v1039_v34 = vsel %vm4529_vm11, %v1030_v56, %v4543_v18  ;;  %v3297_v14 = vld [vmem:[#allocation2 + $0x170] sm:$0xf]  ;;  %v3692_v39 = vld [vmem:[#allocation2 + $0x190] sm:$0xf0]  ;;  %v847_v23 = vsel %vm4551_vm14, %v845_v33, %v846_v30  ;;  %v934_v45 = vsel %vm4551_vm14, %v3105_v13, %v933_v12 }
  0x8b   : > { %v3305_v62 = vld [vmem:[#allocation2 + $0x178] sm:$0xf]  ;;  %v3693_v40 = vld [vmem:[#allocation2 + $0x198] sm:$0xf0]  ;;  %1160 = vst [vmem:[#allocation2 + $0x40] sm:$0xf] %v1039_v34  ;;  %v3298_v36 = vor.u32 %v3692_v39, %v3297_v14 }
  0x8c   : > { %v936_v27 = vrot.slane %v4560_v28, 6  ;;  %v1173_v44 = vld [vmem:[%s3969_s10 + $0xc] sm:$0xf]  ;;  %892 = vst [vmem:[#allocation2 + $0x14] sm:$0xf] %v844_v42  ;;  %v935_v37 = vrot.slane %v933_v12, 4  ;;  %v3306_v61 = vor.u32 %v3693_v40, %v3305_v62 }
  0x8d   : > { %v4574_v47 = vld [vmem:[%s3969_s10 + $0x10] sm:$0xf]  ;;  %893 = vst [vmem:[#allocation2 + $0x38] sm:$0xf] %v847_v23  ;;  %v1205_v29 = vrot.slane %v1173_v44, 7  ;;  %v1040_v7 = vrot.slane %v4543_v18, 4 }
  0x8e   : > { %v1208_v46 = vrot.slane %v4574_v47, 7  ;;  %v937_v51 = vsel %vm4551_vm14, %v935_v37, %v936_v27  ;;  %982 = vst [vmem:[#allocation2 + $0x18] sm:$0xf] %v934_v45  ;;  %v998_v54 = vld [vmem:[%s3969_s10 + $0x14] sm:$0xf]  ;;  %v848_v21 = vrot.slane %v846_v30, 4 }
  0x8f   : > { %983 = vst [vmem:[#allocation2 + $0x3c] sm:$0xf] %v937_v51  ;;  %v1042_v58 = vshrl.u32 %v998_v54, 16  ;;  %v1045_v60 = vshll.u32 %v998_v54, 16  ;;  %v999_v63 = vld [vmem:[%s3969_s10 + $0x18] sm:$0xf] }
  0x90   : > { %v1052_v43 = vshrl.u32 %v999_v63, 16  ;;  %v1055_v50 = vshll.u32 %v999_v63, 16  ;;  %v815_v1 = vld [vmem:[%s3969_s10 + $0x10] sm:$0xf]  ;;  %v908_v49 = vld [vmem:[%s3969_s10 + $0x14] sm:$0xf] }
  0x91   : > { %v1044_v3 = vrot.slane %v1042_v58, 6  ;;  %v1047_v4 = vrot.slane %v1045_v60, 7  ;;  %v849_v10 = vrot.slane %v815_v1, 6  ;;  %v1330_v15 = vld [vmem:[#allocation2 + $0x1b8] sm:$0x33]  ;;  %v938_v33 = vrot.slane %v936_v27, 4 }
  0x92   : > { %v1054_v5 = vrot.slane %v1052_v43, 6  ;;  %v1057_v52 = vrot.slane %v1055_v50, 7  ;;  %v4600_v19 = vld [vmem:[%s3969_s10 + $0x14] sm:$0xf]  ;;  %v4603_v20 = vld [vmem:[%s3969_s10 + $0x18] sm:$0xf]  ;;  %v1654_v28 = vunpack.c.h.b16 %v1330_v15  ;;  %v1653_v42 = vunpack.c.l.b16 %v1330_v15 }
  0x93   : > { %v1048_v6 = vor.u32 %v1047_v4, %v1044_v3  ;;  %v851_v24 = vrot.slane %v849_v10, 4  ;;  %v852_v25 = vrot.slane %v4600_v19, 6  ;;  %v4611_v31 = vld [vmem:[#allocation2 + $0x1c0] sm:$0x33]  ;;  %v939_v34 = vrot.slane %v908_v49, 6 }
  0x94   : > { %v4594_v8 = vor.u32 %v1057_v52, %v1054_v5  ;;  %v850_v13 = vsel %vm4551_vm14, %v848_v21, %v849_v10  ;;  %v942_v11 = vrot.slane %v4603_v20, 6  ;;  %v1175_v30 = vld [vmem:[%s3969_s10 + $0x14] sm:$0xf]  ;;  %v1210_v14 = vrot.slane %v1208_v46, 4  ;;  %v1001_v53 = vld [vmem:[%s3969_s10 + $0x20] sm:$0xf] }
  0x95   : > { %v1050_v56 = vrot.slane %v1048_v6, 4  ;;  %v1049_v16 = vsel %vm4529_vm11, %v1040_v7, %v1048_v6  ;;  %v853_v12 = vsel %vm4551_vm14, %v851_v24, %v852_v25  ;;  %894 = vst [vmem:[#allocation2 + $0x5c] sm:$0xf] %v850_v13  ;;  %v1211_v39 = vrot.slane %v1175_v30, 7  ;;  %v3864_v62 = vld [vmem:[#allocation2 + $0x1b0] sm:$0x33] }
  0x96   : > { %2289 = vmatmul.bf16.gmra.mxu1 %v3258_v55  ;;  %2332 = vmatmul.bf16.gmra.mxu2 %v3262_v57  ;;  %v1207_v57 = vrot.slane %v1205_v29, 4  ;;  %1161 = vst [vmem:[#allocation2 + $0x64] sm:$0xf] %v1049_v16  ;;  %v1652_v40 = vunpack.c.h.b16 %v3864_v62  ;;  %v1655_v27 = vunpack.c.l.b16 %v4611_v31  ;;  %v1717_v47 = vpack.c.b16 %v1654_v28, %v1654_v28  ;;  %v817_v50 = vld [vmem:[%s3969_s10 + $0x18] sm:$0xf] }
  0x97   : > { %2375 = vmatmul.bf16.gmra.mxu3 %v3266_v22  ;;  %v3106_v22 = vrot.slane %v1172_v17, 11  ;;  %v1059_v18 = vsel %vm4529_vm11, %v1050_v56, %v4594_v8  ;;  %v4622_v17 = vld [vmem:[%s3969_s10 + $0x18] sm:$0xf]  ;;  %895 = vst [vmem:[#allocation2 + $0x80] sm:$0xf] %v853_v12  ;;  %v1212_v45 = vsel %vm4576_vm1, %v1210_v14, %v1211_v39  ;;  %v1213_v37 = vrot.slane %v1211_v39, 4 }
  0x98   : > { %v1209_v0 = vsel %vm4576_vm1, %v1207_v57, %v1208_v46  ;;  %1162 = vst [vmem:[#allocation2 + $0x88] sm:$0xf] %v1059_v18  ;;  %v1214_v23 = vrot.slane %v4622_v17, 7  ;;  %v1715_v51 = vpack.c.b16 %v1652_v40, %v1652_v40  ;;  %v1716_v54 = vpack.c.b16 %v1653_v42, %v1653_v42  ;;  %v910_v52 = vld [vmem:[%s3969_s10 + $0x1c] sm:$0xf] }
  0x99   : > { %v1206_v55 = vsel %vm4576_vm1, %v3106_v22, %v1205_v29  ;;  %1257 = vst [vmem:[#allocation2 + $0x44] sm:$0xf] %v1209_v0  ;;  %v1000_v22 = vld [vmem:[%s3969_s10 + $0x1c] sm:$0xf]  ;;  %v1718_v57 = vpack.c.b16 %v1655_v27, %v1655_v27  ;;  %v1060_v4 = vrot.slane %v4594_v8, 4  ;;  %v855_v5 = vrot.slane %v817_v50, 6 }
  0x9a   : > { %2418 = vmatmul.bf16.gmra.mxu0 %v3270_v32  ;;  %v3294_v32 = vor.u32 %v3687_v35, %v3291_v9  ;;  %1256 = vst [vmem:[#allocation2 + $0x20] sm:$0xf] %v1206_v55  ;;  %v940_v35 = vsel %vm4551_vm14, %v938_v33, %v939_v34  ;;  %v941_v9 = vrot.slane %v939_v34, 4  ;;  %v1215_v29 = vsel %vm4576_vm1, %v1213_v37, %v1214_v23  ;;  %v4652_v1 = vld [vmem:[%s3969_s10 + $0x1c] sm:$0xf]  ;;  %v2606_v50 = vld [vmem:[#allocation6 + $0x8] sm:$0xff] }
  0x9b   : > { %984 = vst [vmem:[#allocation2 + $0x60] sm:$0xf] %v940_v35  ;;  %v1062_v46 = vshrl.u32 %v1000_v22, 16  ;;  %v4655_v10 = vld [vmem:[%s3969_s10 + $0x20] sm:$0xf]  ;;  %v854_v8 = vrot.slane %v852_v25, 4 }
  0x9c   : > { %v943_v44 = vsel %vm4551_vm14, %v941_v9, %v942_v11  ;;  %1258 = vst [vmem:[#allocation2 + $0x68] sm:$0xf] %v1212_v45  ;;  %v857_v15 = vrot.slane %v855_v5, 4  ;;  %v1177_v16 = vld [vmem:[%s3969_s10 + $0x1c] sm:$0xf]  ;;  %v858_v34 = vrot.slane %v4652_v1, 6 }
  0x9d   : > { %985 = vst [vmem:[#allocation2 + $0x84] sm:$0xf] %v943_v44  ;;  %v1064_v58 = vrot.slane %v1062_v46, 6  ;;  %v3645_v24 = vld [vmem:[#allocation2 + $0x1c] sm:$0xf]  ;;  %v944_v28 = vrot.slane %v942_v11, 4  ;;  %v856_v30 = vsel %vm4551_vm14, %v854_v8, %v855_v5 }
  0x9e   : > { %1259 = vst [vmem:[#allocation2 + $0x8c] sm:$0xf] %v1215_v29  ;;  %v3135_v33 = vld [vmem:[#allocation2 + $0x3c] sm:$0xf0]  ;;  %v945_v13 = vrot.slane %v910_v52, 6  ;;  %v948_v12 = vrot.slane %v4655_v10, 6  ;;  %v859_v20 = vsel %vm4551_vm14, %v857_v15, %v858_v34 }
  0x9f   : > { %v2605_v25 = vld [vmem:[#allocation6] sm:$0xff]  ;;  %v4676_v17 = vld [vmem:[%s3969_s10 + $0x20] sm:$0xf]  ;;  %v1216_v35 = vrot.slane %v1214_v23, 4  ;;  %v1217_v9 = vrot.slane %v1177_v16, 7  ;;  %v3913_v62 = vmov 0  }
  0xa0   : > { %v3644_v14 = vld [vmem:[#allocation2 + $0x14] sm:$0xf]  ;;  %v3127_v39 = vld [vmem:[#allocation2 + $0x34] sm:$0xf0]  ;;  %3861 = vset.pattern.permute.xlu0 %v3913_v62  ;;  %896 = vst [vmem:[#allocation2 + $0xa4] sm:$0xf] %v856_v30  ;;  %v946_v11 = vsel %vm4551_vm14, %v944_v28, %v945_v13  ;;  %3862 = vset.pattern.permute.xlu1 %v3913_v62 }
  0xa1   : > { %v947_v40 = vrot.slane %v945_v13, 4  ;;  %v1220_v42 = vrot.slane %v4676_v17, 7  ;;  %v3133_v27 = vld [vmem:[#allocation2 + $0x18] sm:$0xf]  ;;  %2620 = vperm.xlu0 %3861, %v2605_v25   ;;  %897 = vst [vmem:[#allocation2 + $0xc8] sm:$0xf] %v859_v20  ;;  %v1218_v23 = vsel %vm4576_vm1, %v1216_v35, %v1217_v9  ;;  %3863 = vset.pattern.permute.xlu2 %v3913_v62 }
  0xa2   : > { %v1219_v44 = vrot.slane %v1217_v9, 4  ;;  %v3649_v45 = vld [vmem:[#allocation2 + $0x38] sm:$0xf0]  ;;  %v3141_v37 = vld [vmem:[#allocation2 + $0x20] sm:$0xf] }
  0xa3   : > { %986 = vst [vmem:[#allocation2 + $0xa8] sm:$0xf] %v946_v11  ;;  %v3650_v29 = vld [vmem:[#allocation2 + $0x40] sm:$0xf0]  ;;  %v819_v16 = vld [vmem:[%s3969_s10 + $0x20] sm:$0xf] }
  0xa4   : > { %v1221_v46 = vsel %vm4576_vm1, %v1219_v44, %v1220_v42  ;;  %1260 = vst [vmem:[#allocation2 + $0xb0] sm:$0xf] %v1218_v23  ;;  %v4706_v13 = vld [vmem:[%s3969_s10 + $0x24] sm:$0xf]  ;;  %v861_v25 = vrot.slane %v819_v16, 6  ;;  %v1222_v30 = vrot.slane %v1220_v42, 4 }
  0xa5   : > { %1261 = vst [vmem:[#allocation2 + $0xd4] sm:$0xf] %v1221_v46  ;;  %v912_v17 = vld [vmem:[%s3969_s10 + $0x24] sm:$0xf]  ;;  %v3171_v9 = vld [vmem:[#allocation2 + $0x84] sm:$0xf0] }
  0xa6   : > { %2294 = vmatmul.bf16.gmra.mxu1 %v3294_v32  ;;  %2337 = vmatmul.bf16.gmra.mxu2 %v3298_v36  ;;  %v1072_v32 = vshrl.u32 %v1001_v53, 16  ;;  %v951_v62 = vrot.slane %v912_v17, 6  ;;  %v2607_v11 = vld [vmem:[#allocation6 + $0x10] sm:$0xff]  ;;  %v4725_v23 = vld [vmem:[%s3969_s10 + $0x28] sm:$0xf] }
  0xa7   : > { %2380 = vmatmul.bf16.gmra.mxu3 %v3302_v41  ;;  %v1065_v41 = vshll.u32 %v1000_v22, 16  ;;  %v3138_v22 = vor.u32 %v3645_v24, %v3135_v33  ;;  %v950_v33 = vrot.slane %v948_v12, 4  ;;  %v3653_v44 = vld [vmem:[#allocation2 + $0x5c] sm:$0xf]  ;;  %2630 = vperm.xlu1 %3862, %v2607_v11  }
  0xa8   : > { %v1074_v0 = vrot.slane %v1072_v32, 6 }
  0xa9   : > { %v1067_v60 = vrot.slane %v1065_v41, 7  ;;  %v1002_v41 = vld [vmem:[%s3969_s10 + $0x24] sm:$0xf]  ;;  %2625 = vperm.xlu0 %3861, %v2606_v50  }
  0xaa   : > { %2423 = vmatmul.bf16.gmra.mxu0 %v3306_v61  ;;  %v1075_v61 = vshll.u32 %v1001_v53, 16  ;;  %v1085_v53 = vshll.u32 %v1002_v41, 16 }
  0xab   : > { %v1068_v63 = vor.u32 %v1067_v60, %v1064_v58  ;;  %v3134_v58 = vor.u32 %v3649_v45, %v3133_v27  ;;  %v1003_v60 = vld [vmem:[%s3969_s10 + $0x28] sm:$0xf]  ;;  %v1179_v27 = vld [vmem:[%s3969_s10 + $0x24] sm:$0xf]  ;;  %v3163_v45 = vld [vmem:[#allocation2 + $0x7c] sm:$0xf0] }
  0xac   : > { %v1077_v3 = vrot.slane %v1075_v61, 7  ;;  %v3142_v61 = vor.u32 %v3650_v29, %v3141_v37  ;;  %v1095_v5 = vshll.u32 %v1003_v60, 16  ;;  %v3169_v37 = vld [vmem:[#allocation2 + $0x60] sm:$0xf]  ;;  %v953_v29 = vrot.slane %v951_v62, 4 }
  0xad   : > { %v1070_v43 = vrot.slane %v1068_v63, 4  ;;  %v1069_v56 = vsel %vm4529_vm11, %v1060_v4, %v1068_v63  ;;  %v1092_v4 = vshrl.u32 %v1003_v60, 16  ;;  %v1223_v46 = vrot.slane %v1179_v27, 7 }
  0xae   : > { %v4644_v6 = vor.u32 %v1077_v3, %v1074_v0  ;;  %1163 = vst [vmem:[#allocation2 + $0xac] sm:$0xf] %v1069_v56  ;;  %v1087_v3 = vrot.slane %v1085_v53, 7  ;;  %v1097_v1 = vrot.slane %v1095_v5, 7  ;;  %v3177_v53 = vld [vmem:[#allocation2 + $0x68] sm:$0xf] }
  0xaf   : > { %v1094_v56 = vrot.slane %v1092_v4, 6  ;;  %v1225_v60 = vrot.slane %v1223_v46, 4 }
  0xb0   : > { %v1079_v49 = vsel %vm4529_vm11, %v1070_v43, %v4644_v6  ;;  %v1080_v10 = vrot.slane %v4644_v6, 4 }
  0xb1   : > { %1164 = vst [vmem:[#allocation2 + $0xd0] sm:$0xf] %v1079_v49  ;;  %v860_v49 = vrot.slane %v858_v34, 4  ;;  %v4698_v15 = vor.u32 %v1097_v1, %v1094_v56  ;;  %v864_v34 = vrot.slane %v4706_v13, 6  ;;  %v1005_v1 = vld [vmem:[%s3969_s10 + $0x30] sm:$0xf] }
  0xb3   : > { %v4638_v55 = vpop.f32.mrf.mxu1  ;;  %v1100_v17 = vrot.slane %v4698_v15, 4 }
  0xb5   : > { %v4640_v36 = vpop.f32.mrf.mxu0 }
  0xb6   : > { %2299 = vmatmul.bf16.gmra.mxu1 %v1715_v51  ;;  %2342 = vmatmul.bf16.gmra.mxu2 %v1716_v54  ;;  %v1082_v54 = vshrl.u32 %v1002_v41, 16  ;;  %v3658_v41 = vld [vmem:[#allocation2 + $0x80] sm:$0xf0] }
  0xb7   : > { %2385 = vmatmul.bf16.gmra.mxu3 %v1717_v47  ;;  %v949_v47 = vsel %vm4551_vm14, %v947_v40, %v948_v12  ;;  %v3654_v12 = vld [vmem:[#allocation2 + $0x64] sm:$0xf]  ;;  %v862_v40 = vsel %vm4551_vm14, %v860_v49, %v861_v25  ;;  %v3170_v56 = vor.u32 %v3658_v41, %v3169_v37  ;;  %v4757_v37 = vld [vmem:[%s3969_s10 + $0x2c] sm:$0xf] }
  0xb8   : > { %987 = vst [vmem:[#allocation2 + $0xcc] sm:$0xf] %v949_v47  ;;  %v1084_v0 = vrot.slane %v1082_v54, 6  ;;  %v1226_v54 = vrot.slane %v4725_v23, 7  ;;  %v1181_v41 = vld [vmem:[%s3969_s10 + $0x2c] sm:$0xf] }
  0xb9   : > { %v4647_v7 = vpop.f32.mrf.mxu2  ;;  %898 = vst [vmem:[#allocation2 + $0xec] sm:$0xf] %v862_v40 }
  0xba   : > { %2428 = vmatmul.bf16.gmra.mxu0 %v1718_v57  ;;  %v3130_v57 = vor.u32 %v3644_v14, %v3127_v39  ;;  %v1088_v52 = vor.u32 %v1087_v3, %v1084_v0  ;;  %v863_v14 = vrot.slane %v861_v25, 4  ;;  %v4716_v39 = vld [vmem:[%s3969_s10 + $0x28] sm:$0xf]  ;;  %v1004_v0 = vld [vmem:[%s3969_s10 + $0x2c] sm:$0xf]  ;;  %v1227_v4 = vsel %vm4576_vm1, %v1225_v60, %v1226_v54 }
  0xbb   : > { %v4663_v18 = vpop.f32.mrf.mxu1  ;;  %v954_v42 = vrot.slane %v4716_v39, 6  ;;  %v1102_v50 = vshrl.u32 %v1004_v0, 16  ;;  %v1105_v5 = vshll.u32 %v1004_v0, 16  ;;  %1263 = vst [vmem:[#allocation2 + $0x11c] sm:$0xf] %v1227_v4  ;;  %v870_v60 = vrot.slane %v4757_v37, 6 }
  0xbc   : > { %v4665_v21 = vpop.f32.mrf.mxu3  ;;  %v1090_v8 = vrot.slane %v1088_v52, 4  ;;  %v1089_v28 = vsel %vm4529_vm11, %v1080_v10, %v1088_v52  ;;  %v865_v47 = vsel %vm4551_vm14, %v863_v14, %v864_v34  ;;  %v3166_v52 = vor.u32 %v3653_v44, %v3163_v45  ;;  %v914_v44 = vld [vmem:[%s3969_s10 + $0x2c] sm:$0xf] }
  0xbd   : > { %v4671_v19 = vpop.f32.mrf.mxu0  ;;  %1165 = vst [vmem:[#allocation2 + $0xf4] sm:$0xf] %v1089_v28  ;;  %v1107_v16 = vrot.slane %v1105_v5, 7  ;;  %v3207_v5 = vld [vmem:[#allocation2 + $0xcc] sm:$0xf0] }
  0xbe   : > { %v1099_v6 = vsel %vm4529_vm11, %v1090_v8, %v4698_v15  ;;  %899 = vst [vmem:[#allocation2 + $0x110] sm:$0xf] %v865_v47  ;;  %v1104_v8 = vrot.slane %v1102_v50, 6  ;;  %v4760_v47 = vld [vmem:[%s3969_s10 + $0x30] sm:$0xf] }
  0xbf   : > { %1166 = vst [vmem:[#allocation2 + $0x118] sm:$0xf] %v1099_v6  ;;  %v1115_v6 = vshll.u32 %v1005_v1, 16 }
  0xc1   : > { %v4690_v51 = vpop.f32.mrf.mxu2  ;;  %v1117_v14 = vrot.slane %v1115_v6, 7  ;;  %v3213_v6 = vld [vmem:[#allocation2 + $0xb0] sm:$0xf] }
  0xc3   : > { %v4693_v32 = vpop.f32.mrf.mxu1 }
  0xc4   : > { %v2259_v63 = vpop.f32.mrf.mxu3 }
  0xc5   : > { %v4695_v43 = vpop.f32.mrf.mxu0  ;;  %v3659_v63 = vld [vmem:[#allocation2 + $0x88] sm:$0xf0] }
  0xc6   : > { %2441 = vmatmul.bf16.vlgmr.msra.gmra.mxu1 %v3130_v57  ;;  %2484 = vmatmul.bf16.vlgmr.msra.gmra.mxu2 %v3134_v58  ;;  %v955_v57 = vsel %vm4551_vm14, %v953_v29, %v954_v42  ;;  %v1224_v58 = vsel %vm4576_vm1, %v1222_v30, %v1223_v46  ;;  %v3178_v49 = vor.u32 %v3659_v63, %v3177_v53  ;;  %v2608_v30 = vld [vmem:[#allocation6 + $0x18] sm:$0xff]  ;;  %v866_v46 = vrot.slane %v864_v34, 4 }
  0xc7   : > { %2527 = vmatmul.bf16.vlgmr.msra.gmra.mxu3 %v3138_v22  ;;  %v952_v22 = vsel %vm4551_vm14, %v950_v33, %v951_v62  ;;  %989 = vst [vmem:[#allocation2 + $0x114] sm:$0xf] %v955_v57  ;;  %v1112_v33 = vshrl.u32 %v1005_v1, 16  ;;  %2635 = vperm.xlu1 %3862, %v2608_v30   ;;  %v3663_v57 = vld [vmem:[#allocation2 + $0xac] sm:$0xf]  ;;  %v957_v63 = vrot.slane %v914_v44, 6 }
  0xc8   : > { %988 = vst [vmem:[#allocation2 + $0xf0] sm:$0xf] %v952_v22  ;;  %v960_v34 = vrot.slane %v4760_v47, 6  ;;  %v3199_v1 = vld [vmem:[#allocation2 + $0xc4] sm:$0xf0]  ;;  %v3210_v23 = vor.u32 %v3663_v57, %v3207_v5 }
  0xc9   : > { %v4701_v24 = vpop.f32.mrf.mxu2  ;;  %1262 = vst [vmem:[#allocation2 + $0xf8] sm:$0xf] %v1224_v58  ;;  %v3671_v47 = vld [vmem:[#allocation2 + $0xec] sm:$0xf] }
  0xca   : > { %2570 = vmatmul.bf16.vlgmr.msra.gmra.mxu0 %v3142_v61  ;;  %v3174_v61 = vor.u32 %v3654_v12, %v3171_v9  ;;  %v1108_v12 = vor.u32 %v1107_v16, %v1104_v8  ;;  %v1114_v9 = vrot.slane %v1112_v33, 6  ;;  %v3667_v8 = vld [vmem:[#allocation2 + $0xc8] sm:$0xf0]  ;;  %v1229_v16 = vrot.slane %v1181_v41, 7 }
  0xcb   : > { %v4713_v35 = vpop.f32.mrf.mxu1 }
  0xcc   : > { %v1110_v11 = vrot.slane %v1108_v12, 4  ;;  %v4751_v40 = vor.u32 %v1117_v14, %v1114_v9  ;;  %v1109_v15 = vsel %vm4529_vm11, %v1100_v17, %v1108_v12  ;;  %v3668_v17 = vld [vmem:[#allocation2 + $0xd0] sm:$0xf0]  ;;  %v1231_v9 = vrot.slane %v1229_v16, 4 }
  0xcd   : > { %v4718_v20 = vpop.f32.mrf.mxu0  ;;  %1167 = vst [vmem:[#allocation2 + $0x13c] sm:$0xf] %v1109_v15  ;;  %v1006_v14 = vld [vmem:[%s3969_s10 + $0x34] sm:$0xf]  ;;  %v1007_v15 = vld [vmem:[%s3969_s10 + $0x38] sm:$0xf] }
  0xce   : > { %v1119_v29 = vsel %vm4529_vm11, %v1110_v11, %v4751_v40  ;;  %v1125_v11 = vshll.u32 %v1006_v14, 16 }
  0xcf   : > { %1168 = vst [vmem:[#allocation2 + $0x160] sm:$0xf] %v1119_v29  ;;  %v3214_v29 = vor.u32 %v3668_v17, %v3213_v6 }
  0xd0   : > { %v1127_v41 = vrot.slane %v1125_v11, 7  ;;  %v3249_v26 = vld [vmem:[#allocation2 + $0xf8] sm:$0xf] }
  0xd1   : > { %v4741_v3 = vpop.f32.mrf.mxu2 }
  0xd3   : > { %v2270_v10 = vpop.f32.mrf.mxu1 }
  0xd4   : > { %v2271_v28 = vadd.f32 %v2270_v10, %v4640_v36  ;;  %v821_v36 = vld [vmem:[%s3969_s10 + $0x28] sm:$0xf] }
  0xd5   : > { %v867_v27 = vrot.slane %v821_v36, 6  ;;  %v3205_v10 = vld [vmem:[#allocation2 + $0xa8] sm:$0xf] }
  0xd6   : > { %2446 = vmatmul.bf16.gmra.mxu1 %v3166_v52  ;;  %2489 = vmatmul.bf16.gmra.mxu2 %v3170_v56  ;;  %v4776_v52 = vld [vmem:[%s3969_s10 + $0x30] sm:$0xf]  ;;  %v3662_v56 = vld [vmem:[#allocation2 + $0xa4] sm:$0xf]  ;;  %v3206_v44 = vor.u32 %v3667_v8, %v3205_v10  ;;  %v3279_v59 = vld [vmem:[#allocation2 + $0x15c] sm:$0xf0] }
  0xd7   : > { %2532 = vmatmul.bf16.gmra.mxu3 %v3174_v61  ;;  %v2399_v25 = vpop.f32.mrf.mxu0  ;;  %v869_v58 = vrot.slane %v867_v27, 4  ;;  %v956_v61 = vrot.slane %v954_v42, 4  ;;  %v868_v13 = vsel %vm4551_vm14, %v866_v46, %v867_v27  ;;  %v959_v42 = vrot.slane %v957_v63, 4 }
  0xd8   : > { %900 = vst [vmem:[#allocation2 + $0x134] sm:$0xf] %v868_v13  ;;  %v1232_v33 = vrot.slane %v4776_v52, 7  ;;  %v3202_v27 = vor.u32 %v3662_v56, %v3199_v1  ;;  %v1120_v1 = vrot.slane %v4751_v40, 4  ;;  %v872_v40 = vrot.slane %v870_v60, 4 }
  0xd9   : > { %v2313_v45 = vpop.f32.mrf.mxu2  ;;  %v871_v39 = vsel %vm4551_vm14, %v869_v58, %v870_v60  ;;  %v961_v12 = vsel %vm4551_vm14, %v959_v42, %v960_v34  ;;  %v916_v42 = vld [vmem:[%s3969_s10 + $0x34] sm:$0xf] }
  0xda   : > { %v2356_v62 = vpop.f32.mrf.mxu3  ;;  %2575 = vmatmul.bf16.gmra.mxu0 %v3178_v49  ;;  %v2314_v22 = vadd.f32 %v2313_v45, %v2271_v28  ;;  %v1228_v49 = vrot.slane %v1226_v54, 4  ;;  %901 = vst [vmem:[#allocation2 + $0x158] sm:$0xf] %v871_v39  ;;  %v1233_v45 = vsel %vm4576_vm1, %v1231_v9, %v1232_v33  ;;  %v823_v39 = vld [vmem:[%s3969_s10 + $0x30] sm:$0xf]  ;;  %v962_v9 = vrot.slane %v960_v34, 4 }
  0xdb   : > { %v2272_v53 = vpop.f32.mrf.mxu1  ;;  %991 = vst [vmem:[#allocation2 + $0x15c] sm:$0xf] %v961_v12  ;;  %v1183_v12 = vld [vmem:[%s3969_s10 + $0x34] sm:$0xf]  ;;  %v3235_v34 = vld [vmem:[#allocation2 + $0x10c] sm:$0xf0] }
  0xdc   : > { %v2357_v0 = vadd.f32 %v2356_v62, %v2314_v22  ;;  %v2273_v4 = vadd.f32 %v2272_v53, %v4671_v19  ;;  %v958_v19 = vsel %vm4551_vm14, %v956_v61, %v957_v63  ;;  %v1230_v54 = vsel %vm4576_vm1, %v1228_v49, %v1229_v16  ;;  %1265 = vst [vmem:[#allocation2 + $0x164] sm:$0xf] %v1233_v45  ;;  %v4812_v16 = vld [vmem:[%s3969_s10 + $0x38] sm:$0xf] }
  0xdd   : > { %990 = vst [vmem:[#allocation2 + $0x138] sm:$0xf] %v958_v19  ;;  %v1132_v53 = vshrl.u32 %v1007_v15, 16  ;;  %v1135_v63 = vshll.u32 %v1007_v15, 16  ;;  %v873_v19 = vrot.slane %v823_v39, 6 }
  0xde   : > { %v4787_v28 = vadd.f32 %v2399_v25, %v2357_v0  ;;  %1264 = vst [vmem:[#allocation2 + $0x140] sm:$0xf] %v1230_v54  ;;  %v1122_v25 = vshrl.u32 %v1006_v14, 16  ;;  %v3672_v54 = vld [vmem:[#allocation2 + $0xf4] sm:$0xf] }
  0xdf   : > { %v2401_v50 = vpop.f32.mrf.mxu0  ;;  %v1137_v5 = vrot.slane %v1135_v63, 7  ;;  %v875_v17 = vrot.slane %v873_v19, 4  ;;  %v874_v37 = vsel %vm4551_vm14, %v872_v40, %v873_v19  ;;  %v1184_v45 = vld [vmem:[%s3969_s10 + $0x38] sm:$0xf] }
  0xe0   : > { %v1124_v46 = vrot.slane %v1122_v25, 6  ;;  %902 = vst [vmem:[#allocation2 + $0x17c] sm:$0xf] %v874_v37  ;;  %v1238_v2 = vrot.slane %v1184_v45, 7  ;;  %v3680_v45 = vld [vmem:[#allocation2 + $0x134] sm:$0xf] }
  0xe1   : > { %v2315_v62 = vpop.f32.mrf.mxu2  ;;  %v877_v60 = vsel %vm4551_vm14, %v875_v17, %v876_v38 }
  0xe2   : > { %v2358_v30 = vpop.f32.mrf.mxu3  ;;  %v2316_v36 = vadd.f32 %v2315_v62, %v2273_v4  ;;  %v1128_v0 = vor.u32 %v1127_v41, %v1124_v46  ;;  %v1134_v4 = vrot.slane %v1132_v53, 6  ;;  %v966_v62 = vrot.slane %v4812_v16, 6  ;;  %v3241_v46 = vld [vmem:[#allocation2 + $0xf0] sm:$0xf]  ;;  %903 = vst [vmem:[#allocation2 + $0x1a0] sm:$0xf] %v877_v60 }
  0xe3   : > { %v2275_v22 = vpop.f32.mrf.mxu1  ;;  %v3676_v53 = vld [vmem:[#allocation2 + $0x110] sm:$0xf0]  ;;  %v2612_v16 = vld [vmem:[#allocation6 + $0x38] sm:$0xff] }
  0xe4   : > { %v2359_v57 = vadd.f32 %v2358_v30, %v2316_v36  ;;  %v2276_v58 = vadd.f32 %v2275_v22, %v4695_v43  ;;  %v1130_v10 = vrot.slane %v1128_v0, 4  ;;  %v4806_v43 = vor.u32 %v1137_v5, %v1134_v4  ;;  %2655 = vperm.xlu1 %3862, %v2612_v16   ;;  %v3681_v60 = vld [vmem:[#allocation2 + $0x13c] sm:$0xf] }
  0xe5   : > { %v1129_v8 = vsel %vm4529_vm11, %v1120_v1, %v1128_v0  ;;  %v963_v30 = vrot.slane %v916_v42, 6  ;;  %v1234_v22 = vrot.slane %v1232_v33, 4  ;;  %v3677_v0 = vld [vmem:[#allocation2 + $0x118] sm:$0xf0]  ;;  %v3242_v5 = vor.u32 %v3676_v53, %v3241_v46  ;;  %v3686_v46 = vld [vmem:[#allocation2 + $0x160] sm:$0xf0] }
  0xe6   : > { %2451 = vmatmul.bf16.gmra.mxu1 %v3202_v27  ;;  %2494 = vmatmul.bf16.gmra.mxu2 %v3206_v44  ;;  %v4802_v13 = vadd.f32 %v2401_v50, %v2359_v57  ;;  %v1139_v6 = vsel %vm4529_vm11, %v1130_v10, %v4806_v43  ;;  %1169 = vst [vmem:[#allocation2 + $0x184] sm:$0xf] %v1129_v8  ;;  %v3243_v27 = vld [vmem:[#allocation2 + $0x114] sm:$0xf0]  ;;  %v2609_v8 = vld [vmem:[#allocation6 + $0x20] sm:$0xff]  ;;  %v968_v40 = vrot.slane %v966_v62, 4 }
  0xe7   : > { %2537 = vmatmul.bf16.gmra.mxu3 %v3210_v23  ;;  %v2404_v61 = vpop.f32.mrf.mxu0  ;;  %1170 = vst [vmem:[#allocation2 + $0x1a8] sm:$0xf] %v1139_v6  ;;  %v965_v14 = vrot.slane %v963_v30, 4  ;;  %v2611_v44 = vld [vmem:[#allocation6 + $0x30] sm:$0xff]  ;;  %v964_v15 = vsel %vm4551_vm14, %v962_v9, %v963_v30  ;;  %v3246_v63 = vor.u32 %v3672_v54, %v3243_v27  ;;  %v3250_v10 = vor.u32 %v3677_v0, %v3249_v26  ;;  %v2614_v30 = vld [vmem:[#allocation6 + $0x48] sm:$0xff] }
  0xe8   : > { %2650 = vperm.xlu0 %3861, %v2611_v44   ;;  %992 = vst [vmem:[#allocation2 + $0x180] sm:$0xf] %v964_v15  ;;  %2640 = vperm.xlu2 %3863, %v2609_v8   ;;  %v1185_v54 = vld [vmem:[%s3969_s10 + $0x3c] sm:$0x1]  ;;  %v2617_v44 = vld [vmem:[#allocation6 + $0x60] sm:$0xf] }
  0xe9   : > { %v2318_v49 = vpop.f32.mrf.mxu2  ;;  %994 = vst [vmem:[#allocation2 + $0x1c8] sm:$0x3] %v968_v40  ;;  %v3271_v15 = vld [vmem:[#allocation2 + $0x154] sm:$0xf0]  ;;  %v3307_v16 = vld [vmem:[#allocation2 + $0x19c] sm:$0xf0] }
  0xea   : > { %v2361_v56 = vpop.f32.mrf.mxu3  ;;  %2580 = vmatmul.bf16.gmra.mxu0 %v3214_v29  ;;  %v2319_v50 = vadd.f32 %v2318_v49, %v2276_v58  ;;  %v1235_v29 = vrot.slane %v1183_v12, 7  ;;  %v3274_v53 = vor.u32 %v3680_v45, %v3271_v15 }
  0xeb   : > { %v2277_v23 = vpop.f32.mrf.mxu1 }
  0xec   : > { %v2362_v25 = vadd.f32 %v2361_v56, %v2319_v50  ;;  %v2278_v11 = vadd.f32 %v2277_v23, %v4718_v20  ;;  %v967_v20 = vsel %vm4551_vm14, %v965_v14, %v966_v62  ;;  %v1236_v57 = vsel %vm4576_vm1, %v1234_v22, %v1235_v29  ;;  %v1008_v56 = vld [vmem:[%s3969_s10 + $0x3c] sm:$0x1]  ;;  %s2754_s10 = smul.u32 104, %s3958_s25 }
  0xed   : > { %v1237_v58 = vrot.slane %v1235_v29, 4  ;;  %993 = vst [vmem:[#allocation2 + $0x1a4] sm:$0xf] %v967_v20  ;;  %v1142_v39 = vshll.u32 %v1008_v56, 16  ;;  %v1140_v50 = vrot.slane %v4806_v43, 4  ;;  %v1240_v14 = vrot.slane %v1238_v2, 4 }
  0xee   : > { %v4837_v41 = vadd.f32 %v2404_v61, %v2362_v25  ;;  %1266 = vst [vmem:[#allocation2 + $0x188] sm:$0xf] %v1236_v57  ;;  %v3238_v61 = vor.u32 %v3671_v47, %v3235_v34  ;;  %v1241_v25 = vrot.slane %v1185_v54, 7  ;;  %v3277_v20 = vld [vmem:[#allocation2 + $0x138] sm:$0xf]  ;;  %v3282_v29 = vor.u32 %v3681_v60, %v3279_v59  ;;  %s4883_s7 = scalar_lea.vmem [#allocation3], %s2754_s10 }
  0xef   : > { %v2406_v36 = vpop.f32.mrf.mxu0  ;;  %v1239_v33 = vsel %vm4576_vm1, %v1237_v58, %v1238_v2  ;;  %v1144_v6 = vrot.slane %v1142_v39, 7  ;;  %v3685_v22 = vld [vmem:[#allocation2 + $0x158] sm:$0xf0] }
  0xf0   : > { %1267 = vst [vmem:[#allocation2 + $0x1ac] sm:$0xf] %v1239_v33  ;;  %2665 = vperm.xlu0 %3861, %v2614_v30   ;;  %v1242_v37 = vsel %vm4576_vm1, %v1240_v14, %v1241_v25  ;;  %v3278_v48 = vor.u32 %v3685_v22, %v3277_v20  ;;  %v2615_v57 = vld [vmem:[#allocation6 + $0x50] sm:$0xff]  ;;  %v3313_v30 = vld [vmem:[#allocation2 + $0x180] sm:$0xf] }
  0xf1   : > { %v2320_v52 = vpop.f32.mrf.mxu2  ;;  %1268 = vst [vmem:[#allocation2 + $0x1d0] sm:$0x3] %v1242_v37  ;;  %2670 = vperm.xlu1 %3862, %v2615_v57   ;;  %v2616_v22 = vld [vmem:[#allocation6 + $0x58] sm:$0xff] }
  0xf2   : > { %v2363_v38 = vpop.f32.mrf.mxu3  ;;  %v2321_v4 = vadd.f32 %v2320_v52, %v2278_v11 }
  0xf3   : > { %v2280_v1 = vpop.f32.mrf.mxu1 }
  0xf4   : > { %v2364_v19 = vadd.f32 %v2363_v38, %v2321_v4  ;;  %v2281_v42 = vadd.f32 %v2280_v1, %v4638_v55  ;;  %v1145_v55 = vsel %vm4529_vm11, %v1140_v50, %v1144_v6  ;;  %v3694_v50 = vld [vmem:[#allocation2 + $0x1a0] sm:$0xf0] }
  0xf5   : > { %1171 = vst [vmem:[#allocation2 + $0x1cc] sm:$0x3] %v1145_v55  ;;  %v3321_v40 = vld [vmem:[#allocation2 + $0x188] sm:$0xf] }
  0xf6   : > { %2456 = vmatmul.bf16.gmra.mxu1 %v3238_v61  ;;  %2499 = vmatmul.bf16.gmra.mxu2 %v3242_v5  ;;  %v4846_v17 = vadd.f32 %v2406_v36, %v2364_v19  ;;  %v2610_v36 = vld [vmem:[#allocation6 + $0x28] sm:$0xff]  ;;  %v3690_v19 = vld [vmem:[#allocation2 + $0x184] sm:$0xf] }
  0xf7   : > { %2542 = vmatmul.bf16.gmra.mxu3 %v3246_v63  ;;  %v2409_v49 = vpop.f32.mrf.mxu0  ;;  %2645 = vperm.xlu2 %3863, %v2610_v36  }
  0xf8   : > { %2680 = vperm.xlu0 %3861, %v2617_v44   ;;  %v1333_v20 = vld [vmem:[#allocation2 + $0x1d0] sm:$0x3] }
  0xf9   : > { %v2323_v23 = vpop.f32.mrf.mxu2 }
  0xfa   : > { %v2366_v12 = vpop.f32.mrf.mxu3  ;;  %2585 = vmatmul.bf16.gmra.mxu0 %v3250_v10  ;;  %v2324_v9 = vadd.f32 %v2323_v23, %v2281_v42  ;;  %v3315_v42 = vld [vmem:[#allocation2 + $0x1a4] sm:$0xf0] }
  0xfb   : > { %v2282_v43 = vpop.f32.mrf.mxu1  ;;  %v3318_v6 = vor.u32 %v3690_v19, %v3315_v42 }
  0xfc   : > { %v2367_v11 = vadd.f32 %v2366_v12, %v2324_v9  ;;  %v2283_v27 = vadd.f32 %v2282_v43, %v4663_v18  ;;  %v3285_v18 = vld [vmem:[#allocation2 + $0x140] sm:$0xf]  ;;  %v3695_v12 = vld [vmem:[#allocation2 + $0x1a8] sm:$0xf0]  ;;  %v3314_v9 = vor.u32 %v3694_v50, %v3313_v30 }
  0xfd   : > { %v3286_v63 = vor.u32 %v3686_v46, %v3285_v18  ;;  %v3322_v25 = vor.u32 %v3695_v12, %v3321_v40  ;;  %v1332_v37 = vld [vmem:[#allocation2 + $0x1c8] sm:$0x33] }
  0xfe   : > { %v4854_v47 = vadd.f32 %v2409_v49, %v2367_v11  ;;  %v3689_v49 = vld [vmem:[#allocation2 + $0x17c] sm:$0xf]  ;;  %v2613_v11 = vld [vmem:[#allocation6 + $0x40] sm:$0xff]  ;;  %v1658_v15 = vunpack.c.h.b16 %v1332_v37  ;;  %v1657_v18 = vunpack.c.l.b16 %v1332_v37 }
  0xff   : > { %v2411_v62 = vpop.f32.mrf.mxu0  ;;  %v3310_v54 = vor.u32 %v3689_v49, %v3307_v16  ;;  %2660 = vperm.xlu2 %3863, %v2613_v11  }
 0x101   : > { %v2325_v2 = vpop.f32.mrf.mxu2 }
 0x102   : > { %v2368_v34 = vpop.f32.mrf.mxu3  ;;  %v2326_v38 = vadd.f32 %v2325_v2, %v2283_v27 }
 0x103   : > { %v2285_v58 = vpop.f32.mrf.mxu1 }
 0x104   : > { %v2369_v26 = vadd.f32 %v2368_v34, %v2326_v38  ;;  %v2286_v0 = vadd.f32 %v2285_v58, %v4693_v32  ;;  %v1659_v38 = vunpack.c.l.b16 %v1333_v20 }
 0x106   : > { %2461 = vmatmul.bf16.gmra.mxu1 %v3274_v53  ;;  %2504 = vmatmul.bf16.gmra.mxu2 %v3278_v48  ;;  %v4857_v33 = vadd.f32 %v2411_v62, %v2369_v26 }
 0x107   : > { %2547 = vmatmul.bf16.gmra.mxu3 %v3282_v29  ;;  %v2414_v52 = vpop.f32.mrf.mxu0  ;;  %2675 = vperm.xlu2 %3863, %v2616_v22   ;;  %v1656_v29 = vunpack.c.h.b16 %v4611_v31 }
 0x109   : > { %v2328_v61 = vpop.f32.mrf.mxu2  ;;  %v1719_v58 = vpack.c.b16 %v1656_v29, %v1656_v29 }
 0x10a   : > { %v2371_v4 = vpop.f32.mrf.mxu3  ;;  %2590 = vmatmul.bf16.gmra.mxu0 %v3286_v63  ;;  %v2329_v5 = vadd.f32 %v2328_v61, %v2286_v0  ;;  %v1720_v63 = vpack.c.b16 %v1657_v18, %v1657_v18  ;;  %v1722_v0 = vpack.c.b16 %v1659_v38, %v1659_v38 }
 0x10b   : > { %v2287_v56 = vpop.f32.mrf.mxu1 }
 0x10c   : > { %v2372_v1 = vadd.f32 %v2371_v4, %v2329_v5  ;;  %v2288_v10 = vadd.f32 %v2287_v56, %v4713_v35 }
 0x10e   : > { %v4860_v8 = vadd.f32 %v2414_v52, %v2372_v1 }
 0x10f   : > { %v2416_v39 = vpop.f32.mrf.mxu0 }
 0x111   : > { %v2330_v55 = vpop.f32.mrf.mxu2 }
 0x112   : > { %v2373_v32 = vpop.f32.mrf.mxu3  ;;  %v2331_v23 = vadd.f32 %v2330_v55, %v2288_v10 }
 0x113   : > { %v2290_v14 = vpop.f32.mrf.mxu1 }
 0x114   : > { %v2374_v35 = vadd.f32 %v2373_v32, %v2331_v23  ;;  %v2291_v36 = vadd.f32 %v2290_v14, %v4647_v7  ;;  %v1721_v7 = vpack.c.b16 %v1658_v15, %v1658_v15 }
 0x116   : > { %2466 = vmatmul.bf16.gmra.mxu1 %v3310_v54  ;;  %2509 = vmatmul.bf16.gmra.mxu2 %v3314_v9  ;;  %v4862_v27 = vadd.f32 %v2416_v39, %v2374_v35 }
 0x117   : > { %2552 = vmatmul.bf16.gmra.mxu3 %v3318_v6  ;;  %v2419_v43 = vpop.f32.mrf.mxu0 }
 0x119   : > { %v2333_v44 = vpop.f32.mrf.mxu2 }
 0x11a   : > { %v2376_v62 = vpop.f32.mrf.mxu3  ;;  %2595 = vmatmul.bf16.gmra.mxu0 %v3322_v25  ;;  %v2334_v60 = vadd.f32 %v2333_v44, %v2291_v36 }
 0x11b   : > { %v2292_v59 = vpop.f32.mrf.mxu1 }
 0x11c   : > { %v2377_v45 = vadd.f32 %v2376_v62, %v2334_v60  ;;  %v2293_v53 = vadd.f32 %v2292_v59, %v4690_v51  ;;  %v2621_v59 = vpop.permute.xlu0 %2620 }
 0x11e   : > { %v4866_v46 = vadd.f32 %v2419_v43, %v2377_v45 }
 0x11f   : > { %v2421_v34 = vpop.f32.mrf.mxu0 }
 0x121   : > { %v2335_v48 = vpop.f32.mrf.mxu2 }
 0x122   : > { %v2378_v2 = vpop.f32.mrf.mxu3  ;;  %v2336_v57 = vadd.f32 %v2335_v48, %v2293_v53 }
 0x123   : > { %v2295_v26 = vpop.f32.mrf.mxu1 }
 0x124   : > { %v2379_v52 = vadd.f32 %v2378_v2, %v2336_v57  ;;  %v2296_v5 = vadd.f32 %v2295_v26, %v4701_v24  ;;  %v2626_v38 = vpop.permute.xlu0 %2625 }
 0x126   : > { %2471 = vmatmul.bf16.gmra.mxu1 %v1719_v58  ;;  %2514 = vmatmul.bf16.gmra.mxu2 %v1720_v63  ;;  %v4869_v31 = vadd.f32 %v2421_v34, %v2379_v52 }
 0x127   : > { %2557 = vmatmul.bf16.gmra.mxu3 %v1721_v7  ;;  %v2424_v4 = vpop.f32.mrf.mxu0 }
 0x129   : > { %v2338_v56 = vpop.f32.mrf.mxu2 }
 0x12a   : > { %v2381_v61 = vpop.f32.mrf.mxu3  ;;  %2600 = vmatmul.bf16.gmra.mxu0 %v1722_v0  ;;  %v2339_v51 = vadd.f32 %v2338_v56, %v2296_v5 }
 0x12b   : > { %v2297_v1 = vpop.f32.mrf.mxu1 }
 0x12c   : > { %v2382_v10 = vadd.f32 %v2381_v61, %v2339_v51  ;;  %v2298_v49 = vadd.f32 %v2297_v1, %v4741_v3  ;;  %v2631_v61 = vpop.permute.xlu1 %2630 }
 0x12e   : > { %v4872_v19 = vadd.f32 %v2424_v4, %v2382_v10 }
 0x12f   : > { %v2426_v39 = vpop.f32.mrf.mxu0 }
 0x131   : > { %v2340_v32 = vpop.f32.mrf.mxu2 }
 0x132   : > { %v2383_v42 = vpop.f32.mrf.mxu3  ;;  %v2341_v16 = vadd.f32 %v2340_v32, %v2298_v49 }
 0x133   : > { %v2300_v30 = vpop.f32.mrf.mxu1 }
 0x134   : > { %v2384_v50 = vadd.f32 %v2383_v42, %v2341_v16  ;;  %v2301_v24 = vadd.f32 %v2300_v30, %v4665_v21 }
 0x136   : > { %v4875_v40 = vadd.f32 %v2426_v39, %v2384_v50 }
 0x137   : > { %v2429_v6 = vpop.f32.mrf.mxu0 }
 0x139   : > { %v2343_v55 = vpop.f32.mrf.mxu2 }
 0x13a   : > { %v2386_v12 = vpop.f32.mrf.mxu3  ;;  %v2344_v23 = vadd.f32 %v2343_v55, %v2301_v24  ;;  %v2636_v24 = vpop.permute.xlu1 %2635 }
 0x13b   : > { %v2302_v54 = vpop.f32.mrf.mxu1 }
 0x13c   : > { %v2387_v9 = vadd.f32 %v2386_v12, %v2344_v23 }
 0x13e   : > { %v4878_v25 = vadd.f32 %v2429_v6, %v2387_v9 }
 0x13f   : > { %v2431_v14 = vpop.f32.mrf.mxu0 }
 0x141   : > { %v2345_v3 = vpop.f32.mrf.mxu2 }
 0x142   : > { %v2388_v35 = vpop.f32.mrf.mxu3 }
 0x143   : > { %v2442_v43 = vpop.f32.mrf.mxu1 }
 0x144   : > { %v2443_v36 = vadd.f32 %v2442_v43, %v4787_v28 }
 0x147   : > { %v2571_v11 = vpop.f32.mrf.mxu0 }
 0x149   : > { %v2485_v44 = vpop.f32.mrf.mxu2 }
 0x14a   : > { %v2528_v62 = vpop.f32.mrf.mxu3  ;;  %v2486_v37 = vadd.f32 %v2485_v44, %v2443_v36 }
 0x14b   : > { %v2444_v60 = vpop.f32.mrf.mxu1 }
 0x14c   : > { %v2529_v21 = vadd.f32 %v2528_v62, %v2486_v37  ;;  %v2445_v20 = vadd.f32 %v2444_v60, %v4802_v13 }
 0x14e   : > { %v2572_v34 = vadd.f32 %v2571_v11, %v2529_v21  ;;  %v2641_v11 = vpop.permute.xlu2 %2640 }
 0x14f   : > { %v2573_v45 = vpop.f32.mrf.mxu0 }
 0x150   : > { %2756 = vst [vmem:[%s4883_s7] sm:$0xff] %v2572_v34  ;;  %v2683_v53 = vmul.f32 %v2621_v59, %v2572_v34 }
 0x151   : > { %v2487_v22 = vpop.f32.mrf.mxu2 }
 0x152   : > { %v2530_v15 = vpop.f32.mrf.mxu3  ;;  %v2488_v29 = vadd.f32 %v2487_v22, %v2445_v20  ;;  %v2720_v63 = vmul.f32 %v2683_v53, %v2683_v53 }
 0x153   : > { %v2447_v18 = vpop.f32.mrf.mxu1 }
 0x154   : > { %v2531_v28 = vadd.f32 %v2530_v15, %v2488_v29  ;;  %v2448_v57 = vadd.f32 %v2447_v18, %v4837_v41 }
 0x156   : > { %v2574_v7 = vadd.f32 %v2573_v45, %v2531_v28  ;;  %v2646_v28 = vpop.permute.xlu2 %2645 }
 0x157   : > { %v2576_v2 = vpop.f32.mrf.mxu0 }
 0x158   : > { %v2684_v58 = vmul.f32 %v2626_v38, %v2574_v7  ;;  %2757 = vst [vmem:[%s4883_s7 + $0x8] sm:$0xff] %v2574_v7 }
 0x159   : > { %v2490_v13 = vpop.f32.mrf.mxu2 }
 0x15a   : > { %v2533_v48 = vpop.f32.mrf.mxu3  ;;  %v2697_v26 = vadd.f32 %v2684_v58, %v2683_v53  ;;  %v2721_v0 = vmul.f32 %v2684_v58, %v2684_v58  ;;  %v2491_v52 = vadd.f32 %v2490_v13, %v2448_v57 }
 0x15b   : > { %v2449_v4 = vpop.f32.mrf.mxu1 }
 0x15c   : > { %v2733_v5 = vadd.f32 %v2721_v0, %v2720_v63  ;;  %v2534_v56 = vadd.f32 %v2533_v48, %v2491_v52  ;;  %v2450_v39 = vadd.f32 %v2449_v4, %v4846_v17  ;;  %v2651_v52 = vpop.permute.xlu0 %2650 }
 0x15e   : > { %v2577_v1 = vadd.f32 %v2576_v2, %v2534_v56 }
 0x15f   : > { %v2578_v51 = vpop.f32.mrf.mxu0 }
 0x160   : > { %v2685_v42 = vmul.f32 %v2631_v61, %v2577_v1  ;;  %2758 = vst [vmem:[%s4883_s7 + $0x10] sm:$0xff] %v2577_v1 }
 0x161   : > { %v2492_v41 = vpop.f32.mrf.mxu2 }
 0x162   : > { %v2535_v10 = vpop.f32.mrf.mxu3  ;;  %v2698_v49 = vadd.f32 %v2697_v26, %v2685_v42  ;;  %v2722_v32 = vmul.f32 %v2685_v42, %v2685_v42  ;;  %v2493_v16 = vadd.f32 %v2492_v41, %v2450_v39 }
 0x163   : > { %v2452_v30 = vpop.f32.mrf.mxu1 }
 0x164   : > { %v2734_v50 = vadd.f32 %v2733_v5, %v2722_v32  ;;  %v2536_v6 = vadd.f32 %v2535_v10, %v2493_v16  ;;  %v2453_v54 = vadd.f32 %v2452_v30, %v4854_v47  ;;  %v2656_v32 = vpop.permute.xlu1 %2655 }
 0x166   : > { %v2579_v55 = vadd.f32 %v2578_v51, %v2536_v6 }
 0x167   : > { %v2581_v12 = vpop.f32.mrf.mxu0 }
 0x168   : > { %v2686_v9 = vmul.f32 %v2636_v24, %v2579_v55  ;;  %2759 = vst [vmem:[%s4883_s7 + $0x18] sm:$0xff] %v2579_v55 }
 0x169   : > { %v2495_v17 = vpop.f32.mrf.mxu2 }
 0x16a   : > { %v2538_v23 = vpop.f32.mrf.mxu3  ;;  %v2699_v14 = vadd.f32 %v2698_v49, %v2686_v9  ;;  %v2723_v35 = vmul.f32 %v2686_v9, %v2686_v9  ;;  %v2496_v3 = vadd.f32 %v2495_v17, %v2453_v54 }
 0x16b   : > { %v2454_v43 = vpop.f32.mrf.mxu1 }
 0x16c   : > { %v2735_v62 = vadd.f32 %v2734_v50, %v2723_v35  ;;  %v2539_v36 = vadd.f32 %v2538_v23, %v2496_v3  ;;  %v2455_v59 = vadd.f32 %v2454_v43, %v4857_v33 }
 0x16e   : > { %v2582_v37 = vadd.f32 %v2581_v12, %v2539_v36 }
 0x16f   : > { %v2583_v44 = vpop.f32.mrf.mxu0 }
 0x170   : > { %v2687_v21 = vmul.f32 %v2641_v11, %v2582_v37  ;;  %2760 = vst [vmem:[%s4883_s7 + $0x20] sm:$0xff] %v2582_v37 }
 0x171   : > { %v2497_v47 = vpop.f32.mrf.mxu2 }
 0x172   : > { %v2540_v60 = vpop.f32.mrf.mxu3  ;;  %v2700_v45 = vadd.f32 %v2699_v14, %v2687_v21  ;;  %v2724_v34 = vmul.f32 %v2687_v21, %v2687_v21  ;;  %v2498_v15 = vadd.f32 %v2497_v47, %v2455_v59  ;;  %v2661_v14 = vpop.permute.xlu2 %2660 }
 0x173   : > { %v2457_v20 = vpop.f32.mrf.mxu1 }
 0x174   : > { %v2736_v22 = vadd.f32 %v2735_v62, %v2724_v34  ;;  %v2541_v29 = vadd.f32 %v2540_v60, %v2498_v15  ;;  %v2458_v53 = vadd.f32 %v2457_v20, %v4860_v8 }
 0x176   : > { %v2584_v2 = vadd.f32 %v2583_v44, %v2541_v29 }
 0x177   : > { %v2586_v18 = vpop.f32.mrf.mxu0 }
 0x178   : > { %v2688_v7 = vmul.f32 %v2646_v28, %v2584_v2  ;;  %2761 = vst [vmem:[%s4883_s7 + $0x28] sm:$0xff] %v2584_v2 }
 0x179   : > { %v2500_v33 = vpop.f32.mrf.mxu2 }
 0x17a   : > { %v2543_v38 = vpop.f32.mrf.mxu3  ;;  %v2701_v48 = vadd.f32 %v2700_v45, %v2688_v7  ;;  %v2725_v57 = vmul.f32 %v2688_v7, %v2688_v7  ;;  %v2501_v58 = vadd.f32 %v2500_v33, %v2458_v53  ;;  %v2666_v45 = vpop.permute.xlu0 %2665 }
 0x17b   : > { %v2459_v13 = vpop.f32.mrf.mxu1  ;;  %v2671_v33 = vpop.permute.xlu1 %2670 }
 0x17c   : > { %v2737_v63 = vadd.f32 %v2736_v22, %v2725_v57  ;;  %v2544_v26 = vadd.f32 %v2543_v38, %v2501_v58  ;;  %v2460_v5 = vadd.f32 %v2459_v13, %v4862_v27 }
 0x17e   : > { %v2587_v4 = vadd.f32 %v2586_v18, %v2544_v26 }
 0x17f   : > { %v2588_v0 = vpop.f32.mrf.mxu0 }
 0x180   : > { %v2689_v56 = vmul.f32 %v2651_v52, %v2587_v4  ;;  %2762 = vst [vmem:[%s4883_s7 + $0x30] sm:$0xff] %v2587_v4 }
 0x181   : > { %v2502_v8 = vpop.f32.mrf.mxu2 }
 0x182   : > { %v2545_v61 = vpop.f32.mrf.mxu3  ;;  %v2702_v51 = vadd.f32 %v2701_v48, %v2689_v56  ;;  %v2726_v1 = vmul.f32 %v2689_v56, %v2689_v56  ;;  %v2503_v10 = vadd.f32 %v2502_v8, %v2460_v5  ;;  %v2676_v56 = vpop.permute.xlu2 %2675 }
 0x183   : > { %v2462_v39 = vpop.f32.mrf.mxu1 }
 0x184   : > { %v2738_v42 = vadd.f32 %v2737_v63, %v2726_v1  ;;  %v2546_v41 = vadd.f32 %v2545_v61, %v2503_v10  ;;  %v2463_v50 = vadd.f32 %v2462_v39, %v4866_v46 }
 0x186   : > { %v2589_v16 = vadd.f32 %v2588_v0, %v2546_v41 }
 0x187   : > { %v2591_v49 = vpop.f32.mrf.mxu0 }
 0x188   : > { %v2690_v6 = vmul.f32 %v2656_v32, %v2589_v16  ;;  %2763 = vst [vmem:[%s4883_s7 + $0x38] sm:$0xff] %v2589_v16 }
 0x189   : > { %v2505_v27 = vpop.f32.mrf.mxu2 }
 0x18a   : > { %v2548_v30 = vpop.f32.mrf.mxu3  ;;  %v2703_v12 = vadd.f32 %v2702_v51, %v2690_v6  ;;  %v2727_v24 = vmul.f32 %v2690_v6, %v2690_v6  ;;  %v2506_v55 = vadd.f32 %v2505_v27, %v2463_v50  ;;  %v2681_v50 = vpop.permute.xlu0 %2680 }
 0x18b   : > { %v2464_v23 = vpop.f32.mrf.mxu1 }
 0x18c   : > { %v2739_v54 = vadd.f32 %v2738_v42, %v2727_v24  ;;  %v2549_v9 = vadd.f32 %v2548_v30, %v2506_v55  ;;  %v2465_v43 = vadd.f32 %v2464_v23, %v4869_v31 }
 0x18e   : > { %v2592_v35 = vadd.f32 %v2591_v49, %v2549_v9 }
 0x18f   : > { %v2593_v17 = vpop.f32.mrf.mxu0 }
 0x190   : > { %v2691_v11 = vmul.f32 %v2661_v14, %v2592_v35  ;;  %2764 = vst [vmem:[%s4883_s7 + $0x40] sm:$0xff] %v2592_v35 }
 0x191   : > { %v2507_v46 = vpop.f32.mrf.mxu2 }
 0x192   : > { %v2550_v3 = vpop.f32.mrf.mxu3  ;;  %v2704_v62 = vadd.f32 %v2703_v12, %v2691_v11  ;;  %v2728_v36 = vmul.f32 %v2691_v11, %v2691_v11  ;;  %v2508_v44 = vadd.f32 %v2507_v46, %v2465_v43 }
 0x193   : > { %v2467_v37 = vpop.f32.mrf.mxu1 }
 0x194   : > { %v2740_v60 = vadd.f32 %v2739_v54, %v2728_v36  ;;  %v2551_v59 = vadd.f32 %v2550_v3, %v2508_v44  ;;  %v2468_v20 = vadd.f32 %v2467_v37, %v4872_v19  ;;  %v2696_v36 = vld [vmem:[#allocation4] sm:$0x1] }
 0x196   : > { %v2594_v47 = vadd.f32 %v2593_v17, %v2551_v59 }
 0x197   : > { %v2596_v21 = vpop.f32.mrf.mxu0 }
 0x198   : > { %v2692_v15 = vmul.f32 %v2666_v45, %v2594_v47  ;;  %2765 = vst [vmem:[%s4883_s7 + $0x48] sm:$0xff] %v2594_v47 }
 0x199   : > { %v2510_v22 = vpop.f32.mrf.mxu2 }
 0x19a   : > { %v2553_v34 = vpop.f32.mrf.mxu3  ;;  %v2705_v31 = vadd.f32 %v2704_v62, %v2692_v15  ;;  %v2729_v29 = vmul.f32 %v2692_v15, %v2692_v15  ;;  %v2511_v18 = vadd.f32 %v2510_v22, %v2468_v20 }
 0x19b   : > { %v2469_v28 = vpop.f32.mrf.mxu1 }
 0x19c   : > { %v2741_v2 = vadd.f32 %v2740_v60, %v2729_v29  ;;  %v2554_v38 = vadd.f32 %v2553_v34, %v2511_v18  ;;  %v2470_v58 = vadd.f32 %v2469_v28, %v4875_v40  ;;  %v2719_v60 = vld [vmem:[#allocation5] sm:$0x1] }
 0x19e   : > { %v2597_v7 = vadd.f32 %v2596_v21, %v2554_v38 }
 0x19f   : > { %v2598_v53 = vpop.f32.mrf.mxu0 }
 0x1a0   : > { %v2693_v57 = vmul.f32 %v2671_v33, %v2597_v7  ;;  %2766 = vst [vmem:[%s4883_s7 + $0x50] sm:$0xff] %v2597_v7 }
 0x1a1   : > { %v2512_v13 = vpop.f32.mrf.mxu2 }
 0x1a2   : > { %v2555_v48 = vpop.f32.mrf.mxu3  ;;  %v2706_v63 = vadd.f32 %v2705_v31, %v2693_v57  ;;  %v2730_v26 = vmul.f32 %v2693_v57, %v2693_v57  ;;  %v2513_v19 = vadd.f32 %v2512_v13, %v2470_v58 }
 0x1a3   : > { %v2472_v0 = vpop.f32.mrf.mxu1 }
 0x1a4   : > { %v2742_v52 = vadd.f32 %v2741_v2, %v2730_v26  ;;  %v2556_v4 = vadd.f32 %v2555_v48, %v2513_v19  ;;  %v2473_v1 = vadd.f32 %v2472_v0, %v4878_v25 }
 0x1a6   : > { %v2599_v5 = vadd.f32 %v2598_v53, %v2556_v4 }
 0x1a7   : > { %v2601_v61 = vpop.f32.mrf.mxu0 }
 0x1a8   : > { %v2694_v51 = vmul.f32 %v2676_v56, %v2599_v5  ;;  %2767 = vst [vmem:[%s4883_s7 + $0x58] sm:$0xff] %v2599_v5 }
 0x1a9   : > { %v2515_v10 = vpop.f32.mrf.mxu2 }
 0x1aa   : > { %v2558_v8 = vpop.f32.mrf.mxu3  ;;  %v2707_v39 = vadd.f32 %v2706_v63, %v2694_v51  ;;  %v2731_v42 = vmul.f32 %v2694_v51, %v2694_v51  ;;  %v2516_v40 = vadd.f32 %v2515_v10, %v2473_v1 }
 0x1ab   : > { %v2474_v41 = vpop.f32.mrf.mxu1 }
 0x1ac   : > { %v2743_v49 = vadd.f32 %v2742_v52, %v2731_v42  ;;  %v2559_v32 = vadd.f32 %v2558_v8, %v2516_v40 }
 0x1ae   : > { %v2602_v30 = vadd.f32 %v2601_v61, %v2559_v32 }
 0x1af   : > { %v2603_v16 = vpop.f32.mrf.mxu0 }
 0x1b0   : > { %v2695_v27 = vmul.f32 %v2681_v50, %v2602_v30  ;;  %2768 = vst [vmem:[%s4883_s7 + $0x60] sm:$0xf] %v2602_v30 }
 0x1b1   : > { %v2517_v12 = vpop.f32.mrf.mxu2 }
 0x1b2   : > { %v2560_v6 = vpop.f32.mrf.mxu3  ;;  %v2709_v24 = vsel %vm2708_vm2, %v2695_v27, 0.0  ;;  %v2732_v55 = vmul.f32 %v2695_v27, %v2695_v27 }
 0x1b3   : > { %v2710_v23 = vadd.f32 %v2709_v24, %v2707_v39 }
 0x1b4   : > { %v2744_v54 = vsel %vm2708_vm2, %v2732_v55, 0.0 }
 0x1b5   : > { %v2711_v25 = vrot.slane %v2710_v23, 4  ;;  %v2745_v9 = vadd.f32 %v2744_v54, %v2743_v49 }
 0x1b7   : > { %v2712_v17 = vadd.f32 %v2711_v25, %v2710_v23  ;;  %v2746_v14 = vrot.slane %v2745_v9, 4 }
 0x1b9   : > { %v2713_v35 = vrot.slane %v2712_v17, 2  ;;  %v2747_v3 = vadd.f32 %v2746_v14, %v2745_v9 }
 0x1bb   : > { %v2714_v43 = vadd.f32 %v2713_v35, %v2712_v17  ;;  %v2748_v11 = vrot.slane %v2747_v3, 2 }
 0x1bd   : > { %v2715_v46 = vrot.slane %v2714_v43, 1  ;;  %v2749_v62 = vadd.f32 %v2748_v11, %v2747_v3 }
 0x1bf   : > { %v2716_v44 = vadd.f32 %v2715_v46, %v2714_v43  ;;  %v2750_v37 = vrot.slane %v2749_v62, 1 }
 0x1c1   : > { %v2717_v59 = vadd.f32 %v2716_v44, %v2696_v36  ;;  %v2751_v21 = vadd.f32 %v2750_v37, %v2749_v62  ;;  %2772 = sbr.rel (%p3611_p8) target bundleno = 686 (0x2ae), region = 56 }
 0x1c3   : > { %2718 = vst [vmem:[#allocation4] sm:$0x1] %v2717_v59  ;;  %v2752_v47 = vadd.f32 %v2751_v21, %v2719_v60 }
 0x1c5   : > { %2753 = vst [vmem:[#allocation5] sm:$0x1] %v2752_v47 }
 0x1c6   : > { %v2780_v33 = vld [vmem:[%s5018_s2] sm:$0x1]  ;;  %v2815_v63 = vld [vmem:[#allocation3 + $0x60] sm:$0xf]  ;;  %v2958_v26 = vld [vmem:[#allocation3 + $0xc8] sm:$0xf] }
 0x1c7   : > { %v2793_v13 = vld [vmem:[%s5019_s3] sm:$0x1]  ;;  %v2813_v19 = vld [vmem:[#allocation3 + $0x50] sm:$0xff]  ;;  %v2814_v0 = vld [vmem:[#allocation3 + $0x58] sm:$0xff]  ;;  %vm2886_vm6 = vcmask 818176  }
 0x1c8   : > { %v2956_v61 = vld [vmem:[#allocation3 + $0xb8] sm:$0xff]  ;;  %v2957_v5 = vld [vmem:[#allocation3 + $0xc0] sm:$0xff]  ;;  %v2812_v8 = vld [vmem:[#allocation3 + $0x48] sm:$0xff] }
 0x1c9   : > { %v2811_v56 = vld [vmem:[#allocation3 + $0x40] sm:$0xff]  ;;  %v2954_v51 = vld [vmem:[#allocation3 + $0xa8] sm:$0xff]  ;;  %v2955_v1 = vld [vmem:[#allocation3 + $0xb0] sm:$0xff] }
 0x1ca   : > { %v2773_v45 = vld [vmem:[#allocation4] sm:$0x1]  ;;  %v2810_v49 = vld [vmem:[#allocation3 + $0x38] sm:$0xff]  ;;  %v2953_v3 = vld [vmem:[#allocation3 + $0xa0] sm:$0xff] }
 0x1cb   : > { %v2774_v15 = vmul.f32 0.0078125, %v2773_v45  ;;  %v2809_v41 = vld [vmem:[#allocation3 + $0x30] sm:$0xff]  ;;  %v2952_v32 = vld [vmem:[#allocation3 + $0x98] sm:$0xff] }
 0x1cc   : > { %v2775_v34 = vld [vmem:[#allocation5] sm:$0x1] }
 0x1cd   : > { %v2776_v20 = vmul.f32 0.0078125, %v2775_v34  ;;  %v2777_v22 = vmul.f32 %v2774_v15, %v2774_v15 }
 0x1cf   : > { %v2778_v31 = vsub.f32 %v2776_v20, %v2777_v22 }
 0x1d1   : > { %v2779_v29 = vmax.f32 %v2778_v31, 0.0 }
 0x1d3   : > { %v2781_v18 = vadd.f32 1e-05, %v2779_v29 }
 0x1d5   : > { %3865 = vrsqrt.f32 %v2781_v18  ;;  %vm2788_vm3 = vweird.f32 %v2781_v18 }
 0x1db   : > { %v3866_v28 = vpop.eup %3865 }
 0x1dc   : > { %v2783_v2 = vmul.f32 %v3866_v28, %v2781_v18  ;;  %vm2789_vm4 = vweird.f32 %v3866_v28 }
 0x1dd   : > { %vm2790_vm5 = vmor %vm2788_vm3, %vm2789_vm4 }
 0x1de   : > { %v2784_v38 = vmul.f32 %v3866_v28, %v2783_v2  ;;  %v2807_v2 = vld [vmem:[#allocation3 + $0x20] sm:$0xff] }
 0x1e0   : > { %v2785_v53 = vmul.f32 0.5, %v2784_v38  ;;  %v2808_v38 = vld [vmem:[#allocation3 + $0x28] sm:$0xff] }
 0x1e2   : > { %v2786_v7 = vsub.f32 1.5, %v2785_v53  ;;  %v2950_v53 = vld [vmem:[#allocation3 + $0x88] sm:$0xff] }
 0x1e4   : > { %v2787_v48 = vmul.f32 %v3866_v28, %v2786_v7 }
 0x1e6   : > { %v2791_v57 = vsel %vm2790_vm5, %v3866_v28, %v2787_v48 }
 0x1e7   : > { %v2792_v58 = vmul.f32 %v2791_v57, %v2780_v33 }
 0x1e9   : > { %v2794_v52 = vmul.f32 %v2792_v58, %v2774_v15  ;;  %v4916_v4 = vperm.slane %v2792_v58, 0  ;;  %v2951_v58 = vld [vmem:[#allocation3 + $0x90] sm:$0xff] }
 0x1eb   : > { %v2795_v10 = vsub.f32 %v2793_v13, %v2794_v52  ;;  %v2831_v39 = vmul.f32 %v4916_v4, %v2815_v63  ;;  %v2971_v42 = vmul.f32 %v2958_v26, %v4916_v4  ;;  %v2829_v40 = vmul.f32 %v4916_v4, %v2813_v19 }
 0x1ec   : > { %v2830_v16 = vmul.f32 %v4916_v4, %v2814_v0  ;;  %v2969_v30 = vmul.f32 %v2956_v61, %v4916_v4  ;;  %v2970_v50 = vmul.f32 %v2957_v5, %v4916_v4  ;;  %v2827_v6 = vmul.f32 %v4916_v4, %v2811_v56  ;;  %v2805_v56 = vld [vmem:[#allocation3 + $0x10] sm:$0xff] }
 0x1ed   : > { %v4925_v27 = vperm.slane %v2795_v10, 0  ;;  %v2828_v12 = vmul.f32 %v4916_v4, %v2812_v8  ;;  %v2967_v24 = vmul.f32 %v2954_v51, %v4916_v4  ;;  %v2968_v55 = vmul.f32 %v2955_v1, %v4916_v4  ;;  %v2806_v10 = vld [vmem:[#allocation3 + $0x18] sm:$0xff] }
 0x1ee   : > { %v2825_v23 = vmul.f32 %v4916_v4, %v2809_v41  ;;  %v2826_v54 = vmul.f32 %v4916_v4, %v2810_v49  ;;  %v2965_v25 = vmul.f32 %v2952_v32, %v4916_v4  ;;  %v2966_v45 = vmul.f32 %v2953_v3, %v4916_v4  ;;  %v2948_v41 = vld [vmem:[#allocation3 + $0x78] sm:$0xff]  ;;  %v2949_v49 = vld [vmem:[#allocation3 + $0x80] sm:$0xff] }
 0x1ef   : > { %v2847_v9 = vadd.f32 %v4925_v27, %v2831_v39  ;;  %v2984_v17 = vadd.f32 %v2971_v42, %v4925_v27  ;;  %v2845_v14 = vadd.f32 %v4925_v27, %v2829_v40  ;;  %v2846_v35 = vadd.f32 %v4925_v27, %v2830_v16 }
 0x1f0   : > { %v2982_v43 = vadd.f32 %v2969_v30, %v4925_v27  ;;  %v2983_v11 = vadd.f32 %v2970_v50, %v4925_v27  ;;  %v2843_v46 = vadd.f32 %v4925_v27, %v2827_v6  ;;  %v2844_v62 = vadd.f32 %v4925_v27, %v2828_v12 }
 0x1f1   : > { %v2860_v36 = vmax.f32 %v2847_v9, 0.0  ;;  %v2997_v44 = vmax.f32 %v2984_v17, 0.0  ;;  %v2858_v37 = vmax.f32 %v2845_v14, 0.0  ;;  %v2859_v60 = vmax.f32 %v2846_v35, 0.0  ;;  %v2946_v17 = vld [vmem:[#allocation3 + $0x68] sm:$0xff] }
 0x1f2   : > { %v2995_v59 = vmax.f32 %v2982_v43, 0.0  ;;  %v2996_v21 = vmax.f32 %v2983_v11, 0.0  ;;  %v2856_v47 = vmax.f32 %v2843_v46, 0.0  ;;  %v2857_v20 = vmax.f32 %v2844_v62, 0.0  ;;  %v2947_v11 = vld [vmem:[#allocation3 + $0x70] sm:$0xff] }
 0x1f3   : > { %v2867_v34 = vpack.c.bf16 %v2860_v36, %v2860_v36  ;;  %v3004_v15 = vpack.c.bf16 %v2997_v44, %v2997_v44  ;;  %v2980_v22 = vadd.f32 %v2967_v24, %v4925_v27  ;;  %v2866_v31 = vpack.c.bf16 %v2859_v60, %v2858_v37  ;;  %v2803_v24 = vld [vmem:[#allocation3] sm:$0xff] }
 0x1f4   : > { %v3003_v29 = vpack.c.bf16 %v2996_v21, %v2995_v59  ;;  %v2981_v18 = vadd.f32 %v2968_v55, %v4925_v27  ;;  %v2841_v28 = vadd.f32 %v4925_v27, %v2825_v23  ;;  %v2842_v57 = vadd.f32 %v4925_v27, %v2826_v54  ;;  %v2804_v55 = vld [vmem:[#allocation3 + $0x8] sm:$0xff] }
 0x1f5   : > { %v2901_v7 = vsel %vm838_vm12, %v2867_v34, 0  ;;  %v3006_v33 = vsel %vm838_vm12, %v3004_v15, 0  ;;  %v2993_v48 = vmax.f32 %v2980_v22, 0.0  ;;  %v2978_v26 = vadd.f32 %v2965_v25, %v4925_v27 }
 0x1f6   : > { %2904 = vmatpush.bf16.msra.mxu0 %v2901_v7  ;;  %3824 = vmatpush.bf16.msra.mxu2 %v2901_v7  ;;  %v2994_v13 = vmax.f32 %v2981_v18, 0.0  ;;  %v2854_v63 = vmax.f32 %v2841_v28, 0.0  ;;  %v2979_v19 = vadd.f32 %v2966_v45, %v4925_v27  ;;  %v2855_v0 = vmax.f32 %v2842_v57, 0.0  ;;  %v3770_v57 = vld [vmem:[%s5021_s5 + $0x10] sm:$0xff] }
 0x1f7   : > { %3009 = vmatpush.bf16.msra.mxu1 %v3006_v33  ;;  %3831 = vmatpush.bf16.msra.mxu3 %v3006_v33  ;;  %v2823_v52 = vmul.f32 %v4916_v4, %v2807_v2  ;;  %v2824_v61 = vmul.f32 %v4916_v4, %v2808_v38  ;;  %v2963_v5 = vmul.f32 %v2950_v53, %v4916_v4  ;;  %v2991_v8 = vmax.f32 %v2978_v26, 0.0 }
 0x1f8   : > { %v2992_v51 = vmax.f32 %v2979_v19, 0.0  ;;  %v2964_v1 = vmul.f32 %v2951_v58, %v4916_v4  ;;  %v2865_v32 = vpack.c.bf16 %v2857_v20, %v2856_v47  ;;  %v2821_v30 = vmul.f32 %v4916_v4, %v2805_v56  ;;  %v2802_v58 = vld [vmem:[%s5021_s5 + $0x18] sm:$0x1] }
 0x1f9   : > { %v2839_v39 = vadd.f32 %v4925_v27, %v2823_v52  ;;  %v2840_v42 = vadd.f32 %v4925_v27, %v2824_v61  ;;  %v2976_v40 = vadd.f32 %v2963_v5, %v4925_v27  ;;  %v3002_v50 = vpack.c.bf16 %v2994_v13, %v2993_v48 }
 0x1fa   : > { %2905 = vmatpush.bf16.msra.mxu0 %v2866_v31  ;;  %3825 = vmatpush.bf16.msra.mxu2 %v2866_v31  ;;  %v2977_v16 = vadd.f32 %v2964_v1, %v4925_v27  ;;  %v2864_v6 = vpack.c.bf16 %v2855_v0, %v2854_v63  ;;  %v2822_v12 = vmul.f32 %v4916_v4, %v2806_v10  ;;  %v2881_v13 = vunpack.c.l.b16 %v2802_v58  ;;  %v3769_v63 = vld [vmem:[%s5021_s5 + $0x8] sm:$0xff] }
 0x1fb   : > { %3010 = vmatpush.bf16.msra.mxu1 %v3003_v29  ;;  %3832 = vmatpush.bf16.msra.mxu3 %v3003_v29  ;;  %v3001_v23 = vpack.c.bf16 %v2992_v51, %v2991_v8  ;;  %v2852_v54 = vmax.f32 %v2839_v39, 0.0  ;;  %v2961_v25 = vmul.f32 %v2948_v41, %v4916_v4  ;;  %v2962_v9 = vmul.f32 %v2949_v49, %v4916_v4 }
 0x1fc   : > { %v2853_v14 = vmax.f32 %v2840_v42, 0.0  ;;  %v2989_v35 = vmax.f32 %v2976_v40, 0.0  ;;  %v2990_v3 = vmax.f32 %v2977_v16, 0.0  ;;  %v2837_v43 = vadd.f32 %v4925_v27, %v2821_v30 }
 0x1fd   : > { %v2838_v46 = vadd.f32 %v4925_v27, %v2822_v12  ;;  %v2819_v62 = vmul.f32 %v4916_v4, %v2803_v24  ;;  %v2820_v36 = vmul.f32 %v4916_v4, %v2804_v55  ;;  %v2974_v44 = vadd.f32 %v2961_v25, %v4925_v27 }
 0x1fe   : > { %2906 = vmatpush.bf16.msra.mxu0 %v2865_v32  ;;  %3826 = vmatpush.bf16.msra.mxu2 %v2865_v32  ;;  %v2975_v37 = vadd.f32 %v2962_v9, %v4925_v27  ;;  %v2959_v60 = vmul.f32 %v2946_v17, %v4916_v4  ;;  %v2960_v59 = vmul.f32 %v2947_v11, %v4916_v4  ;;  %v2850_v45 = vmax.f32 %v2837_v43, 0.0 }
 0x1ff   : > { %3011 = vmatpush.bf16.msra.mxu1 %v3002_v50  ;;  %3833 = vmatpush.bf16.msra.mxu3 %v3002_v50  ;;  %v2863_v21 = vpack.c.bf16 %v2853_v14, %v2852_v54  ;;  %v3000_v47 = vpack.c.bf16 %v2990_v3, %v2989_v35  ;;  %v2851_v34 = vmax.f32 %v2838_v46, 0.0  ;;  %v2835_v15 = vadd.f32 %v4925_v27, %v2819_v62 }
 0x200   : > { %v2836_v20 = vadd.f32 %v4925_v27, %v2820_v36  ;;  %v2987_v22 = vmax.f32 %v2974_v44, 0.0  ;;  %v2988_v31 = vmax.f32 %v2975_v37, 0.0  ;;  %v2972_v29 = vadd.f32 %v2959_v60, %v4925_v27 }
 0x201   : > { %v2973_v18 = vadd.f32 %v2960_v59, %v4925_v27  ;;  %v2862_v4 = vpack.c.bf16 %v2851_v34, %v2850_v45  ;;  %v2848_v28 = vmax.f32 %v2835_v15, 0.0  ;;  %v3768_v27 = vld [vmem:[%s5021_s5] sm:$0xff]  ;;  %v2885_v26 = vpack.c.b16 %v2881_v13, %v2881_v13 }
 0x202   : > { %2907 = vmatpush.bf16.msra.mxu0 %v2864_v6  ;;  %3827 = vmatpush.bf16.msra.mxu2 %v2864_v6  ;;  %v2849_v2 = vmax.f32 %v2836_v20, 0.0  ;;  %v2999_v38 = vpack.c.bf16 %v2988_v31, %v2987_v22  ;;  %v2985_v53 = vmax.f32 %v2972_v29, 0.0 }
 0x203   : > { %3012 = vmatpush.bf16.msra.mxu1 %v3001_v23  ;;  %3834 = vmatpush.bf16.msra.mxu3 %v3001_v23  ;;  %v2986_v7 = vmax.f32 %v2973_v18, 0.0 }
 0x204   : > { %v2861_v33 = vpack.c.bf16 %v2849_v2, %v2848_v28 }
 0x205   : > { %v2998_v48 = vpack.c.bf16 %v2986_v7, %v2985_v53 }
 0x206   : > { %2908 = vmatpush.bf16.msra.mxu0 %v2863_v21  ;;  %3828 = vmatpush.bf16.msra.mxu2 %v2863_v21 }
 0x207   : > { %3013 = vmatpush.bf16.msra.mxu1 %v3000_v47  ;;  %3835 = vmatpush.bf16.msra.mxu3 %v3000_v47 }
 0x20a   : > { %2909 = vmatpush.bf16.msra.mxu0 %v2862_v4  ;;  %3829 = vmatpush.bf16.msra.mxu2 %v2862_v4 }
 0x20b   : > { %3014 = vmatpush.bf16.msra.mxu1 %v2999_v38  ;;  %3836 = vmatpush.bf16.msra.mxu3 %v2999_v38 }
 0x20e   : > { %2910 = vmatpush.bf16.msra.mxu0 %v2861_v33  ;;  %3830 = vmatpush.bf16.msra.mxu2 %v2861_v33 }
 0x20f   : > { %3015 = vmatpush.bf16.msra.mxu1 %v2998_v48  ;;  %3837 = vmatpush.bf16.msra.mxu3 %v2998_v48 }
 0x211   : > { %3624 = vmatmul.msk.bf16.vlgmr.msra.gmra.mxu0 %vm2886_vm6, %v3768_v27  ;;  %3626 = vmatmul.msk.bf16.vlgmr.msra.gmra.mxu2 %vm2886_vm6, %v3770_v57 }
 0x212   : > { %3628 = vmatmul.msk.bf16.vlgmr.msra.gmra.mxu1 %vm2886_vm6, %v3768_v27  ;;  %3630 = vmatmul.msk.bf16.vlgmr.msra.gmra.mxu3 %vm2886_vm6, %v3770_v57 }
 0x221   : > { %3625 = vmatmul.msk.bf16.gmra.mxu0 %vm2886_vm6, %v3769_v63  ;;  %3627 = vmatmul.msk.bf16.gmra.mxu2 %vm2886_vm6, %v2885_v26 }
 0x222   : > { %3629 = vmatmul.msk.bf16.gmra.mxu1 %vm2886_vm6, %v3769_v63  ;;  %3631 = vmatmul.msk.bf16.gmra.mxu3 %vm2886_vm6, %v2885_v26 }
 0x28e   : > { %v2912_v19 = vpop.f32.mrf.mxu0 }
 0x28f   : > { %v3017_v0 = vpop.f32.mrf.mxu1 }
 0x290   : > { %v3036_v52 = vpack.c.bf16 %v3017_v0, %v3017_v0 }
 0x292   : > { %3632 = vst [vmem:[%s5022_s6 + $0x1c] sm:$0xf] %v3036_v52 }
 0x294   : > { %v2922_v61 = vpop.f32.mrf.mxu2 }
 0x295   : > { %v3027_v5 = vpop.f32.mrf.mxu3 }
 0x296   : > { %v2914_v56 = vpop.f32.mrf.mxu0 }
 0x297   : > { %v3774_v8 = vpack.c.bf16 %v2914_v56, %v2912_v19  ;;  %v3019_v51 = vpop.f32.mrf.mxu1 }
 0x299   : > { %3775 = vst [vmem:[%s5022_s6] sm:$0xff] %v3774_v8  }
 0x29c   : > { %v2924_v1 = vpop.f32.mrf.mxu2 }
 0x29d   : > { %v3784_v10 = vpack.c.bf16 %v2924_v1, %v2922_v61  ;;  %v3029_v39 = vpop.f32.mrf.mxu3 }
 0x29e   : > { %v3041_v42 = vpack.c.bf16 %v3029_v39, %v3029_v39  ;;  %v2917_v40 = vpop.f32.mrf.mxu0 }
 0x29f   : > { %3797 = vst [vmem:[%s5022_s6 + $0x10] sm:$0xff] %v3784_v10   ;;  %v3022_v41 = vpop.f32.mrf.mxu1 }
 0x2a0   : > { %3637 = vst [vmem:[%s5022_s6 + $0x30] sm:$0xf] %v3041_v42  ;;  %v3789_v49 = vpack.c.bf16 %v3022_v41, %v3019_v51 }
 0x2a2   : > { %3798 = vst [vmem:[%s5022_s6 + $0x20] sm:$0xff] %v3789_v49  }
 0x2a4   : > { %v2927_v32 = vpop.f32.mrf.mxu2 }
 0x2a5   : > { %v2937_v16 = vpack.c.bf16 %v2927_v32, %v2927_v32  ;;  %v3032_v30 = vpop.f32.mrf.mxu3 }
 0x2a6   : > { %v3042_v50 = vpack.c.bf16 %v3032_v30, %v3032_v30  ;;  %v2919_v6 = vpop.f32.mrf.mxu0 }
 0x2a7   : > { %2944 = vst [vmem:[%s5022_s6 + $0x18] sm:$0x1] %v2937_v16  ;;  %v3779_v12 = vpack.c.bf16 %v2919_v6, %v2917_v40  ;;  %v3024_v24 = vpop.f32.mrf.mxu1 }
 0x2a8   : > { %3638 = vst [vmem:[%s5022_s6 + $0x34] sm:$0x1] %v3042_v50  ;;  %v3794_v55 = vpack.c.bf16 %v3027_v5, %v3024_v24 }
 0x2a9   : > { %3796 = vst [vmem:[%s5022_s6 + $0x8] sm:$0xff] %v3779_v12  }
 0x2aa   : > { %3799 = vst [vmem:[%s5022_s6 + $0x28] sm:$0xff] %v3794_v55  }
 0x2ac   : > { %v2929_v23 = vpop.f32.mrf.mxu2 }
 0x2ad   : > { %v3034_v54 = vpop.f32.mrf.mxu3 }
 0x2ae PF: > { %s17_s21 = sadd.s32 1, %s3907_s21  }
 0x2af   : > { %p14_p9 = scmp.ge.s32.totalorder %s17_s21, 4  }
 0x2b1   :  { %16 = sbr.rel (!%p14_p9) target bundleno = 1 (0x1), region = 86 }
 0x2b6   :  { %3062 = vsyncpa [#allocation7], 1 }
 0x2b7   :  { %3064 = vsyncpa [#allocation7 + $0x1], 1 }

// kernel: _encoder_forward.3
= control target key start
LH: loop header
LB: loop body
LE: loop exit
PB: predicated region body
PF: predicated region fallthrough
CT: control target
= control target key end

     0   :  { %s6326_s21 = smov 0   ;;  %s8894_s0 = inlined_call_operand.vmem [shape: bf16[2,362,4], index: 0, kind: input, shape index: {}]   ;;  %s8895_s1 = inlined_call_operand.vmem [shape: bf16[36,128], index: 1, kind: input, shape index: {}]   ;;  %s8896_s2 = inlined_call_operand.vmem [shape: f32[1,128], index: 2, kind: input, shape index: {}]   ;;  %s8897_s3 = inlined_call_operand.vmem [shape: f32[1,128], index: 3, kind: input, shape index: {}]   ;;  %s8898_s4 = inlined_call_operand.vmem [shape: f32[324,1], index: 4, kind: input, shape index: {}]   ;;  %s8899_s5 = inlined_call_operand.vmem [shape: bf16[122,324], index: 5, kind: input, shape index: {}]   ;;  %s8900_s6 = inlined_call_operand.vmem [shape: bf16[2,122,128], index: 6, kind: output, shape index: {}]  }
   0x1 LB: > { %s6332_s22 = sadd.s32 4294967295, %s6279_s21   ;;  %p5850_p0 = scmp.ge.s32.totalorder %s6279_s21, 1  ;;  %s6279_s21 = sphi %s6326_s21, %s16_s21  }
   0x2   : > { %p207_p1 = scmp.lt.s32.totalorder %s6279_s21, 3 }
   0x4   : > { %p208_p2 = pnand %p5850_p0, %p207_p1 }
   0x5   : > { %p232_p3 = scmp.lt.s32.totalorder (!%p208_p2), %s6332_s22, 1  ;;  %p5852_p4 = scmp.ne.s32.totalorder (!%p208_p2), %s6332_s22, 0 }
   0x6   : > { %211 = sbr.rel (%p208_p2) target bundleno = 1641 (0x669), region = 44 }
   0xb   : > { %s233_s23 = scalar_select %p232_p3, %s6332_s22, 1 }
   0xc   : > { %241 = sbr.rel (%p5852_p4) target bundleno = 20 (0x14), region = 48 }
   0xd   : > { %s6249_s24 = smul.u32 184, %s233_s23 }
   0xf   : > { %s6341_s27 = scalar_lea.vmem %s8894_s0, %s6249_s24 }
  0x11   : > { %v6281_v0 = vmov 0.0  }
  0x12   : > { %242 = vst [vmem:[#allocation4] sm:$0x1] %v6281_v0 }
  0x13   : > { %243 = vst [vmem:[#allocation5] sm:$0x1] %v6281_v0 }
  0x14 PF: > { %v330_v1 = vld [vmem:[%s6341_s27 + $0x8] sm:$0xf]  ;;  %v331_v2 = vld [vmem:[%s6341_s27 + $0xc] sm:$0xf]  ;;  %vm369_vm0 = vsmask.f32 3328 }
  0x15   : > { %vm370_vm1 = vsmask.f32 7440  ;;  %v392_v3 = vshll.u32 %v330_v1, 16  ;;  %v396_v4 = vshrl.u32 %v330_v1, 16  ;;  %v402_v5 = vshll.u32 %v331_v2, 16  ;;  %s6282_s28 = smov 4  }
  0x16   : > { %v406_v6 = vshrl.u32 %v331_v2, 16  ;;  %v328_v7 = vld [vmem:[%s6341_s27] sm:$0xf]  ;;  %v329_v8 = vld [vmem:[%s6341_s27 + $0x4] sm:$0xf]  ;;  %vm6355_vm2 = vmor %vm369_vm0, %vm370_vm1  ;;  %vm285_vm3 = vcmask 27648  }
  0x17   : > { %v6348_v9 = vrot.slane %v392_v3, 5  ;;  %v398_v10 = vrot.slane %v396_v4, 4  ;;  %v404_v11 = vrot.slane %v402_v5, 5  ;;  %v373_v12 = vshrl.u32 %v328_v7, 16  ;;  %v332_v13 = vld [vmem:[%s6341_s27 + $0x10] sm:$0xf] }
  0x18   : > { %v408_v14 = vrot.slane %v406_v6, 4  ;;  %v376_v15 = vshll.u32 %v328_v7, 16  ;;  %v382_v16 = vshll.u32 %v329_v8, 16  ;;  %v386_v17 = vshrl.u32 %v329_v8, 16  ;;  %v333_v18 = vld [vmem:[%s6341_s27 + $0x14] sm:$0xf] }
  0x19   : > { %v399_v19 = vor.u32 %v398_v10, %v6348_v9  ;;  %v375_v20 = vrot.slane %v373_v12, 4  ;;  %v412_v21 = vshll.u32 %v332_v13, 16  ;;  %v416_v22 = vshrl.u32 %v332_v13, 16  ;;  %v335_v28 = vld [vmem:[%s6341_s27 + $0x1c] sm:$0xf]  ;;  %s6283_s29 = smov 8  }
  0x1a   : > { %v378_v24 = vrot.slane %v376_v15, 5  ;;  %v384_v25 = vrot.slane %v382_v16, 5  ;;  %v388_v26 = vrot.slane %v386_v17, 4  ;;  %v409_v27 = vor.u32 %v408_v14, %v404_v11  ;;  %v334_v40 = vld [vmem:[%s6341_s27 + $0x18] sm:$0xf]  ;;  %s6284_s30 = smov 12  }
  0x1b   : > { %v400_v29 = vrot.slane %v399_v19, 4  ;;  %v414_v30 = vrot.slane %v412_v21, 5  ;;  %v418_v31 = vrot.slane %v416_v22, 4  ;;  %v422_v32 = vshll.u32 %v333_v18, 16  ;;  %v336_v44 = vld [vmem:[%s6341_s27 + $0x20] sm:$0xf] }
  0x1c   : > { %v379_v33 = vor.u32 %v378_v24, %v375_v20  ;;  %v389_v34 = vor.u32 %v388_v26, %v384_v25  ;;  %v426_v35 = vshrl.u32 %v333_v18, 16  ;;  %v442_v39 = vshll.u32 %v335_v28, 16  ;;  %v338_v51 = vld [vmem:[%s6341_s27 + $0x28] sm:$0xf]  ;;  %v337_v60 = vld [vmem:[%s6341_s27 + $0x24] sm:$0xf] }
  0x1d   : > { %v405_v36 = vsel %vm6355_vm2, %v400_v29, %v404_v11  ;;  %v419_v37 = vor.u32 %v418_v31, %v414_v30  ;;  %v424_v38 = vrot.slane %v422_v32, 5  ;;  %v410_v42 = vrot.slane %v409_v27, 4  ;;  %v339_v4 = vld [vmem:[%s6341_s27 + $0x2c] sm:$0xf]  ;;  %v341_v15 = vld [vmem:[%s6341_s27 + $0x34] sm:$0xf] }
  0x1e   : > { %785 = vrot.lane.b32.xlu1 %v405_v36, %s6282_s28  ;;  %v380_v41 = vrot.slane %v379_v33, 4  ;;  %v428_v43 = vrot.slane %v426_v35, 4  ;;  %v6365_v46 = vrot.slane %v442_v39, 5  ;;  %v446_v47 = vshrl.u32 %v335_v28, 16  ;;  %v340_v22 = vld [vmem:[%s6341_s27 + $0x30] sm:$0xf] }
  0x1f   : > { %v420_v45 = vrot.slane %v419_v37, 4  ;;  %v390_v49 = vrot.slane %v389_v34, 4  ;;  %v432_v50 = vshll.u32 %v334_v40, 16  ;;  %v452_v54 = vshll.u32 %v336_v44, 16  ;;  %v342_v33 = vld [vmem:[%s6341_s27 + $0x38] sm:$0xf] }
  0x20   : > { %v385_v48 = vsel %vm6355_vm2, %v380_v41, %v384_v25  ;;  %v448_v53 = vrot.slane %v446_v47, 4  ;;  %v436_v55 = vshrl.u32 %v334_v40, 16  ;;  %v415_v56 = vsel %vm6355_vm2, %v410_v42, %v414_v30  ;;  %v344_v40 = vld [vmem:[%s6341_s27 + $0x40] sm:$0xf]  ;;  %v343_v47 = vld [vmem:[%s6341_s27 + $0x3c] sm:$0xf] }
  0x21   : > { %781 = vrot.lane.b32.xlu0 %v385_v48, %s6282_s28  ;;  %v425_v52 = vsel %vm6355_vm2, %v420_v45, %v424_v38  ;;  %v456_v57 = vshrl.u32 %v336_v44, 16  ;;  %v434_v58 = vrot.slane %v432_v50, 5  ;;  %v429_v59 = vor.u32 %v428_v43, %v424_v38  ;;  %v253_v23 = vld [vmem:[%s6341_s27 + $0x24] sm:$0xf]  ;;  %s6285_s7 = smov 16   ;;  %s6286_s8 = smov 20  }
  0x22   : > { %789 = vrot.lane.b32.xlu2 %v425_v52, %s6282_s28  ;;  %v449_v61 = vor.u32 %v448_v53, %v6365_v46  ;;  %v438_v62 = vrot.slane %v436_v55, 4  ;;  %v472_v63 = vshll.u32 %v338_v51, 16  ;;  %v476_v0 = vshrl.u32 %v338_v51, 16  ;;  %295 = vst.msk [vmem:[#allocation2 + $0x24] sm:$0xf] %vm285_vm3, %v253_v23  ;;  %s6287_s9 = smov 24  }
  0x23   : > { %v430_v1 = vrot.slane %v429_v59, 4  ;;  %v395_v2 = vsel %vm6355_vm2, %v390_v49, %v6348_v9  ;;  %v454_v3 = vrot.slane %v452_v54, 5  ;;  %v462_v5 = vshll.u32 %v337_v60, 16  ;;  %s6288_s10 = smov 28   ;;  %s6289_s11 = smov 32  }
  0x24   : > { %v439_v6 = vor.u32 %v438_v62, %v434_v58  ;;  %v486_v7 = vshrl.u32 %v339_v4, 16  ;;  %v466_v8 = vshrl.u32 %v337_v60, 16  ;;  %v458_v10 = vrot.slane %v456_v57, 4  ;;  %s4828_s12 = smul.u32 328, %s6332_s22  ;;  %p5967_p5 = scmp.ne.s32.totalorder %s6332_s22, 1 }
  0x25   : > { %v450_v11 = vrot.slane %v449_v61, 4  ;;  %v435_v12 = vsel %vm6355_vm2, %v430_v1, %v434_v58  ;;  %v474_v13 = vrot.slane %v472_v63, 5  ;;  %v478_v14 = vrot.slane %v476_v0, 4  ;;  %v345_v58 = vld [vmem:[%s6341_s27 + $0x44] sm:$0xf] }
  0x26   : > { %787 = vrot.lane.b32.xlu1 %v415_v56, %s6282_s28  ;;  %v459_v16 = vor.u32 %v458_v10, %v454_v3  ;;  %v482_v9 = vshll.u32 %v339_v4, 16  ;;  %v464_v17 = vrot.slane %v462_v5, 5  ;;  %v440_v18 = vrot.slane %v439_v6, 4  ;;  %v347_v0 = vld [vmem:[%s6341_s27 + $0x4c] sm:$0xf]  ;;  %s8259_s13 = scalar_lea.vmem [#allocation3], %s4828_s12 }
  0x27   : > { %v468_v19 = vrot.slane %v466_v8, 4  ;;  %v502_v20 = vshll.u32 %v341_v15, 16  ;;  %v506_v21 = vshrl.u32 %v341_v15, 16  ;;  %v455_v24 = vsel %vm6355_vm2, %v450_v11, %v454_v3  ;;  %v346_v11 = vld [vmem:[%s6341_s27 + $0x48] sm:$0xf] }
  0x28   : > { %v479_v25 = vor.u32 %v478_v14, %v474_v13  ;;  %v460_v26 = vrot.slane %v459_v16, 4  ;;  %v488_v27 = vrot.slane %v486_v7, 4  ;;  %v484_v28 = vrot.slane %v482_v9, 5  ;;  %v348_v16 = vld [vmem:[%s6341_s27 + $0x50] sm:$0xf] }
  0x29   : > { %783 = vrot.lane.b32.xlu0 %v395_v2, %s6282_s28  ;;  %v492_v29 = vshll.u32 %v340_v22, 16  ;;  %v496_v30 = vshrl.u32 %v340_v22, 16  ;;  %v445_v31 = vsel %vm6355_vm2, %v440_v18, %v6365_v46  ;;  %v469_v32 = vor.u32 %v468_v19, %v464_v17 }
  0x2a   : > { %791 = vrot.lane.b32.xlu2 %v435_v12, %s6282_s28  ;;  %v504_v34 = vrot.slane %v502_v20, 5  ;;  %v508_v35 = vrot.slane %v506_v21, 4  ;;  %v480_v36 = vrot.slane %v479_v25, 4  ;;  %v465_v37 = vsel %vm6355_vm2, %v460_v26, %v464_v17  ;;  %v350_v25 = vld [vmem:[%s6341_s27 + $0x58] sm:$0xf] }
  0x2b   : > { %v516_v38 = vshrl.u32 %v342_v33, 16  ;;  %v489_v39 = vor.u32 %v488_v27, %v484_v28  ;;  %v512_v41 = vshll.u32 %v342_v33, 16  ;;  %v494_v42 = vrot.slane %v492_v29, 5 }
  0x2c   : > { %v498_v43 = vrot.slane %v496_v30, 4  ;;  %v470_v44 = vrot.slane %v469_v32, 4  ;;  %v509_v45 = vor.u32 %v508_v35, %v504_v34  ;;  %v532_v46 = vshll.u32 %v344_v40, 16  ;;  %v349_v32 = vld [vmem:[%s6341_s27 + $0x54] sm:$0xf] }
  0x2d   : > { %v485_v48 = vsel %vm6355_vm2, %v480_v36, %v484_v28  ;;  %v490_v49 = vrot.slane %v489_v39, 4  ;;  %v536_v50 = vshrl.u32 %v344_v40, 16  ;;  %v518_v51 = vrot.slane %v516_v38, 4  ;;  %v351_v38 = vld [vmem:[%s6341_s27 + $0x5c] sm:$0xf] }
  0x2e   : > { %795 = vrot.lane.b32.xlu1 %v455_v24, %s6282_s28  ;;  %v514_v52 = vrot.slane %v512_v41, 5  ;;  %v499_v53 = vor.u32 %v498_v43, %v494_v42  ;;  %v522_v54 = vshll.u32 %v343_v47, 16  ;;  %v526_v55 = vshrl.u32 %v343_v47, 16 }
  0x2f   : > { %v475_v56 = vsel %vm6355_vm2, %v470_v44, %v474_v13  ;;  %v510_v57 = vrot.slane %v509_v45, 4  ;;  %v534_v59 = vrot.slane %v532_v46, 5  ;;  %v495_v60 = vsel %vm6355_vm2, %v490_v49, %v494_v42  ;;  %v353_v45 = vld [vmem:[%s6341_s27 + $0x64] sm:$0xf] }
  0x30   : > { %v538_v61 = vrot.slane %v536_v50, 4  ;;  %v546_v62 = vshrl.u32 %v345_v58, 16  ;;  %v519_v63 = vor.u32 %v518_v51, %v514_v52  ;;  %v500_v1 = vrot.slane %v499_v53, 4 }
  0x31   : > { %793 = vrot.lane.b32.xlu0 %v445_v31, %s6282_s28  ;;  %v542_v2 = vshll.u32 %v345_v58, 16  ;;  %v524_v3 = vrot.slane %v522_v54, 5  ;;  %v528_v4 = vrot.slane %v526_v55, 4  ;;  %v562_v5 = vshll.u32 %v347_v0, 16 }
  0x32   : > { %797 = vrot.lane.b32.xlu2 %v465_v37, %s6282_s28  ;;  %v566_v6 = vshrl.u32 %v347_v0, 16  ;;  %v515_v7 = vsel %vm6355_vm2, %v510_v57, %v514_v52  ;;  %v539_v8 = vor.u32 %v538_v61, %v534_v59  ;;  %v520_v10 = vrot.slane %v519_v63, 4 }
  0x33   : > { %v548_v12 = vrot.slane %v546_v62, 4  ;;  %v505_v13 = vsel %vm6355_vm2, %v500_v1, %v504_v34  ;;  %v544_v14 = vrot.slane %v542_v2, 5  ;;  %v529_v15 = vor.u32 %v528_v4, %v524_v3  ;;  %v354_v2 = vld [vmem:[%s6341_s27 + $0x68] sm:$0xf] }
  0x34   : > { %v6420_v9 = vrot.slane %v562_v5, 5  ;;  %v568_v17 = vrot.slane %v566_v6, 4  ;;  %v552_v18 = vshll.u32 %v346_v11, 16  ;;  %v556_v19 = vshrl.u32 %v346_v11, 16 }
  0x35   : > { %v540_v20 = vrot.slane %v539_v8, 4  ;;  %v525_v21 = vsel %vm6355_vm2, %v520_v10, %v524_v3  ;;  %v576_v22 = vshrl.u32 %v348_v16, 16  ;;  %v549_v24 = vor.u32 %v548_v12, %v544_v14  ;;  %v356_v10 = vld [vmem:[%s6341_s27 + $0x70] sm:$0xf] }
  0x36   : > { %801 = vrot.lane.b32.xlu1 %v485_v48, %s6282_s28  ;;  %v530_v26 = vrot.slane %v529_v15, 4  ;;  %v572_v27 = vshll.u32 %v348_v16, 16  ;;  %v569_v28 = vor.u32 %v568_v17, %v6420_v9  ;;  %v554_v29 = vrot.slane %v552_v18, 5 }
  0x37   : > { %v558_v30 = vrot.slane %v556_v19, 4  ;;  %v592_v31 = vshll.u32 %v350_v25, 16  ;;  %v545_v33 = vsel %vm6355_vm2, %v540_v20, %v544_v14  ;;  %v550_v34 = vrot.slane %v549_v24, 4  ;;  %v355_v14 = vld [vmem:[%s6341_s27 + $0x6c] sm:$0xf] }
  0x38   : > { %v596_v35 = vshrl.u32 %v350_v25, 16  ;;  %v578_v36 = vrot.slane %v576_v22, 4  ;;  %v574_v37 = vrot.slane %v572_v27, 5  ;;  %v582_v39 = vshll.u32 %v349_v32, 16 }
  0x39   : > { %799 = vrot.lane.b32.xlu0 %v475_v56, %s6282_s28  ;;  %v586_v40 = vshrl.u32 %v349_v32, 16  ;;  %v535_v41 = vsel %vm6355_vm2, %v530_v26, %v534_v59  ;;  %v570_v42 = vrot.slane %v569_v28, 4  ;;  %v559_v43 = vor.u32 %v558_v30, %v554_v29  ;;  %v352_v59 = vld [vmem:[%s6341_s27 + $0x60] sm:$0xf]  ;;  %v357_v28 = vld [vmem:[%s6341_s27 + $0x74] sm:$0xf] }
  0x3a   : > { %803 = vrot.lane.b32.xlu2 %v495_v60, %s6282_s28  ;;  %v594_v44 = vrot.slane %v592_v31, 5  ;;  %v555_v46 = vsel %vm6355_vm2, %v550_v34, %v554_v29  ;;  %v598_v47 = vrot.slane %v596_v35, 4  ;;  %v606_v48 = vshrl.u32 %v351_v38, 16 }
  0x3b   : > { %v579_v49 = vor.u32 %v578_v36, %v574_v37  ;;  %v602_v50 = vshll.u32 %v351_v38, 16  ;;  %v584_v51 = vrot.slane %v582_v39, 5  ;;  %v588_v52 = vrot.slane %v586_v40, 4  ;;  %v359_v36 = vld [vmem:[%s6341_s27 + $0x7c] sm:$0xf] }
  0x3c   : > { %v622_v53 = vshll.u32 %v353_v45, 16  ;;  %v626_v54 = vshrl.u32 %v353_v45, 16  ;;  %v560_v55 = vrot.slane %v559_v43, 4  ;;  %v575_v56 = vsel %vm6355_vm2, %v570_v42, %v574_v37 }
  0x3d   : > { %v599_v57 = vor.u32 %v598_v47, %v594_v44  ;;  %v580_v58 = vrot.slane %v579_v49, 4  ;;  %v608_v60 = vrot.slane %v606_v48, 4  ;;  %v604_v61 = vrot.slane %v602_v50, 5  ;;  %v360_v48 = vld [vmem:[%s6341_s27 + $0x80] sm:$0xf] }
  0x3e   : > { %807 = vrot.lane.b32.xlu1 %v515_v7, %s6282_s28  ;;  %v589_v62 = vor.u32 %v588_v52, %v584_v51  ;;  %v6443_v63 = vrot.slane %v622_v53, 5  ;;  %v628_v0 = vrot.slane %v626_v54, 4  ;;  %v565_v1 = vsel %vm6355_vm2, %v560_v55, %v6420_v9 }
  0x3f   : > { %v612_v3 = vshll.u32 %v352_v59, 16  ;;  %v616_v4 = vshrl.u32 %v352_v59, 16  ;;  %v600_v5 = vrot.slane %v599_v57, 4  ;;  %v585_v6 = vsel %vm6355_vm2, %v580_v58, %v584_v51  ;;  %v362_v58 = vld [vmem:[%s6341_s27 + $0x88] sm:$0xf] }
  0x40   : > { %v636_v7 = vshrl.u32 %v354_v2, 16  ;;  %v609_v8 = vor.u32 %v608_v60, %v604_v61  ;;  %v590_v11 = vrot.slane %v589_v62, 4  ;;  %v629_v12 = vor.u32 %v628_v0, %v6443_v63  ;;  %v361_v62 = vld [vmem:[%s6341_s27 + $0x84] sm:$0xf]  ;;  %v248_v0 = vld [vmem:[%s6341_s27 + $0x10] sm:$0xf] }
  0x41   : > { %805 = vrot.lane.b32.xlu0 %v505_v13, %s6282_s28  ;;  %v632_v13 = vshll.u32 %v354_v2, 16  ;;  %v614_v15 = vrot.slane %v612_v3, 5  ;;  %v618_v16 = vrot.slane %v616_v4, 4  ;;  %v652_v9 = vshll.u32 %v356_v10, 16  ;;  %290 = vst.msk [vmem:[#allocation2 + $0x10] sm:$0xf] %vm285_vm3, %v248_v0 }
  0x42   : > { %809 = vrot.lane.b32.xlu2 %v525_v21, %s6282_s28  ;;  %v656_v17 = vshrl.u32 %v356_v10, 16  ;;  %v605_v18 = vsel %vm6355_vm2, %v600_v5, %v604_v61  ;;  %v610_v19 = vrot.slane %v609_v8, 4  ;;  %v638_v20 = vrot.slane %v636_v7, 4 }
  0x43   : > { %v642_v21 = vshll.u32 %v355_v14, 16  ;;  %v646_v22 = vshrl.u32 %v355_v14, 16  ;;  %v595_v24 = vsel %vm6355_vm2, %v590_v11, %v594_v44  ;;  %v634_v25 = vrot.slane %v632_v13, 5  ;;  %v363_v13 = vld [vmem:[%s6341_s27 + $0x8c] sm:$0xf] }
  0x44   : > { %v630_v26 = vrot.slane %v629_v12, 4  ;;  %v619_v27 = vor.u32 %v618_v16, %v614_v15  ;;  %v6463_v29 = vrot.slane %v652_v9, 5  ;;  %v658_v30 = vrot.slane %v656_v17, 4 }
  0x45   : > { %v615_v31 = vsel %vm6355_vm2, %v610_v19, %v614_v15  ;;  %v666_v32 = vshrl.u32 %v357_v28, 16  ;;  %v644_v34 = vrot.slane %v642_v21, 5  ;;  %v648_v35 = vrot.slane %v646_v22, 4  ;;  %v365_v21 = vld [vmem:[%s6341_s27 + $0x94] sm:$0xf] }
  0x46   : > { %813 = vrot.lane.b32.xlu1 %v545_v33, %s6282_s28  ;;  %v639_v33 = vor.u32 %v638_v20, %v634_v25  ;;  %v662_v37 = vshll.u32 %v357_v28, 16  ;;  %v635_v38 = vsel %vm6355_vm2, %v630_v26, %v634_v25  ;;  %v620_v39 = vrot.slane %v619_v27, 4  ;;  %v364_v28 = vld [vmem:[%s6341_s27 + $0x90] sm:$0xf] }
  0x47   : > { %v659_v40 = vor.u32 %v658_v30, %v6463_v29  ;;  %v682_v43 = vshll.u32 %v359_v36, 16  ;;  %v686_v44 = vshrl.u32 %v359_v36, 16  ;;  %v668_v45 = vrot.slane %v666_v32, 4 }
  0x48   : > { %v640_v42 = vrot.slane %v639_v33, 4  ;;  %v664_v47 = vrot.slane %v662_v37, 5  ;;  %v625_v50 = vsel %vm6355_vm2, %v620_v39, %v6443_v63  ;;  %v696_v52 = vshrl.u32 %v360_v48, 16 }
  0x49   : > { %811 = vrot.lane.b32.xlu0 %v535_v41, %s6282_s28  ;;  %v358_v41 = vld [vmem:[%s6341_s27 + $0x78] sm:$0xf]  ;;  %v660_v51 = vrot.slane %v659_v40, 4  ;;  %v6481_v55 = vrot.slane %v682_v43, 5  ;;  %v692_v60 = vshll.u32 %v360_v48, 16  ;;  %v716_v2 = vshrl.u32 %v362_v58, 16 }
  0x4a   : > { %815 = vrot.lane.b32.xlu2 %v555_v46, %s6282_s28  ;;  %v649_v46 = vor.u32 %v648_v35, %v644_v34  ;;  %v672_v49 = vshll.u32 %v358_v41, 16  ;;  %v676_v53 = vshrl.u32 %v358_v41, 16  ;;  %v645_v54 = vsel %vm6355_vm2, %v640_v42, %v644_v34  ;;  %v366_v35 = vld [vmem:[%s6341_s27 + $0x98] sm:$0xf] }
  0x4b   : > { %v669_v57 = vor.u32 %v668_v45, %v664_v47  ;;  %v698_v3 = vrot.slane %v696_v52, 4  ;;  %v665_v4 = vsel %vm6355_vm2, %v660_v51, %v664_v47  ;;  %v694_v7 = vrot.slane %v692_v60, 5  ;;  %v368_v51 = vld [vmem:[%s6341_s27 + $0xa0] sm:$0x7] }
  0x4c   : > { %v650_v59 = vrot.slane %v649_v46, 4  ;;  %v674_v61 = vrot.slane %v672_v49, 5  ;;  %v678_v63 = vrot.slane %v676_v53, 4  ;;  %v702_v8 = vshll.u32 %v361_v62, 16  ;;  %v367_v49 = vld [vmem:[%s6341_s27 + $0x9c] sm:$0xf] }
  0x4d   : > { %v706_v10 = vshrl.u32 %v361_v62, 16  ;;  %v718_v15 = vrot.slane %v716_v2, 4  ;;  %v699_v16 = vor.u32 %v698_v3, %v694_v7  ;;  %v722_v22 = vshll.u32 %v363_v13, 16  ;;  %v244_v52 = vld [vmem:[%s6341_s27] sm:$0xf] }
  0x4e   : > { %819 = vrot.lane.b32.xlu1 %v575_v56, %s6282_s28  ;;  %v688_v56 = vrot.slane %v686_v44, 4  ;;  %v655_v11 = vsel %vm6355_vm2, %v650_v59, %v6463_v29  ;;  %v679_v12 = vor.u32 %v678_v63, %v674_v61  ;;  %v704_v19 = vrot.slane %v702_v8, 5  ;;  %286 = vst.msk [vmem:[#allocation2] sm:$0xf] %vm285_vm3, %v244_v52  ;;  %v247_v8 = vld [vmem:[%s6341_s27 + $0xc] sm:$0xf] }
  0x4f   : > { %v708_v20 = vrot.slane %v706_v10, 4  ;;  %v700_v27 = vrot.slane %v699_v16, 4  ;;  %v742_v30 = vshll.u32 %v365_v21, 16  ;;  %v724_v34 = vrot.slane %v722_v22, 5  ;;  %289 = vst.msk [vmem:[#allocation2 + $0xc] sm:$0xf] %vm285_vm3, %v247_v8 }
  0x50   : > { %v689_v5 = vor.u32 %v688_v56, %v6481_v55  ;;  %v680_v25 = vrot.slane %v679_v12, 4  ;;  %v732_v36 = vshll.u32 %v364_v28, 16  ;;  %v736_v37 = vshrl.u32 %v364_v28, 16  ;;  %v958_v8 = vld [vmem:[%s6341_s27 + $0x2c] sm:$0xf] }
  0x51   : > { %817 = vrot.lane.b32.xlu0 %v565_v1, %s6282_s28  ;;  %v712_v1 = vshll.u32 %v362_v58, 16  ;;  %v709_v33 = vor.u32 %v708_v20, %v704_v19  ;;  %v705_v40 = vsel %vm6355_vm2, %v700_v27, %v704_v19  ;;  %v744_v41 = vrot.slane %v742_v30, 5  ;;  %v252_v58 = vld [vmem:[%s6341_s27 + $0x20] sm:$0xf]  ;;  %v949_v19 = vld [vmem:[%s6341_s27 + $0x8] sm:$0xf] }
  0x52   : > { %821 = vrot.lane.b32.xlu2 %v585_v6, %s6282_s28  ;;  %v670_v6 = vrot.slane %v669_v57, 4  ;;  %v690_v9 = vrot.slane %v689_v5, 4  ;;  %v756_v43 = vshrl.u32 %v366_v35, 16  ;;  %v752_v46 = vshll.u32 %v366_v35, 16  ;;  %294 = vst.msk [vmem:[#allocation2 + $0x20] sm:$0xf] %vm285_vm3, %v252_v58 }
  0x53   : > { %v6497_v14 = vrot.slane %v712_v1, 5  ;;  %v710_v45 = vrot.slane %v709_v33, 4  ;;  %v734_v47 = vrot.slane %v732_v36, 5  ;;  %v738_v48 = vrot.slane %v736_v37, 4  ;;  %v947_v20 = vld [vmem:[%s6341_s27] sm:$0xe] }
  0x54   : > { %v675_v17 = vsel %vm6355_vm2, %v670_v6, %v674_v61  ;;  %v695_v29 = vsel %vm6355_vm2, %v690_v9, %v694_v7  ;;  %v758_v56 = vrot.slane %v756_v43, 4  ;;  %v754_v57 = vrot.slane %v752_v46, 5  ;;  %v950_v30 = vld [vmem:[%s6341_s27 + $0xc] sm:$0xf]  ;;  %v953_v46 = vld [vmem:[%s6341_s27 + $0x18] sm:$0xf] }
  0x55   : > { %v719_v26 = vor.u32 %v718_v15, %v6497_v14  ;;  %v772_v59 = vshll.u32 %v368_v51, 16  ;;  %v776_v60 = vshrl.u32 %v368_v51, 16  ;;  %v762_v61 = vshll.u32 %v367_v49, 16  ;;  %v255_v15 = vld [vmem:[%s6341_s27 + $0x2c] sm:$0xf] }
  0x56   : > { %825 = vrot.lane.b32.xlu1 %v605_v18, %s6282_s28  ;;  %v726_v18 = vshrl.u32 %v363_v13, 16  ;;  %v766_v62 = vshrl.u32 %v367_v49, 16  ;;  %v715_v0 = vsel %vm6355_vm2, %v710_v45, %v6497_v14  ;;  %v739_v63 = vor.u32 %v738_v48, %v734_v47  ;;  %297 = vst.msk [vmem:[#allocation2 + $0x2c] sm:$0xf] %vm285_vm3, %v255_v15  ;;  %v256_v58 = vld [vmem:[%s6341_s27 + $0x30] sm:$0xf] }
  0x57   : > { %v720_v39 = vrot.slane %v719_v26, 4  ;;  %v759_v3 = vor.u32 %v758_v56, %v754_v57  ;;  %v778_v5 = vrot.slane %v776_v60, 4  ;;  %v764_v6 = vrot.slane %v762_v61, 5  ;;  %v250_v26 = vld [vmem:[%s6341_s27 + $0x18] sm:$0xf] }
  0x58   : > { %v728_v32 = vrot.slane %v726_v18, 4  ;;  %v768_v7 = vrot.slane %v766_v62, 4  ;;  %v740_v10 = vrot.slane %v739_v63, 4  ;;  %vm904_vm4 = vcmask 60448   ;;  %292 = vst.msk [vmem:[#allocation2 + $0x18] sm:$0xf] %vm285_vm3, %v250_v26 }
  0x59   : > { %823 = vrot.lane.b32.xlu0 %v595_v24, %s6282_s28  ;;  %v249_v24 = vld [vmem:[%s6341_s27 + $0x14] sm:$0xf]  ;;  %v725_v53 = vsel %vm6355_vm2, %v720_v39, %v724_v34  ;;  %v760_v13 = vrot.slane %v759_v3, 4  ;;  %vm1029_vm5 = vcmask 1042432   ;;  %vm1030_vm6 = vcmask 1046532  }
  0x5a   : > { %827 = vrot.lane.b32.xlu2 %v615_v31, %s6282_s28  ;;  %291 = vst.msk [vmem:[#allocation2 + $0x14] sm:$0xf] %vm285_vm3, %v249_v24  ;;  %v746_v31 = vshrl.u32 %v365_v21, 16  ;;  %v729_v44 = vor.u32 %v728_v32, %v724_v34  ;;  %v769_v9 = vor.u32 %v768_v7, %v764_v6  ;;  %v251_v24 = vld [vmem:[%s6341_s27 + $0x1c] sm:$0xf]  ;;  %v1037_v27 = vrot.slane %v949_v19, 5  ;;  %vm6561_vm7 = vmor %vm1029_vm5, %vm1030_vm6 }
  0x5b   : > { %v765_v18 = vsel %vm6355_vm2, %v760_v13, %v764_v6  ;;  %293 = vst.msk [vmem:[#allocation2 + $0x1c] sm:$0xf] %vm285_vm3, %v251_v24  ;;  %v5853_v28 = vrot.slane %v947_v20, 9  ;;  %v258_v32 = vld [vmem:[%s6341_s27 + $0x38] sm:$0xf]  ;;  %v1040_v36 = vrot.slane %v950_v30, 5 }
  0x5c   : > { %v748_v42 = vrot.slane %v746_v31, 4  ;;  %v770_v22 = vrot.slane %v769_v9, 4  ;;  %300 = vst.msk [vmem:[#allocation2 + $0x38] sm:$0xf] %vm285_vm3, %v258_v32  ;;  %v1039_v35 = vrot.slane %v1037_v27, 4  ;;  %v1049_v51 = vrot.slane %v953_v46, 5 }
  0x5d   : > { %v257_v56 = vld [vmem:[%s6341_s27 + $0x34] sm:$0xf]  ;;  %298 = vst.msk [vmem:[#allocation2 + $0x30] sm:$0xf] %vm285_vm3, %v256_v58  ;;  %v956_v63 = vld [vmem:[%s6341_s27 + $0x24] sm:$0xf] }
  0x5e   : > { %831 = vrot.lane.b32.xlu1 %v635_v38, %s6282_s28  ;;  %v685_v38 = vsel %vm6355_vm2, %v680_v25, %v6481_v55  ;;  %v730_v55 = vrot.slane %v729_v44, 4  ;;  %v948_v25 = vld [vmem:[%s6341_s27 + $0x4] sm:$0xf]  ;;  %v1042_v44 = vrot.slane %v1040_v36, 4  ;;  %299 = vst.msk [vmem:[#allocation2 + $0x34] sm:$0xf] %vm285_vm3, %v257_v56 }
  0x5f   : > { %v1034_v33 = vrot.slane %v948_v25, 5  ;;  %v1051_v62 = vrot.slane %v1049_v51, 4  ;;  %v259_v13 = vld [vmem:[%s6341_s27 + $0x3c] sm:$0xf]  ;;  %v960_v30 = vld [vmem:[%s6341_s27 + $0x34] sm:$0xf] }
  0x60   : > { %v735_v2 = vsel %vm6355_vm2, %v730_v55, %v734_v47  ;;  %v261_v47 = vld [vmem:[%s6341_s27 + $0x44] sm:$0xf]  ;;  %301 = vst.msk [vmem:[#allocation2 + $0x3c] sm:$0xf] %vm285_vm3, %v259_v13  ;;  %v267_v19 = vld [vmem:[%s6341_s27 + $0x5c] sm:$0xf] }
  0x61   : > { %829 = vrot.lane.b32.xlu0 %v625_v50, %s6282_s28  ;;  %v246_v50 = vld [vmem:[%s6341_s27 + $0x8] sm:$0xf]  ;;  %v1035_v37 = vsel %vm6561_vm7, %v5853_v28, %v1034_v33  ;;  %v1036_v39 = vrot.slane %v1034_v33, 4  ;;  %303 = vst.msk [vmem:[#allocation2 + $0x44] sm:$0xf] %vm285_vm3, %v261_v47  ;;  %vm326_vm8 = vcmask 25600  }
  0x62   : > { %833 = vrot.lane.b32.xlu2 %v645_v54, %s6282_s28  ;;  %288 = vst.msk [vmem:[#allocation2 + $0x8] sm:$0xf] %vm285_vm3, %v246_v50  ;;  %v749_v54 = vor.u32 %v748_v42, %v744_v41  ;;  %v1041_v42 = vsel %vm6561_vm7, %v1039_v35, %v1040_v36  ;;  %v262_v32 = vld [vmem:[%s6341_s27 + $0x48] sm:$0xf]  ;;  %v266_v47 = vld [vmem:[%s6341_s27 + $0x58] sm:$0xf] }
  0x63   : > { %v1038_v49 = vsel %vm6561_vm7, %v1036_v39, %v1037_v27  ;;  %309 = vst.msk [vmem:[#allocation2 + $0x5c] sm:$0xf] %vm285_vm3, %v267_v19  ;;  %v961_v27 = vld [vmem:[%s6341_s27 + $0x38] sm:$0xf]  ;;  %v270_v39 = vld [vmem:[%s6341_s27 + $0x68] sm:$0xf] }
  0x64   : > { %v750_v1 = vrot.slane %v749_v54, 4  ;;  %v955_v54 = vld [vmem:[%s6341_s27 + $0x20] sm:$0xf]  ;;  %v1073_v35 = vrot.slane %v961_v27, 5  ;;  %304 = vst.msk [vmem:[#allocation2 + $0x48] sm:$0xf] %vm285_vm3, %v262_v32 }
  0x65   : > { %v1055_v61 = vrot.slane %v955_v54, 5  ;;  %312 = vst.msk [vmem:[#allocation2 + $0x68] sm:$0xf] %vm285_vm3, %v270_v39  ;;  %v273_v56 = vld [vmem:[%s6341_s27 + $0x74] sm:$0xf]  ;;  %vm1277_vm9 = vcmask 93248  }
  0x66   : > { %837 = vrot.lane.b32.xlu1 %v665_v4, %s6282_s28  ;;  %v774_v4 = vrot.slane %v772_v59, 5  ;;  %v755_v12 = vsel %vm6355_vm2, %v750_v1, %v754_v57  ;;  %v954_v57 = vld [vmem:[%s6341_s27 + $0x1c] sm:$0xf]  ;;  %v264_v1 = vld [vmem:[%s6341_s27 + $0x50] sm:$0xf]  ;;  %v1075_v23 = vrot.slane %v1073_v35, 4 }
  0x67   : > { %306 = vst.msk [vmem:[#allocation2 + $0x50] sm:$0xf] %vm285_vm3, %v264_v1  ;;  %v269_v1 = vld [vmem:[%s6341_s27 + $0x64] sm:$0xf]  ;;  %v272_v19 = vld [vmem:[%s6341_s27 + $0x70] sm:$0xf] }
  0x68   : > { %v779_v16 = vor.u32 %v778_v5, %v774_v4  ;;  %v775_v34 = vsel %vm6355_vm2, %v770_v22, %v774_v4  ;;  %v1057_v4 = vrot.slane %v1055_v61, 4  ;;  %v1058_v5 = vrot.slane %v956_v63, 5  ;;  %308 = vst.msk [vmem:[#allocation2 + $0x58] sm:$0xf] %vm285_vm3, %v266_v47  ;;  %v275_v39 = vld [vmem:[%s6341_s27 + $0x7c] sm:$0xf] }
  0x69   : > { %835 = vrot.lane.b32.xlu0 %v655_v11, %s6282_s28  ;;  %v245_v11 = vld [vmem:[%s6341_s27 + $0x4] sm:$0xf]  ;;  %315 = vst.msk [vmem:[#allocation2 + $0x74] sm:$0xf] %vm285_vm3, %v273_v56  ;;  %v282_v47 = vld [vmem:[%s6341_s27 + $0x98] sm:$0xf] }
  0x6a   : > { %839 = vrot.lane.b32.xlu2 %v675_v17, %s6282_s28  ;;  %287 = vst.msk [vmem:[#allocation2 + $0x4] sm:$0xf] %vm285_vm3, %v245_v11  ;;  %v745_v17 = vsel %vm6355_vm2, %v740_v10, %v744_v41  ;;  %v780_v21 = vrot.slane %v779_v16, 4  ;;  %v951_v41 = vld [vmem:[%s6341_s27 + $0x10] sm:$0xf]  ;;  %v1059_v15 = vsel %vm6561_vm7, %v1057_v4, %v1058_v5  ;;  %v1064_v16 = vrot.slane %v958_v8, 5 }
  0x6b   : > { %v1043_v48 = vrot.slane %v951_v41, 5  ;;  %v260_v11 = vld [vmem:[%s6341_s27 + $0x40] sm:$0xf]  ;;  %v1060_v9 = vrot.slane %v1058_v5, 4  ;;  %311 = vst.msk [vmem:[#allocation2 + $0x64] sm:$0xf] %vm285_vm3, %v269_v1 }
  0x6c   : > { %302 = vst.msk [vmem:[#allocation2 + $0x40] sm:$0xf] %vm285_vm3, %v260_v11  ;;  %v1066_v22 = vrot.slane %v1064_v16, 4  ;;  %v276_v11 = vld [vmem:[%s6341_s27 + $0x80] sm:$0xf]  ;;  %vm945_vm10 = vcmask 58400  }
  0x6d   : > { %v1044_v52 = vsel %vm6561_vm7, %v1042_v44, %v1043_v48  ;;  %v1045_v55 = vrot.slane %v1043_v48, 4  ;;  %v963_v48 = vld [vmem:[%s6341_s27 + $0x40] sm:$0xf]  ;;  %318 = vst.msk [vmem:[#allocation2 + $0x80] sm:$0xf] %vm285_vm3, %v276_v11  ;;  %vm1647_vm11 = vcmask 126048  }
  0x6e   : > { %843 = vrot.lane.b32.xlu1 %v695_v29, %s6282_s28  ;;  %314 = vst.msk [vmem:[#allocation2 + $0x70] sm:$0xf] %vm285_vm3, %v272_v19  ;;  %v278_v56 = vld [vmem:[%s6341_s27 + $0x88] sm:$0xf]  ;;  %v978_v11 = vld [vmem:[%s6341_s27 + $0x7c] sm:$0xf] }
  0x6f   : > { %317 = vst.msk [vmem:[#allocation2 + $0x7c] sm:$0xf] %vm285_vm3, %v275_v39  ;;  %vm1731_vm12 = vsmask.f32 2304  ;;  %vm1732_vm13 = vsmask.f32 6416 }
  0x70   : > { %324 = vst.msk [vmem:[#allocation2 + $0x98] sm:$0xf] %vm285_vm3, %v282_v47  ;;  %vm7034_vm14 = vmor %vm1731_vm12, %vm1732_vm13  ;;  %vm1318_vm15 = vcmask 91200   ;;  %vm1688_vm0 = vcmask 124000   ;;  %vm2266_vm1 = vcmask 158848   ;;  %vm2391_vm2 = vcmask 1041408  }
  0x71   : > { %841 = vrot.lane.b32.xlu0 %v685_v38, %s6282_s28  ;;  %v952_v38 = vld [vmem:[%s6341_s27 + $0x14] sm:$0xf]  ;;  %320 = vst.msk [vmem:[#allocation2 + $0x88] sm:$0xf] %vm285_vm3, %v278_v56  ;;  %vm2639_vm5 = vcmask 191648   ;;  %vm2307_vm6 = vcmask 156800  }
  0x72   : > { %845 = vrot.lane.b32.xlu2 %v705_v40, %s6282_s28  ;;  %v254_v40 = vld [vmem:[%s6341_s27 + $0x28] sm:$0xf]  ;;  %v1046_v43 = vrot.slane %v952_v38, 5  ;;  %v962_v38 = vld [vmem:[%s6341_s27 + $0x3c] sm:$0xf]  ;;  %vm3050_vm12 = vcmask 222400  }
  0x73   : > { %296 = vst.msk [vmem:[#allocation2 + $0x28] sm:$0xf] %vm285_vm3, %v254_v40  ;;  %v1070_v40 = vrot.slane %v960_v30, 5  ;;  %vm3634_vm13 = vcmask 257248  }
  0x74   : > { %v1048_v50 = vrot.slane %v1046_v43, 4  ;;  %v1047_v3 = vsel %vm6561_vm7, %v1045_v55, %v1046_v43  ;;  %v965_v55 = vld [vmem:[%s6341_s27 + $0x48] sm:$0xf] }
  0x75   : > { %v1072_v46 = vrot.slane %v1070_v40, 4 }
  0x76   : > { %849 = vrot.lane.b32.xlu1 %v725_v53, %s6282_s28  ;;  %v1050_v60 = vsel %vm6561_vm7, %v1048_v50, %v1049_v51 }
  0x77   : > { %v1074_v58 = vsel %vm6561_vm7, %v1072_v46, %v1073_v35  ;;  %v974_v46 = vld [vmem:[%s6341_s27 + $0x6c] sm:$0xf] }
  0x79   : > { %847 = vrot.lane.b32.xlu0 %v715_v0, %s6282_s28 }
  0x7a   : > { %851 = vrot.lane.b32.xlu2 %v735_v2, %s6282_s28  ;;  %v1052_v2 = vrot.slane %v954_v57, 5  ;;  %v1079_v57 = vrot.slane %v963_v48, 5 }
  0x7c   : > { %v790_v14 = vpop.permute.xlu2 %789  ;;  %v1053_v6 = vsel %vm6561_vm7, %v1051_v62, %v1052_v2  ;;  %v1054_v10 = vrot.slane %v1052_v2, 4  ;;  %v1081_v63 = vrot.slane %v1079_v57, 4  ;;  %v966_v2 = vld [vmem:[%s6341_s27 + $0x4c] sm:$0xf] }
  0x7d   : > { %909 = vst.msk [vmem:[#allocation2 + $0x10] sm:$0xf] %vm904_vm4, %v790_v14 }
  0x7e   : > { %855 = vrot.lane.b32.xlu1 %v755_v12, %s6282_s28  ;;  %v957_v12 = vld [vmem:[%s6341_s27 + $0x28] sm:$0xf] }
  0x7f   : > { %v1061_v20 = vrot.slane %v957_v12, 5  ;;  %v1088_v12 = vrot.slane %v966_v2, 5 }
  0x81   : > { %853 = vrot.lane.b32.xlu0 %v745_v17, %s6282_s28  ;;  %v1062_v25 = vsel %vm6561_vm7, %v1060_v9, %v1061_v20  ;;  %v1063_v28 = vrot.slane %v1061_v20, 4  ;;  %v969_v20 = vld [vmem:[%s6341_s27 + $0x58] sm:$0xf] }
  0x82   : > { %857 = vrot.lane.b32.xlu2 %v765_v18, %s6282_s28  ;;  %v959_v18 = vld [vmem:[%s6341_s27 + $0x30] sm:$0xf]  ;;  %v1097_v30 = vrot.slane %v969_v20, 5 }
  0x83   : > { %v1067_v24 = vrot.slane %v959_v18, 5  ;;  %v1065_v41 = vsel %vm6561_vm7, %v1063_v28, %v1064_v16  ;;  %v1090_v18 = vrot.slane %v1088_v12, 4  ;;  %v971_v28 = vld [vmem:[%s6341_s27 + $0x60] sm:$0xf] }
  0x84   : > { %v792_v29 = vpop.permute.xlu2 %791 }
  0x85   : > { %910 = vst.msk [vmem:[#allocation2 + $0x14] sm:$0xf] %vm904_vm4, %v792_v29  ;;  %v263_v29 = vld [vmem:[%s6341_s27 + $0x4c] sm:$0xf]  ;;  %v1069_v36 = vrot.slane %v1067_v24, 4 }
  0x86   : > { %861 = vrot.lane.b32.xlu1 %v780_v21, %s6282_s28  ;;  %v1056_v21 = vsel %vm6561_vm7, %v1054_v10, %v1055_v61  ;;  %305 = vst.msk [vmem:[#allocation2 + $0x4c] sm:$0xf] %vm285_vm3, %v263_v29  ;;  %v968_v10 = vld [vmem:[%s6341_s27 + $0x54] sm:$0xf]  ;;  %v279_v29 = vld [vmem:[%s6341_s27 + $0x8c] sm:$0xf] }
  0x87   : > { %v1071_v43 = vsel %vm6561_vm7, %v1069_v36, %v1070_v40  ;;  %321 = vst.msk [vmem:[#allocation2 + $0x8c] sm:$0xf] %vm285_vm3, %v279_v29  ;;  %v972_v40 = vld [vmem:[%s6341_s27 + $0x64] sm:$0xf]  ;;  %v283_v29 = vld [vmem:[%s6341_s27 + $0x9c] sm:$0xf] }
  0x88   : > { %v1106_v48 = vrot.slane %v972_v40, 5  ;;  %325 = vst.msk [vmem:[#allocation2 + $0x9c] sm:$0xf] %vm285_vm3, %v283_v29 }
  0x89   : > { %859 = vrot.lane.b32.xlu0 %v775_v34, %s6282_s28  ;;  %v1068_v34 = vsel %vm6561_vm7, %v1066_v22, %v1067_v24 }
  0x8a   : > { %1154 = vrot.lane.b32.xlu2 %v1035_v37, %s6283_s29 }
  0x8c   : > { %v798_v45 = vpop.permute.xlu2 %797 }
  0x8d   : > { %913 = vst.msk [vmem:[#allocation2 + $0x20] sm:$0xf] %vm904_vm4, %v798_v45  ;;  %v964_v45 = vld [vmem:[%s6341_s27 + $0x44] sm:$0xf] }
  0x8e   : > { %1158 = vrot.lane.b32.xlu1 %v1041_v42, %s6283_s29  ;;  %v1076_v42 = vrot.slane %v962_v38, 5  ;;  %v1099_v38 = vrot.slane %v1097_v30, 4 }
  0x90   : > { %v786_v53 = vpop.permute.xlu1 %785  ;;  %v1077_v51 = vsel %vm6561_vm7, %v1075_v23, %v1076_v42 }
  0x91   : > { %1156 = vrot.lane.b32.xlu0 %v1038_v49, %s6283_s29  ;;  %907 = vst.msk [vmem:[#allocation2 + $0x8] sm:$0xf] %vm904_vm4, %v786_v53  ;;  %v265_v49 = vld [vmem:[%s6341_s27 + $0x54] sm:$0xf]  ;;  %v1078_v53 = vrot.slane %v1076_v42, 4 }
  0x92   : > { %1160 = vrot.lane.b32.xlu2 %v1044_v52, %s6283_s29  ;;  %v1082_v52 = vrot.slane %v964_v45, 5  ;;  %307 = vst.msk [vmem:[#allocation2 + $0x54] sm:$0xf] %vm285_vm3, %v265_v49 }
  0x93   : > { %v782_v59 = vpop.permute.xlu0 %781  ;;  %v1080_v61 = vsel %vm6561_vm7, %v1078_v53, %v1079_v57  ;;  %v975_v57 = vld [vmem:[%s6341_s27 + $0x70] sm:$0xf] }
  0x94   : > { %905 = vst.msk [vmem:[#allocation2] sm:$0xf] %vm904_vm4, %v782_v59  ;;  %v804_v0 = vpop.permute.xlu2 %803  ;;  %v1084_v59 = vrot.slane %v1082_v52, 4  ;;  %v1083_v13 = vsel %vm6561_vm7, %v1081_v63, %v1082_v52  ;;  %v977_v63 = vld [vmem:[%s6341_s27 + $0x78] sm:$0xf]  ;;  %v1115_v1 = vrot.slane %v975_v57, 5 }
  0x95   : > { %916 = vst.msk [vmem:[#allocation2 + $0x2c] sm:$0xf] %vm904_vm4, %v804_v0  ;;  %v967_v0 = vld [vmem:[%s6341_s27 + $0x50] sm:$0xf] }
  0x96   : > { %1164 = vrot.lane.b32.xlu1 %v1050_v60, %s6283_s29  ;;  %v1085_v60 = vrot.slane %v965_v55, 5  ;;  %v1108_v55 = vrot.slane %v1106_v48, 4 }
  0x98   : > { %v788_v7 = vpop.permute.xlu1 %787  ;;  %v1086_v5 = vsel %vm6561_vm7, %v1084_v59, %v1085_v60 }
  0x99   : > { %1162 = vrot.lane.b32.xlu0 %v1047_v3, %s6283_s29  ;;  %908 = vst.msk [vmem:[#allocation2 + $0xc] sm:$0xf] %vm904_vm4, %v788_v7  ;;  %v268_v3 = vld [vmem:[%s6341_s27 + $0x60] sm:$0xf]  ;;  %v1087_v7 = vrot.slane %v1085_v60, 4 }
  0x9a   : > { %1166 = vrot.lane.b32.xlu2 %v1053_v6, %s6283_s29  ;;  %v1091_v6 = vrot.slane %v967_v0, 5  ;;  %310 = vst.msk [vmem:[#allocation2 + $0x60] sm:$0xf] %vm285_vm3, %v268_v3 }
  0x9b   : > { %v784_v14 = vpop.permute.xlu0 %783  ;;  %v1089_v16 = vsel %vm6561_vm7, %v1087_v7, %v1088_v12  ;;  %v979_v7 = vld [vmem:[%s6341_s27 + $0x80] sm:$0xf]  ;;  %v280_v12 = vld [vmem:[%s6341_s27 + $0x90] sm:$0xf] }
  0x9c   : > { %906 = vst.msk [vmem:[#allocation2 + $0x4] sm:$0xf] %vm904_vm4, %v784_v14  ;;  %v810_v17 = vpop.permute.xlu2 %809  ;;  %v1093_v14 = vrot.slane %v1091_v6, 4  ;;  %v1092_v32 = vsel %vm6561_vm7, %v1090_v18, %v1091_v6  ;;  %v1124_v18 = vrot.slane %v978_v11, 5 }
  0x9d   : > { %919 = vst.msk [vmem:[#allocation2 + $0x38] sm:$0xf] %vm904_vm4, %v810_v17  ;;  %v970_v17 = vld [vmem:[%s6341_s27 + $0x5c] sm:$0xf] }
  0x9e   : > { %1170 = vrot.lane.b32.xlu1 %v1059_v15, %s6283_s29  ;;  %v1094_v15 = vrot.slane %v968_v10, 5  ;;  %v281_v10 = vld [vmem:[%s6341_s27 + $0x94] sm:$0xf]  ;;  %322 = vst.msk [vmem:[#allocation2 + $0x90] sm:$0xf] %vm285_vm3, %v280_v12 }
  0x9f   : > { %323 = vst.msk [vmem:[#allocation2 + $0x94] sm:$0xf] %vm285_vm3, %v281_v10 }
  0xa0   : > { %v796_v26 = vpop.permute.xlu1 %795  ;;  %v1095_v24 = vsel %vm6561_vm7, %v1093_v14, %v1094_v15 }
  0xa1   : > { %1168 = vrot.lane.b32.xlu0 %v1056_v21, %s6283_s29  ;;  %912 = vst.msk [vmem:[#allocation2 + $0x1c] sm:$0xf] %vm904_vm4, %v796_v26  ;;  %v271_v21 = vld [vmem:[%s6341_s27 + $0x6c] sm:$0xf]  ;;  %v1096_v26 = vrot.slane %v1094_v15, 4  ;;  %v1127_v15 = vrot.slane %v979_v7, 5 }
  0xa2   : > { %1172 = vrot.lane.b32.xlu2 %v1062_v25, %s6283_s29  ;;  %v1100_v25 = vrot.slane %v970_v17, 5  ;;  %313 = vst.msk [vmem:[#allocation2 + $0x6c] sm:$0xf] %vm285_vm3, %v271_v21  ;;  %v980_v17 = vld [vmem:[%s6341_s27 + $0x84] sm:$0xf] }
  0xa3   : > { %v794_v33 = vpop.permute.xlu0 %793  ;;  %v1098_v35 = vsel %vm6561_vm7, %v1096_v26, %v1097_v30  ;;  %v1129_v20 = vrot.slane %v1127_v15, 4  ;;  %v1130_v21 = vrot.slane %v980_v17, 5  ;;  %v1126_v26 = vrot.slane %v1124_v18, 4  ;;  %v1323_v7 = vld [vmem:[%s6341_s27 + $0x14] sm:$0xf] }
  0xa4   : > { %911 = vst.msk [vmem:[#allocation2 + $0x18] sm:$0xf] %vm904_vm4, %v794_v33  ;;  %v816_v37 = vpop.permute.xlu2 %815  ;;  %v1102_v33 = vrot.slane %v1100_v25, 4  ;;  %v1101_v49 = vsel %vm6561_vm7, %v1099_v38, %v1100_v25  ;;  %v982_v25 = vld [vmem:[%s6341_s27 + $0x8c] sm:$0xf]  ;;  %v1410_v12 = vrot.slane %v1323_v7, 5 }
  0xa5   : > { %922 = vst.msk [vmem:[#allocation2 + $0x44] sm:$0xf] %vm904_vm4, %v816_v37  ;;  %v973_v37 = vld [vmem:[%s6341_s27 + $0x68] sm:$0xf]  ;;  %v1128_v38 = vsel %vm6561_vm7, %v1126_v26, %v1127_v15  ;;  %v1324_v15 = vld [vmem:[%s6341_s27 + $0x18] sm:$0xf] }
  0xa6   : > { %1176 = vrot.lane.b32.xlu1 %v1068_v34, %s6283_s29  ;;  %v1103_v34 = vrot.slane %v971_v28, 5  ;;  %v981_v28 = vld [vmem:[%s6341_s27 + $0x88] sm:$0xf]  ;;  %v1412_v17 = vrot.slane %v1410_v12, 4 }
  0xa8   : > { %v802_v44 = vpop.permute.xlu1 %801  ;;  %v1104_v42 = vsel %vm6561_vm7, %v1102_v33, %v1103_v34  ;;  %v1136_v33 = vrot.slane %v982_v25, 5 }
  0xa9   : > { %1174 = vrot.lane.b32.xlu0 %v1065_v41, %s6283_s29  ;;  %915 = vst.msk [vmem:[#allocation2 + $0x28] sm:$0xf] %vm904_vm4, %v802_v44  ;;  %v274_v41 = vld [vmem:[%s6341_s27 + $0x78] sm:$0xf]  ;;  %v1105_v44 = vrot.slane %v1103_v34, 4  ;;  %v1132_v34 = vrot.slane %v1130_v21, 4 }
  0xaa   : > { %1178 = vrot.lane.b32.xlu2 %v1071_v43, %s6283_s29  ;;  %v1109_v43 = vrot.slane %v973_v37, 5  ;;  %316 = vst.msk [vmem:[#allocation2 + $0x78] sm:$0xf] %vm285_vm3, %v274_v41  ;;  %v1133_v37 = vrot.slane %v981_v28, 5  ;;  %v1138_v39 = vrot.slane %v1136_v33, 4 }
  0xab   : > { %v800_v50 = vpop.permute.xlu0 %799  ;;  %v1107_v52 = vsel %vm6561_vm7, %v1105_v44, %v1106_v48  ;;  %v984_v44 = vld [vmem:[%s6341_s27 + $0x94] sm:$0xf] }
  0xac   : > { %914 = vst.msk [vmem:[#allocation2 + $0x24] sm:$0xf] %vm904_vm4, %v800_v50  ;;  %v822_v54 = vpop.permute.xlu2 %821  ;;  %v1111_v50 = vrot.slane %v1109_v43, 4  ;;  %v1110_v2 = vsel %vm6561_vm7, %v1108_v55, %v1109_v43  ;;  %v1134_v41 = vsel %vm6561_vm7, %v1132_v34, %v1133_v37  ;;  %v1135_v43 = vrot.slane %v1133_v37, 4 }
  0xad   : > { %925 = vst.msk [vmem:[#allocation2 + $0x50] sm:$0xf] %vm904_vm4, %v822_v54  ;;  %v976_v54 = vld [vmem:[%s6341_s27 + $0x74] sm:$0xf] }
  0xae   : > { %1182 = vrot.lane.b32.xlu1 %v1077_v51, %s6283_s29  ;;  %v1112_v51 = vrot.slane %v974_v46, 5 }
  0xb0   : > { %v808_v62 = vpop.permute.xlu1 %807  ;;  %v1113_v60 = vsel %vm6561_vm7, %v1111_v50, %v1112_v51  ;;  %v986_v50 = vld [vmem:[%s6341_s27 + $0x9c] sm:$0xf] }
  0xb1   : > { %1180 = vrot.lane.b32.xlu0 %v1074_v58, %s6283_s29  ;;  %918 = vst.msk [vmem:[#allocation2 + $0x34] sm:$0xf] %vm904_vm4, %v808_v62  ;;  %v277_v58 = vld [vmem:[%s6341_s27 + $0x84] sm:$0xf]  ;;  %v1114_v62 = vrot.slane %v1112_v51, 4  ;;  %v1142_v51 = vrot.slane %v984_v44, 5 }
  0xb2   : > { %1184 = vrot.lane.b32.xlu2 %v1080_v61, %s6283_s29  ;;  %v1118_v61 = vrot.slane %v976_v54, 5  ;;  %319 = vst.msk [vmem:[#allocation2 + $0x84] sm:$0xf] %vm285_vm3, %v277_v58  ;;  %v1148_v54 = vrot.slane %v986_v50, 5  ;;  %v987_v58 = vld [vmem:[%s6341_s27 + $0xa0] sm:$0x7] }
  0xb3   : > { %v806_v4 = vpop.permute.xlu0 %805  ;;  %v1144_v57 = vrot.slane %v1142_v51, 4  ;;  %vm2392_vm3 = vcmask 1045508  }
  0xb4   : > { %917 = vst.msk [vmem:[#allocation2 + $0x30] sm:$0xf] %vm904_vm4, %v806_v4  ;;  %v828_v8 = vpop.permute.xlu2 %827  ;;  %v1120_v3 = vrot.slane %v1118_v61, 4  ;;  %v1121_v4 = vrot.slane %v977_v63, 5  ;;  %v1321_v63 = vld [vmem:[%s6341_s27 + $0xc] sm:$0xf] }
  0xb5   : > { %928 = vst.msk [vmem:[#allocation2 + $0x5c] sm:$0xf] %vm904_vm4, %v828_v8  ;;  %v1117_v8 = vrot.slane %v1115_v1, 4 }
  0xb6   : > { %1188 = vrot.lane.b32.xlu1 %v1086_v5, %s6283_s29  ;;  %v1116_v5 = vsel %vm6561_vm7, %v1114_v62, %v1115_v1  ;;  %v1122_v14 = vsel %vm6561_vm7, %v1120_v3, %v1121_v4  ;;  %v1151_v1 = vrot.slane %v987_v58, 5 }
  0xb7   : > { %v1119_v19 = vsel %vm6561_vm7, %v1117_v8, %v1118_v61  ;;  %v1150_v61 = vrot.slane %v1148_v54, 4  ;;  %v1322_v8 = vld [vmem:[%s6341_s27 + $0x10] sm:$0xf] }
  0xb8   : > { %v814_v9 = vpop.permute.xlu1 %813 }
  0xb9   : > { %1186 = vrot.lane.b32.xlu0 %v1083_v13, %s6283_s29  ;;  %921 = vst.msk [vmem:[#allocation2 + $0x40] sm:$0xf] %vm904_vm4, %v814_v9 }
  0xba   : > { %1190 = vrot.lane.b32.xlu2 %v1089_v16, %s6283_s29  ;;  %v1123_v16 = vrot.slane %v1121_v4, 4  ;;  %v1404_v4 = vrot.slane %v1321_v63, 5 }
  0xbb   : > { %v812_v22 = vpop.permute.xlu0 %811 }
  0xbc   : > { %920 = vst.msk [vmem:[#allocation2 + $0x3c] sm:$0xf] %vm904_vm4, %v812_v22  ;;  %v834_v27 = vpop.permute.xlu2 %833  ;;  %v1125_v22 = vsel %vm6561_vm7, %v1123_v16, %v1124_v18  ;;  %v1153_v16 = vrot.slane %v1151_v1, 4  ;;  %v1413_v18 = vrot.slane %v1324_v15, 5 }
  0xbd   : > { %931 = vst.msk [vmem:[#allocation2 + $0x68] sm:$0xf] %vm904_vm4, %v834_v27  ;;  %v284_v27 = vld [vmem:[%s6341_s27 + $0xa0] sm:$0x3] }
  0xbe   : > { %1194 = vrot.lane.b32.xlu1 %v1095_v24, %s6283_s29  ;;  %327 = vst.msk [vmem:[#allocation2 + $0xa0] sm:$0x3] %vm326_vm8, %v284_v27  ;;  %v1414_v26 = vsel %vm6561_vm7, %v1412_v17, %v1413_v18  ;;  %v1415_v28 = vrot.slane %v1413_v18, 4  ;;  %v1338_v18 = vld [vmem:[%s6341_s27 + $0x50] sm:$0xf] }
  0xbf   : > { %vm3094_vm8 = vsmask.f32 1280 }
  0xc0   : > { %v820_v36 = vpop.permute.xlu1 %819 }
  0xc1   : > { %1192 = vrot.lane.b32.xlu0 %v1092_v32, %s6283_s29  ;;  %924 = vst.msk [vmem:[#allocation2 + $0x4c] sm:$0xf] %vm904_vm4, %v820_v36  ;;  %v1131_v32 = vsel %vm6561_vm7, %v1129_v20, %v1130_v21  ;;  %v983_v36 = vld [vmem:[%s6341_s27 + $0x90] sm:$0xf]  ;;  %v1326_v21 = vld [vmem:[%s6341_s27 + $0x20] sm:$0xf] }
  0xc2   : > { %1196 = vrot.lane.b32.xlu2 %v1098_v35, %s6283_s29  ;;  %v1139_v40 = vrot.slane %v983_v36, 5  ;;  %v1419_v27 = vrot.slane %v1326_v21, 5 }
  0xc3   : > { %v818_v23 = vpop.permute.xlu0 %817 }
  0xc4   : > { %923 = vst.msk [vmem:[#allocation2 + $0x48] sm:$0xf] %vm904_vm4, %v818_v23  ;;  %v840_v45 = vpop.permute.xlu2 %839  ;;  %v1140_v46 = vsel %vm6561_vm7, %v1138_v39, %v1139_v40  ;;  %v1141_v48 = vrot.slane %v1139_v40, 4  ;;  %v1421_v34 = vrot.slane %v1419_v27, 4  ;;  %v1328_v40 = vld [vmem:[%s6341_s27 + $0x28] sm:$0xf] }
  0xc5   : > { %934 = vst.msk [vmem:[#allocation2 + $0x74] sm:$0xf] %vm904_vm4, %v840_v45 }
  0xc6   : > { %1200 = vrot.lane.b32.xlu1 %v1104_v42, %s6283_s29  ;;  %v985_v42 = vld [vmem:[%s6341_s27 + $0x98] sm:$0xf]  ;;  %v1143_v55 = vsel %vm6561_vm7, %v1141_v48, %v1142_v51 }
  0xc7   : > { %v1145_v47 = vrot.slane %v985_v42, 5 }
  0xc8   : > { %v826_v53 = vpop.permute.xlu1 %825 }
  0xc9   : > { %1198 = vrot.lane.b32.xlu0 %v1101_v49, %s6283_s29  ;;  %927 = vst.msk [vmem:[#allocation2 + $0x58] sm:$0xf] %vm904_vm4, %v826_v53  ;;  %v1147_v53 = vrot.slane %v1145_v47, 4 }
  0xca   : > { %1202 = vrot.lane.b32.xlu2 %v1107_v52, %s6283_s29  ;;  %v1137_v52 = vsel %vm6561_vm7, %v1135_v43, %v1136_v33 }
  0xcb   : > { %v824_v59 = vpop.permute.xlu0 %823 }
  0xcc   : > { %926 = vst.msk [vmem:[#allocation2 + $0x54] sm:$0xf] %vm904_vm4, %v824_v59  ;;  %v846_v0 = vpop.permute.xlu2 %845 }
  0xcd   : > { %937 = vst.msk [vmem:[#allocation2 + $0x80] sm:$0xf] %vm904_vm4, %v846_v0  ;;  %v1320_v0 = vld [vmem:[%s6341_s27 + $0x8] sm:$0xe] }
  0xce   : > { %1206 = vrot.lane.b32.xlu1 %v1113_v60, %s6283_s29  ;;  %v1149_v60 = vsel %vm6561_vm7, %v1147_v53, %v1148_v54  ;;  %v5854_v3 = vrot.slane %v1320_v0, 9  ;;  %v1331_v54 = vld [vmem:[%s6341_s27 + $0x34] sm:$0xf] }
  0xd0   : > { %v832_v6 = vpop.permute.xlu1 %831  ;;  %v1405_v11 = vsel %vm6561_vm7, %v5854_v3, %v1404_v4  ;;  %v1335_v3 = vld [vmem:[%s6341_s27 + $0x44] sm:$0xf] }
  0xd1   : > { %1204 = vrot.lane.b32.xlu0 %v1110_v2, %s6283_s29  ;;  %930 = vst.msk [vmem:[#allocation2 + $0x64] sm:$0xf] %vm904_vm4, %v832_v6  ;;  %v1146_v2 = vsel %vm6561_vm7, %v1144_v57, %v1145_v47 }
  0xd2   : > { %1208 = vrot.lane.b32.xlu2 %v1116_v5, %s6283_s29  ;;  %v1152_v5 = vsel %vm6561_vm7, %v1150_v61, %v1151_v1  ;;  %v1434_v61 = vrot.slane %v1331_v54, 5 }
  0xd3   : > { %v830_v13 = vpop.permute.xlu0 %829 }
  0xd4   : > { %929 = vst.msk [vmem:[#allocation2 + $0x60] sm:$0xf] %vm904_vm4, %v830_v13  ;;  %v852_v9 = vpop.permute.xlu2 %851  ;;  %v1406_v13 = vrot.slane %v1404_v4, 4  ;;  %v1436_v4 = vrot.slane %v1434_v61, 4 }
  0xd5   : > { %940 = vst.msk [vmem:[#allocation2 + $0x8c] sm:$0xf] %vm904_vm4, %v852_v9  ;;  %v1407_v9 = vrot.slane %v1322_v8, 5  ;;  %v1446_v8 = vrot.slane %v1335_v3, 5 }
  0xd6   : > { %1212 = vrot.lane.b32.xlu1 %v1122_v14, %s6283_s29 }
  0xd7   : > { %v1448_v15 = vrot.slane %v1446_v8, 4 }
  0xd8   : > { %v838_v24 = vpop.permute.xlu1 %837 }
  0xd9   : > { %1210 = vrot.lane.b32.xlu0 %v1119_v19, %s6283_s29  ;;  %933 = vst.msk [vmem:[#allocation2 + $0x70] sm:$0xf] %vm904_vm4, %v838_v24  ;;  %v1408_v19 = vsel %vm6561_vm7, %v1406_v13, %v1407_v9  ;;  %v1325_v24 = vld [vmem:[%s6341_s27 + $0x1c] sm:$0xf] }
  0xda   : > { %1214 = vrot.lane.b32.xlu2 %v1125_v22, %s6283_s29  ;;  %v1409_v22 = vrot.slane %v1407_v9, 4 }
  0xdb   : > { %v836_v30 = vpop.permute.xlu0 %835 }
  0xdc   : > { %932 = vst.msk [vmem:[#allocation2 + $0x6c] sm:$0xf] %vm904_vm4, %v836_v30  ;;  %v858_v35 = vpop.permute.xlu2 %857  ;;  %v1327_v30 = vld [vmem:[%s6341_s27 + $0x24] sm:$0xf]  ;;  %v1411_v33 = vsel %vm6561_vm7, %v1409_v22, %v1410_v12  ;;  %v1336_v12 = vld [vmem:[%s6341_s27 + $0x48] sm:$0xf] }
  0xdd   : > { %943 = vst.msk [vmem:[#allocation2 + $0x98] sm:$0xf] %vm904_vm4, %v858_v35  ;;  %v1422_v35 = vrot.slane %v1327_v30, 5 }
  0xde   : > { %1218 = vrot.lane.b32.xlu1 %v1131_v32, %s6283_s29  ;;  %v1416_v32 = vrot.slane %v1325_v24, 5  ;;  %v1455_v24 = vrot.slane %v1338_v18, 5 }
  0xdf   : > { %v1424_v43 = vrot.slane %v1422_v35, 4 }
  0xe0   : > { %v844_v23 = vpop.permute.xlu1 %843  ;;  %v1417_v36 = vsel %vm6561_vm7, %v1415_v28, %v1416_v32  ;;  %v1418_v39 = vrot.slane %v1416_v32, 4  ;;  %v1457_v30 = vrot.slane %v1455_v24, 4 }
  0xe1   : > { %1216 = vrot.lane.b32.xlu0 %v1128_v38, %s6283_s29  ;;  %936 = vst.msk [vmem:[#allocation2 + $0x7c] sm:$0xf] %vm904_vm4, %v844_v23  ;;  %v1329_v38 = vld [vmem:[%s6341_s27 + $0x2c] sm:$0xf]  ;;  %v1423_v23 = vsel %vm6561_vm7, %v1421_v34, %v1422_v35  ;;  %v1341_v35 = vld [vmem:[%s6341_s27 + $0x5c] sm:$0xf] }
  0xe2   : > { %1220 = vrot.lane.b32.xlu2 %v1134_v41, %s6283_s29  ;;  %v1428_v42 = vrot.slane %v1329_v38, 5  ;;  %v1420_v47 = vsel %vm6561_vm7, %v1418_v39, %v1419_v27  ;;  %v1339_v27 = vld [vmem:[%s6341_s27 + $0x54] sm:$0xf] }
  0xe3   : > { %v842_v45 = vpop.permute.xlu0 %841  ;;  %v1458_v32 = vrot.slane %v1339_v27, 5 }
  0xe4   : > { %935 = vst.msk [vmem:[#allocation2 + $0x78] sm:$0xf] %vm904_vm4, %v842_v45  ;;  %v1155_v49 = vpop.permute.xlu2 %1154  ;;  %v1330_v45 = vld [vmem:[%s6341_s27 + $0x30] sm:$0xf]  ;;  %v1430_v48 = vrot.slane %v1428_v42, 4 }
  0xe5   : > { %1278 = vst.msk [vmem:[#allocation2] sm:$0xf] %vm1277_vm9, %v1155_v49  ;;  %v1431_v49 = vrot.slane %v1330_v45, 5  ;;  %v1459_v39 = vsel %vm6561_vm7, %v1457_v30, %v1458_v32 }
  0xe6   : > { %1224 = vrot.lane.b32.xlu1 %v1140_v46, %s6283_s29  ;;  %v1425_v46 = vrot.slane %v1328_v40, 5  ;;  %v1464_v40 = vrot.slane %v1341_v35, 5 }
  0xe7   : > { %v1433_v58 = vrot.slane %v1431_v49, 4 }
  0xe8   : > { %v850_v56 = vpop.permute.xlu1 %849  ;;  %v1426_v50 = vsel %vm6561_vm7, %v1424_v43, %v1425_v46  ;;  %v1427_v53 = vrot.slane %v1425_v46, 4  ;;  %v1466_v45 = vrot.slane %v1464_v40, 4 }
  0xe9   : > { %1222 = vrot.lane.b32.xlu0 %v1137_v52, %s6283_s29  ;;  %939 = vst.msk [vmem:[#allocation2 + $0x88] sm:$0xf] %vm904_vm4, %v850_v56  ;;  %v1332_v52 = vld [vmem:[%s6341_s27 + $0x38] sm:$0xf]  ;;  %v1432_v56 = vsel %vm6561_vm7, %v1430_v48, %v1431_v49  ;;  %v1435_v1 = vsel %vm6561_vm7, %v1433_v58, %v1434_v61  ;;  %v1344_v49 = vld [vmem:[%s6341_s27 + $0x68] sm:$0xf] }
  0xea   : > { %1226 = vrot.lane.b32.xlu2 %v1143_v55, %s6283_s29  ;;  %v1437_v57 = vrot.slane %v1332_v52, 5  ;;  %v1473_v54 = vrot.slane %v1344_v49, 5 }
  0xeb   : > { %v848_v59 = vpop.permute.xlu0 %847 }
  0xec   : > { %938 = vst.msk [vmem:[#allocation2 + $0x84] sm:$0xf] %vm904_vm4, %v848_v59  ;;  %v1161_v62 = vpop.permute.xlu2 %1160  ;;  %v1439_v0 = vrot.slane %v1437_v57, 4 }
  0xed   : > { %1281 = vst.msk [vmem:[#allocation2 + $0xc] sm:$0xf] %vm1277_vm9, %v1161_v62  ;;  %v1429_v62 = vsel %vm6561_vm7, %v1427_v53, %v1428_v42  ;;  %v1342_v42 = vld [vmem:[%s6341_s27 + $0x60] sm:$0xf] }
  0xee   : > { %1230 = vrot.lane.b32.xlu1 %v1149_v60, %s6283_s29  ;;  %v1333_v60 = vld [vmem:[%s6341_s27 + $0x3c] sm:$0xf]  ;;  %v1467_v46 = vrot.slane %v1342_v42, 5 }
  0xef   : > { %v1440_v63 = vrot.slane %v1333_v60, 5  ;;  %v1475_v60 = vrot.slane %v1473_v54, 4 }
  0xf0   : > { %v856_v6 = vpop.permute.xlu1 %855  ;;  %v1468_v53 = vsel %vm6561_vm7, %v1466_v45, %v1467_v46 }
  0xf1   : > { %1228 = vrot.lane.b32.xlu0 %v1146_v2, %s6283_s29  ;;  %942 = vst.msk [vmem:[#allocation2 + $0x94] sm:$0xf] %vm904_vm4, %v856_v6  ;;  %v1441_v7 = vsel %vm6561_vm7, %v1439_v0, %v1440_v63 }
  0xf2   : > { %1232 = vrot.lane.b32.xlu2 %v1152_v5, %s6283_s29  ;;  %v1334_v5 = vld [vmem:[%s6341_s27 + $0x40] sm:$0xf] }
  0xf3   : > { %v854_v10 = vpop.permute.xlu0 %853  ;;  %v1443_v13 = vrot.slane %v1334_v5, 5 }
  0xf4   : > { %941 = vst.msk [vmem:[#allocation2 + $0x90] sm:$0xf] %vm904_vm4, %v854_v10  ;;  %v1167_v14 = vpop.permute.xlu2 %1166  ;;  %v1442_v10 = vrot.slane %v1440_v63, 4  ;;  %v1347_v63 = vld [vmem:[%s6341_s27 + $0x74] sm:$0xf] }
  0xf5   : > { %1284 = vst.msk [vmem:[#allocation2 + $0x18] sm:$0xf] %vm1277_vm9, %v1167_v14  ;;  %v1438_v14 = vsel %vm6561_vm7, %v1436_v4, %v1437_v57  ;;  %v1345_v57 = vld [vmem:[%s6341_s27 + $0x6c] sm:$0xf]  ;;  %v1482_v5 = vrot.slane %v1347_v63, 5 }
  0xf6   : > { %1524 = vrot.lane.b32.xlu1 %v1405_v11, %s6284_s30  ;;  %v1444_v9 = vsel %vm6561_vm7, %v1442_v10, %v1443_v13  ;;  %v1476_v61 = vrot.slane %v1345_v57, 5 }
  0xf8   : > { %v862_v20 = vpop.permute.xlu1 %861  ;;  %v1477_v4 = vsel %vm6561_vm7, %v1475_v60, %v1476_v61  ;;  %v1359_v60 = vld [vmem:[%s6341_s27 + $0xa4] sm:$0xf] }
  0xf9   : > { %1234 = vrot.lane.b32.xlu0 %v1153_v16, %s6283_s29  ;;  %946 = vst.msk [vmem:[#allocation2 + $0xa0] sm:$0x3] %vm945_vm10, %v862_v20  ;;  %v1449_v16 = vrot.slane %v1336_v12, 5  ;;  %v1337_v20 = vld [vmem:[%s6341_s27 + $0x4c] sm:$0xf]  ;;  %v1484_v12 = vrot.slane %v1482_v5, 4 }
  0xfa   : > { %1526 = vrot.lane.b32.xlu2 %v1408_v19, %s6284_s30  ;;  %v1445_v19 = vrot.slane %v1443_v13, 4  ;;  %v1452_v28 = vrot.slane %v1337_v20, 5 }
  0xfb   : > { %v860_v25 = vpop.permute.xlu0 %859  ;;  %v1450_v22 = vsel %vm6561_vm7, %v1448_v15, %v1449_v16 }
  0xfc   : > { %944 = vst.msk [vmem:[#allocation2 + $0x9c] sm:$0xf] %vm904_vm4, %v860_v25  ;;  %v1173_v29 = vpop.permute.xlu2 %1172  ;;  %v1451_v25 = vrot.slane %v1449_v16, 4  ;;  %v1350_v16 = vld [vmem:[%s6341_s27 + $0x80] sm:$0xf]  ;;  %vm7237_vm4 = vmor %vm2391_vm2, %vm2392_vm3  ;;  %vm3675_vm3 = vcmask 255200  }
  0xfd   : > { %1287 = vst.msk [vmem:[#allocation2 + $0x24] sm:$0xf] %vm1277_vm9, %v1173_v29  ;;  %v1447_v29 = vsel %vm6561_vm7, %v1445_v19, %v1446_v8  ;;  %v1348_v8 = vld [vmem:[%s6341_s27 + $0x78] sm:$0xf]  ;;  %v1491_v20 = vrot.slane %v1350_v16, 5 }
  0xfe   : > { %1530 = vrot.lane.b32.xlu1 %v1414_v26, %s6284_s30  ;;  %v1485_v13 = vrot.slane %v1348_v8, 5 }
  0xff   : > { %v1493_v27 = vrot.slane %v1491_v20, 4 }
 0x100   : > { %v1159_v37 = vpop.permute.xlu1 %1158  ;;  %v1486_v19 = vsel %vm6561_vm7, %v1484_v12, %v1485_v13  ;;  %v1692_v12 = vld [vmem:[%s6341_s27 + $0x10] sm:$0xf] }
 0x101   : > { %1528 = vrot.lane.b32.xlu0 %v1411_v33, %s6284_s30  ;;  %1280 = vst.msk [vmem:[#allocation2 + $0x8] sm:$0xf] %vm1277_vm9, %v1159_v37  ;;  %v1453_v33 = vsel %vm6561_vm7, %v1451_v25, %v1452_v28  ;;  %v1340_v37 = vld [vmem:[%s6341_s27 + $0x58] sm:$0xf] }
 0x102   : > { %1532 = vrot.lane.b32.xlu2 %v1417_v36, %s6284_s30  ;;  %v1454_v36 = vrot.slane %v1452_v28, 4  ;;  %v1461_v43 = vrot.slane %v1340_v37, 5 }
 0x103   : > { %v1157_v41 = vpop.permute.xlu0 %1156 }
 0x104   : > { %1279 = vst.msk [vmem:[#allocation2 + $0x4] sm:$0xf] %vm1277_vm9, %v1157_v41  ;;  %v1179_v44 = vpop.permute.xlu2 %1178  ;;  %v1460_v41 = vrot.slane %v1458_v32, 4  ;;  %v1353_v32 = vld [vmem:[%s6341_s27 + $0x8c] sm:$0xf] }
 0x105   : > { %1290 = vst.msk [vmem:[#allocation2 + $0x30] sm:$0xf] %vm1277_vm9, %v1179_v44  ;;  %v1456_v44 = vsel %vm6561_vm7, %v1454_v36, %v1455_v24  ;;  %v1351_v24 = vld [vmem:[%s6341_s27 + $0x84] sm:$0xf]  ;;  %v1500_v37 = vrot.slane %v1353_v32, 5 }
 0x106   : > { %1536 = vrot.lane.b32.xlu1 %v1423_v23, %s6284_s30  ;;  %v1494_v28 = vrot.slane %v1351_v24, 5 }
 0x107   : > { %v1502_v42 = vrot.slane %v1500_v37, 4 }
 0x108   : > { %v1165_v51 = vpop.permute.xlu1 %1164  ;;  %v1495_v36 = vsel %vm6561_vm7, %v1493_v27, %v1494_v28 }
 0x109   : > { %1534 = vrot.lane.b32.xlu0 %v1420_v47, %s6284_s30  ;;  %1283 = vst.msk [vmem:[#allocation2 + $0x14] sm:$0xf] %vm1277_vm9, %v1165_v51  ;;  %v1462_v47 = vsel %vm6561_vm7, %v1460_v41, %v1461_v43  ;;  %v1343_v51 = vld [vmem:[%s6341_s27 + $0x64] sm:$0xf] }
 0x10a   : > { %1538 = vrot.lane.b32.xlu2 %v1426_v50, %s6284_s30  ;;  %v1463_v50 = vrot.slane %v1461_v43, 4  ;;  %v1470_v58 = vrot.slane %v1343_v51, 5 }
 0x10b   : > { %v1163_v55 = vpop.permute.xlu0 %1162 }
 0x10c   : > { %1282 = vst.msk [vmem:[#allocation2 + $0x10] sm:$0xf] %vm1277_vm9, %v1163_v55  ;;  %v1185_v59 = vpop.permute.xlu2 %1184  ;;  %v1469_v55 = vrot.slane %v1467_v46, 4  ;;  %v1356_v46 = vld [vmem:[%s6341_s27 + $0x98] sm:$0xf] }
 0x10d   : > { %1293 = vst.msk [vmem:[#allocation2 + $0x3c] sm:$0xf] %vm1277_vm9, %v1185_v59  ;;  %v1465_v59 = vsel %vm6561_vm7, %v1463_v50, %v1464_v40  ;;  %v1354_v40 = vld [vmem:[%s6341_s27 + $0x90] sm:$0xf]  ;;  %v1509_v51 = vrot.slane %v1356_v46, 5 }
 0x10e   : > { %1542 = vrot.lane.b32.xlu1 %v1432_v56, %s6284_s30  ;;  %v1503_v43 = vrot.slane %v1354_v40, 5 }
 0x10f   : > { %v1511_v57 = vrot.slane %v1509_v51, 4 }
 0x110   : > { %v1171_v2 = vpop.permute.xlu1 %1170  ;;  %v1504_v50 = vsel %vm6561_vm7, %v1502_v42, %v1503_v43 }
 0x111   : > { %1540 = vrot.lane.b32.xlu0 %v1429_v62, %s6284_s30  ;;  %1286 = vst.msk [vmem:[#allocation2 + $0x20] sm:$0xf] %vm1277_vm9, %v1171_v2  ;;  %v1471_v62 = vsel %vm6561_vm7, %v1469_v55, %v1470_v58  ;;  %v1346_v2 = vld [vmem:[%s6341_s27 + $0x70] sm:$0xf] }
 0x112   : > { %1544 = vrot.lane.b32.xlu2 %v1435_v1, %s6284_s30  ;;  %v1472_v1 = vrot.slane %v1470_v58, 4  ;;  %v1479_v10 = vrot.slane %v1346_v2, 5 }
 0x113   : > { %v1169_v6 = vpop.permute.xlu0 %1168 }
 0x114   : > { %1285 = vst.msk [vmem:[#allocation2 + $0x1c] sm:$0xf] %vm1277_vm9, %v1169_v6  ;;  %v1191_v11 = vpop.permute.xlu2 %1190  ;;  %v1478_v6 = vrot.slane %v1476_v61, 4 }
 0x115   : > { %1296 = vst.msk [vmem:[#allocation2 + $0x48] sm:$0xf] %vm1277_vm9, %v1191_v11  ;;  %v1474_v11 = vsel %vm6561_vm7, %v1472_v1, %v1473_v54  ;;  %v1357_v54 = vld [vmem:[%s6341_s27 + $0x9c] sm:$0xf]  ;;  %v1518_v1 = vrot.slane %v1359_v60, 5 }
 0x116   : > { %1548 = vrot.lane.b32.xlu1 %v1441_v7, %s6284_s30  ;;  %v1512_v58 = vrot.slane %v1357_v54, 5 }
 0x117   : > { %v1520_v16 = vrot.slane %v1518_v1, 4 }
 0x118   : > { %v1177_v17 = vpop.permute.xlu1 %1176  ;;  %v1514_v2 = vrot.slane %v1512_v58, 4 }
 0x119   : > { %1546 = vrot.lane.b32.xlu0 %v1438_v14, %s6284_s30  ;;  %1289 = vst.msk [vmem:[#allocation2 + $0x2c] sm:$0xf] %vm1277_vm9, %v1177_v17  ;;  %v1480_v14 = vsel %vm6561_vm7, %v1478_v6, %v1479_v10  ;;  %v1349_v17 = vld [vmem:[%s6341_s27 + $0x7c] sm:$0xf]  ;;  %v1360_v6 = vld [vmem:[%s6341_s27 + $0xa8] sm:$0x7] }
 0x11a   : > { %1550 = vrot.lane.b32.xlu2 %v1444_v9, %s6284_s30  ;;  %v1481_v9 = vrot.slane %v1479_v10, 4  ;;  %v1488_v25 = vrot.slane %v1349_v17, 5 }
 0x11b   : > { %v1175_v21 = vpop.permute.xlu0 %1174 }
 0x11c   : > { %1288 = vst.msk [vmem:[#allocation2 + $0x28] sm:$0xf] %vm1277_vm9, %v1175_v21  ;;  %v1197_v26 = vpop.permute.xlu2 %1196  ;;  %v1487_v21 = vrot.slane %v1485_v13, 4 }
 0x11d   : > { %1299 = vst.msk [vmem:[#allocation2 + $0x54] sm:$0xf] %vm1277_vm9, %v1197_v26  ;;  %v1483_v26 = vsel %vm6561_vm7, %v1481_v9, %v1482_v5  ;;  %v1513_v5 = vsel %vm6561_vm7, %v1511_v57, %v1512_v58  ;;  %v1521_v9 = vrot.slane %v1360_v6, 5  ;;  %v1696_v58 = vld [vmem:[%s6341_s27 + $0x20] sm:$0xf] }
 0x11e   : > { %1554 = vrot.lane.b32.xlu1 %v1450_v22, %s6284_s30 }
 0x11f   : > { %v1523_v42 = vrot.slane %v1521_v9, 4 }
 0x120   : > { %v1183_v34 = vpop.permute.xlu1 %1182 }
 0x121   : > { %1552 = vrot.lane.b32.xlu0 %v1447_v29, %s6284_s30  ;;  %1292 = vst.msk [vmem:[#allocation2 + $0x38] sm:$0xf] %vm1277_vm9, %v1183_v34  ;;  %v1489_v29 = vsel %vm6561_vm7, %v1487_v21, %v1488_v25  ;;  %v1352_v34 = vld [vmem:[%s6341_s27 + $0x88] sm:$0xf]  ;;  %v1757_v21 = vshll.u32 %v1692_v12, 16 }
 0x122   : > { %1556 = vrot.lane.b32.xlu2 %v1453_v33, %s6284_s30  ;;  %v1490_v33 = vrot.slane %v1488_v25, 4  ;;  %v1497_v41 = vrot.slane %v1352_v34, 5 }
 0x123   : > { %v1181_v38 = vpop.permute.xlu0 %1180 }
 0x124   : > { %1291 = vst.msk [vmem:[#allocation2 + $0x34] sm:$0xf] %vm1277_vm9, %v1181_v38  ;;  %v1203_v23 = vpop.permute.xlu2 %1202  ;;  %v1496_v38 = vrot.slane %v1494_v28, 4  ;;  %v1693_v28 = vld [vmem:[%s6341_s27 + $0x14] sm:$0xf] }
 0x125   : > { %1302 = vst.msk [vmem:[#allocation2 + $0x60] sm:$0xf] %vm1277_vm9, %v1203_v23  ;;  %v1492_v23 = vsel %vm6561_vm7, %v1490_v33, %v1491_v20  ;;  %v1754_v20 = vshrl.u32 %v1692_v12, 16  ;;  %v1522_v33 = vsel %vm6561_vm7, %v1520_v16, %v1521_v9  ;;  %v1767_v40 = vshll.u32 %v1693_v28, 16 }
 0x126   : > { %1560 = vrot.lane.b32.xlu1 %v1459_v39, %s6284_s30 }
 0x128   : > { %v1189_v48 = vpop.permute.xlu1 %1188 }
 0x129   : > { %1558 = vrot.lane.b32.xlu0 %v1456_v44, %s6284_s30  ;;  %1295 = vst.msk [vmem:[#allocation2 + $0x44] sm:$0xf] %vm1277_vm9, %v1189_v48  ;;  %v1498_v44 = vsel %vm6561_vm7, %v1496_v38, %v1497_v41  ;;  %v1355_v48 = vld [vmem:[%s6341_s27 + $0x94] sm:$0xf] }
 0x12a   : > { %1562 = vrot.lane.b32.xlu2 %v1462_v47, %s6284_s30  ;;  %v1499_v47 = vrot.slane %v1497_v41, 4  ;;  %v1506_v55 = vrot.slane %v1355_v48, 5 }
 0x12b   : > { %v1187_v52 = vpop.permute.xlu0 %1186 }
 0x12c   : > { %1294 = vst.msk [vmem:[#allocation2 + $0x40] sm:$0xf] %vm1277_vm9, %v1187_v52  ;;  %v1209_v56 = vpop.permute.xlu2 %1208  ;;  %v1505_v52 = vrot.slane %v1503_v43, 4  ;;  %v1508_v63 = vrot.slane %v1506_v55, 4 }
 0x12d   : > { %1305 = vst.msk [vmem:[#allocation2 + $0x6c] sm:$0xf] %vm1277_vm9, %v1209_v56  ;;  %v1501_v56 = vsel %vm6561_vm7, %v1499_v47, %v1500_v37  ;;  %v1695_v37 = vld [vmem:[%s6341_s27 + $0x1c] sm:$0xf] }
 0x12e   : > { %1566 = vrot.lane.b32.xlu1 %v1468_v53, %s6284_s30  ;;  %v1787_v46 = vshll.u32 %v1695_v37, 16 }
 0x130   : > { %v1195_v0 = vpop.permute.xlu1 %1194 }
 0x131   : > { %1564 = vrot.lane.b32.xlu0 %v1465_v59, %s6284_s30  ;;  %1298 = vst.msk [vmem:[#allocation2 + $0x50] sm:$0xf] %vm1277_vm9, %v1195_v0  ;;  %v1507_v59 = vsel %vm6561_vm7, %v1505_v52, %v1506_v55  ;;  %v1358_v0 = vld [vmem:[%s6341_s27 + $0xa0] sm:$0xf]  ;;  %v1697_v52 = vld [vmem:[%s6341_s27 + $0x24] sm:$0xf] }
 0x132   : > { %1568 = vrot.lane.b32.xlu2 %v1471_v62, %s6284_s30  ;;  %v1691_v62 = vld [vmem:[%s6341_s27 + $0xc] sm:$0xf] }
 0x133   : > { %v1193_v3 = vpop.permute.xlu0 %1192  ;;  %v1747_v8 = vshll.u32 %v1691_v62, 16 }
 0x134   : > { %1297 = vst.msk [vmem:[#allocation2 + $0x4c] sm:$0xf] %vm1277_vm9, %v1193_v3  ;;  %v1215_v7 = vpop.permute.xlu2 %1214  ;;  %v1690_v3 = vld [vmem:[%s6341_s27 + $0x8] sm:$0xe] }
 0x135   : > { %1308 = vst.msk [vmem:[#allocation2 + $0x78] sm:$0xf] %vm1277_vm9, %v1215_v7  ;;  %v1744_v7 = vshrl.u32 %v1691_v62, 16  ;;  %v1735_v13 = vshrl.u32 %v1690_v3, 16  ;;  %v1807_v62 = vshll.u32 %v1697_v52, 16 }
 0x136   : > { %1572 = vrot.lane.b32.xlu1 %v1477_v4, %s6284_s30 }
 0x138   : > { %v1201_v15 = vpop.permute.xlu1 %1200 }
 0x139   : > { %1570 = vrot.lane.b32.xlu0 %v1474_v11, %s6284_s30  ;;  %1301 = vst.msk [vmem:[#allocation2 + $0x5c] sm:$0xf] %vm1277_vm9, %v1201_v15  ;;  %v1515_v11 = vrot.slane %v1358_v0, 5  ;;  %v1510_v15 = vsel %vm6561_vm7, %v1508_v63, %v1509_v51  ;;  %v1769_v51 = vrot.slane %v1767_v40, 6 }
 0x13a   : > { %1574 = vrot.lane.b32.xlu2 %v1480_v14, %s6284_s30  ;;  %v1738_v14 = vshll.u32 %v1690_v3, 16  ;;  %v1797_v3 = vshll.u32 %v1696_v58, 16 }
 0x13b   : > { %v1199_v18 = vpop.permute.xlu0 %1198  ;;  %v1516_v17 = vsel %vm6561_vm7, %v1514_v2, %v1515_v11  ;;  %v1517_v25 = vrot.slane %v1515_v11, 4  ;;  %v1794_v2 = vshrl.u32 %v1696_v58, 16 }
 0x13c   : > { %1300 = vst.msk [vmem:[#allocation2 + $0x58] sm:$0xf] %vm1277_vm9, %v1199_v18  ;;  %v1221_v22 = vpop.permute.xlu2 %1220  ;;  %v1746_v18 = vrot.slane %v1744_v7, 5  ;;  %v1740_v27 = vrot.slane %v1738_v14, 6  ;;  %v1799_v9 = vrot.slane %v1797_v3, 6 }
 0x13d   : > { %1311 = vst.msk [vmem:[#allocation2 + $0x84] sm:$0xf] %vm1277_vm9, %v1221_v22  ;;  %v1694_v22 = vld [vmem:[%s6341_s27 + $0x18] sm:$0xf]  ;;  %v1519_v41 = vsel %vm6561_vm7, %v1517_v25, %v1518_v1  ;;  %v1698_v1 = vld [vmem:[%s6341_s27 + $0x28] sm:$0xf] }
 0x13e   : > { %1578 = vrot.lane.b32.xlu1 %v1486_v19, %s6284_s30  ;;  %v1749_v19 = vrot.slane %v1747_v8, 6  ;;  %v1814_v11 = vshrl.u32 %v1698_v1, 16  ;;  %v1817_v12 = vshll.u32 %v1698_v1, 16  ;;  %v1796_v16 = vrot.slane %v1794_v2, 5  ;;  %v1706_v3 = vld [vmem:[%s6341_s27 + $0x48] sm:$0xf] }
 0x13f   : > { %vm3009_vm7 = vcmask 224448  }
 0x140   : > { %v1207_v30 = vpop.permute.xlu1 %1206  ;;  %v1750_v34 = vor.u32 %v1749_v19, %v1746_v18  ;;  %v1819_v25 = vrot.slane %v1817_v12, 6  ;;  %v1897_v12 = vshll.u32 %v1706_v3, 16 }
 0x141   : > { %1576 = vrot.lane.b32.xlu0 %v1483_v26, %s6284_s30  ;;  %1304 = vst.msk [vmem:[#allocation2 + $0x68] sm:$0xf] %vm1277_vm9, %v1207_v30  ;;  %v1737_v26 = vrot.slane %v1735_v13, 5  ;;  %v1777_v30 = vshll.u32 %v1694_v22, 16  ;;  %v1700_v13 = vld [vmem:[%s6341_s27 + $0x30] sm:$0xf] }
 0x142   : > { %1580 = vrot.lane.b32.xlu2 %v1489_v29, %s6284_s30  ;;  %v1774_v29 = vshrl.u32 %v1694_v22, 16  ;;  %v1752_v47 = vrot.slane %v1750_v34, 4  ;;  %v1834_v19 = vshrl.u32 %v1700_v13, 16 }
 0x143   : > { %v1205_v35 = vpop.permute.xlu0 %1204 }
 0x144   : > { %1303 = vst.msk [vmem:[#allocation2 + $0x64] sm:$0xf] %vm1277_vm9, %v1205_v35  ;;  %v1227_v39 = vpop.permute.xlu2 %1226  ;;  %v1756_v35 = vrot.slane %v1754_v20, 5  ;;  %v1776_v43 = vrot.slane %v1774_v29, 5  ;;  %v1837_v20 = vshll.u32 %v1700_v13, 16 }
 0x145   : > { %1314 = vst.msk [vmem:[#allocation2 + $0x90] sm:$0xf] %vm1277_vm9, %v1227_v39  ;;  %v1764_v39 = vshrl.u32 %v1693_v28, 16 }
 0x146   : > { %1584 = vrot.lane.b32.xlu1 %v1495_v36, %s6284_s30  ;;  %v1759_v36 = vrot.slane %v1757_v21, 6 }
 0x148   : > { %v1213_v45 = vpop.permute.xlu1 %1212  ;;  %v1760_v48 = vor.u32 %v1759_v36, %v1756_v35  ;;  %v1839_v35 = vrot.slane %v1837_v20, 6 }
 0x149   : > { %1582 = vrot.lane.b32.xlu0 %v1492_v23, %s6284_s30  ;;  %1307 = vst.msk [vmem:[#allocation2 + $0x74] sm:$0xf] %vm1277_vm9, %v1213_v45  ;;  %v1741_v23 = vor.u32 %v1740_v27, %v1737_v26  ;;  %v1784_v45 = vshrl.u32 %v1695_v37, 16  ;;  %v1701_v27 = vld [vmem:[%s6341_s27 + $0x34] sm:$0xf] }
 0x14a   : > { %1586 = vrot.lane.b32.xlu2 %v1498_v44, %s6284_s30  ;;  %v1779_v44 = vrot.slane %v1777_v30, 6  ;;  %v1762_v57 = vrot.slane %v1760_v48, 4  ;;  %v1761_v60 = vsel %vm7034_vm14, %v1752_v47, %v1760_v48  ;;  %v1844_v36 = vshrl.u32 %v1701_v27, 16 }
 0x14b   : > { %v1211_v49 = vpop.permute.xlu0 %1210  ;;  %v1786_v55 = vrot.slane %v1784_v45, 5  ;;  %v1847_v37 = vshll.u32 %v1701_v27, 16 }
 0x14c   : > { %1306 = vst.msk [vmem:[#allocation2 + $0x70] sm:$0xf] %vm1277_vm9, %v1211_v49  ;;  %v1233_v53 = vpop.permute.xlu2 %1232  ;;  %v1780_v54 = vor.u32 %v1779_v44, %v1776_v43  ;;  %v1703_v43 = vld [vmem:[%s6341_s27 + $0x3c] sm:$0xf] }
 0x14d   : > { %1317 = vst.msk [vmem:[#allocation2 + $0x9c] sm:$0xf] %vm1277_vm9, %v1233_v53  ;;  %v1742_v53 = vrot.slane %v1741_v23, 4  ;;  %v1849_v47 = vrot.slane %v1847_v37, 6 }
 0x14e   : > { %1590 = vrot.lane.b32.xlu1 %v1504_v50, %s6284_s30  ;;  %v1766_v50 = vrot.slane %v1764_v39, 5 }
 0x150   : > { %v1219_v61 = vpop.permute.xlu1 %1218  ;;  %v1770_v63 = vor.u32 %v1769_v51, %v1766_v50 }
 0x151   : > { %1588 = vrot.lane.b32.xlu0 %v1501_v56, %s6284_s30  ;;  %1310 = vst.msk [vmem:[#allocation2 + $0x80] sm:$0xf] %vm1277_vm9, %v1219_v61  ;;  %v1789_v56 = vrot.slane %v1787_v46, 6  ;;  %v1804_v61 = vshrl.u32 %v1697_v52, 16  ;;  %v1846_v46 = vrot.slane %v1844_v36, 5  ;;  %v1864_v52 = vshrl.u32 %v1703_v43, 16 }
 0x152   : > { %1592 = vrot.lane.b32.xlu2 %v1507_v59, %s6284_s30  ;;  %v1771_v7 = vsel %vm7034_vm14, %v1762_v57, %v1770_v63 }
 0x153   : > { %v1217_v4 = vpop.permute.xlu0 %1216  ;;  %v1790_v6 = vor.u32 %v1789_v56, %v1786_v55  ;;  %v1806_v8 = vrot.slane %v1804_v61, 5  ;;  %v1704_v56 = vld [vmem:[%s6341_s27 + $0x40] sm:$0xf]  ;;  %v1850_v61 = vor.u32 %v1849_v47, %v1846_v46  ;;  %v1710_v47 = vld [vmem:[%s6341_s27 + $0x58] sm:$0xf] }
 0x154   : > { %1309 = vst.msk [vmem:[#allocation2 + $0x7c] sm:$0xf] %vm1277_vm9, %v1217_v4  ;;  %v1527_v10 = vpop.permute.xlu2 %1526  ;;  %v1751_v4 = vsel %vm7034_vm14, %v1742_v53, %v1750_v34  ;;  %v1836_v34 = vrot.slane %v1834_v19, 5  ;;  %v1867_v53 = vshll.u32 %v1703_v43, 16  ;;  %v1874_v1 = vshrl.u32 %v1704_v56, 16 }
 0x155   : > { %1649 = vst.msk [vmem:[#allocation2 + $0x4] sm:$0xf] %vm1647_vm11, %v1527_v10  ;;  %v1809_v10 = vrot.slane %v1807_v62, 6  ;;  %v1792_v26 = vrot.slane %v1790_v6, 4  ;;  %v1877_v2 = vshll.u32 %v1704_v56, 16  ;;  %v1934_v56 = vshrl.u32 %v1710_v47, 16 }
 0x156   : > { %1596 = vrot.lane.b32.xlu1 %v1513_v5, %s6284_s30  ;;  %v1782_v5 = vrot.slane %v1780_v54, 4  ;;  %v1840_v45 = vor.u32 %v1839_v35, %v1836_v34  ;;  %v1709_v35 = vld [vmem:[%s6341_s27 + $0x54] sm:$0xf] }
 0x157   : > { %v1810_v22 = vor.u32 %v1809_v10, %v1806_v8  ;;  %v1705_v8 = vld [vmem:[%s6341_s27 + $0x44] sm:$0xf]  ;;  %v1924_v43 = vshrl.u32 %v1709_v35, 16 }
 0x158   : > { %v1225_v24 = vpop.permute.xlu1 %1224  ;;  %v1791_v18 = vsel %vm7034_vm14, %v1782_v5, %v1790_v6  ;;  %v1884_v19 = vshrl.u32 %v1705_v8, 16  ;;  %v1887_v20 = vshll.u32 %v1705_v8, 16  ;;  %v1713_v8 = vld [vmem:[%s6341_s27 + $0x64] sm:$0xf] }
 0x159   : > { %1594 = vrot.lane.b32.xlu0 %v1510_v15, %s6284_s30  ;;  %1313 = vst.msk [vmem:[#allocation2 + $0x8c] sm:$0xf] %vm1277_vm9, %v1225_v24  ;;  %v1772_v15 = vrot.slane %v1770_v63, 4  ;;  %v1816_v24 = vrot.slane %v1814_v11, 5  ;;  %v1869_v63 = vrot.slane %v1867_v53, 6  ;;  %v1894_v11 = vshrl.u32 %v1706_v3, 16 }
 0x15a   : > { %1598 = vrot.lane.b32.xlu2 %v1516_v17, %s6284_s30  ;;  %v1699_v17 = vld [vmem:[%s6341_s27 + $0x2c] sm:$0xf]  ;;  %v1889_v34 = vrot.slane %v1887_v20, 6 }
 0x15b   : > { %v1223_v32 = vpop.permute.xlu0 %1222  ;;  %v1824_v29 = vshrl.u32 %v1699_v17, 16  ;;  %v1827_v30 = vshll.u32 %v1699_v17, 16  ;;  %v1820_v39 = vor.u32 %v1819_v25, %v1816_v24  ;;  %v1707_v17 = vld [vmem:[%s6341_s27 + $0x4c] sm:$0xf]  ;;  %v1896_v24 = vrot.slane %v1894_v11, 5 }
 0x15c   : > { %1312 = vst.msk [vmem:[#allocation2 + $0x88] sm:$0xf] %vm1277_vm9, %v1223_v32  ;;  %v1533_v38 = vpop.permute.xlu2 %1532  ;;  %v1781_v32 = vsel %vm7034_vm14, %v1772_v15, %v1780_v54  ;;  %v1876_v15 = vrot.slane %v1874_v1, 5  ;;  %v1899_v25 = vrot.slane %v1897_v12, 6  ;;  %v1907_v27 = vshll.u32 %v1707_v17, 16 }
 0x15d   : > { %1652 = vst.msk [vmem:[#allocation2 + $0x10] sm:$0xf] %vm1647_vm11, %v1533_v38  ;;  %v1812_v38 = vrot.slane %v1810_v22, 4  ;;  %v1826_v23 = vrot.slane %v1824_v29, 5  ;;  %v1822_v48 = vrot.slane %v1820_v39, 4 }
 0x15e   : > { %1602 = vrot.lane.b32.xlu1 %v1522_v33, %s6284_s30  ;;  %v1800_v33 = vor.u32 %v1799_v9, %v1796_v16  ;;  %v1879_v16 = vrot.slane %v1877_v2, 6  ;;  %v1852_v9 = vrot.slane %v1850_v61, 4  ;;  %v1900_v37 = vor.u32 %v1899_v25, %v1896_v24  ;;  %v1715_v25 = vld [vmem:[%s6341_s27 + $0x6c] sm:$0xf] }
 0x15f   : > { %v1821_v51 = vsel %vm7034_vm14, %v1812_v38, %v1820_v39  ;;  %v1909_v39 = vrot.slane %v1907_v27, 6 }
 0x160   : > { %v1231_v49 = vpop.permute.xlu1 %1230  ;;  %v1801_v40 = vsel %vm7034_vm14, %v1792_v26, %v1800_v33  ;;  %v1802_v44 = vrot.slane %v1800_v33, 4  ;;  %v1904_v26 = vshrl.u32 %v1707_v17, 16  ;;  %v1880_v29 = vor.u32 %v1879_v16, %v1876_v15 }
 0x161   : > { %1600 = vrot.lane.b32.xlu0 %v1519_v41, %s6284_s30  ;;  %1316 = vst.msk [vmem:[#allocation2 + $0x98] sm:$0xf] %vm1277_vm9, %v1231_v49  ;;  %v1702_v49 = vld [vmem:[%s6341_s27 + $0x38] sm:$0xf]  ;;  %v1886_v33 = vrot.slane %v1884_v19, 5  ;;  %v1967_v17 = vshll.u32 %v1713_v8, 16 }
 0x162   : > { %1604 = vrot.lane.b32.xlu2 %v1523_v42, %s6284_s30  ;;  %v1829_v42 = vrot.slane %v1827_v30, 6  ;;  %v1854_v57 = vshrl.u32 %v1702_v49, 16  ;;  %v1857_v58 = vshll.u32 %v1702_v49, 16  ;;  %v1906_v38 = vrot.slane %v1904_v26, 5 }
 0x163   : > { %v1229_v59 = vpop.permute.xlu0 %1228  ;;  %v1890_v46 = vor.u32 %v1889_v34, %v1886_v33 }
 0x164   : > { %1315 = vst.msk [vmem:[#allocation2 + $0x94] sm:$0xf] %vm1277_vm9, %v1229_v59  ;;  %v1539_v0 = vpop.permute.xlu2 %1538  ;;  %v1830_v55 = vor.u32 %v1829_v42, %v1826_v23  ;;  %v1811_v59 = vsel %vm7034_vm14, %v1802_v44, %v1810_v22  ;;  %v1856_v6 = vrot.slane %v1854_v57, 5  ;;  %v1927_v44 = vshll.u32 %v1709_v35, 16 }
 0x165   : > { %1655 = vst.msk [vmem:[#allocation2 + $0x1c] sm:$0xf] %vm1647_vm11, %v1539_v0  ;;  %v1866_v0 = vrot.slane %v1864_v52, 5  ;;  %v1910_v52 = vor.u32 %v1909_v39, %v1906_v38  ;;  %v1937_v57 = vshll.u32 %v1710_v47, 16  ;;  %v1984_v35 = vshrl.u32 %v1715_v25, 16 }
 0x166   : > { %2145 = vrot.lane.b32.xlu1 %v1761_v60, %s6285_s7  ;;  %v1842_v60 = vrot.slane %v1840_v45, 4  ;;  %v1831_v62 = vsel %vm7034_vm14, %v1822_v48, %v1830_v55  ;;  %v1832_v5 = vrot.slane %v1830_v55, 4  ;;  %v1929_v55 = vrot.slane %v1927_v44, 6  ;;  %v1716_v39 = vld [vmem:[%s6341_s27 + $0x70] sm:$0xf] }
 0x167   : > { %v1994_v47 = vshrl.u32 %v1716_v39, 16  ;;  %vm3095_vm9 = vsmask.f32 5392 }
 0x168   : > { %v1525_v14 = vpop.permute.xlu1 %1524  ;;  %v1851_v10 = vsel %vm7034_vm14, %v1842_v60, %v1850_v61  ;;  %v1892_v60 = vrot.slane %v1890_v46, 4  ;;  %vm7651_vm10 = vmor %vm3094_vm8, %vm3095_vm9 }
 0x169   : > { %2143 = vrot.lane.b32.xlu0 %v1751_v4, %s6285_s7  ;;  %1648 = vst.msk [vmem:[#allocation2] sm:$0xf] %vm1647_vm11, %v1525_v14  ;;  %v1870_v14 = vor.u32 %v1869_v63, %v1866_v0  ;;  %v1711_v0 = vld [vmem:[%s6341_s27 + $0x5c] sm:$0xf] }
 0x16a   : > { %2147 = vrot.lane.b32.xlu2 %v1771_v7, %s6285_s7  ;;  %v1859_v7 = vrot.slane %v1857_v58, 6  ;;  %v1712_v58 = vld [vmem:[%s6341_s27 + $0x60] sm:$0xf]  ;;  %v1944_v11 = vshrl.u32 %v1711_v0, 16  ;;  %v1947_v12 = vshll.u32 %v1711_v0, 16 }
 0x16b   : > { %v1235_v21 = vpop.permute.xlu0 %1234  ;;  %v1954_v1 = vshrl.u32 %v1712_v58, 16  ;;  %v1957_v2 = vshll.u32 %v1712_v58, 16  ;;  %v1719_v0 = vld [vmem:[%s6341_s27 + $0x7c] sm:$0xf] }
 0x16c   : > { %1319 = vst.msk [vmem:[#allocation2 + $0xa0] sm:$0x3] %vm1318_vm15, %v1235_v21  ;;  %v1545_v28 = vpop.permute.xlu2 %1544  ;;  %v1841_v21 = vsel %vm7034_vm14, %v1832_v5, %v1840_v45  ;;  %v1860_v22 = vor.u32 %v1859_v7, %v1856_v6  ;;  %v1936_v5 = vrot.slane %v1934_v56, 5  ;;  %v1939_v6 = vrot.slane %v1937_v57, 6 }
 0x16d   : > { %1658 = vst.msk [vmem:[#allocation2 + $0x28] sm:$0xf] %vm1647_vm11, %v1545_v28  ;;  %v1872_v28 = vrot.slane %v1870_v14, 4  ;;  %v1912_v7 = vrot.slane %v1910_v52, 4  ;;  %v1956_v15 = vrot.slane %v1954_v1, 5  ;;  %v1959_v16 = vrot.slane %v1957_v2, 6 }
 0x16e   : > { %2151 = vrot.lane.b32.xlu1 %v1791_v18, %s6285_s7  ;;  %v1861_v30 = vsel %vm7034_vm14, %v1852_v9, %v1860_v22  ;;  %v1862_v36 = vrot.slane %v1860_v22, 4  ;;  %v1964_v9 = vshrl.u32 %v1713_v8, 16  ;;  %v1940_v19 = vor.u32 %v1939_v6, %v1936_v5 }
 0x16f   : > { %v1881_v42 = vsel %vm7034_vm14, %v1872_v28, %v1880_v29  ;;  %v1946_v22 = vrot.slane %v1944_v11, 5  ;;  %v1949_v24 = vrot.slane %v1947_v12, 6  ;;  %v1960_v27 = vor.u32 %v1959_v16, %v1956_v15  ;;  %v1721_v16 = vld [vmem:[%s6341_s27 + $0x84] sm:$0xf] }
 0x170   : > { %v1531_v41 = vpop.permute.xlu1 %1530  ;;  %v1966_v28 = vrot.slane %v1964_v9, 5  ;;  %v2027_v8 = vshll.u32 %v1719_v0, 16  ;;  %vm3762_vm15 = vcmask 1044484  }
 0x171   : > { %2149 = vrot.lane.b32.xlu0 %v1781_v32, %s6285_s7  ;;  %1651 = vst.msk [vmem:[#allocation2 + $0xc] sm:$0xf] %vm1647_vm11, %v1531_v41  ;;  %v1708_v41 = vld [vmem:[%s6341_s27 + $0x50] sm:$0xf]  ;;  %v1950_v38 = vor.u32 %v1949_v24, %v1946_v22 }
 0x172   : > { %2153 = vrot.lane.b32.xlu2 %v1801_v40, %s6285_s7  ;;  %v1882_v40 = vrot.slane %v1880_v29, 4  ;;  %v1914_v48 = vshrl.u32 %v1708_v41, 16  ;;  %v1917_v49 = vshll.u32 %v1708_v41, 16  ;;  %v1969_v29 = vrot.slane %v1967_v17, 6 }
 0x173   : > { %v1529_v50 = vpop.permute.xlu0 %1528 }
 0x174   : > { %1650 = vst.msk [vmem:[#allocation2 + $0x8] sm:$0xf] %vm1647_vm11, %v1529_v50  ;;  %v1551_v54 = vpop.permute.xlu2 %1550  ;;  %v1871_v50 = vsel %vm7034_vm14, %v1862_v36, %v1870_v14  ;;  %v1891_v53 = vsel %vm7034_vm14, %v1882_v40, %v1890_v46  ;;  %v1916_v61 = vrot.slane %v1914_v48, 5  ;;  %v1987_v36 = vshll.u32 %v1715_v25, 16 }
 0x175   : > { %1661 = vst.msk [vmem:[#allocation2 + $0x34] sm:$0xf] %vm1647_vm11, %v1551_v54  ;;  %v1926_v54 = vrot.slane %v1924_v43, 5  ;;  %v1970_v43 = vor.u32 %v1969_v29, %v1966_v28  ;;  %v1997_v48 = vshll.u32 %v1716_v39, 16  ;;  %v2044_v25 = vshrl.u32 %v1721_v16, 16 }
 0x176   : > { %2157 = vrot.lane.b32.xlu1 %v1821_v51, %s6285_s7  ;;  %v1902_v51 = vrot.slane %v1900_v37, 4  ;;  %v1989_v46 = vrot.slane %v1987_v36, 6  ;;  %v1722_v29 = vld [vmem:[%s6341_s27 + $0x88] sm:$0xf] }
 0x177   : > { %v2054_v39 = vshrl.u32 %v1722_v29, 16 }
 0x178   : > { %v1537_v4 = vpop.permute.xlu1 %1536  ;;  %v1911_v63 = vsel %vm7034_vm14, %v1902_v51, %v1910_v52  ;;  %v1952_v51 = vrot.slane %v1950_v38, 4 }
 0x179   : > { %2155 = vrot.lane.b32.xlu0 %v1811_v59, %s6285_s7  ;;  %1654 = vst.msk [vmem:[#allocation2 + $0x18] sm:$0xf] %vm1647_vm11, %v1537_v4  ;;  %v1930_v4 = vor.u32 %v1929_v55, %v1926_v54  ;;  %v1717_v54 = vld [vmem:[%s6341_s27 + $0x74] sm:$0xf] }
 0x17a   : > { %2159 = vrot.lane.b32.xlu2 %v1831_v62, %s6285_s7  ;;  %v1919_v62 = vrot.slane %v1917_v49, 6  ;;  %v1718_v49 = vld [vmem:[%s6341_s27 + $0x78] sm:$0xf]  ;;  %v2004_v1 = vshrl.u32 %v1717_v54, 16  ;;  %v2007_v2 = vshll.u32 %v1717_v54, 16 }
 0x17b   : > { %v1535_v13 = vpop.permute.xlu0 %1534  ;;  %v2014_v56 = vshrl.u32 %v1718_v49, 16  ;;  %v2017_v57 = vshll.u32 %v1718_v49, 16  ;;  %v1725_v54 = vld [vmem:[%s6341_s27 + $0x94] sm:$0xf] }
 0x17c   : > { %1653 = vst.msk [vmem:[#allocation2 + $0x14] sm:$0xf] %vm1647_vm11, %v1535_v13  ;;  %v1557_v18 = vpop.permute.xlu2 %1556  ;;  %v1901_v13 = vsel %vm7034_vm14, %v1892_v60, %v1900_v37  ;;  %v1920_v14 = vor.u32 %v1919_v62, %v1916_v61  ;;  %v1996_v60 = vrot.slane %v1994_v47, 5  ;;  %v1999_v61 = vrot.slane %v1997_v48, 6 }
 0x17d   : > { %1664 = vst.msk [vmem:[#allocation2 + $0x40] sm:$0xf] %vm1647_vm11, %v1557_v18  ;;  %v1932_v18 = vrot.slane %v1930_v4, 4  ;;  %v1972_v62 = vrot.slane %v1970_v43, 4  ;;  %v2016_v5 = vrot.slane %v2014_v56, 5  ;;  %v2019_v6 = vrot.slane %v2017_v57, 6 }
 0x17e   : > { %2163 = vrot.lane.b32.xlu1 %v1851_v10, %s6285_s7  ;;  %v1921_v20 = vsel %vm7034_vm14, %v1912_v7, %v1920_v14  ;;  %v1922_v26 = vrot.slane %v1920_v14, 4  ;;  %v2024_v7 = vshrl.u32 %v1719_v0, 16  ;;  %v2000_v11 = vor.u32 %v1999_v61, %v1996_v60 }
 0x17f   : > { %v1941_v34 = vsel %vm7034_vm14, %v1932_v18, %v1940_v19  ;;  %v2006_v14 = vrot.slane %v2004_v1, 5  ;;  %v2009_v15 = vrot.slane %v2007_v2, 6  ;;  %v2020_v17 = vor.u32 %v2019_v6, %v2016_v5  ;;  %v1727_v6 = vld [vmem:[%s6341_s27 + $0x9c] sm:$0xf] }
 0x180   : > { %v1543_v32 = vpop.permute.xlu1 %1542  ;;  %v2026_v18 = vrot.slane %v2024_v7, 5  ;;  %v2087_v0 = vshll.u32 %v1725_v54, 16 }
 0x181   : > { %2161 = vrot.lane.b32.xlu0 %v1841_v21, %s6285_s7  ;;  %1657 = vst.msk [vmem:[#allocation2 + $0x24] sm:$0xf] %vm1647_vm11, %v1543_v32  ;;  %v1714_v32 = vld [vmem:[%s6341_s27 + $0x68] sm:$0xf]  ;;  %v2010_v28 = vor.u32 %v2009_v15, %v2006_v14 }
 0x182   : > { %2165 = vrot.lane.b32.xlu2 %v1861_v30, %s6285_s7  ;;  %v1942_v30 = vrot.slane %v1940_v19, 4  ;;  %v1974_v40 = vshrl.u32 %v1714_v32, 16  ;;  %v1977_v41 = vshll.u32 %v1714_v32, 16  ;;  %v2029_v19 = vrot.slane %v2027_v8, 6 }
 0x183   : > { %v1541_v23 = vpop.permute.xlu0 %1540 }
 0x184   : > { %1656 = vst.msk [vmem:[#allocation2 + $0x20] sm:$0xf] %vm1647_vm11, %v1541_v23  ;;  %v1563_v45 = vpop.permute.xlu2 %1562  ;;  %v1931_v23 = vsel %vm7034_vm14, %v1922_v26, %v1930_v4  ;;  %v1951_v44 = vsel %vm7034_vm14, %v1942_v30, %v1950_v38  ;;  %v1976_v52 = vrot.slane %v1974_v40, 5  ;;  %v2047_v26 = vshll.u32 %v1721_v16, 16 }
 0x185   : > { %1667 = vst.msk [vmem:[#allocation2 + $0x4c] sm:$0xf] %vm1647_vm11, %v1563_v45  ;;  %v1986_v45 = vrot.slane %v1984_v35, 5  ;;  %v2030_v35 = vor.u32 %v2029_v19, %v2026_v18  ;;  %v2057_v40 = vshll.u32 %v1722_v29, 16  ;;  %v2104_v16 = vshrl.u32 %v1727_v6, 16 }
 0x186   : > { %2169 = vrot.lane.b32.xlu1 %v1881_v42, %s6285_s7  ;;  %v1962_v42 = vrot.slane %v1960_v27, 4  ;;  %v2049_v38 = vrot.slane %v2047_v26, 6  ;;  %v1728_v19 = vld [vmem:[%s6341_s27 + $0xa0] sm:$0xf] }
 0x187   : > { %v2114_v29 = vshrl.u32 %v1728_v19, 16 }
 0x188   : > { %v1549_v59 = vpop.permute.xlu1 %1548  ;;  %v1971_v55 = vsel %vm7034_vm14, %v1962_v42, %v1970_v43  ;;  %v2012_v42 = vrot.slane %v2010_v28, 4 }
 0x189   : > { %2167 = vrot.lane.b32.xlu0 %v1871_v50, %s6285_s7  ;;  %1660 = vst.msk [vmem:[#allocation2 + $0x30] sm:$0xf] %vm1647_vm11, %v1549_v59  ;;  %v1990_v59 = vor.u32 %v1989_v46, %v1986_v45  ;;  %v1723_v45 = vld [vmem:[%s6341_s27 + $0x8c] sm:$0xf] }
 0x18a   : > { %2171 = vrot.lane.b32.xlu2 %v1891_v53, %s6285_s7  ;;  %v1979_v53 = vrot.slane %v1977_v41, 6  ;;  %v1724_v41 = vld [vmem:[%s6341_s27 + $0x90] sm:$0xf]  ;;  %v2064_v56 = vshrl.u32 %v1723_v45, 16  ;;  %v2067_v57 = vshll.u32 %v1723_v45, 16 }
 0x18b   : > { %v1547_v3 = vpop.permute.xlu0 %1546  ;;  %v2074_v47 = vshrl.u32 %v1724_v41, 16  ;;  %v2077_v48 = vshll.u32 %v1724_v41, 16 }
 0x18c   : > { %1659 = vst.msk [vmem:[#allocation2 + $0x2c] sm:$0xf] %vm1647_vm11, %v1547_v3  ;;  %v1569_v10 = vpop.permute.xlu2 %1568  ;;  %v1961_v3 = vsel %vm7034_vm14, %v1952_v51, %v1960_v27  ;;  %v1980_v4 = vor.u32 %v1979_v53, %v1976_v52  ;;  %v2056_v51 = vrot.slane %v2054_v39, 5  ;;  %v2059_v52 = vrot.slane %v2057_v40, 6 }
 0x18d   : > { %1670 = vst.msk [vmem:[#allocation2 + $0x58] sm:$0xf] %vm1647_vm11, %v1569_v10  ;;  %v1992_v10 = vrot.slane %v1990_v59, 4  ;;  %v2032_v53 = vrot.slane %v2030_v35, 4  ;;  %v2076_v60 = vrot.slane %v2074_v47, 5  ;;  %v2079_v61 = vrot.slane %v2077_v48, 6 }
 0x18e   : > { %2175 = vrot.lane.b32.xlu1 %v1911_v63, %s6285_s7  ;;  %v1981_v12 = vsel %vm7034_vm14, %v1972_v62, %v1980_v4  ;;  %v1982_v9 = vrot.slane %v1980_v4, 4  ;;  %v2084_v62 = vshrl.u32 %v1725_v54, 16  ;;  %v2060_v1 = vor.u32 %v2059_v52, %v2056_v51 }
 0x18f   : > { %v2001_v24 = vsel %vm7034_vm14, %v1992_v10, %v2000_v11  ;;  %v2066_v4 = vrot.slane %v2064_v56, 5  ;;  %v2069_v5 = vrot.slane %v2067_v57, 6  ;;  %v2080_v8 = vor.u32 %v2079_v61, %v2076_v60 }
 0x190   : > { %v1555_v21 = vpop.permute.xlu1 %1554  ;;  %v2086_v10 = vrot.slane %v2084_v62, 5  ;;  %v2116_v40 = vrot.slane %v2114_v29, 5  ;;  %v2315_v29 = vld [vmem:[%s6341_s27 + $0x20] sm:$0xf] }
 0x191   : > { %2173 = vrot.lane.b32.xlu0 %v1901_v13, %s6285_s7  ;;  %1663 = vst.msk [vmem:[#allocation2 + $0x3c] sm:$0xf] %vm1647_vm11, %v1555_v21  ;;  %v1720_v21 = vld [vmem:[%s6341_s27 + $0x80] sm:$0xf]  ;;  %v2070_v18 = vor.u32 %v2069_v5, %v2066_v4  ;;  %v2311_v4 = vld [vmem:[%s6341_s27 + $0x10] sm:$0xf] }
 0x192   : > { %2177 = vrot.lane.b32.xlu2 %v1921_v20, %s6285_s7  ;;  %v2002_v20 = vrot.slane %v2000_v11, 4  ;;  %v2034_v30 = vshrl.u32 %v1720_v21, 16  ;;  %v2037_v32 = vshll.u32 %v1720_v21, 16  ;;  %v2089_v11 = vrot.slane %v2087_v0, 6  ;;  %v2309_v5 = vld [vmem:[%s6341_s27 + $0x8] sm:$0xc] }
 0x193   : > { %v1553_v33 = vpop.permute.xlu0 %1552 }
 0x194   : > { %1662 = vst.msk [vmem:[#allocation2 + $0x38] sm:$0xf] %vm1647_vm11, %v1553_v33  ;;  %v1575_v37 = vpop.permute.xlu2 %1574  ;;  %v1991_v33 = vsel %vm7034_vm14, %v1982_v9, %v1990_v59  ;;  %v2011_v36 = vsel %vm7034_vm14, %v2002_v20, %v2010_v28  ;;  %v2036_v43 = vrot.slane %v2034_v30, 5  ;;  %v2107_v9 = vshll.u32 %v1727_v6, 16 }
 0x195   : > { %1673 = vst.msk [vmem:[#allocation2 + $0x64] sm:$0xf] %vm1647_vm11, %v1575_v37  ;;  %v2046_v37 = vrot.slane %v2044_v25, 5  ;;  %v2090_v25 = vor.u32 %v2089_v11, %v2086_v10  ;;  %v2117_v30 = vshll.u32 %v1728_v19, 16  ;;  %v2399_v11 = vrot.slane %v2311_v4, 6 }
 0x196   : > { %2181 = vrot.lane.b32.xlu1 %v1941_v34, %s6285_s7  ;;  %v2022_v34 = vrot.slane %v2020_v17, 4  ;;  %v2109_v28 = vrot.slane %v2107_v9, 6  ;;  %v2322_v4 = vld [vmem:[%s6341_s27 + $0x3c] sm:$0xf] }
 0x197   : > { %v2119_v41 = vrot.slane %v2117_v30, 6 }
 0x198   : > { %v1561_v50 = vpop.permute.xlu1 %1560  ;;  %v2031_v46 = vsel %vm7034_vm14, %v2022_v34, %v2030_v35 }
 0x199   : > { %2179 = vrot.lane.b32.xlu0 %v1931_v23, %s6285_s7  ;;  %1666 = vst.msk [vmem:[#allocation2 + $0x48] sm:$0xf] %vm1647_vm11, %v1561_v50  ;;  %v2050_v50 = vor.u32 %v2049_v38, %v2046_v37  ;;  %v1729_v37 = vld [vmem:[%s6341_s27 + $0xa4] sm:$0xf]  ;;  %v2120_v51 = vor.u32 %v2119_v41, %v2116_v40 }
 0x19a   : > { %2183 = vrot.lane.b32.xlu2 %v1951_v44, %s6285_s7  ;;  %v2039_v44 = vrot.slane %v2037_v32, 6  ;;  %v2124_v45 = vshrl.u32 %v1729_v37, 16 }
 0x19b   : > { %v1559_v58 = vpop.permute.xlu0 %1558  ;;  %v2122_v61 = vrot.slane %v2120_v51, 4 }
 0x19c   : > { %1665 = vst.msk [vmem:[#allocation2 + $0x44] sm:$0xf] %vm1647_vm11, %v1559_v58  ;;  %v1581_v63 = vpop.permute.xlu2 %1580  ;;  %v2021_v58 = vsel %vm7034_vm14, %v2012_v42, %v2020_v17  ;;  %v2040_v59 = vor.u32 %v2039_v44, %v2036_v43  ;;  %v1730_v42 = vld [vmem:[%s6341_s27 + $0xa8] sm:$0xf]  ;;  %v2126_v54 = vrot.slane %v2124_v45, 5 }
 0x19d   : > { %1676 = vst.msk [vmem:[#allocation2 + $0x70] sm:$0xf] %vm1647_vm11, %v1581_v63  ;;  %v2052_v63 = vrot.slane %v2050_v50, 4  ;;  %v2134_v48 = vshrl.u32 %v1730_v42, 16 }
 0x19e   : > { %2187 = vrot.lane.b32.xlu1 %v1971_v55, %s6285_s7  ;;  %v2041_v2 = vsel %vm7034_vm14, %v2032_v53, %v2040_v59  ;;  %v2042_v7 = vrot.slane %v2040_v59, 4 }
 0x19f   : > { %v2061_v15 = vsel %vm7034_vm14, %v2052_v63, %v2060_v1  ;;  %v2136_v57 = vrot.slane %v2134_v48, 5 }
 0x1a0   : > { %v1567_v13 = vpop.permute.xlu1 %1566 }
 0x1a1   : > { %2185 = vrot.lane.b32.xlu0 %v1961_v3, %s6285_s7  ;;  %1669 = vst.msk [vmem:[#allocation2 + $0x54] sm:$0xf] %vm1647_vm11, %v1567_v13  ;;  %v1726_v13 = vld [vmem:[%s6341_s27 + $0x98] sm:$0xf] }
 0x1a2   : > { %2189 = vrot.lane.b32.xlu2 %v1981_v12, %s6285_s7  ;;  %v2062_v12 = vrot.slane %v2060_v1, 4  ;;  %v2094_v20 = vshrl.u32 %v1726_v13, 16  ;;  %v2097_v21 = vshll.u32 %v1726_v13, 16 }
 0x1a3   : > { %v1565_v22 = vpop.permute.xlu0 %1564 }
 0x1a4   : > { %1668 = vst.msk [vmem:[#allocation2 + $0x50] sm:$0xf] %vm1647_vm11, %v1565_v22  ;;  %v1587_v27 = vpop.permute.xlu2 %1586  ;;  %v2051_v22 = vsel %vm7034_vm14, %v2042_v7, %v2050_v50  ;;  %v2071_v26 = vsel %vm7034_vm14, %v2062_v12, %v2070_v18  ;;  %v2099_v34 = vrot.slane %v2097_v21, 6  ;;  %v5855_v12 = vrot.slane %v2309_v5, 10  ;;  %v2314_v21 = vld [vmem:[%s6341_s27 + $0x1c] sm:$0xf] }
 0x1a5   : > { %1679 = vst.msk [vmem:[#allocation2 + $0x7c] sm:$0xf] %vm1647_vm11, %v1587_v27  ;;  %v2106_v27 = vrot.slane %v2104_v16, 5 }
 0x1a6   : > { %2193 = vrot.lane.b32.xlu1 %v2001_v24, %s6285_s7  ;;  %v2082_v24 = vrot.slane %v2080_v8, 4 }
 0x1a7   : > { %v2110_v39 = vor.u32 %v2109_v28, %v2106_v27 }
 0x1a8   : > { %v1573_v23 = vpop.permute.xlu1 %1572  ;;  %v2091_v35 = vsel %vm7034_vm14, %v2082_v24, %v2090_v25  ;;  %v2313_v24 = vld [vmem:[%s6341_s27 + $0x18] sm:$0xf] }
 0x1a9   : > { %2191 = vrot.lane.b32.xlu0 %v1991_v33, %s6285_s7  ;;  %1672 = vst.msk [vmem:[#allocation2 + $0x60] sm:$0xf] %vm1647_vm11, %v1573_v23  ;;  %v2096_v33 = vrot.slane %v2094_v20, 5  ;;  %v2092_v23 = vrot.slane %v2090_v25, 4  ;;  %v2112_v50 = vrot.slane %v2110_v39, 4  ;;  %v2405_v30 = vrot.slane %v2313_v24, 6 }
 0x1aa   : > { %2195 = vrot.lane.b32.xlu2 %v2011_v36, %s6285_s7  ;;  %v2072_v36 = vrot.slane %v2070_v18, 4 }
 0x1ab   : > { %v1571_v49 = vpop.permute.xlu0 %1570  ;;  %v2100_v44 = vor.u32 %v2099_v34, %v2096_v33  ;;  %v2121_v60 = vsel %vm7034_vm14, %v2112_v50, %v2120_v51  ;;  %v2411_v34 = vrot.slane %v2315_v29, 6  ;;  %v2320_v51 = vld [vmem:[%s6341_s27 + $0x34] sm:$0xf] }
 0x1ac   : > { %1671 = vst.msk [vmem:[#allocation2 + $0x5c] sm:$0xf] %vm1647_vm11, %v1571_v49  ;;  %v1593_v55 = vpop.permute.xlu2 %1592  ;;  %v2081_v47 = vsel %vm7034_vm14, %v2072_v36, %v2080_v8  ;;  %v2137_v49 = vshll.u32 %v1730_v42, 16  ;;  %v2310_v8 = vld [vmem:[%s6341_s27 + $0xc] sm:$0xf] }
 0x1ad   : > { %1682 = vst.msk [vmem:[#allocation2 + $0x88] sm:$0xf] %vm1647_vm11, %v1593_v55  ;;  %v2101_v52 = vsel %vm7034_vm14, %v2092_v23, %v2100_v44  ;;  %v2102_v56 = vrot.slane %v2100_v44, 4  ;;  %v2396_v16 = vrot.slane %v2310_v8, 6  ;;  %v2413_v42 = vrot.slane %v2411_v34, 4 }
 0x1ae   : > { %2199 = vrot.lane.b32.xlu1 %v2031_v46, %s6285_s7  ;;  %v2127_v46 = vshll.u32 %v1729_v37, 16  ;;  %v2317_v37 = vld [vmem:[%s6341_s27 + $0x28] sm:$0xf]  ;;  %v2318_v44 = vld [vmem:[%s6341_s27 + $0x2c] sm:$0xf] }
 0x1af   : > { %v2111_v63 = vsel %vm7034_vm14, %v2102_v56, %v2110_v39  ;;  %v2397_v19 = vsel %vm7237_vm4, %v5855_v12, %v2396_v16  ;;  %v2316_v39 = vld [vmem:[%s6341_s27 + $0x24] sm:$0xf]  ;;  %v2417_v23 = vrot.slane %v2317_v37, 6  ;;  %v2420_v48 = vrot.slane %v2318_v44, 6 }
 0x1b0   : > { %v1579_v3 = vpop.permute.xlu1 %1578  ;;  %v2129_v55 = vrot.slane %v2127_v46, 6  ;;  %v2414_v45 = vrot.slane %v2316_v39, 6  ;;  %v2426_v56 = vrot.slane %v2320_v51, 6  ;;  %v2432_v12 = vrot.slane %v2322_v4, 6 }
 0x1b1   : > { %2197 = vrot.lane.b32.xlu0 %v2021_v58, %s6285_s7  ;;  %1675 = vst.msk [vmem:[#allocation2 + $0x6c] sm:$0xf] %vm1647_vm11, %v1579_v3  ;;  %v2139_v58 = vrot.slane %v2137_v49, 6 }
 0x1b2   : > { %2201 = vrot.lane.b32.xlu2 %v2041_v2, %s6285_s7  ;;  %v2130_v0 = vor.u32 %v2129_v55, %v2126_v54  ;;  %v2415_v49 = vsel %vm7237_vm4, %v2413_v42, %v2414_v45 }
 0x1b3   : > { %v1577_v14 = vpop.permute.xlu0 %1576  ;;  %v2140_v1 = vor.u32 %v2139_v58, %v2136_v57  ;;  %v2422_v57 = vrot.slane %v2420_v48, 4 }
 0x1b4   : > { %1674 = vst.msk [vmem:[#allocation2 + $0x68] sm:$0xf] %vm1647_vm11, %v1577_v14  ;;  %v1599_v17 = vpop.permute.xlu2 %1598  ;;  %v2131_v2 = vsel %vm7034_vm14, %v2122_v61, %v2130_v0  ;;  %v2132_v7 = vrot.slane %v2130_v0, 4  ;;  %v2312_v14 = vld [vmem:[%s6341_s27 + $0x14] sm:$0xf] }
 0x1b5   : > { %1685 = vst.msk [vmem:[#allocation2 + $0x94] sm:$0xf] %vm1647_vm11, %v1599_v17  ;;  %v2142_v6 = vrot.slane %v2140_v1, 4  ;;  %v2401_v17 = vrot.slane %v2399_v11, 4  ;;  %v2402_v18 = vrot.slane %v2312_v14, 6 }
 0x1b6   : > { %2205 = vrot.lane.b32.xlu1 %v2061_v15, %s6285_s7  ;;  %v2141_v9 = vsel %vm7034_vm14, %v2132_v7, %v2140_v1  ;;  %vm3761_vm14 = vcmask 1040384  }
 0x1b7   : > { %v2403_v25 = vsel %vm7237_vm4, %v2401_v17, %v2402_v18  ;;  %v2404_v27 = vrot.slane %v2402_v18, 4  ;;  %v2326_v18 = vld [vmem:[%s6341_s27 + $0x4c] sm:$0xf] }
 0x1b8   : > { %v1585_v32 = vpop.permute.xlu1 %1584  ;;  %v2444_v24 = vrot.slane %v2326_v18, 6 }
 0x1b9   : > { %2203 = vrot.lane.b32.xlu0 %v2051_v22, %s6285_s7  ;;  %1678 = vst.msk [vmem:[#allocation2 + $0x78] sm:$0xf] %vm1647_vm11, %v1585_v32  ;;  %v2398_v22 = vrot.slane %v2396_v16, 4 }
 0x1ba   : > { %2207 = vrot.lane.b32.xlu2 %v2071_v26, %s6285_s7  ;;  %v2408_v26 = vrot.slane %v2314_v21, 6  ;;  %v2446_v29 = vrot.slane %v2444_v24, 4 }
 0x1bb   : > { %v1583_v38 = vpop.permute.xlu0 %1582  ;;  %v2400_v32 = vsel %vm7237_vm4, %v2398_v22, %v2399_v11  ;;  %v2324_v11 = vld [vmem:[%s6341_s27 + $0x44] sm:$0xf] }
 0x1bc   : > { %1677 = vst.msk [vmem:[#allocation2 + $0x74] sm:$0xf] %vm1647_vm11, %v1583_v38  ;;  %v1605_v43 = vpop.permute.xlu2 %1604  ;;  %v2410_v33 = vrot.slane %v2408_v26, 4  ;;  %v2407_v38 = vrot.slane %v2405_v30, 4  ;;  %v2438_v16 = vrot.slane %v2324_v11, 6 }
 0x1bd   : > { %1689 = vst.msk [vmem:[#allocation2 + $0xa0] sm:$0x3] %vm1688_vm0, %v1605_v43  ;;  %vm7856_vm0 = vmor %vm3761_vm14, %vm3762_vm15 }
 0x1be   : > { %2211 = vrot.lane.b32.xlu1 %v2091_v35, %s6285_s7  ;;  %v2406_v35 = vsel %vm7237_vm4, %v2404_v27, %v2405_v30  ;;  %v2412_v41 = vsel %vm7237_vm4, %v2410_v33, %v2411_v34  ;;  %v2409_v46 = vsel %vm7237_vm4, %v2407_v38, %v2408_v26  ;;  %v2327_v26 = vld [vmem:[%s6341_s27 + $0x50] sm:$0xf]  ;;  %v2329_v34 = vld [vmem:[%s6341_s27 + $0x58] sm:$0xf] }
 0x1bf   : > { %v2447_v30 = vrot.slane %v2327_v26, 6  ;;  %v2453_v39 = vrot.slane %v2329_v34, 6 }
 0x1c0   : > { %v1591_v53 = vpop.permute.xlu1 %1590 }
 0x1c1   : > { %2209 = vrot.lane.b32.xlu0 %v2081_v47, %s6285_s7  ;;  %1681 = vst.msk [vmem:[#allocation2 + $0x84] sm:$0xf] %vm1647_vm11, %v1591_v53  ;;  %v2419_v47 = vrot.slane %v2417_v23, 4  ;;  %v2319_v53 = vld [vmem:[%s6341_s27 + $0x30] sm:$0xf]  ;;  %v2448_v38 = vsel %vm7237_vm4, %v2446_v29, %v2447_v30  ;;  %v2455_v44 = vrot.slane %v2453_v39, 4 }
 0x1c2   : > { %2213 = vrot.lane.b32.xlu2 %v2101_v52, %s6285_s7  ;;  %v2416_v52 = vrot.slane %v2414_v45, 4 }
 0x1c3   : > { %v1589_v59 = vpop.permute.xlu0 %1588  ;;  %v2421_v55 = vsel %vm7237_vm4, %v2419_v47, %v2420_v48  ;;  %v2332_v48 = vld [vmem:[%s6341_s27 + $0x64] sm:$0xf] }
 0x1c4   : > { %1680 = vst.msk [vmem:[#allocation2 + $0x80] sm:$0xf] %vm1647_vm11, %v1589_v59  ;;  %v2148_v62 = vpop.permute.xlu2 %2147  ;;  %v2321_v59 = vld [vmem:[%s6341_s27 + $0x38] sm:$0xf]  ;;  %v2418_v61 = vsel %vm7237_vm4, %v2416_v52, %v2417_v23  ;;  %v2330_v23 = vld [vmem:[%s6341_s27 + $0x5c] sm:$0xf] }
 0x1c5   : > { %2269 = vst.msk [vmem:[#allocation2 + $0x8] sm:$0xf] %vm2266_vm1, %v2148_v62  ;;  %v2428_v62 = vrot.slane %v2426_v56, 4  ;;  %v2429_v0 = vrot.slane %v2321_v59, 6  ;;  %v2456_v45 = vrot.slane %v2330_v23, 6 }
 0x1c6   : > { %2217 = vrot.lane.b32.xlu1 %v2121_v60, %s6285_s7  ;;  %v2423_v60 = vrot.slane %v2319_v53, 6  ;;  %v2462_v53 = vrot.slane %v2332_v48, 6 }
 0x1c7   : > { %v2431_v8 = vrot.slane %v2429_v0, 4  ;;  %v2457_v52 = vsel %vm7237_vm4, %v2455_v44, %v2456_v45 }
 0x1c8   : > { %v1597_v3 = vpop.permute.xlu1 %1596  ;;  %v2464_v59 = vrot.slane %v2462_v53, 4 }
 0x1c9   : > { %2215 = vrot.lane.b32.xlu0 %v2111_v63, %s6285_s7  ;;  %1684 = vst.msk [vmem:[#allocation2 + $0x90] sm:$0xf] %vm1647_vm11, %v1597_v3  ;;  %v2424_v63 = vsel %vm7237_vm4, %v2422_v57, %v2423_v60  ;;  %v2425_v3 = vrot.slane %v2423_v60, 4 }
 0x1ca   : > { %2219 = vrot.lane.b32.xlu2 %v2131_v2, %s6285_s7  ;;  %v2323_v2 = vld [vmem:[%s6341_s27 + $0x40] sm:$0xf] }
 0x1cb   : > { %v1595_v10 = vpop.permute.xlu0 %1594  ;;  %v2435_v7 = vrot.slane %v2323_v2, 6 }
 0x1cc   : > { %1683 = vst.msk [vmem:[#allocation2 + $0x8c] sm:$0xf] %vm1647_vm11, %v1595_v10  ;;  %v2154_v13 = vpop.permute.xlu2 %2153 }
 0x1cd   : > { %2272 = vst.msk [vmem:[#allocation2 + $0x14] sm:$0xf] %vm2266_vm1, %v2154_v13  ;;  %v2427_v13 = vsel %vm7237_vm4, %v2425_v3, %v2426_v56  ;;  %v2437_v14 = vrot.slane %v2435_v7, 4  ;;  %v2333_v56 = vld [vmem:[%s6341_s27 + $0x68] sm:$0xf] }
 0x1ce   : > { %2223 = vrot.lane.b32.xlu1 %v2142_v6, %s6285_s7  ;;  %v2430_v6 = vsel %vm7237_vm4, %v2428_v62, %v2429_v0  ;;  %v2465_v60 = vrot.slane %v2333_v56, 6  ;;  %v2335_v0 = vld [vmem:[%s6341_s27 + $0x70] sm:$0xf] }
 0x1cf   : > { %v2439_v22 = vsel %vm7237_vm4, %v2437_v14, %v2438_v16  ;;  %v2471_v4 = vrot.slane %v2335_v0, 6 }
 0x1d0   : > { %v1603_v20 = vpop.permute.xlu1 %1602  ;;  %v2466_v3 = vsel %vm7237_vm4, %v2464_v59, %v2465_v60 }
 0x1d1   : > { %2221 = vrot.lane.b32.xlu0 %v2141_v9, %s6285_s7  ;;  %1687 = vst.msk [vmem:[#allocation2 + $0x9c] sm:$0xf] %vm1647_vm11, %v1603_v20  ;;  %v2433_v9 = vsel %vm7237_vm4, %v2431_v8, %v2432_v12  ;;  %v2325_v20 = vld [vmem:[%s6341_s27 + $0x48] sm:$0xf]  ;;  %v2473_v11 = vrot.slane %v2471_v4, 4 }
 0x1d2   : > { %2516 = vrot.lane.b32.xlu2 %v2397_v19, %s6286_s8  ;;  %v2434_v19 = vrot.slane %v2432_v12, 4  ;;  %v2441_v27 = vrot.slane %v2325_v20, 6 }
 0x1d3   : > { %v1601_v31 = vpop.permute.xlu0 %1600 }
 0x1d4   : > { %1686 = vst.msk [vmem:[#allocation2 + $0x98] sm:$0xf] %vm1647_vm11, %v1601_v31  ;;  %v2160_v28 = vpop.permute.xlu2 %2159  ;;  %v2440_v31 = vrot.slane %v2438_v16, 4  ;;  %v2338_v16 = vld [vmem:[%s6341_s27 + $0x7c] sm:$0xf]  ;;  %vm2680_vm11 = vcmask 189600  }
 0x1d5   : > { %2275 = vst.msk [vmem:[#allocation2 + $0x20] sm:$0xf] %vm2266_vm1, %v2160_v28  ;;  %v2436_v28 = vsel %vm7237_vm4, %v2434_v19, %v2435_v7  ;;  %v2336_v7 = vld [vmem:[%s6341_s27 + $0x74] sm:$0xf]  ;;  %v2480_v20 = vrot.slane %v2338_v16, 6 }
 0x1d6   : > { %2520 = vrot.lane.b32.xlu1 %v2403_v25, %s6286_s8  ;;  %v2474_v12 = vrot.slane %v2336_v7, 6 }
 0x1d7   : > { %v2482_v26 = vrot.slane %v2480_v20, 4 }
 0x1d8   : > { %v2146_v36 = vpop.permute.xlu1 %2145  ;;  %v2475_v19 = vsel %vm7237_vm4, %v2473_v11, %v2474_v12 }
 0x1d9   : > { %2518 = vrot.lane.b32.xlu0 %v2400_v32, %s6286_s8  ;;  %2268 = vst.msk [vmem:[#allocation2 + $0x4] sm:$0xf] %vm2266_vm1, %v2146_v36  ;;  %v2442_v32 = vsel %vm7237_vm4, %v2440_v31, %v2441_v27  ;;  %v2328_v36 = vld [vmem:[%s6341_s27 + $0x54] sm:$0xf] }
 0x1da   : > { %2522 = vrot.lane.b32.xlu2 %v2406_v35, %s6286_s8  ;;  %v2443_v35 = vrot.slane %v2441_v27, 4  ;;  %v2450_v42 = vrot.slane %v2328_v36, 6 }
 0x1db   : > { %v2144_v40 = vpop.permute.xlu0 %2143 }
 0x1dc   : > { %2267 = vst.msk [vmem:[#allocation2] sm:$0xf] %vm2266_vm1, %v2144_v40  ;;  %v2166_v43 = vpop.permute.xlu2 %2165  ;;  %v2449_v40 = vrot.slane %v2447_v30, 4  ;;  %v2341_v30 = vld [vmem:[%s6341_s27 + $0x88] sm:$0xf] }
 0x1dd   : > { %2278 = vst.msk [vmem:[#allocation2 + $0x2c] sm:$0xf] %vm2266_vm1, %v2166_v43  ;;  %v2445_v43 = vsel %vm7237_vm4, %v2443_v35, %v2444_v24  ;;  %v2339_v24 = vld [vmem:[%s6341_s27 + $0x80] sm:$0xf]  ;;  %v2489_v36 = vrot.slane %v2341_v30, 6 }
 0x1de   : > { %2526 = vrot.lane.b32.xlu1 %v2412_v41, %s6286_s8  ;;  %v2483_v27 = vrot.slane %v2339_v24, 6 }
 0x1df   : > { %v2491_v23 = vrot.slane %v2489_v36, 4 }
 0x1e0   : > { %v2152_v50 = vpop.permute.xlu1 %2151  ;;  %v2484_v35 = vsel %vm7237_vm4, %v2482_v26, %v2483_v27  ;;  %v2685_v26 = vld [vmem:[%s6341_s27 + $0x1c] sm:$0xf] }
 0x1e1   : > { %2524 = vrot.lane.b32.xlu0 %v2409_v46, %s6286_s8  ;;  %2271 = vst.msk [vmem:[#allocation2 + $0x10] sm:$0xf] %vm2266_vm1, %v2152_v50  ;;  %v2451_v46 = vsel %vm7237_vm4, %v2449_v40, %v2450_v42  ;;  %v2331_v50 = vld [vmem:[%s6341_s27 + $0x60] sm:$0xf]  ;;  %v2772_v30 = vrot.slane %v2685_v26, 6 }
 0x1e2   : > { %2528 = vrot.lane.b32.xlu2 %v2415_v49, %s6286_s8  ;;  %v2452_v49 = vrot.slane %v2450_v42, 4  ;;  %v2459_v57 = vrot.slane %v2331_v50, 6 }
 0x1e3   : > { %v2150_v54 = vpop.permute.xlu0 %2149 }
 0x1e4   : > { %2270 = vst.msk [vmem:[#allocation2 + $0xc] sm:$0xf] %vm2266_vm1, %v2150_v54  ;;  %v2172_v58 = vpop.permute.xlu2 %2171  ;;  %v2458_v54 = vrot.slane %v2456_v45, 4  ;;  %v2344_v45 = vld [vmem:[%s6341_s27 + $0x94] sm:$0xf] }
 0x1e5   : > { %2281 = vst.msk [vmem:[#allocation2 + $0x38] sm:$0xf] %vm2266_vm1, %v2172_v58  ;;  %v2454_v58 = vsel %vm7237_vm4, %v2452_v49, %v2453_v39  ;;  %v2342_v39 = vld [vmem:[%s6341_s27 + $0x8c] sm:$0xf]  ;;  %v2498_v50 = vrot.slane %v2344_v45, 6 }
 0x1e6   : > { %2532 = vrot.lane.b32.xlu1 %v2421_v55, %s6286_s8  ;;  %v2492_v42 = vrot.slane %v2342_v39, 6 }
 0x1e7   : > { %v2500_v56 = vrot.slane %v2498_v50, 4 }
 0x1e8   : > { %v2158_v1 = vpop.permute.xlu1 %2157  ;;  %v2493_v49 = vsel %vm7237_vm4, %v2491_v23, %v2492_v42 }
 0x1e9   : > { %2530 = vrot.lane.b32.xlu0 %v2418_v61, %s6286_s8  ;;  %2274 = vst.msk [vmem:[#allocation2 + $0x1c] sm:$0xf] %vm2266_vm1, %v2158_v1  ;;  %v2460_v61 = vsel %vm7237_vm4, %v2458_v54, %v2459_v57  ;;  %v2334_v1 = vld [vmem:[%s6341_s27 + $0x6c] sm:$0xf] }
 0x1ea   : > { %2534 = vrot.lane.b32.xlu2 %v2424_v63, %s6286_s8  ;;  %v2461_v63 = vrot.slane %v2459_v57, 4  ;;  %v2468_v8 = vrot.slane %v2334_v1, 6 }
 0x1eb   : > { %v2156_v5 = vpop.permute.xlu0 %2155 }
 0x1ec   : > { %2273 = vst.msk [vmem:[#allocation2 + $0x18] sm:$0xf] %vm2266_vm1, %v2156_v5  ;;  %v2178_v10 = vpop.permute.xlu2 %2177  ;;  %v2467_v5 = vrot.slane %v2465_v60, 4  ;;  %v2347_v60 = vld [vmem:[%s6341_s27 + $0xa0] sm:$0xf] }
 0x1ed   : > { %2284 = vst.msk [vmem:[#allocation2 + $0x44] sm:$0xf] %vm2266_vm1, %v2178_v10  ;;  %v2463_v10 = vsel %vm7237_vm4, %v2461_v63, %v2462_v53  ;;  %v2345_v53 = vld [vmem:[%s6341_s27 + $0x98] sm:$0xf]  ;;  %v2507_v1 = vrot.slane %v2347_v60, 6 }
 0x1ee   : > { %2538 = vrot.lane.b32.xlu1 %v2430_v6, %s6286_s8  ;;  %v2501_v57 = vrot.slane %v2345_v53, 6 }
 0x1ef   : > { %v2509_v7 = vrot.slane %v2507_v1, 4 }
 0x1f0   : > { %v2164_v17 = vpop.permute.xlu1 %2163  ;;  %v2502_v63 = vsel %vm7237_vm4, %v2500_v56, %v2501_v57 }
 0x1f1   : > { %2536 = vrot.lane.b32.xlu0 %v2427_v13, %s6286_s8  ;;  %2277 = vst.msk [vmem:[#allocation2 + $0x28] sm:$0xf] %vm2266_vm1, %v2164_v17  ;;  %v2469_v13 = vsel %vm7237_vm4, %v2467_v5, %v2468_v8  ;;  %v2337_v17 = vld [vmem:[%s6341_s27 + $0x78] sm:$0xf] }
 0x1f2   : > { %2540 = vrot.lane.b32.xlu2 %v2433_v9, %s6286_s8  ;;  %v2470_v9 = vrot.slane %v2468_v8, 4  ;;  %v2477_v31 = vrot.slane %v2337_v17, 6 }
 0x1f3   : > { %v2162_v21 = vpop.permute.xlu0 %2161 }
 0x1f4   : > { %2276 = vst.msk [vmem:[#allocation2 + $0x24] sm:$0xf] %vm2266_vm1, %v2162_v21  ;;  %v2184_v25 = vpop.permute.xlu2 %2183  ;;  %v2476_v21 = vrot.slane %v2474_v12, 4 }
 0x1f5   : > { %2287 = vst.msk [vmem:[#allocation2 + $0x50] sm:$0xf] %vm2266_vm1, %v2184_v25  ;;  %v2472_v25 = vsel %vm7237_vm4, %v2470_v9, %v2471_v4  ;;  %v2348_v4 = vld [vmem:[%s6341_s27 + $0xa4] sm:$0xf] }
 0x1f6   : > { %2544 = vrot.lane.b32.xlu1 %v2439_v22, %s6286_s8  ;;  %v2510_v8 = vrot.slane %v2348_v4, 6 }
 0x1f8   : > { %v2170_v33 = vpop.permute.xlu1 %2169  ;;  %v2511_v16 = vsel %vm7237_vm4, %v2509_v7, %v2510_v8  ;;  %v2512_v9 = vrot.slane %v2510_v8, 4  ;;  %v2693_v8 = vld [vmem:[%s6341_s27 + $0x3c] sm:$0xf] }
 0x1f9   : > { %2542 = vrot.lane.b32.xlu0 %v2436_v28, %s6286_s8  ;;  %2280 = vst.msk [vmem:[#allocation2 + $0x34] sm:$0xf] %vm2266_vm1, %v2170_v33  ;;  %v2478_v28 = vsel %vm7237_vm4, %v2476_v21, %v2477_v31  ;;  %v2340_v33 = vld [vmem:[%s6341_s27 + $0x84] sm:$0xf] }
 0x1fa   : > { %2546 = vrot.lane.b32.xlu2 %v2442_v32, %s6286_s8  ;;  %v2479_v32 = vrot.slane %v2477_v31, 4  ;;  %v2486_v40 = vrot.slane %v2340_v33, 6 }
 0x1fb   : > { %v2168_v37 = vpop.permute.xlu0 %2167 }
 0x1fc   : > { %2279 = vst.msk [vmem:[#allocation2 + $0x30] sm:$0xf] %vm2266_vm1, %v2168_v37  ;;  %v2190_v41 = vpop.permute.xlu2 %2189  ;;  %v2485_v37 = vrot.slane %v2483_v27, 4  ;;  %v2684_v27 = vld [vmem:[%s6341_s27 + $0x18] sm:$0xf] }
 0x1fd   : > { %2290 = vst.msk [vmem:[#allocation2 + $0x5c] sm:$0xf] %vm2266_vm1, %v2190_v41  ;;  %v2481_v41 = vsel %vm7237_vm4, %v2479_v32, %v2480_v20 }
 0x1fe   : > { %2550 = vrot.lane.b32.xlu1 %v2448_v38, %s6286_s8 }
 0x200   : > { %v2176_v47 = vpop.permute.xlu1 %2175 }
 0x201   : > { %2548 = vrot.lane.b32.xlu0 %v2445_v43, %s6286_s8  ;;  %2283 = vst.msk [vmem:[#allocation2 + $0x40] sm:$0xf] %vm2266_vm1, %v2176_v47  ;;  %v2487_v43 = vsel %vm7237_vm4, %v2485_v37, %v2486_v40  ;;  %v2343_v47 = vld [vmem:[%s6341_s27 + $0x90] sm:$0xf]  ;;  %v2774_v37 = vrot.slane %v2772_v30, 4 }
 0x202   : > { %2552 = vrot.lane.b32.xlu2 %v2451_v46, %s6286_s8  ;;  %v2488_v46 = vrot.slane %v2486_v40, 4  ;;  %v2495_v54 = vrot.slane %v2343_v47, 6 }
 0x203   : > { %v2174_v51 = vpop.permute.xlu0 %2173 }
 0x204   : > { %2282 = vst.msk [vmem:[#allocation2 + $0x3c] sm:$0xf] %vm2266_vm1, %v2174_v51  ;;  %v2196_v55 = vpop.permute.xlu2 %2195  ;;  %v2494_v51 = vrot.slane %v2492_v42, 4  ;;  %v2687_v42 = vld [vmem:[%s6341_s27 + $0x24] sm:$0xf] }
 0x205   : > { %2293 = vst.msk [vmem:[#allocation2 + $0x68] sm:$0xf] %vm2266_vm1, %v2196_v55  ;;  %v2490_v55 = vsel %vm7237_vm4, %v2488_v46, %v2489_v36  ;;  %v2769_v36 = vrot.slane %v2684_v27, 6 }
 0x206   : > { %2556 = vrot.lane.b32.xlu1 %v2457_v52, %s6286_s8 }
 0x207   : > { %v2771_v23 = vrot.slane %v2769_v36, 4 }
 0x208   : > { %v2182_v62 = vpop.permute.xlu1 %2181 }
 0x209   : > { %2554 = vrot.lane.b32.xlu0 %v2454_v58, %s6286_s8  ;;  %2286 = vst.msk [vmem:[#allocation2 + $0x4c] sm:$0xf] %vm2266_vm1, %v2182_v62  ;;  %v2496_v58 = vsel %vm7237_vm4, %v2494_v51, %v2495_v54  ;;  %v2346_v62 = vld [vmem:[%s6341_s27 + $0x9c] sm:$0xf] }
 0x20a   : > { %2558 = vrot.lane.b32.xlu2 %v2460_v61, %s6286_s8  ;;  %v2497_v61 = vrot.slane %v2495_v54, 4  ;;  %v2504_v5 = vrot.slane %v2346_v62, 6 }
 0x20b   : > { %v2180_v2 = vpop.permute.xlu0 %2179 }
 0x20c   : > { %2285 = vst.msk [vmem:[#allocation2 + $0x48] sm:$0xf] %vm2266_vm1, %v2180_v2  ;;  %v2202_v6 = vpop.permute.xlu2 %2201  ;;  %v2503_v2 = vrot.slane %v2501_v57, 4  ;;  %v2506_v12 = vrot.slane %v2504_v5, 4  ;;  %v2690_v57 = vld [vmem:[%s6341_s27 + $0x30] sm:$0xf] }
 0x20d   : > { %2296 = vst.msk [vmem:[#allocation2 + $0x74] sm:$0xf] %vm2266_vm1, %v2202_v6  ;;  %v2499_v6 = vsel %vm7237_vm4, %v2497_v61, %v2498_v50  ;;  %v2773_v50 = vsel %vm7237_vm4, %v2771_v23, %v2772_v30  ;;  %v2698_v30 = vld [vmem:[%s6341_s27 + $0x50] sm:$0xf] }
 0x20e   : > { %2562 = vrot.lane.b32.xlu1 %v2466_v3, %s6286_s8  ;;  %v2508_v21 = vsel %vm7237_vm4, %v2506_v12, %v2507_v1 }
 0x210   : > { %v2188_v14 = vpop.permute.xlu1 %2187 }
 0x211   : > { %2560 = vrot.lane.b32.xlu0 %v2463_v10, %s6286_s8  ;;  %2289 = vst.msk [vmem:[#allocation2 + $0x58] sm:$0xf] %vm2266_vm1, %v2188_v14  ;;  %v2505_v10 = vsel %vm7237_vm4, %v2503_v2, %v2504_v5 }
 0x212   : > { %2564 = vrot.lane.b32.xlu2 %v2469_v13, %s6286_s8  ;;  %v2349_v13 = vld [vmem:[%s6341_s27 + $0xa8] sm:$0xf] }
 0x213   : > { %v2186_v18 = vpop.permute.xlu0 %2185  ;;  %v2513_v20 = vrot.slane %v2349_v13, 6 }
 0x214   : > { %2288 = vst.msk [vmem:[#allocation2 + $0x54] sm:$0xf] %vm2266_vm1, %v2186_v18  ;;  %v2208_v22 = vpop.permute.xlu2 %2207  ;;  %v2682_v18 = vld [vmem:[%s6341_s27 + $0x10] sm:$0xc] }
 0x215   : > { %2299 = vst.msk [vmem:[#allocation2 + $0x80] sm:$0xf] %vm2266_vm1, %v2208_v22  ;;  %v5856_v22 = vrot.slane %v2682_v18, 10  ;;  %v2514_v31 = vsel %vm7237_vm4, %v2512_v9, %v2513_v20  ;;  %v2796_v9 = vrot.slane %v2693_v8, 6 }
 0x216   : > { %2568 = vrot.lane.b32.xlu1 %v2475_v19, %s6286_s8  ;;  %v2683_v19 = vld [vmem:[%s6341_s27 + $0x14] sm:$0xf] }
 0x217   : > { %v2766_v24 = vrot.slane %v2683_v19, 6 }
 0x218   : > { %v2194_v29 = vpop.permute.xlu1 %2193 }
 0x219   : > { %2566 = vrot.lane.b32.xlu0 %v2472_v25, %s6286_s8  ;;  %2292 = vst.msk [vmem:[#allocation2 + $0x64] sm:$0xf] %vm2266_vm1, %v2194_v29  ;;  %v2767_v29 = vsel %vm7237_vm4, %v5856_v22, %v2766_v24  ;;  %v2768_v32 = vrot.slane %v2766_v24, 4  ;;  %v2697_v22 = vld [vmem:[%s6341_s27 + $0x4c] sm:$0xf]  ;;  %v2798_v24 = vrot.slane %v2796_v9, 4 }
 0x21a   : > { %2570 = vrot.lane.b32.xlu2 %v2478_v28, %s6286_s8  ;;  %v2808_v27 = vrot.slane %v2697_v22, 6 }
 0x21b   : > { %v2192_v34 = vpop.permute.xlu0 %2191  ;;  %v2770_v39 = vsel %vm7237_vm4, %v2768_v32, %v2769_v36 }
 0x21c   : > { %2291 = vst.msk [vmem:[#allocation2 + $0x60] sm:$0xf] %vm2266_vm1, %v2192_v34  ;;  %v2214_v38 = vpop.permute.xlu2 %2213  ;;  %v2686_v34 = vld [vmem:[%s6341_s27 + $0x20] sm:$0xf] }
 0x21d   : > { %2302 = vst.msk [vmem:[#allocation2 + $0x8c] sm:$0xf] %vm2266_vm1, %v2214_v38  ;;  %v2775_v38 = vrot.slane %v2686_v34, 6  ;;  %v2810_v34 = vrot.slane %v2808_v27, 4 }
 0x21e   : > { %2574 = vrot.lane.b32.xlu1 %v2484_v35, %s6286_s8  ;;  %v2515_v35 = vrot.slane %v2513_v20, 4 }
 0x21f   : > { %v2777_v46 = vrot.slane %v2775_v38, 4 }
 0x220   : > { %v2200_v44 = vpop.permute.xlu1 %2199 }
 0x221   : > { %2572 = vrot.lane.b32.xlu0 %v2481_v41, %s6286_s8  ;;  %2295 = vst.msk [vmem:[#allocation2 + $0x70] sm:$0xf] %vm2266_vm1, %v2200_v44  ;;  %v2688_v41 = vld [vmem:[%s6341_s27 + $0x28] sm:$0xf]  ;;  %v2776_v44 = vsel %vm7237_vm4, %v2774_v37, %v2775_v38  ;;  %v2700_v38 = vld [vmem:[%s6341_s27 + $0x58] sm:$0xf] }
 0x222   : > { %2576 = vrot.lane.b32.xlu2 %v2487_v43, %s6286_s8  ;;  %v2781_v45 = vrot.slane %v2688_v41, 6 }
 0x223   : > { %v2198_v48 = vpop.permute.xlu0 %2197 }
 0x224   : > { %2294 = vst.msk [vmem:[#allocation2 + $0x6c] sm:$0xf] %vm2266_vm1, %v2198_v48  ;;  %v2220_v52 = vpop.permute.xlu2 %2219  ;;  %v2689_v48 = vld [vmem:[%s6341_s27 + $0x2c] sm:$0xf]  ;;  %v2783_v51 = vrot.slane %v2781_v45, 4 }
 0x225   : > { %2305 = vst.msk [vmem:[#allocation2 + $0x98] sm:$0xf] %vm2266_vm1, %v2220_v52  ;;  %v2784_v52 = vrot.slane %v2689_v48, 6 }
 0x226   : > { %2580 = vrot.lane.b32.xlu1 %v2493_v49, %s6286_s8  ;;  %v2778_v49 = vrot.slane %v2687_v42, 6  ;;  %v2817_v42 = vrot.slane %v2700_v38, 6 }
 0x227   : > { %v2786_v61 = vrot.slane %v2784_v52, 4 }
 0x228   : > { %v2206_v59 = vpop.permute.xlu1 %2205  ;;  %v2779_v53 = vsel %vm7237_vm4, %v2777_v46, %v2778_v49  ;;  %v2780_v56 = vrot.slane %v2778_v49, 4  ;;  %v2819_v48 = vrot.slane %v2817_v42, 4 }
 0x229   : > { %2578 = vrot.lane.b32.xlu0 %v2490_v55, %s6286_s8  ;;  %2298 = vst.msk [vmem:[#allocation2 + $0x7c] sm:$0xf] %vm2266_vm1, %v2206_v59  ;;  %v2691_v55 = vld [vmem:[%s6341_s27 + $0x34] sm:$0xf]  ;;  %v2785_v59 = vsel %vm7237_vm4, %v2783_v51, %v2784_v52  ;;  %v2703_v52 = vld [vmem:[%s6341_s27 + $0x64] sm:$0xf] }
 0x22a   : > { %2582 = vrot.lane.b32.xlu2 %v2496_v58, %s6286_s8  ;;  %v2790_v60 = vrot.slane %v2691_v55, 6  ;;  %v2782_v1 = vsel %vm7237_vm4, %v2780_v56, %v2781_v45  ;;  %v2701_v45 = vld [vmem:[%s6341_s27 + $0x5c] sm:$0xf] }
 0x22b   : > { %v2204_v0 = vpop.permute.xlu0 %2203  ;;  %v2820_v49 = vrot.slane %v2701_v45, 6 }
 0x22c   : > { %2297 = vst.msk [vmem:[#allocation2 + $0x78] sm:$0xf] %vm2266_vm1, %v2204_v0  ;;  %v2517_v3 = vpop.permute.xlu2 %2516  ;;  %v2692_v0 = vld [vmem:[%s6341_s27 + $0x38] sm:$0xf]  ;;  %v2792_v2 = vrot.slane %v2790_v60, 4 }
 0x22d   : > { %2640 = vst.msk [vmem:[#allocation2] sm:$0xf] %vm2639_vm5, %v2517_v3  ;;  %v2793_v3 = vrot.slane %v2692_v0, 6  ;;  %v2821_v56 = vsel %vm7237_vm4, %v2819_v48, %v2820_v49 }
 0x22e   : > { %2586 = vrot.lane.b32.xlu1 %v2502_v63, %s6286_s8  ;;  %v2787_v63 = vrot.slane %v2690_v57, 6  ;;  %v2826_v57 = vrot.slane %v2703_v52, 6 }
 0x22f   : > { %v2795_v13 = vrot.slane %v2793_v3, 4 }
 0x230   : > { %v2212_v11 = vpop.permute.xlu1 %2211  ;;  %v2788_v4 = vsel %vm7237_vm4, %v2786_v61, %v2787_v63  ;;  %v2789_v7 = vrot.slane %v2787_v63, 4  ;;  %v2828_v0 = vrot.slane %v2826_v57, 4 }
 0x231   : > { %2584 = vrot.lane.b32.xlu0 %v2499_v6, %s6286_s8  ;;  %2301 = vst.msk [vmem:[#allocation2 + $0x88] sm:$0xf] %vm2266_vm1, %v2212_v11  ;;  %v2694_v6 = vld [vmem:[%s6341_s27 + $0x40] sm:$0xf]  ;;  %v2794_v11 = vsel %vm7237_vm4, %v2792_v2, %v2793_v3  ;;  %v2797_v20 = vsel %vm7237_vm4, %v2795_v13, %v2796_v9  ;;  %v2706_v3 = vld [vmem:[%s6341_s27 + $0x70] sm:$0xf] }
 0x232   : > { %2588 = vrot.lane.b32.xlu2 %v2505_v10, %s6286_s8  ;;  %v2799_v12 = vrot.slane %v2694_v6, 6  ;;  %v2835_v8 = vrot.slane %v2706_v3, 6 }
 0x233   : > { %v2210_v14 = vpop.permute.xlu0 %2209 }
 0x234   : > { %2300 = vst.msk [vmem:[#allocation2 + $0x84] sm:$0xf] %vm2266_vm1, %v2210_v14  ;;  %v2523_v17 = vpop.permute.xlu2 %2522  ;;  %v2801_v18 = vrot.slane %v2799_v12, 4 }
 0x235   : > { %2643 = vst.msk [vmem:[#allocation2 + $0xc] sm:$0xf] %vm2639_vm5, %v2523_v17  ;;  %v2791_v17 = vsel %vm7237_vm4, %v2789_v7, %v2790_v60  ;;  %v2704_v60 = vld [vmem:[%s6341_s27 + $0x68] sm:$0xf] }
 0x236   : > { %2592 = vrot.lane.b32.xlu1 %v2511_v16, %s6286_s8  ;;  %v2695_v16 = vld [vmem:[%s6341_s27 + $0x44] sm:$0xf]  ;;  %v2829_v63 = vrot.slane %v2704_v60, 6 }
 0x237   : > { %v2802_v19 = vrot.slane %v2695_v16, 6  ;;  %v2837_v16 = vrot.slane %v2835_v8, 4 }
 0x238   : > { %v2218_v25 = vpop.permute.xlu1 %2217  ;;  %v2830_v7 = vsel %vm7237_vm4, %v2828_v0, %v2829_v63 }
 0x239   : > { %2590 = vrot.lane.b32.xlu0 %v2508_v21, %s6286_s8  ;;  %2304 = vst.msk [vmem:[#allocation2 + $0x94] sm:$0xf] %vm2266_vm1, %v2218_v25  ;;  %v2803_v26 = vsel %vm7237_vm4, %v2801_v18, %v2802_v19 }
 0x23a   : > { %2594 = vrot.lane.b32.xlu2 %v2514_v31, %s6286_s8  ;;  %v2696_v31 = vld [vmem:[%s6341_s27 + $0x48] sm:$0xf] }
 0x23b   : > { %v2216_v28 = vpop.permute.xlu0 %2215  ;;  %v2805_v32 = vrot.slane %v2696_v31, 6 }
 0x23c   : > { %2303 = vst.msk [vmem:[#allocation2 + $0x90] sm:$0xf] %vm2266_vm1, %v2216_v28  ;;  %v2529_v33 = vpop.permute.xlu2 %2528  ;;  %v2804_v28 = vrot.slane %v2802_v19, 4  ;;  %v2709_v19 = vld [vmem:[%s6341_s27 + $0x7c] sm:$0xf] }
 0x23d   : > { %2646 = vst.msk [vmem:[#allocation2 + $0x18] sm:$0xf] %vm2639_vm5, %v2529_v33  ;;  %v2800_v33 = vsel %vm7237_vm4, %v2798_v24, %v2799_v12  ;;  %v2707_v12 = vld [vmem:[%s6341_s27 + $0x74] sm:$0xf]  ;;  %v2844_v31 = vrot.slane %v2709_v19, 6 }
 0x23e   : > { %2886 = vrot.lane.b32.xlu1 %v2767_v29, %s6287_s9  ;;  %v2806_v36 = vsel %vm7237_vm4, %v2804_v28, %v2805_v32  ;;  %v2838_v9 = vrot.slane %v2707_v12, 6 }
 0x240   : > { %v2224_v40 = vpop.permute.xlu1 %2223  ;;  %v2839_v24 = vsel %vm7237_vm4, %v2837_v16, %v2838_v9  ;;  %v2721_v16 = vld [vmem:[%s6341_s27 + $0xac] sm:$0xf] }
 0x241   : > { %2596 = vrot.lane.b32.xlu0 %v2515_v35, %s6286_s8  ;;  %2308 = vst.msk [vmem:[#allocation2 + $0xa0] sm:$0x3] %vm2307_vm6, %v2224_v40  ;;  %v2811_v35 = vrot.slane %v2698_v30, 6  ;;  %v2699_v40 = vld [vmem:[%s6341_s27 + $0x54] sm:$0xf]  ;;  %v2846_v30 = vrot.slane %v2844_v31, 4 }
 0x242   : > { %2888 = vrot.lane.b32.xlu2 %v2770_v39, %s6287_s9  ;;  %v2807_v39 = vrot.slane %v2805_v32, 4  ;;  %v2814_v46 = vrot.slane %v2699_v40, 6  ;;  %vm4726_vm6 = vcmask 1043456  }
 0x243   : > { %v2222_v43 = vpop.permute.xlu0 %2221  ;;  %v2812_v23 = vsel %vm7237_vm4, %v2810_v34, %v2811_v35 }
 0x244   : > { %2306 = vst.msk [vmem:[#allocation2 + $0x9c] sm:$0xf] %vm2266_vm1, %v2222_v43  ;;  %v2535_v47 = vpop.permute.xlu2 %2534  ;;  %v2813_v43 = vrot.slane %v2811_v35, 4  ;;  %v2712_v35 = vld [vmem:[%s6341_s27 + $0x88] sm:$0xf]  ;;  %vm4011_vm1 = vcmask 290048  }
 0x245   : > { %2649 = vst.msk [vmem:[#allocation2 + $0x24] sm:$0xf] %vm2639_vm5, %v2535_v47  ;;  %v2809_v47 = vsel %vm7237_vm4, %v2807_v39, %v2808_v27  ;;  %v2710_v27 = vld [vmem:[%s6341_s27 + $0x80] sm:$0xf]  ;;  %v2853_v40 = vrot.slane %v2712_v35, 6 }
 0x246   : > { %2892 = vrot.lane.b32.xlu1 %v2776_v44, %s6287_s9  ;;  %v2847_v32 = vrot.slane %v2710_v27, 6 }
 0x247   : > { %v2855_v45 = vrot.slane %v2853_v40, 4 }
 0x248   : > { %v2521_v54 = vpop.permute.xlu1 %2520  ;;  %v2848_v39 = vsel %vm7237_vm4, %v2846_v30, %v2847_v32  ;;  %v3054_v30 = vld [vmem:[%s6341_s27 + $0x18] sm:$0xf] }
 0x249   : > { %2890 = vrot.lane.b32.xlu0 %v2773_v50, %s6287_s9  ;;  %2642 = vst.msk [vmem:[#allocation2 + $0x8] sm:$0xf] %vm2639_vm5, %v2521_v54  ;;  %v2815_v50 = vsel %vm7237_vm4, %v2813_v43, %v2814_v46  ;;  %v2702_v54 = vld [vmem:[%s6341_s27 + $0x60] sm:$0xf] }
 0x24a   : > { %2894 = vrot.lane.b32.xlu2 %v2779_v53, %s6287_s9  ;;  %v2816_v53 = vrot.slane %v2814_v46, 4  ;;  %v2823_v61 = vrot.slane %v2702_v54, 6 }
 0x24b   : > { %v2519_v58 = vpop.permute.xlu0 %2518 }
 0x24c   : > { %2641 = vst.msk [vmem:[#allocation2 + $0x4] sm:$0xf] %vm2639_vm5, %v2519_v58  ;;  %v2541_v62 = vpop.permute.xlu2 %2540  ;;  %v2822_v58 = vrot.slane %v2820_v49, 4  ;;  %v2715_v49 = vld [vmem:[%s6341_s27 + $0x94] sm:$0xf] }
 0x24d   : > { %2652 = vst.msk [vmem:[#allocation2 + $0x30] sm:$0xf] %vm2639_vm5, %v2541_v62  ;;  %v2818_v62 = vsel %vm7237_vm4, %v2816_v53, %v2817_v42  ;;  %v2713_v42 = vld [vmem:[%s6341_s27 + $0x8c] sm:$0xf]  ;;  %v2862_v54 = vrot.slane %v2715_v49, 6 }
 0x24e   : > { %2898 = vrot.lane.b32.xlu1 %v2785_v59, %s6287_s9  ;;  %v2856_v46 = vrot.slane %v2713_v42, 6 }
 0x24f   : > { %v2864_v60 = vrot.slane %v2862_v54, 4 }
 0x250   : > { %v2527_v5 = vpop.permute.xlu1 %2526  ;;  %v2857_v53 = vsel %vm7237_vm4, %v2855_v45, %v2856_v46 }
 0x251   : > { %2896 = vrot.lane.b32.xlu0 %v2782_v1, %s6287_s9  ;;  %2645 = vst.msk [vmem:[#allocation2 + $0x14] sm:$0xf] %vm2639_vm5, %v2527_v5  ;;  %v2824_v1 = vsel %vm7237_vm4, %v2822_v58, %v2823_v61  ;;  %v2705_v5 = vld [vmem:[%s6341_s27 + $0x6c] sm:$0xf] }
 0x252   : > { %2900 = vrot.lane.b32.xlu2 %v2788_v4, %s6287_s9  ;;  %v2825_v4 = vrot.slane %v2823_v61, 4  ;;  %v2832_v13 = vrot.slane %v2705_v5, 6 }
 0x253   : > { %v2525_v10 = vpop.permute.xlu0 %2524 }
 0x254   : > { %2644 = vst.msk [vmem:[#allocation2 + $0x10] sm:$0xf] %vm2639_vm5, %v2525_v10  ;;  %v2547_v14 = vpop.permute.xlu2 %2546  ;;  %v2831_v10 = vrot.slane %v2829_v63, 4  ;;  %v2718_v63 = vld [vmem:[%s6341_s27 + $0xa0] sm:$0xf] }
 0x255   : > { %2655 = vst.msk [vmem:[#allocation2 + $0x3c] sm:$0xf] %vm2639_vm5, %v2547_v14  ;;  %v2827_v14 = vsel %vm7237_vm4, %v2825_v4, %v2826_v57  ;;  %v2716_v57 = vld [vmem:[%s6341_s27 + $0x98] sm:$0xf]  ;;  %v2871_v5 = vrot.slane %v2718_v63, 6 }
 0x256   : > { %2904 = vrot.lane.b32.xlu1 %v2794_v11, %s6287_s9  ;;  %v2865_v61 = vrot.slane %v2716_v57, 6 }
 0x257   : > { %v2873_v12 = vrot.slane %v2871_v5, 4 }
 0x258   : > { %v2533_v21 = vpop.permute.xlu1 %2532  ;;  %v2866_v4 = vsel %vm7237_vm4, %v2864_v60, %v2865_v61 }
 0x259   : > { %2902 = vrot.lane.b32.xlu0 %v2791_v17, %s6287_s9  ;;  %2648 = vst.msk [vmem:[#allocation2 + $0x20] sm:$0xf] %vm2639_vm5, %v2533_v21  ;;  %v2833_v17 = vsel %vm7237_vm4, %v2831_v10, %v2832_v13  ;;  %v2708_v21 = vld [vmem:[%s6341_s27 + $0x78] sm:$0xf] }
 0x25a   : > { %2906 = vrot.lane.b32.xlu2 %v2797_v20, %s6287_s9  ;;  %v2834_v20 = vrot.slane %v2832_v13, 4  ;;  %v2841_v28 = vrot.slane %v2708_v21, 6 }
 0x25b   : > { %v2531_v25 = vpop.permute.xlu0 %2530 }
 0x25c   : > { %2647 = vst.msk [vmem:[#allocation2 + $0x1c] sm:$0xf] %vm2639_vm5, %v2531_v25  ;;  %v2553_v29 = vpop.permute.xlu2 %2552  ;;  %v2840_v25 = vrot.slane %v2838_v9, 4 }
 0x25d   : > { %2658 = vst.msk [vmem:[#allocation2 + $0x48] sm:$0xf] %vm2639_vm5, %v2553_v29  ;;  %v2836_v29 = vsel %vm7237_vm4, %v2834_v20, %v2835_v8  ;;  %v2719_v8 = vld [vmem:[%s6341_s27 + $0xa4] sm:$0xf]  ;;  %v2880_v20 = vrot.slane %v2721_v16, 6 }
 0x25e   : > { %2910 = vrot.lane.b32.xlu1 %v2803_v26, %s6287_s9  ;;  %v2874_v13 = vrot.slane %v2719_v8, 6 }
 0x25f   : > { %v2882_v35 = vrot.slane %v2880_v20, 4 }
 0x260   : > { %v2539_v37 = vpop.permute.xlu1 %2538  ;;  %v2876_v21 = vrot.slane %v2874_v13, 4 }
 0x261   : > { %2908 = vrot.lane.b32.xlu0 %v2800_v33, %s6287_s9  ;;  %2651 = vst.msk [vmem:[#allocation2 + $0x2c] sm:$0xf] %vm2639_vm5, %v2539_v37  ;;  %v2842_v33 = vsel %vm7237_vm4, %v2840_v25, %v2841_v28  ;;  %v2711_v37 = vld [vmem:[%s6341_s27 + $0x84] sm:$0xf]  ;;  %v2722_v25 = vld [vmem:[%s6341_s27 + $0xb0] sm:$0xf] }
 0x262   : > { %2912 = vrot.lane.b32.xlu2 %v2806_v36, %s6287_s9  ;;  %v2843_v36 = vrot.slane %v2841_v28, 4  ;;  %v2850_v43 = vrot.slane %v2711_v37, 6 }
 0x263   : > { %v2537_v41 = vpop.permute.xlu0 %2536 }
 0x264   : > { %2650 = vst.msk [vmem:[#allocation2 + $0x28] sm:$0xf] %vm2639_vm5, %v2537_v41  ;;  %v2559_v44 = vpop.permute.xlu2 %2558  ;;  %v2849_v41 = vrot.slane %v2847_v32, 4 }
 0x265   : > { %2661 = vst.msk [vmem:[#allocation2 + $0x54] sm:$0xf] %vm2639_vm5, %v2559_v44  ;;  %v2845_v44 = vsel %vm7237_vm4, %v2843_v36, %v2844_v31  ;;  %v2875_v31 = vsel %vm7237_vm4, %v2873_v12, %v2874_v13  ;;  %v2883_v36 = vrot.slane %v2722_v25, 6  ;;  %v3058_v13 = vld [vmem:[%s6341_s27 + $0x28] sm:$0xf] }
 0x266   : > { %2916 = vrot.lane.b32.xlu1 %v2812_v23, %s6287_s9 }
 0x267   : > { %v2885_v60 = vrot.slane %v2883_v36, 4 }
 0x268   : > { %v2545_v51 = vpop.permute.xlu1 %2544 }
 0x269   : > { %2914 = vrot.lane.b32.xlu0 %v2809_v47, %s6287_s9  ;;  %2654 = vst.msk [vmem:[#allocation2 + $0x38] sm:$0xf] %vm2639_vm5, %v2545_v51  ;;  %v2851_v47 = vsel %vm7237_vm4, %v2849_v41, %v2850_v43  ;;  %v2714_v51 = vld [vmem:[%s6341_s27 + $0x90] sm:$0xf]  ;;  %v3120_v41 = vshll.u32 %v3054_v30, 16 }
 0x26a   : > { %2918 = vrot.lane.b32.xlu2 %v2815_v50, %s6287_s9  ;;  %v2852_v50 = vrot.slane %v2850_v43, 4  ;;  %v2859_v58 = vrot.slane %v2714_v51, 6 }
 0x26b   : > { %v2543_v55 = vpop.permute.xlu0 %2542 }
 0x26c   : > { %2653 = vst.msk [vmem:[#allocation2 + $0x34] sm:$0xf] %vm2639_vm5, %v2543_v55  ;;  %v2565_v59 = vpop.permute.xlu2 %2564  ;;  %v2858_v55 = vrot.slane %v2856_v46, 4  ;;  %v3055_v46 = vld [vmem:[%s6341_s27 + $0x1c] sm:$0xf] }
 0x26d   : > { %2664 = vst.msk [vmem:[#allocation2 + $0x60] sm:$0xf] %vm2639_vm5, %v2565_v59  ;;  %v2854_v59 = vsel %vm7237_vm4, %v2852_v50, %v2853_v40  ;;  %v3117_v40 = vshrl.u32 %v3054_v30, 16  ;;  %v2884_v50 = vsel %vm7237_vm4, %v2882_v35, %v2883_v36  ;;  %v3130_v57 = vshll.u32 %v3055_v46, 16 }
 0x26e   : > { %2922 = vrot.lane.b32.xlu1 %v2821_v56, %s6287_s9 }
 0x270   : > { %v2551_v2 = vpop.permute.xlu1 %2550 }
 0x271   : > { %2920 = vrot.lane.b32.xlu0 %v2818_v62, %s6287_s9  ;;  %2657 = vst.msk [vmem:[#allocation2 + $0x44] sm:$0xf] %vm2639_vm5, %v2551_v2  ;;  %v2860_v62 = vsel %vm7237_vm4, %v2858_v55, %v2859_v58  ;;  %v2717_v2 = vld [vmem:[%s6341_s27 + $0x9c] sm:$0xf] }
 0x272   : > { %2924 = vrot.lane.b32.xlu2 %v2824_v1, %s6287_s9  ;;  %v2861_v1 = vrot.slane %v2859_v58, 4  ;;  %v2868_v10 = vrot.slane %v2717_v2, 6 }
 0x273   : > { %v2549_v6 = vpop.permute.xlu0 %2548 }
 0x274   : > { %2656 = vst.msk [vmem:[#allocation2 + $0x40] sm:$0xf] %vm2639_vm5, %v2549_v6  ;;  %v2571_v11 = vpop.permute.xlu2 %2570  ;;  %v2867_v6 = vrot.slane %v2865_v61, 4  ;;  %v2870_v19 = vrot.slane %v2868_v10, 4 }
 0x275   : > { %2667 = vst.msk [vmem:[#allocation2 + $0x6c] sm:$0xf] %vm2639_vm5, %v2571_v11  ;;  %v2863_v11 = vsel %vm7237_vm4, %v2861_v1, %v2862_v54  ;;  %v3057_v54 = vld [vmem:[%s6341_s27 + $0x24] sm:$0xf] }
 0x276   : > { %2928 = vrot.lane.b32.xlu1 %v2830_v7, %s6287_s9  ;;  %v3150_v63 = vshll.u32 %v3057_v54, 16 }
 0x278   : > { %v2557_v18 = vpop.permute.xlu1 %2556 }
 0x279   : > { %2926 = vrot.lane.b32.xlu0 %v2827_v14, %s6287_s9  ;;  %2660 = vst.msk [vmem:[#allocation2 + $0x50] sm:$0xf] %vm2639_vm5, %v2557_v18  ;;  %v2869_v14 = vsel %vm7237_vm4, %v2867_v6, %v2868_v10  ;;  %v2720_v18 = vld [vmem:[%s6341_s27 + $0xa8] sm:$0xf]  ;;  %v3059_v6 = vld [vmem:[%s6341_s27 + $0x2c] sm:$0xf] }
 0x27a   : > { %2930 = vrot.lane.b32.xlu2 %v2833_v17, %s6287_s9  ;;  %v3053_v17 = vld [vmem:[%s6341_s27 + $0x14] sm:$0xf] }
 0x27b   : > { %v2555_v22 = vpop.permute.xlu0 %2554  ;;  %v3110_v27 = vshll.u32 %v3053_v17, 16 }
 0x27c   : > { %2659 = vst.msk [vmem:[#allocation2 + $0x4c] sm:$0xf] %vm2639_vm5, %v2555_v22  ;;  %v2577_v26 = vpop.permute.xlu2 %2576  ;;  %v3052_v22 = vld [vmem:[%s6341_s27 + $0x10] sm:$0xc] }
 0x27d   : > { %2670 = vst.msk [vmem:[#allocation2 + $0x78] sm:$0xf] %vm2639_vm5, %v2577_v26  ;;  %v3107_v26 = vshrl.u32 %v3053_v17, 16  ;;  %v3098_v32 = vshrl.u32 %v3052_v22, 16  ;;  %v3170_v17 = vshll.u32 %v3059_v6, 16 }
 0x27e   : > { %2934 = vrot.lane.b32.xlu1 %v2839_v24, %s6287_s9 }
 0x280   : > { %v2563_v34 = vpop.permute.xlu1 %2562 }
 0x281   : > { %2932 = vrot.lane.b32.xlu0 %v2836_v29, %s6287_s9  ;;  %2663 = vst.msk [vmem:[#allocation2 + $0x5c] sm:$0xf] %vm2639_vm5, %v2563_v34  ;;  %v2877_v29 = vrot.slane %v2720_v18, 6  ;;  %v2872_v34 = vsel %vm7237_vm4, %v2870_v19, %v2871_v5  ;;  %v3132_v5 = vrot.slane %v3130_v57, 7 }
 0x282   : > { %2936 = vrot.lane.b32.xlu2 %v2842_v33, %s6287_s9  ;;  %v3101_v33 = vshll.u32 %v3052_v22, 16  ;;  %v3160_v22 = vshll.u32 %v3058_v13, 16 }
 0x283   : > { %v2561_v38 = vpop.permute.xlu0 %2560  ;;  %v2878_v37 = vsel %vm7237_vm4, %v2876_v21, %v2877_v29  ;;  %v2879_v43 = vrot.slane %v2877_v29, 4  ;;  %v3157_v21 = vshrl.u32 %v3058_v13, 16 }
 0x284   : > { %2662 = vst.msk [vmem:[#allocation2 + $0x58] sm:$0xf] %vm2639_vm5, %v2561_v38  ;;  %v2583_v23 = vpop.permute.xlu2 %2582  ;;  %v3109_v38 = vrot.slane %v3107_v26, 6  ;;  %v3103_v45 = vrot.slane %v3101_v33, 7  ;;  %v3162_v36 = vrot.slane %v3160_v22, 7 }
 0x285   : > { %2673 = vst.msk [vmem:[#allocation2 + $0x84] sm:$0xf] %vm2639_vm5, %v2583_v23  ;;  %v3056_v23 = vld [vmem:[%s6341_s27 + $0x20] sm:$0xf]  ;;  %v2881_v58 = vsel %vm7237_vm4, %v2879_v43, %v2880_v20  ;;  %v3060_v20 = vld [vmem:[%s6341_s27 + $0x30] sm:$0xf] }
 0x286   : > { %2940 = vrot.lane.b32.xlu1 %v2848_v39, %s6287_s9  ;;  %v3112_v39 = vrot.slane %v3110_v27, 7  ;;  %v3177_v29 = vshrl.u32 %v3060_v20, 16  ;;  %v3180_v30 = vshll.u32 %v3060_v20, 16  ;;  %v3159_v35 = vrot.slane %v3157_v21, 6  ;;  %v3068_v22 = vld [vmem:[%s6341_s27 + $0x50] sm:$0xf] }
 0x287   : > { %vm4218_vm4 = vcmask 293888  }
 0x288   : > { %v2569_v48 = vpop.permute.xlu1 %2568  ;;  %v3113_v51 = vor.u32 %v3112_v39, %v3109_v38  ;;  %v3182_v43 = vrot.slane %v3180_v30, 7  ;;  %v3260_v30 = vshll.u32 %v3068_v22, 16 }
 0x289   : > { %2938 = vrot.lane.b32.xlu0 %v2845_v44, %s6287_s9  ;;  %2666 = vst.msk [vmem:[#allocation2 + $0x68] sm:$0xf] %vm2639_vm5, %v2569_v48  ;;  %v3100_v44 = vrot.slane %v3098_v32, 6  ;;  %v3140_v48 = vshll.u32 %v3056_v23, 16  ;;  %v3062_v32 = vld [vmem:[%s6341_s27 + $0x38] sm:$0xf] }
 0x28a   : > { %2942 = vrot.lane.b32.xlu2 %v2851_v47, %s6287_s9  ;;  %v3137_v47 = vshrl.u32 %v3056_v23, 16  ;;  %v3115_v1 = vrot.slane %v3113_v51, 4  ;;  %v3197_v39 = vshrl.u32 %v3062_v32, 16 }
 0x28b   : > { %v2567_v52 = vpop.permute.xlu0 %2566 }
 0x28c   : > { %2665 = vst.msk [vmem:[#allocation2 + $0x64] sm:$0xf] %vm2639_vm5, %v2567_v52  ;;  %v2589_v56 = vpop.permute.xlu2 %2588  ;;  %v3119_v52 = vrot.slane %v3117_v40, 6  ;;  %v3139_v61 = vrot.slane %v3137_v47, 6  ;;  %v3200_v40 = vshll.u32 %v3062_v32, 16 }
 0x28d   : > { %2676 = vst.msk [vmem:[#allocation2 + $0x90] sm:$0xf] %vm2639_vm5, %v2589_v56  ;;  %v3127_v56 = vshrl.u32 %v3055_v46, 16 }
 0x28e   : > { %2946 = vrot.lane.b32.xlu1 %v2857_v53, %s6287_s9  ;;  %v3122_v53 = vrot.slane %v3120_v41, 7 }
 0x290   : > { %v2575_v0 = vpop.permute.xlu1 %2574  ;;  %v3123_v2 = vor.u32 %v3122_v53, %v3119_v52  ;;  %v3202_v52 = vrot.slane %v3200_v40, 7 }
 0x291   : > { %2944 = vrot.lane.b32.xlu0 %v2854_v59, %s6287_s9  ;;  %2669 = vst.msk [vmem:[#allocation2 + $0x74] sm:$0xf] %vm2639_vm5, %v2575_v0  ;;  %v3104_v59 = vor.u32 %v3103_v45, %v3100_v44  ;;  %v3147_v0 = vshrl.u32 %v3057_v54, 16  ;;  %v3063_v45 = vld [vmem:[%s6341_s27 + $0x3c] sm:$0xf] }
 0x292   : > { %2948 = vrot.lane.b32.xlu2 %v2860_v62, %s6287_s9  ;;  %v3142_v62 = vrot.slane %v3140_v48, 7  ;;  %v3125_v12 = vrot.slane %v3123_v2, 4  ;;  %v3124_v16 = vsel %vm7651_vm10, %v3115_v1, %v3123_v2  ;;  %v3207_v53 = vshrl.u32 %v3063_v45, 16 }
 0x293   : > { %v2573_v3 = vpop.permute.xlu0 %2572  ;;  %v3149_v10 = vrot.slane %v3147_v0, 6  ;;  %v3210_v54 = vshll.u32 %v3063_v45, 16 }
 0x294   : > { %2668 = vst.msk [vmem:[#allocation2 + $0x70] sm:$0xf] %vm2639_vm5, %v2573_v3  ;;  %v2595_v7 = vpop.permute.xlu2 %2594  ;;  %v3143_v8 = vor.u32 %v3142_v62, %v3139_v61  ;;  %v3065_v61 = vld [vmem:[%s6341_s27 + $0x44] sm:$0xf] }
 0x295   : > { %2679 = vst.msk [vmem:[#allocation2 + $0x9c] sm:$0xf] %vm2639_vm5, %v2595_v7  ;;  %v3105_v7 = vrot.slane %v3104_v59, 4  ;;  %v3212_v1 = vrot.slane %v3210_v54, 7 }
 0x296   : > { %2952 = vrot.lane.b32.xlu1 %v2866_v4, %s6287_s9  ;;  %v3129_v4 = vrot.slane %v3127_v56, 6 }
 0x298   : > { %v2581_v9 = vpop.permute.xlu1 %2580  ;;  %v3133_v19 = vor.u32 %v3132_v5, %v3129_v4 }
 0x299   : > { %2950 = vrot.lane.b32.xlu0 %v2863_v11, %s6287_s9  ;;  %2672 = vst.msk [vmem:[#allocation2 + $0x80] sm:$0xf] %vm2639_vm5, %v2581_v9  ;;  %v3152_v11 = vrot.slane %v3150_v63, 7  ;;  %v3167_v9 = vshrl.u32 %v3059_v6, 16  ;;  %v3209_v63 = vrot.slane %v3207_v53, 6  ;;  %v3227_v6 = vshrl.u32 %v3065_v61, 16 }
 0x29a   : > { %2954 = vrot.lane.b32.xlu2 %v2869_v14, %s6287_s9  ;;  %v3134_v26 = vsel %vm7651_vm10, %v3125_v12, %v3133_v19 }
 0x29b   : > { %v2579_v24 = vpop.permute.xlu0 %2578  ;;  %v3153_v25 = vor.u32 %v3152_v11, %v3149_v10  ;;  %v3169_v27 = vrot.slane %v3167_v9, 6  ;;  %v3066_v11 = vld [vmem:[%s6341_s27 + $0x48] sm:$0xf]  ;;  %v3213_v9 = vor.u32 %v3212_v1, %v3209_v63  ;;  %v3072_v1 = vld [vmem:[%s6341_s27 + $0x60] sm:$0xf] }
 0x29c   : > { %2671 = vst.msk [vmem:[#allocation2 + $0x7c] sm:$0xf] %vm2639_vm5, %v2579_v24  ;;  %v2889_v28 = vpop.permute.xlu2 %2888  ;;  %v3114_v24 = vsel %vm7651_vm10, %v3105_v7, %v3113_v51  ;;  %v3199_v51 = vrot.slane %v3197_v39, 6  ;;  %v3230_v7 = vshll.u32 %v3065_v61, 16  ;;  %v3237_v20 = vshrl.u32 %v3066_v11, 16 }
 0x29d   : > { %3011 = vst.msk [vmem:[#allocation2 + $0x4] sm:$0xf] %vm3009_vm7, %v2889_v28  ;;  %v3172_v28 = vrot.slane %v3170_v17, 7  ;;  %v3155_v44 = vrot.slane %v3153_v25, 4  ;;  %v3240_v21 = vshll.u32 %v3066_v11, 16  ;;  %v3297_v11 = vshrl.u32 %v3072_v1, 16 }
 0x29e   : > { %2958 = vrot.lane.b32.xlu1 %v2875_v31, %s6287_s9  ;;  %v3145_v31 = vrot.slane %v3143_v8, 4  ;;  %v3203_v0 = vor.u32 %v3202_v52, %v3199_v51  ;;  %v3071_v52 = vld [vmem:[%s6341_s27 + $0x5c] sm:$0xf] }
 0x29f   : > { %v3173_v23 = vor.u32 %v3172_v28, %v3169_v27  ;;  %v3067_v27 = vld [vmem:[%s6341_s27 + $0x4c] sm:$0xf]  ;;  %v3287_v61 = vshrl.u32 %v3071_v52, 16 }
 0x2a0   : > { %v2587_v42 = vpop.permute.xlu1 %2586  ;;  %v3154_v38 = vsel %vm7651_vm10, %v3145_v31, %v3153_v25  ;;  %v3247_v39 = vshrl.u32 %v3067_v27, 16  ;;  %v3250_v40 = vshll.u32 %v3067_v27, 16  ;;  %v3075_v27 = vld [vmem:[%s6341_s27 + $0x6c] sm:$0xf] }
 0x2a1   : > { %2956 = vrot.lane.b32.xlu0 %v2872_v34, %s6287_s9  ;;  %2675 = vst.msk [vmem:[#allocation2 + $0x8c] sm:$0xf] %vm2639_vm5, %v2587_v42  ;;  %v3135_v34 = vrot.slane %v3133_v19, 4  ;;  %v3179_v42 = vrot.slane %v3177_v29, 6  ;;  %v3232_v19 = vrot.slane %v3230_v7, 7  ;;  %v3257_v29 = vshrl.u32 %v3068_v22, 16 }
 0x2a2   : > { %2960 = vrot.lane.b32.xlu2 %v2878_v37, %s6287_s9  ;;  %v3061_v37 = vld [vmem:[%s6341_s27 + $0x34] sm:$0xf]  ;;  %v3252_v51 = vrot.slane %v3250_v40, 7 }
 0x2a3   : > { %v2585_v49 = vpop.permute.xlu0 %2584  ;;  %v3187_v47 = vshrl.u32 %v3061_v37, 16  ;;  %v3190_v48 = vshll.u32 %v3061_v37, 16  ;;  %v3183_v56 = vor.u32 %v3182_v43, %v3179_v42  ;;  %v3069_v37 = vld [vmem:[%s6341_s27 + $0x54] sm:$0xf]  ;;  %v3259_v42 = vrot.slane %v3257_v29, 6 }
 0x2a4   : > { %2674 = vst.msk [vmem:[#allocation2 + $0x88] sm:$0xf] %vm2639_vm5, %v2585_v49  ;;  %v2895_v55 = vpop.permute.xlu2 %2894  ;;  %v3144_v49 = vsel %vm7651_vm10, %v3135_v34, %v3143_v8  ;;  %v3239_v34 = vrot.slane %v3237_v20, 6  ;;  %v3262_v43 = vrot.slane %v3260_v30, 7  ;;  %v3270_v45 = vshll.u32 %v3069_v37, 16 }
 0x2a5   : > { %3014 = vst.msk [vmem:[#allocation2 + $0x10] sm:$0xf] %vm3009_vm7, %v2895_v55  ;;  %v3175_v55 = vrot.slane %v3173_v23, 4  ;;  %v3189_v59 = vrot.slane %v3187_v47, 6  ;;  %v3185_v2 = vrot.slane %v3183_v56, 4 }
 0x2a6   : > { %2964 = vrot.lane.b32.xlu1 %v2884_v50, %s6287_s9  ;;  %v3163_v50 = vor.u32 %v3162_v36, %v3159_v35  ;;  %v3242_v35 = vrot.slane %v3240_v21, 7  ;;  %v3215_v36 = vrot.slane %v3213_v9, 4  ;;  %v3263_v54 = vor.u32 %v3262_v43, %v3259_v42  ;;  %v3077_v43 = vld [vmem:[%s6341_s27 + $0x74] sm:$0xf] }
 0x2a7   : > { %v3184_v5 = vsel %vm7651_vm10, %v3175_v55, %v3183_v56  ;;  %v3272_v56 = vrot.slane %v3270_v45, 7 }
 0x2a8   : > { %v2593_v3 = vpop.permute.xlu1 %2592  ;;  %v3164_v57 = vsel %vm7651_vm10, %v3155_v44, %v3163_v50  ;;  %v3165_v62 = vrot.slane %v3163_v50, 4  ;;  %v3267_v44 = vshrl.u32 %v3069_v37, 16  ;;  %v3243_v47 = vor.u32 %v3242_v35, %v3239_v34 }
 0x2a9   : > { %2962 = vrot.lane.b32.xlu0 %v2881_v58, %s6287_s9  ;;  %2678 = vst.msk [vmem:[#allocation2 + $0x98] sm:$0xf] %vm2639_vm5, %v2593_v3  ;;  %v3064_v3 = vld [vmem:[%s6341_s27 + $0x40] sm:$0xf]  ;;  %v3249_v50 = vrot.slane %v3247_v39, 6  ;;  %v3330_v37 = vshll.u32 %v3075_v27, 16 }
 0x2aa   : > { %2966 = vrot.lane.b32.xlu2 %v2885_v60, %s6287_s9  ;;  %v3192_v60 = vrot.slane %v3190_v48, 7  ;;  %v3217_v12 = vshrl.u32 %v3064_v3, 16  ;;  %v3220_v13 = vshll.u32 %v3064_v3, 16  ;;  %v3269_v55 = vrot.slane %v3267_v44, 6 }
 0x2ab   : > { %v2591_v14 = vpop.permute.xlu0 %2590  ;;  %v3253_v63 = vor.u32 %v3252_v51, %v3249_v50 }
 0x2ac   : > { %2677 = vst.msk [vmem:[#allocation2 + $0x94] sm:$0xf] %vm2639_vm5, %v2591_v14  ;;  %v2901_v18 = vpop.permute.xlu2 %2900  ;;  %v3193_v10 = vor.u32 %v3192_v60, %v3189_v59  ;;  %v3174_v14 = vsel %vm7651_vm10, %v3165_v62, %v3173_v23  ;;  %v3219_v25 = vrot.slane %v3217_v12, 6  ;;  %v3290_v62 = vshll.u32 %v3071_v52, 16 }
 0x2ad   : > { %3017 = vst.msk [vmem:[#allocation2 + $0x1c] sm:$0xf] %vm3009_vm7, %v2901_v18  ;;  %v3229_v18 = vrot.slane %v3227_v6, 6  ;;  %v3273_v6 = vor.u32 %v3272_v56, %v3269_v55  ;;  %v3300_v12 = vshll.u32 %v3072_v1, 16  ;;  %v3347_v52 = vshrl.u32 %v3077_v43, 16 }
 0x2ae   : > { %3513 = vrot.lane.b32.xlu1 %v3124_v16, %s6288_s10  ;;  %v3205_v16 = vrot.slane %v3203_v0, 4  ;;  %v3194_v17 = vsel %vm7651_vm10, %v3185_v2, %v3193_v10  ;;  %v3195_v31 = vrot.slane %v3193_v10, 4  ;;  %v3292_v10 = vrot.slane %v3290_v62, 7  ;;  %v3078_v56 = vld [vmem:[%s6341_s27 + $0x78] sm:$0xf] }
 0x2af   : > { %v3357_v1 = vshrl.u32 %v3078_v56, 16  ;;  %vm4052_vm5 = vcmask 288000  }
 0x2b0   : > { %v2887_v33 = vpop.permute.xlu1 %2886  ;;  %v3214_v28 = vsel %vm7651_vm10, %v3205_v16, %v3213_v9  ;;  %v3255_v16 = vrot.slane %v3253_v63, 4 }
 0x2b1   : > { %3511 = vrot.lane.b32.xlu0 %v3114_v24, %s6288_s10  ;;  %3010 = vst.msk [vmem:[#allocation2] sm:$0xf] %vm3009_vm7, %v2887_v33  ;;  %v3233_v33 = vor.u32 %v3232_v19, %v3229_v18  ;;  %v3073_v18 = vld [vmem:[%s6341_s27 + $0x64] sm:$0xf] }
 0x2b2   : > { %3515 = vrot.lane.b32.xlu2 %v3134_v26, %s6288_s10  ;;  %v3222_v26 = vrot.slane %v3220_v13, 7  ;;  %v3074_v13 = vld [vmem:[%s6341_s27 + $0x68] sm:$0xf]  ;;  %v3307_v29 = vshrl.u32 %v3073_v18, 16  ;;  %v3310_v30 = vshll.u32 %v3073_v18, 16 }
 0x2b3   : > { %v2597_v41 = vpop.permute.xlu0 %2596  ;;  %v3317_v20 = vshrl.u32 %v3074_v13, 16  ;;  %v3320_v21 = vshll.u32 %v3074_v13, 16  ;;  %v3081_v18 = vld [vmem:[%s6341_s27 + $0x84] sm:$0xf] }
 0x2b4   : > { %2681 = vst.msk [vmem:[#allocation2 + $0xa0] sm:$0x3] %vm2680_vm11, %v2597_v41  ;;  %v2907_v46 = vpop.permute.xlu2 %2906  ;;  %v3204_v41 = vsel %vm7651_vm10, %v3195_v31, %v3203_v0  ;;  %v3223_v23 = vor.u32 %v3222_v26, %v3219_v25  ;;  %v3299_v31 = vrot.slane %v3297_v11, 6  ;;  %v3302_v25 = vrot.slane %v3300_v12, 7 }
 0x2b5   : > { %3020 = vst.msk [vmem:[#allocation2 + $0x28] sm:$0xf] %vm3009_vm7, %v2907_v46  ;;  %v3235_v46 = vrot.slane %v3233_v33, 4  ;;  %v3275_v26 = vrot.slane %v3273_v6, 4  ;;  %v3319_v34 = vrot.slane %v3317_v20, 6  ;;  %v3322_v35 = vrot.slane %v3320_v21, 7 }
 0x2b6   : > { %3519 = vrot.lane.b32.xlu1 %v3154_v38, %s6288_s10  ;;  %v3224_v48 = vsel %vm7651_vm10, %v3215_v36, %v3223_v23  ;;  %v3225_v53 = vrot.slane %v3223_v23, 4  ;;  %v3327_v36 = vshrl.u32 %v3075_v27, 16  ;;  %v3303_v39 = vor.u32 %v3302_v25, %v3299_v31 }
 0x2b7   : > { %v3244_v60 = vsel %vm7651_vm10, %v3235_v46, %v3243_v47  ;;  %v3309_v23 = vrot.slane %v3307_v29, 6  ;;  %v3312_v42 = vrot.slane %v3310_v30, 7  ;;  %v3323_v45 = vor.u32 %v3322_v35, %v3319_v34  ;;  %v3083_v35 = vld [vmem:[%s6341_s27 + $0x8c] sm:$0xf] }
 0x2b8   : > { %v2893_v58 = vpop.permute.xlu1 %2892  ;;  %v3329_v46 = vrot.slane %v3327_v36, 6  ;;  %v3390_v27 = vshll.u32 %v3081_v18, 16 }
 0x2b9   : > { %3517 = vrot.lane.b32.xlu0 %v3144_v49, %s6288_s10  ;;  %3013 = vst.msk [vmem:[#allocation2 + $0xc] sm:$0xf] %vm3009_vm7, %v2893_v58  ;;  %v3070_v58 = vld [vmem:[%s6341_s27 + $0x58] sm:$0xf]  ;;  %v3313_v55 = vor.u32 %v3312_v42, %v3309_v23 }
 0x2ba   : > { %3521 = vrot.lane.b32.xlu2 %v3164_v57, %s6288_s10  ;;  %v3245_v57 = vrot.slane %v3243_v47, 4  ;;  %v3277_v2 = vshrl.u32 %v3070_v58, 16  ;;  %v3280_v3 = vshll.u32 %v3070_v58, 16  ;;  %v3332_v47 = vrot.slane %v3330_v37, 7  ;;  %v3082_v37 = vld [vmem:[%s6341_s27 + $0x88] sm:$0xf] }
 0x2bb   : > { %v2891_v4 = vpop.permute.xlu0 %2890 }
 0x2bc   : > { %3012 = vst.msk [vmem:[#allocation2 + $0x8] sm:$0xf] %vm3009_vm7, %v2891_v4  ;;  %v2913_v8 = vpop.permute.xlu2 %2912  ;;  %v3234_v4 = vsel %vm7651_vm10, %v3225_v53, %v3233_v33  ;;  %v3254_v7 = vsel %vm7651_vm10, %v3245_v57, %v3253_v63  ;;  %v3279_v9 = vrot.slane %v3277_v2, 6  ;;  %v3350_v53 = vshll.u32 %v3077_v43, 16 }
 0x2bd   : > { %3023 = vst.msk [vmem:[#allocation2 + $0x34] sm:$0xf] %vm3009_vm7, %v2913_v8  ;;  %v3289_v8 = vrot.slane %v3287_v61, 6  ;;  %v3333_v61 = vor.u32 %v3332_v47, %v3329_v46  ;;  %v3360_v2 = vshll.u32 %v3078_v56, 16  ;;  %v3407_v43 = vshrl.u32 %v3083_v35, 16 }
 0x2be   : > { %3525 = vrot.lane.b32.xlu1 %v3184_v5, %s6288_s10  ;;  %v3265_v5 = vrot.slane %v3263_v54, 4  ;;  %v3352_v63 = vrot.slane %v3350_v53, 7  ;;  %v3084_v47 = vld [vmem:[%s6341_s27 + $0x90] sm:$0xf] }
 0x2c0   : > { %v2899_v24 = vpop.permute.xlu1 %2898  ;;  %v3274_v19 = vsel %vm7651_vm10, %v3265_v5, %v3273_v6  ;;  %v3315_v5 = vrot.slane %v3313_v55, 4 }
 0x2c1   : > { %3523 = vrot.lane.b32.xlu0 %v3174_v14, %s6288_s10  ;;  %3016 = vst.msk [vmem:[#allocation2 + $0x18] sm:$0xf] %vm3009_vm7, %v2899_v24  ;;  %v3293_v24 = vor.u32 %v3292_v10, %v3289_v8  ;;  %v3079_v8 = vld [vmem:[%s6341_s27 + $0x7c] sm:$0xf] }
 0x2c2   : > { %3527 = vrot.lane.b32.xlu2 %v3194_v17, %s6288_s10  ;;  %v3282_v17 = vrot.slane %v3280_v3, 7  ;;  %v3080_v3 = vld [vmem:[%s6341_s27 + $0x80] sm:$0xf]  ;;  %v3367_v20 = vshrl.u32 %v3079_v8, 16  ;;  %v3370_v21 = vshll.u32 %v3079_v8, 16 }
 0x2c3   : > { %v2897_v32 = vpop.permute.xlu0 %2896  ;;  %v3377_v11 = vshrl.u32 %v3080_v3, 16  ;;  %v3380_v12 = vshll.u32 %v3080_v3, 16  ;;  %v3087_v8 = vld [vmem:[%s6341_s27 + $0x9c] sm:$0xf] }
 0x2c4   : > { %3015 = vst.msk [vmem:[#allocation2 + $0x14] sm:$0xf] %vm3009_vm7, %v2897_v32  ;;  %v2919_v38 = vpop.permute.xlu2 %2918  ;;  %v3264_v32 = vsel %vm7651_vm10, %v3255_v16, %v3263_v54  ;;  %v3283_v33 = vor.u32 %v3282_v17, %v3279_v9  ;;  %v3359_v16 = vrot.slane %v3357_v1, 6  ;;  %v3362_v9 = vrot.slane %v3360_v2, 7  ;;  %v3085_v2 = vld [vmem:[%s6341_s27 + $0x94] sm:$0xf] }
 0x2c5   : > { %3026 = vst.msk [vmem:[#allocation2 + $0x40] sm:$0xf] %vm3009_vm7, %v2919_v38  ;;  %v3295_v38 = vrot.slane %v3293_v24, 4  ;;  %v3335_v17 = vrot.slane %v3333_v61, 4  ;;  %v3379_v31 = vrot.slane %v3377_v11, 6  ;;  %v3382_v25 = vrot.slane %v3380_v12, 7 }
 0x2c6   : > { %3531 = vrot.lane.b32.xlu1 %v3214_v28, %s6288_s10  ;;  %v3284_v40 = vsel %vm7651_vm10, %v3275_v26, %v3283_v33  ;;  %v3285_v44 = vrot.slane %v3283_v33, 4  ;;  %v3387_v26 = vshrl.u32 %v3081_v18, 16  ;;  %v3363_v29 = vor.u32 %v3362_v9, %v3359_v16 }
 0x2c7   : > { %v3304_v51 = vsel %vm7651_vm10, %v3295_v38, %v3303_v39  ;;  %v3369_v33 = vrot.slane %v3367_v20, 6  ;;  %v3372_v34 = vrot.slane %v3370_v21, 7  ;;  %v3383_v38 = vor.u32 %v3382_v25, %v3379_v31 }
 0x2c8   : > { %v2905_v49 = vpop.permute.xlu1 %2904  ;;  %v3430_v16 = vshll.u32 %v3085_v2, 16  ;;  %v3450_v18 = vshll.u32 %v3087_v8, 16 }
 0x2c9   : > { %3529 = vrot.lane.b32.xlu0 %v3204_v41, %s6288_s10  ;;  %3019 = vst.msk [vmem:[#allocation2 + $0x24] sm:$0xf] %vm3009_vm7, %v2905_v49  ;;  %v3076_v49 = vld [vmem:[%s6341_s27 + $0x70] sm:$0xf]  ;;  %v3373_v46 = vor.u32 %v3372_v34, %v3369_v33  ;;  %v3088_v33 = vld [vmem:[%s6341_s27 + $0xa0] sm:$0xf] }
 0x2ca   : > { %3533 = vrot.lane.b32.xlu2 %v3224_v48, %s6288_s10  ;;  %v3305_v48 = vrot.slane %v3303_v39, 4  ;;  %v3337_v57 = vshrl.u32 %v3076_v49, 16  ;;  %v3340_v58 = vshll.u32 %v3076_v49, 16  ;;  %v3389_v39 = vrot.slane %v3387_v26, 6 }
 0x2cb   : > { %v2903_v59 = vpop.permute.xlu0 %2902  ;;  %v3400_v49 = vshll.u32 %v3082_v37, 16  ;;  %v3375_v1 = vrot.slane %v3373_v46, 4 }
 0x2cc   : > { %3018 = vst.msk [vmem:[#allocation2 + $0x20] sm:$0xf] %vm3009_vm7, %v2903_v59  ;;  %v2925_v0 = vpop.permute.xlu2 %2924  ;;  %v3294_v59 = vsel %vm7651_vm10, %v3285_v44, %v3293_v24  ;;  %v3314_v62 = vsel %vm7651_vm10, %v3305_v48, %v3313_v55  ;;  %v3339_v6 = vrot.slane %v3337_v57, 6  ;;  %v3410_v44 = vshll.u32 %v3083_v35, 16 }
 0x2cd   : > { %3029 = vst.msk [vmem:[#allocation2 + $0x4c] sm:$0xf] %vm3009_vm7, %v2925_v0  ;;  %v3349_v0 = vrot.slane %v3347_v52, 6  ;;  %v3397_v48 = vshrl.u32 %v3082_v37, 16  ;;  %v3409_v55 = vrot.slane %v3407_v43, 6  ;;  %v3417_v57 = vshrl.u32 %v3084_v47, 16 }
 0x2ce   : > { %3537 = vrot.lane.b32.xlu1 %v3244_v60, %s6288_s10  ;;  %v3325_v60 = vrot.slane %v3323_v45, 4  ;;  %v3412_v56 = vrot.slane %v3410_v44, 7  ;;  %v3384_v9 = vsel %vm7651_vm10, %v3375_v1, %v3383_v38  ;;  %v3090_v37 = vld [vmem:[%s6341_s27 + $0xa8] sm:$0xf] }
 0x2d0   : > { %v2911_v14 = vpop.permute.xlu1 %2910  ;;  %v3334_v10 = vsel %vm7651_vm10, %v3325_v60, %v3333_v61  ;;  %v3399_v60 = vrot.slane %v3397_v48, 6  ;;  %v3402_v61 = vrot.slane %v3400_v49, 7  ;;  %v3480_v48 = vshll.u32 %v3090_v37, 16 }
 0x2d1   : > { %3535 = vrot.lane.b32.xlu0 %v3234_v4, %s6288_s10  ;;  %3022 = vst.msk [vmem:[#allocation2 + $0x30] sm:$0xf] %vm3009_vm7, %v2911_v14  ;;  %v3353_v14 = vor.u32 %v3352_v63, %v3349_v0 }
 0x2d2   : > { %3539 = vrot.lane.b32.xlu2 %v3254_v7, %s6288_s10  ;;  %v3342_v7 = vrot.slane %v3340_v58, 7  ;;  %v3420_v58 = vshll.u32 %v3084_v47, 16  ;;  %v3403_v11 = vor.u32 %v3402_v61, %v3399_v60 }
 0x2d3   : > { %v2909_v22 = vpop.permute.xlu0 %2908 }
 0x2d4   : > { %3021 = vst.msk [vmem:[#allocation2 + $0x2c] sm:$0xf] %vm3009_vm7, %v2909_v22  ;;  %v2931_v28 = vpop.permute.xlu2 %2930  ;;  %v3324_v22 = vsel %vm7651_vm10, %v3315_v5, %v3323_v45  ;;  %v3343_v24 = vor.u32 %v3342_v7, %v3339_v6  ;;  %v3419_v5 = vrot.slane %v3417_v57, 6  ;;  %v3422_v6 = vrot.slane %v3420_v58, 7  ;;  %v3091_v57 = vld [vmem:[%s6341_s27 + $0xac] sm:$0xf] }
 0x2d5   : > { %3032 = vst.msk [vmem:[#allocation2 + $0x58] sm:$0xf] %vm3009_vm7, %v2931_v28  ;;  %v3355_v28 = vrot.slane %v3353_v14, 4  ;;  %v3405_v31 = vrot.slane %v3403_v11, 4  ;;  %v3487_v1 = vshrl.u32 %v3091_v57, 16 }
 0x2d6   : > { %3543 = vrot.lane.b32.xlu1 %v3274_v19, %s6288_s10  ;;  %v3344_v30 = vsel %vm7651_vm10, %v3335_v17, %v3343_v24  ;;  %v3345_v36 = vrot.slane %v3343_v24, 4  ;;  %v3447_v17 = vshrl.u32 %v3087_v8, 16  ;;  %v3423_v20 = vor.u32 %v3422_v6, %v3419_v5 }
 0x2d7   : > { %v3364_v42 = vsel %vm7651_vm10, %v3355_v28, %v3363_v29 }
 0x2d8   : > { %v2917_v41 = vpop.permute.xlu1 %2916  ;;  %v3449_v28 = vrot.slane %v3447_v17, 6 }
 0x2d9   : > { %3541 = vrot.lane.b32.xlu0 %v3264_v32, %s6288_s10  ;;  %3025 = vst.msk [vmem:[#allocation2 + $0x3c] sm:$0xf] %vm3009_vm7, %v2917_v41  ;;  %v3365_v41 = vrot.slane %v3363_v29, 4  ;;  %v3452_v29 = vrot.slane %v3450_v18, 7 }
 0x2da   : > { %3545 = vrot.lane.b32.xlu2 %v3284_v40, %s6288_s10  ;;  %v3392_v40 = vrot.slane %v3390_v27, 7  ;;  %v3432_v27 = vrot.slane %v3430_v16, 7 }
 0x2db   : > { %v2915_v50 = vpop.permute.xlu0 %2914  ;;  %v3374_v53 = vsel %vm7651_vm10, %v3365_v41, %v3373_v46  ;;  %v3453_v43 = vor.u32 %v3452_v29, %v3449_v28  ;;  %v3477_v46 = vshrl.u32 %v3090_v37, 16  ;;  %v3677_v28 = vld [vmem:[%s6341_s27 + $0x10] sm:$0x8]  ;;  %v3680_v37 = vld [vmem:[%s6341_s27 + $0x1c] sm:$0xf] }
 0x2dc   : > { %3024 = vst.msk [vmem:[#allocation2 + $0x38] sm:$0xf] %vm3009_vm7, %v2915_v50  ;;  %v2937_v54 = vpop.permute.xlu2 %2936  ;;  %v3354_v50 = vsel %vm7651_vm10, %v3345_v36, %v3353_v14  ;;  %v3393_v52 = vor.u32 %v3392_v40, %v3389_v39  ;;  %v3427_v14 = vshrl.u32 %v3085_v2, 16  ;;  %v3425_v36 = vrot.slane %v3423_v20, 4 }
 0x2dd   : > { %3035 = vst.msk [vmem:[#allocation2 + $0x64] sm:$0xf] %vm3009_vm7, %v2937_v54  ;;  %v3086_v54 = vld [vmem:[%s6341_s27 + $0x98] sm:$0xf]  ;;  %v3455_v60 = vrot.slane %v3453_v43, 4  ;;  %v3490_v2 = vshll.u32 %v3091_v57, 16 }
 0x2de   : > { %3549 = vrot.lane.b32.xlu1 %v3304_v51, %s6288_s10  ;;  %v3385_v51 = vrot.slane %v3383_v38, 4  ;;  %v3440_v0 = vshll.u32 %v3086_v54, 16  ;;  %v3395_v7 = vrot.slane %v3393_v52, 4  ;;  %v3429_v26 = vrot.slane %v3427_v14, 6 }
 0x2e0   : > { %v2923_v4 = vpop.permute.xlu1 %2922  ;;  %v3394_v63 = vsel %vm7651_vm10, %v3385_v51, %v3393_v52  ;;  %v3404_v21 = vsel %vm7651_vm10, %v3395_v7, %v3403_v11  ;;  %v3433_v41 = vor.u32 %v3432_v27, %v3429_v26  ;;  %v3093_v11 = vld [vmem:[%s6341_s27 + $0xb4] sm:$0x1]  ;;  %v3679_v27 = vld [vmem:[%s6341_s27 + $0x18] sm:$0xf] }
 0x2e1   : > { %3547 = vrot.lane.b32.xlu0 %v3294_v59, %s6288_s10  ;;  %3028 = vst.msk [vmem:[#allocation2 + $0x48] sm:$0xf] %vm3009_vm7, %v2923_v4  ;;  %v3413_v4 = vor.u32 %v3412_v56, %v3409_v55  ;;  %v3479_v56 = vrot.slane %v3477_v46, 6  ;;  %v3507_v18 = vshll.u32 %v3093_v11, 16  ;;  %v3681_v46 = vld [vmem:[%s6341_s27 + $0x20] sm:$0xf] }
 0x2e2   : > { %3551 = vrot.lane.b32.xlu2 %v3314_v62, %s6288_s10  ;;  %v3437_v62 = vshrl.u32 %v3086_v54, 16  ;;  %v3434_v47 = vsel %vm7651_vm10, %v3425_v36, %v3433_v41  ;;  %v3435_v51 = vrot.slane %v3433_v41, 4 }
 0x2e3   : > { %v2921_v13 = vpop.permute.xlu0 %2920  ;;  %v3414_v38 = vsel %vm7651_vm10, %v3405_v31, %v3413_v4  ;;  %v3509_v31 = vrot.slane %v3507_v18, 7  ;;  %v3689_v18 = vld [vmem:[%s6341_s27 + $0x40] sm:$0xf] }
 0x2e4   : > { %3027 = vst.msk [vmem:[#allocation2 + $0x44] sm:$0xf] %vm3009_vm7, %v2921_v13  ;;  %v2943_v19 = vpop.permute.xlu2 %2942  ;;  %v3439_v12 = vrot.slane %v3437_v62, 6  ;;  %v3442_v13 = vrot.slane %v3440_v0, 7 }
 0x2e5   : > { %3038 = vst.msk [vmem:[#allocation2 + $0x70] sm:$0xf] %vm3009_vm7, %v2943_v19  ;;  %v3415_v19 = vrot.slane %v3413_v4, 4 }
 0x2e6   : > { %3555 = vrot.lane.b32.xlu1 %v3334_v10, %s6288_s10  ;;  %v3443_v25 = vor.u32 %v3442_v13, %v3439_v12  ;;  %v3489_v12 = vrot.slane %v3487_v1, 6  ;;  %v3492_v13 = vrot.slane %v3490_v2, 7  ;;  %v3686_v2 = vld [vmem:[%s6341_s27 + $0x34] sm:$0xf] }
 0x2e7   : > { %v3424_v35 = vsel %vm7651_vm10, %v3415_v19, %v3423_v20 }
 0x2e8   : > { %v2929_v32 = vpop.permute.xlu1 %2928  ;;  %v3445_v40 = vrot.slane %v3443_v25, 4 }
 0x2e9   : > { %3553 = vrot.lane.b32.xlu0 %v3324_v22, %s6288_s10  ;;  %3031 = vst.msk [vmem:[#allocation2 + $0x54] sm:$0xf] %vm3009_vm7, %v2929_v32  ;;  %v3089_v22 = vld [vmem:[%s6341_s27 + $0xa4] sm:$0xf] }
 0x2ea   : > { %3557 = vrot.lane.b32.xlu2 %v3344_v30, %s6288_s10  ;;  %v3467_v30 = vshrl.u32 %v3089_v22, 16  ;;  %v3470_v32 = vshll.u32 %v3089_v22, 16  ;;  %v3454_v54 = vsel %vm7651_vm10, %v3445_v40, %v3453_v43 }
 0x2eb   : > { %v2927_v23 = vpop.permute.xlu0 %2926 }
 0x2ec   : > { %3030 = vst.msk [vmem:[#allocation2 + $0x50] sm:$0xf] %vm3009_vm7, %v2927_v23  ;;  %v2949_v45 = vpop.permute.xlu2 %2948  ;;  %v3457_v23 = vshrl.u32 %v3088_v33, 16  ;;  %v3469_v44 = vrot.slane %v3467_v30, 6  ;;  %v3678_v30 = vld [vmem:[%s6341_s27 + $0x14] sm:$0xf] }
 0x2ed   : > { %3041 = vst.msk [vmem:[#allocation2 + $0x7c] sm:$0xf] %vm3009_vm7, %v2949_v45  ;;  %v3472_v45 = vrot.slane %v3470_v32, 7 }
 0x2ee   : > { %3561 = vrot.lane.b32.xlu1 %v3364_v42, %s6288_s10  ;;  %v3460_v42 = vshll.u32 %v3088_v33, 16  ;;  %v3459_v52 = vrot.slane %v3457_v23, 6  ;;  %v3772_v23 = vrot.slane %v3680_v37, 7 }
 0x2ef   : > { %v3473_v55 = vor.u32 %v3472_v45, %v3469_v44  ;;  %v3682_v44 = vld [vmem:[%s6341_s27 + $0x24] sm:$0xf] }
 0x2f0   : > { %v2935_v59 = vpop.permute.xlu1 %2934 }
 0x2f1   : > { %3559 = vrot.lane.b32.xlu0 %v3354_v50, %s6288_s10  ;;  %3034 = vst.msk [vmem:[#allocation2 + $0x60] sm:$0xf] %vm3009_vm7, %v2935_v59  ;;  %v3092_v50 = vld [vmem:[%s6341_s27 + $0xb0] sm:$0xf]  ;;  %v3482_v59 = vrot.slane %v3480_v48, 7  ;;  %v3475_v4 = vrot.slane %v3473_v55, 4 }
 0x2f2   : > { %3563 = vrot.lane.b32.xlu2 %v3374_v53, %s6288_s10  ;;  %v3462_v53 = vrot.slane %v3460_v42, 7  ;;  %v3497_v61 = vshrl.u32 %v3092_v50, 16  ;;  %v3500_v62 = vshll.u32 %v3092_v50, 16  ;;  %v3778_v48 = vrot.slane %v3682_v44, 7 }
 0x2f3   : > { %v2933_v3 = vpop.permute.xlu0 %2932  ;;  %v3483_v5 = vor.u32 %v3482_v59, %v3479_v56 }
 0x2f4   : > { %3033 = vst.msk [vmem:[#allocation2 + $0x5c] sm:$0xf] %vm3009_vm7, %v2933_v3  ;;  %v2955_v10 = vpop.permute.xlu2 %2954  ;;  %v3444_v3 = vsel %vm7651_vm10, %v3435_v51, %v3443_v25  ;;  %v3499_v7 = vrot.slane %v3497_v61, 6  ;;  %v3502_v8 = vrot.slane %v3500_v62, 7  ;;  %v3683_v51 = vld [vmem:[%s6341_s27 + $0x28] sm:$0xf] }
 0x2f5   : > { %3044 = vst.msk [vmem:[#allocation2 + $0x88] sm:$0xf] %vm3009_vm7, %v2955_v10  ;;  %v3485_v19 = vrot.slane %v3483_v5, 4 }
 0x2f6   : > { %3567 = vrot.lane.b32.xlu1 %v3394_v63, %s6288_s10  ;;  %v3463_v63 = vor.u32 %v3462_v53, %v3459_v52  ;;  %v3503_v17 = vor.u32 %v3502_v8, %v3499_v7  ;;  %v3775_v52 = vrot.slane %v3681_v46, 7 }
 0x2f8   : > { %v2941_v24 = vpop.permute.xlu1 %2940  ;;  %v3464_v6 = vsel %vm7651_vm10, %v3455_v60, %v3463_v63  ;;  %v3465_v14 = vrot.slane %v3463_v63, 4  ;;  %v3777_v59 = vrot.slane %v3775_v52, 4  ;;  %v3684_v60 = vld [vmem:[%s6341_s27 + $0x2c] sm:$0xf] }
 0x2f9   : > { %3565 = vrot.lane.b32.xlu0 %v3384_v9, %s6288_s10  ;;  %3037 = vst.msk [vmem:[#allocation2 + $0x6c] sm:$0xf] %vm3009_vm7, %v2941_v24  ;;  %v3484_v9 = vsel %vm7651_vm10, %v3475_v4, %v3483_v5  ;;  %v3505_v24 = vrot.slane %v3503_v17, 4 }
 0x2fa   : > { %3569 = vrot.lane.b32.xlu2 %v3404_v21, %s6288_s10  ;;  %v3493_v21 = vor.u32 %v3492_v13, %v3489_v12  ;;  %v3474_v22 = vsel %vm7651_vm10, %v3465_v14, %v3473_v55  ;;  %v3781_v55 = vrot.slane %v3683_v51, 7  ;;  %v3779_v4 = vsel %vm7856_vm0, %v3777_v59, %v3778_v48  ;;  %v3687_v12 = vld [vmem:[%s6341_s27 + $0x38] sm:$0xf] }
 0x2fb   : > { %v2939_v34 = vpop.permute.xlu0 %2938  ;;  %v3510_v33 = vsel %vm7651_vm10, %v3505_v24, %v3509_v31 }
 0x2fc   : > { %3036 = vst.msk [vmem:[#allocation2 + $0x68] sm:$0xf] %vm3009_vm7, %v2939_v34  ;;  %v2961_v39 = vpop.permute.xlu2 %2960  ;;  %v3494_v25 = vsel %vm7651_vm10, %v3485_v19, %v3493_v21  ;;  %v3495_v29 = vrot.slane %v3493_v21, 4  ;;  %v3769_v34 = vrot.slane %v3679_v27, 7  ;;  %v3783_v63 = vrot.slane %v3781_v55, 4 }
 0x2fd   : > { %3047 = vst.msk [vmem:[#allocation2 + $0x94] sm:$0xf] %vm3009_vm7, %v2961_v39  ;;  %v3766_v39 = vrot.slane %v3678_v30, 7  ;;  %v3793_v19 = vrot.slane %v3687_v12, 7  ;;  %v3690_v27 = vld [vmem:[%s6341_s27 + $0x44] sm:$0xf] }
 0x2fe   : > { %3573 = vrot.lane.b32.xlu1 %v3424_v35, %s6288_s10  ;;  %v5857_v35 = vrot.slane %v3677_v28, 11  ;;  %v3504_v40 = vsel %vm7651_vm10, %v3495_v29, %v3503_v17  ;;  %v3771_v41 = vrot.slane %v3769_v34, 4 }
 0x2ff   : > { %v3768_v45 = vrot.slane %v3766_v39, 4 }
 0x300   : > { %v2947_v49 = vpop.permute.xlu1 %2946  ;;  %v3767_v42 = vsel %vm7856_vm0, %v5857_v35, %v3766_v39  ;;  %v3802_v35 = vrot.slane %v3690_v27, 7 }
 0x301   : > { %3571 = vrot.lane.b32.xlu0 %v3414_v38, %s6288_s10  ;;  %3040 = vst.msk [vmem:[#allocation2 + $0x78] sm:$0xf] %vm3009_vm7, %v2947_v49  ;;  %v3774_v49 = vrot.slane %v3772_v23, 4  ;;  %v3770_v53 = vsel %vm7856_vm0, %v3768_v45, %v3769_v34  ;;  %v3692_v34 = vld [vmem:[%s6341_s27 + $0x4c] sm:$0xf]  ;;  %v4401_v38 = vld [vmem:[%s8898_s4 + $0x10] sm:$0xff] }
 0x302   : > { %3575 = vrot.lane.b32.xlu2 %v3434_v47, %s6288_s10  ;;  %v3773_v47 = vsel %vm7856_vm0, %v3771_v41, %v3772_v23  ;;  %v3808_v39 = vrot.slane %v3692_v34, 7  ;;  %v3694_v23 = vld [vmem:[%s6341_s27 + $0x54] sm:$0xf] }
 0x303   : > { %v2945_v58 = vpop.permute.xlu0 %2944  ;;  %v3776_v56 = vsel %vm7856_vm0, %v3774_v49, %v3775_v52  ;;  %v3814_v46 = vrot.slane %v3694_v23, 7 }
 0x304   : > { %3039 = vst.msk [vmem:[#allocation2 + $0x74] sm:$0xf] %vm3009_vm7, %v2945_v58  ;;  %v2967_v0 = vpop.permute.xlu2 %2966  ;;  %v3685_v58 = vld [vmem:[%s6341_s27 + $0x30] sm:$0xf] }
 0x305   : > { %3051 = vst.msk [vmem:[#allocation2 + $0xa0] sm:$0x3] %vm3050_vm12, %v2967_v0  ;;  %v3787_v0 = vrot.slane %v3685_v58, 7  ;;  %v3816_v51 = vrot.slane %v3814_v46, 4 }
 0x306   : > { %3579 = vrot.lane.b32.xlu1 %v3454_v54, %s6288_s10  ;;  %v3780_v54 = vrot.slane %v3778_v48, 4  ;;  %v3695_v48 = vld [vmem:[%s6341_s27 + $0x58] sm:$0xf] }
 0x307   : > { %v3789_v5 = vrot.slane %v3787_v0, 4  ;;  %v3817_v52 = vrot.slane %v3695_v48, 7 }
 0x308   : > { %v2953_v10 = vpop.permute.xlu1 %2952  ;;  %v3782_v62 = vsel %vm7856_vm0, %v3780_v54, %v3781_v55  ;;  %v3697_v55 = vld [vmem:[%s6341_s27 + $0x60] sm:$0xf] }
 0x309   : > { %3577 = vrot.lane.b32.xlu0 %v3444_v3, %s6288_s10  ;;  %3043 = vst.msk [vmem:[#allocation2 + $0x84] sm:$0xf] %vm3009_vm7, %v2953_v10  ;;  %v3784_v3 = vrot.slane %v3684_v60, 7  ;;  %v3688_v10 = vld [vmem:[%s6341_s27 + $0x3c] sm:$0xf]  ;;  %v3818_v59 = vsel %vm7856_vm0, %v3816_v51, %v3817_v52  ;;  %v3823_v60 = vrot.slane %v3697_v55, 7 }
 0x30a   : > { %3581 = vrot.lane.b32.xlu2 %v3464_v6, %s6288_s10  ;;  %v3790_v6 = vrot.slane %v3686_v2, 7 }
 0x30b   : > { %v2951_v16 = vpop.permute.xlu0 %2950  ;;  %v3785_v7 = vsel %vm7856_vm0, %v3783_v63, %v3784_v3  ;;  %v3786_v11 = vrot.slane %v3784_v3, 4  ;;  %v3825_v2 = vrot.slane %v3823_v60, 4 }
 0x30c   : > { %3042 = vst.msk [vmem:[#allocation2 + $0x80] sm:$0xf] %vm3009_vm7, %v2951_v16  ;;  %v3516_v20 = vpop.permute.xlu2 %3515  ;;  %v3791_v14 = vsel %vm7856_vm0, %v3789_v5, %v3790_v6  ;;  %v3796_v16 = vrot.slane %v3688_v10, 7 }
 0x30d   : > { %3637 = vst.msk [vmem:[#allocation2 + $0x8] sm:$0xf] %vm3634_vm13, %v3516_v20  ;;  %v3788_v20 = vsel %vm7856_vm0, %v3786_v11, %v3787_v0  ;;  %v3698_v0 = vld [vmem:[%s6341_s27 + $0x64] sm:$0xf] }
 0x30e   : > { %3585 = vrot.lane.b32.xlu1 %v3484_v9, %s6288_s10  ;;  %v3792_v9 = vrot.slane %v3790_v6, 4  ;;  %v3798_v21 = vrot.slane %v3796_v16, 4  ;;  %v3826_v3 = vrot.slane %v3698_v0, 7  ;;  %v3700_v6 = vld [vmem:[%s6341_s27 + $0x6c] sm:$0xf] }
 0x30f   : > { %v3832_v12 = vrot.slane %v3700_v6, 7  ;;  %v3711_v6 = vld [vmem:[%s6341_s27 + $0x98] sm:$0xf] }
 0x310   : > { %v2959_v26 = vpop.permute.xlu1 %2958  ;;  %v3794_v24 = vsel %vm7856_vm0, %v3792_v9, %v3793_v19  ;;  %v3827_v11 = vsel %vm7856_vm0, %v3825_v2, %v3826_v3 }
 0x311   : > { %3583 = vrot.lane.b32.xlu0 %v3474_v22, %s6288_s10  ;;  %3046 = vst.msk [vmem:[#allocation2 + $0x90] sm:$0xf] %vm3009_vm7, %v2959_v26  ;;  %v3799_v22 = vrot.slane %v3689_v18, 7  ;;  %v3795_v26 = vrot.slane %v3793_v19, 4  ;;  %v3834_v18 = vrot.slane %v3832_v12, 4 }
 0x312   : > { %3587 = vrot.lane.b32.xlu2 %v3494_v25, %s6288_s10  ;;  %v3691_v25 = vld [vmem:[%s6341_s27 + $0x48] sm:$0xf] }
 0x313   : > { %v2957_v32 = vpop.permute.xlu0 %2956  ;;  %v3800_v29 = vsel %vm7856_vm0, %v3798_v21, %v3799_v22  ;;  %v3805_v30 = vrot.slane %v3691_v25, 7 }
 0x314   : > { %3045 = vst.msk [vmem:[#allocation2 + $0x8c] sm:$0xf] %vm3009_vm7, %v2957_v32  ;;  %v3522_v36 = vpop.permute.xlu2 %3521  ;;  %v3801_v32 = vrot.slane %v3799_v22, 4  ;;  %v3703_v22 = vld [vmem:[%s6341_s27 + $0x78] sm:$0xf] }
 0x315   : > { %3640 = vst.msk [vmem:[#allocation2 + $0x14] sm:$0xf] %vm3634_vm13, %v3522_v36  ;;  %v3797_v36 = vsel %vm7856_vm0, %v3795_v26, %v3796_v16  ;;  %v3807_v37 = vrot.slane %v3805_v30, 4  ;;  %v3701_v16 = vld [vmem:[%s6341_s27 + $0x70] sm:$0xf]  ;;  %v3841_v27 = vrot.slane %v3703_v22, 7 }
 0x316   : > { %3591 = vrot.lane.b32.xlu1 %v3510_v33, %s6288_s10  ;;  %v3835_v19 = vrot.slane %v3701_v16, 7  ;;  %v3865_v16 = vrot.slane %v3711_v6, 7 }
 0x317   : > { %v3809_v45 = vsel %vm7856_vm0, %v3807_v37, %v3808_v39  ;;  %v3843_v34 = vrot.slane %v3841_v27, 4 }
 0x318   : > { %v2965_v43 = vpop.permute.xlu1 %2964  ;;  %v3836_v26 = vsel %vm7856_vm0, %v3834_v18, %v3835_v19 }
 0x319   : > { %3589 = vrot.lane.b32.xlu0 %v3504_v40, %s6288_s10  ;;  %3049 = vst.msk [vmem:[#allocation2 + $0x9c] sm:$0xf] %vm3009_vm7, %v2965_v43  ;;  %v3803_v40 = vsel %vm7856_vm0, %v3801_v32, %v3802_v35  ;;  %v3693_v43 = vld [vmem:[%s6341_s27 + $0x50] sm:$0xf] }
 0x31a   : > { %3888 = vrot.lane.b32.xlu2 %v3767_v42, %s6289_s11  ;;  %v3804_v42 = vrot.slane %v3802_v35, 4  ;;  %v3811_v49 = vrot.slane %v3693_v43, 7 }
 0x31b   : > { %v2963_v15 = vpop.permute.xlu0 %2962 }
 0x31c   : > { %3048 = vst.msk [vmem:[#allocation2 + $0x98] sm:$0xf] %vm3009_vm7, %v2963_v15  ;;  %v3528_v50 = vpop.permute.xlu2 %3527  ;;  %v3810_v15 = vrot.slane %v3808_v39, 4  ;;  %v3706_v39 = vld [vmem:[%s6341_s27 + $0x84] sm:$0xf] }
 0x31d   : > { %3643 = vst.msk [vmem:[#allocation2 + $0x20] sm:$0xf] %vm3634_vm13, %v3528_v50  ;;  %v3806_v50 = vsel %vm7856_vm0, %v3804_v42, %v3805_v30  ;;  %v3704_v30 = vld [vmem:[%s6341_s27 + $0x7c] sm:$0xf]  ;;  %v3850_v43 = vrot.slane %v3706_v39, 7 }
 0x31e   : > { %3892 = vrot.lane.b32.xlu1 %v3773_v47, %s6289_s11  ;;  %v3844_v35 = vrot.slane %v3704_v30, 7 }
 0x31f   : > { %v3852_v48 = vrot.slane %v3850_v43, 4 }
 0x320   : > { %v3514_v57 = vpop.permute.xlu1 %3513  ;;  %v3845_v42 = vsel %vm7856_vm0, %v3843_v34, %v3844_v35  ;;  %v6119_v34 = vld [vmem:[%s8895_s1 + $0x8] sm:$0xff] }
 0x321   : > { %3890 = vrot.lane.b32.xlu0 %v3770_v53, %s6289_s11  ;;  %3636 = vst.msk [vmem:[#allocation2 + $0x4] sm:$0xf] %vm3634_vm13, %v3514_v57  ;;  %v3812_v53 = vsel %vm7856_vm0, %v3810_v15, %v3811_v49  ;;  %v3696_v57 = vld [vmem:[%s6341_s27 + $0x5c] sm:$0xf] }
 0x322   : > { %3894 = vrot.lane.b32.xlu2 %v3776_v56, %s6289_s11  ;;  %v3813_v56 = vrot.slane %v3811_v49, 4  ;;  %v3820_v63 = vrot.slane %v3696_v57, 7 }
 0x323   : > { %v3512_v61 = vpop.permute.xlu0 %3511 }
 0x324   : > { %3635 = vst.msk [vmem:[#allocation2] sm:$0xf] %vm3634_vm13, %v3512_v61  ;;  %v3534_v1 = vpop.permute.xlu2 %3533  ;;  %v3819_v61 = vrot.slane %v3817_v52, 4  ;;  %v3709_v52 = vld [vmem:[%s6341_s27 + $0x90] sm:$0xf] }
 0x325   : > { %3646 = vst.msk [vmem:[#allocation2 + $0x2c] sm:$0xf] %vm3634_vm13, %v3534_v1  ;;  %v3815_v1 = vsel %vm7856_vm0, %v3813_v56, %v3814_v46  ;;  %v3707_v46 = vld [vmem:[%s6341_s27 + $0x88] sm:$0xf]  ;;  %v3859_v57 = vrot.slane %v3709_v52, 7 }
 0x326   : > { %3898 = vrot.lane.b32.xlu1 %v3782_v62, %s6289_s11  ;;  %v3853_v49 = vrot.slane %v3707_v46, 7 }
 0x328   : > { %v3520_v8 = vpop.permute.xlu1 %3519  ;;  %v3854_v56 = vsel %vm7856_vm0, %v3852_v48, %v3853_v49 }
 0x329   : > { %3896 = vrot.lane.b32.xlu0 %v3779_v4, %s6289_s11  ;;  %3639 = vst.msk [vmem:[#allocation2 + $0x10] sm:$0xf] %vm3634_vm13, %v3520_v8  ;;  %v3821_v4 = vsel %vm7856_vm0, %v3819_v61, %v3820_v63  ;;  %v3699_v8 = vld [vmem:[%s6341_s27 + $0x68] sm:$0xf] }
 0x32a   : > { %3900 = vrot.lane.b32.xlu2 %v3785_v7, %s6289_s11  ;;  %v3822_v7 = vrot.slane %v3820_v63, 4  ;;  %v3829_v9 = vrot.slane %v3699_v8, 7  ;;  %v3861_v63 = vrot.slane %v3859_v57, 4 }
 0x32b   : > { %v3518_v13 = vpop.permute.xlu0 %3517 }
 0x32c   : > { %3638 = vst.msk [vmem:[#allocation2 + $0xc] sm:$0xf] %vm3634_vm13, %v3518_v13  ;;  %v3540_v17 = vpop.permute.xlu2 %3539  ;;  %v3828_v13 = vrot.slane %v3826_v3, 4 }
 0x32d   : > { %3649 = vst.msk [vmem:[#allocation2 + $0x38] sm:$0xf] %vm3634_vm13, %v3540_v17  ;;  %v3824_v17 = vsel %vm7856_vm0, %v3822_v7, %v3823_v60  ;;  %v3710_v60 = vld [vmem:[%s6341_s27 + $0x94] sm:$0xf] }
 0x32e   : > { %3904 = vrot.lane.b32.xlu1 %v3791_v14, %s6289_s11 }
 0x330   : > { %v3526_v31 = vpop.permute.xlu1 %3525 }
 0x331   : > { %3902 = vrot.lane.b32.xlu0 %v3788_v20, %s6289_s11  ;;  %3642 = vst.msk [vmem:[#allocation2 + $0x1c] sm:$0xf] %vm3634_vm13, %v3526_v31  ;;  %v3830_v20 = vsel %vm7856_vm0, %v3828_v13, %v3829_v9  ;;  %v3702_v31 = vld [vmem:[%s6341_s27 + $0x74] sm:$0xf]  ;;  %v3713_v13 = vld [vmem:[%s6341_s27 + $0xa0] sm:$0xf] }
 0x332   : > { %3906 = vrot.lane.b32.xlu2 %v3794_v24, %s6289_s11  ;;  %v3831_v24 = vrot.slane %v3829_v9, 4  ;;  %v3838_v32 = vrot.slane %v3702_v31, 7 }
 0x333   : > { %v3524_v28 = vpop.permute.xlu0 %3523 }
 0x334   : > { %3641 = vst.msk [vmem:[#allocation2 + $0x18] sm:$0xf] %vm3634_vm13, %v3524_v28  ;;  %v3546_v33 = vpop.permute.xlu2 %3545  ;;  %v3837_v28 = vrot.slane %v3835_v19, 4  ;;  %v3871_v19 = vrot.slane %v3713_v13, 7  ;;  %v4408_v13 = vld [vmem:[%s8898_s4 + $0x48] sm:$0xff] }
 0x335   : > { %3652 = vst.msk [vmem:[#allocation2 + $0x44] sm:$0xf] %vm3634_vm13, %v3546_v33  ;;  %v3833_v33 = vsel %vm7856_vm0, %v3831_v24, %v3832_v12  ;;  %v3715_v24 = vld [vmem:[%s6341_s27 + $0xa8] sm:$0xf] }
 0x336   : > { %3910 = vrot.lane.b32.xlu1 %v3800_v29, %s6289_s11  ;;  %v3873_v30 = vrot.slane %v3871_v19, 4 }
 0x338   : > { %v3532_v41 = vpop.permute.xlu1 %3531 }
 0x339   : > { %3908 = vrot.lane.b32.xlu0 %v3797_v36, %s6289_s11  ;;  %3645 = vst.msk [vmem:[#allocation2 + $0x28] sm:$0xf] %vm3634_vm13, %v3532_v41  ;;  %v3839_v36 = vsel %vm7856_vm0, %v3837_v28, %v3838_v32  ;;  %v3705_v41 = vld [vmem:[%s6341_s27 + $0x80] sm:$0xf] }
 0x33a   : > { %3912 = vrot.lane.b32.xlu2 %v3803_v40, %s6289_s11  ;;  %v3840_v40 = vrot.slane %v3838_v32, 4  ;;  %v3847_v15 = vrot.slane %v3705_v41, 7 }
 0x33b   : > { %v3530_v44 = vpop.permute.xlu0 %3529 }
 0x33c   : > { %3644 = vst.msk [vmem:[#allocation2 + $0x24] sm:$0xf] %vm3634_vm13, %v3530_v44  ;;  %v3552_v47 = vpop.permute.xlu2 %3551  ;;  %v3846_v44 = vrot.slane %v3844_v35, 4 }
 0x33d   : > { %3655 = vst.msk [vmem:[#allocation2 + $0x50] sm:$0xf] %vm3634_vm13, %v3552_v47  ;;  %v3842_v47 = vsel %vm7856_vm0, %v3840_v40, %v3841_v27 }
 0x33e   : > { %3916 = vrot.lane.b32.xlu1 %v3809_v45, %s6289_s11 }
 0x340   : > { %v3538_v54 = vpop.permute.xlu1 %3537 }
 0x341   : > { %3914 = vrot.lane.b32.xlu0 %v3806_v50, %s6289_s11  ;;  %3648 = vst.msk [vmem:[#allocation2 + $0x34] sm:$0xf] %vm3634_vm13, %v3538_v54  ;;  %v3848_v50 = vsel %vm7856_vm0, %v3846_v44, %v3847_v15  ;;  %v3708_v54 = vld [vmem:[%s6341_s27 + $0x8c] sm:$0xf] }
 0x342   : > { %3918 = vrot.lane.b32.xlu2 %v3812_v53, %s6289_s11  ;;  %v3849_v53 = vrot.slane %v3847_v15, 4  ;;  %v3856_v61 = vrot.slane %v3708_v54, 7 }
 0x343   : > { %v3536_v58 = vpop.permute.xlu0 %3535 }
 0x344   : > { %3647 = vst.msk [vmem:[#allocation2 + $0x30] sm:$0xf] %vm3634_vm13, %v3536_v58  ;;  %v3558_v62 = vpop.permute.xlu2 %3557  ;;  %v3855_v58 = vrot.slane %v3853_v49, 4  ;;  %v3851_v0 = vsel %vm7856_vm0, %v3849_v53, %v3850_v43  ;;  %v3717_v43 = vld [vmem:[%s6341_s27 + $0xb0] sm:$0xf] }
 0x345   : > { %3658 = vst.msk [vmem:[#allocation2 + $0x5c] sm:$0xf] %vm3634_vm13, %v3558_v62  ;;  %v6290_v62 = vmov 0   ;;  %v3718_v49 = vld [vmem:[%s6341_s27 + $0xb4] sm:$0x1] }
 0x346   : > { %3922 = vrot.lane.b32.xlu1 %v3818_v59, %s6289_s11  ;;  %6270 = vset.pattern.permute.xlu0 %v6290_v62  ;;  %v3857_v2 = vsel %vm7856_vm0, %v3855_v58, %v3856_v61  ;;  %v3886_v53 = vrot.slane %v3718_v49, 7  ;;  %v4400_v58 = vld [vmem:[%s8898_s4 + $0x8] sm:$0xff] }
 0x347   : > { %6268 = vset.pattern.permute.xlu1 %v6290_v62  ;;  %6269 = vset.pattern.permute.xlu2 %v6290_v62 }
 0x348   : > { %v3544_v5 = vpop.permute.xlu1 %3543 }
 0x349   : > { %3920 = vrot.lane.b32.xlu0 %v3815_v1, %s6289_s11  ;;  %3651 = vst.msk [vmem:[#allocation2 + $0x40] sm:$0xf] %vm3634_vm13, %v3544_v5  ;;  %v3862_v1 = vrot.slane %v3710_v60, 7  ;;  %v3858_v5 = vrot.slane %v3856_v61, 4  ;;  %v4402_v61 = vld [vmem:[%s8898_s4 + $0x18] sm:$0xff] }
 0x34a   : > { %3924 = vrot.lane.b32.xlu2 %v3821_v4, %s6289_s11  ;;  %v3712_v4 = vld [vmem:[%s6341_s27 + $0x9c] sm:$0xf] }
 0x34b   : > { %v3542_v10 = vpop.permute.xlu0 %3541  ;;  %v3863_v8 = vsel %vm7856_vm0, %v3861_v63, %v3862_v1 }
 0x34c   : > { %3650 = vst.msk [vmem:[#allocation2 + $0x3c] sm:$0xf] %vm3634_vm13, %v3542_v10  ;;  %v3564_v14 = vpop.permute.xlu2 %3563  ;;  %v3868_v10 = vrot.slane %v3712_v4, 7  ;;  %v4406_v4 = vld [vmem:[%s8898_s4 + $0x38] sm:$0xff] }
 0x34d   : > { %3661 = vst.msk [vmem:[#allocation2 + $0x68] sm:$0xf] %vm3634_vm13, %v3564_v14  ;;  %v4099_v14 = vld [vmem:[%s8895_s1 + $0x10] sm:$0x3] }
 0x34e   : > { %3928 = vrot.lane.b32.xlu1 %v3827_v11, %s6289_s11  ;;  %v3864_v11 = vrot.slane %v3862_v1, 4  ;;  %v4212_v9 = vunpack.c.l.b16 %v4099_v14  ;;  %v3870_v18 = vrot.slane %v3868_v10, 4 }
 0x350   : > { %v3550_v21 = vpop.permute.xlu1 %3549  ;;  %v3872_v28 = vsel %vm7856_vm0, %v3870_v18, %v3871_v19  ;;  %v4412_v18 = vld [vmem:[%s8898_s4 + $0x68] sm:$0xff]  ;;  %v4411_v19 = vld [vmem:[%s8898_s4 + $0x60] sm:$0xff] }
 0x351   : > { %3926 = vrot.lane.b32.xlu0 %v3824_v17, %s6289_s11  ;;  %3654 = vst.msk [vmem:[#allocation2 + $0x4c] sm:$0xf] %vm3634_vm13, %v3550_v21  ;;  %v3860_v17 = vsel %vm7856_vm0, %v3858_v5, %v3859_v57  ;;  %v4215_v21 = vpack.c.b16 %v4212_v9, %v4212_v9  ;;  %v4405_v5 = vld [vmem:[%s8898_s4 + $0x30] sm:$0xff]  ;;  %v4410_v9 = vld [vmem:[%s8898_s4 + $0x58] sm:$0xff] }
 0x352   : > { %3930 = vrot.lane.b32.xlu2 %v3830_v20, %s6289_s11  ;;  %v3866_v20 = vsel %vm7856_vm0, %v3864_v11, %v3865_v16 }
 0x353   : > { %v3548_v25 = vpop.permute.xlu0 %3547  ;;  %v4284_v31 = vsel %vm2391_vm2, %v4215_v21, 0 }
 0x354   : > { %3653 = vst.msk [vmem:[#allocation2 + $0x48] sm:$0xf] %vm3634_vm13, %v3548_v25  ;;  %v3570_v29 = vpop.permute.xlu2 %3569  ;;  %v3867_v25 = vrot.slane %v3865_v16, 4  ;;  %4291 = vmatpush.bf16.msra.mxu0 %v4284_v31  ;;  %6227 = vmatpush.bf16.msra.mxu1 %v4284_v31 }
 0x355   : > { %3664 = vst.msk [vmem:[#allocation2 + $0x74] sm:$0xf] %vm3634_vm13, %v3570_v29  ;;  %v3877_v29 = vrot.slane %v3715_v24, 7  ;;  %6228 = vmatpush.bf16.msra.mxu2 %v4284_v31  ;;  %6229 = vmatpush.bf16.msra.mxu3 %v4284_v31  ;;  %v4413_v24 = vld [vmem:[%s8898_s4 + $0x70] sm:$0xff] }
 0x356   : > { %3934 = vrot.lane.b32.xlu1 %v3836_v26, %s6289_s11  ;;  %v3714_v26 = vld [vmem:[%s6341_s27 + $0xa4] sm:$0xf] }
 0x357   : > { %v3874_v35 = vrot.slane %v3714_v26, 7  ;;  %v4414_v26 = vld [vmem:[%s8898_s4 + $0x78] sm:$0xff] }
 0x358   : > { %v3556_v37 = vpop.permute.xlu1 %3555  ;;  %4292 = vmatpush.bf16.msra.mxu0 %v6119_v34  ;;  %6230 = vmatpush.bf16.msra.mxu1 %v6119_v34 }
 0x359   : > { %3932 = vrot.lane.b32.xlu0 %v3833_v33, %s6289_s11  ;;  %3657 = vst.msk [vmem:[#allocation2 + $0x58] sm:$0xf] %vm3634_vm13, %v3556_v37  ;;  %v3716_v33 = vld [vmem:[%s6341_s27 + $0xac] sm:$0xf]  ;;  %v3879_v37 = vrot.slane %v3877_v29, 4  ;;  %v3875_v40 = vsel %vm7856_vm0, %v3873_v30, %v3874_v35  ;;  %6231 = vmatpush.bf16.msra.mxu2 %v6119_v34 }
 0x35a   : > { %3936 = vrot.lane.b32.xlu2 %v3839_v36, %s6289_s11  ;;  %v3869_v36 = vsel %vm7856_vm0, %v3867_v25, %v3868_v10  ;;  %v3880_v39 = vrot.slane %v3716_v33, 7  ;;  %6232 = vmatpush.bf16.msra.mxu3 %v6119_v34  ;;  %v4407_v10 = vld [vmem:[%s8898_s4 + $0x40] sm:$0xff]  ;;  %v4416_v30 = vld [vmem:[%s8898_s4 + $0x88] sm:$0xff]  ;;  %v4418_v33 = vld [vmem:[%s8898_s4 + $0x98] sm:$0xff] }
 0x35b   : > { %v3554_v23 = vpop.permute.xlu0 %3553  ;;  %v4415_v25 = vld [vmem:[%s8898_s4 + $0x80] sm:$0xff]  ;;  %v4417_v34 = vld [vmem:[%s8898_s4 + $0x90] sm:$0xff] }
 0x35c   : > { %3656 = vst.msk [vmem:[#allocation2 + $0x54] sm:$0xf] %vm3634_vm13, %v3554_v23  ;;  %v3576_v45 = vpop.permute.xlu2 %3575  ;;  %v6118_v23 = vld [vmem:[%s8895_s1] sm:$0xff]  ;;  %v3882_v46 = vrot.slane %v3880_v39, 4 }
 0x35d   : > { %3667 = vst.msk [vmem:[#allocation2 + $0x80] sm:$0xf] %vm3634_vm13, %v3576_v45  ;;  %4293 = vmatpush.bf16.msra.mxu0 %v6118_v23  ;;  %v3881_v45 = vsel %vm7856_vm0, %v3879_v37, %v3880_v39  ;;  %6233 = vmatpush.bf16.msra.mxu1 %v6118_v23  ;;  %v4419_v39 = vld [vmem:[%s8898_s4 + $0xa0] sm:$0xff] }
 0x35e   : > { %3940 = vrot.lane.b32.xlu1 %v3845_v42, %s6289_s11  ;;  %v3876_v42 = vrot.slane %v3874_v35, 4  ;;  %6234 = vmatpush.bf16.msra.mxu2 %v6118_v23 }
 0x35f   : > { %6235 = vmatpush.bf16.msra.mxu3 %v6118_v23  ;;  %v4420_v23 = vld [vmem:[%s8898_s4 + $0xa8] sm:$0xff] }
 0x360   : > { %v3562_v51 = vpop.permute.xlu1 %3561  ;;  %v3878_v48 = vsel %vm7856_vm0, %v3876_v42, %v3877_v29 }
 0x361   : > { %3938 = vrot.lane.b32.xlu0 %v3842_v47, %s6289_s11  ;;  %3660 = vst.msk [vmem:[#allocation2 + $0x64] sm:$0xf] %vm3634_vm13, %v3562_v51  ;;  %v3883_v47 = vrot.slane %v3717_v43, 7 }
 0x362   : > { %3942 = vrot.lane.b32.xlu2 %v3848_v50, %s6289_s11 }
 0x363   : > { %v3560_v55 = vpop.permute.xlu0 %3559  ;;  %v3884_v50 = vsel %vm7856_vm0, %v3882_v46, %v3883_v47  ;;  %v3885_v52 = vrot.slane %v3883_v47, 4  ;;  %v4423_v47 = vld [vmem:[%s8898_s4 + $0xc0] sm:$0xff] }
 0x364   : > { %3659 = vst.msk [vmem:[#allocation2 + $0x60] sm:$0xf] %vm3634_vm13, %v3560_v55  ;;  %v3582_v59 = vpop.permute.xlu2 %3581  ;;  %v4399_v55 = vld [vmem:[%s8898_s4] sm:$0xff] }
 0x365   : > { %3670 = vst.msk [vmem:[#allocation2 + $0x8c] sm:$0xf] %vm3634_vm13, %v3582_v59  ;;  %v3887_v57 = vsel %vm7856_vm0, %v3885_v52, %v3886_v53  ;;  %v4427_v53 = vld [vmem:[%s8898_s4 + $0xe0] sm:$0xff] }
 0x366   : > { %3946 = vrot.lane.b32.xlu1 %v3854_v56, %s6289_s11 }
 0x368   : > { %v3568_v3 = vpop.permute.xlu1 %3567 }
 0x369   : > { %3944 = vrot.lane.b32.xlu0 %v3851_v0, %s6289_s11  ;;  %3663 = vst.msk [vmem:[#allocation2 + $0x70] sm:$0xf] %vm3634_vm13, %v3568_v3  ;;  %v4403_v0 = vld [vmem:[%s8898_s4 + $0x20] sm:$0xff] }
 0x36a   : > { %3948 = vrot.lane.b32.xlu2 %v3857_v2, %s6289_s11  ;;  %v4404_v2 = vld [vmem:[%s8898_s4 + $0x28] sm:$0xff] }
 0x36b   : > { %v3566_v7 = vpop.permute.xlu0 %3565 }
 0x36c   : > { %3662 = vst.msk [vmem:[#allocation2 + $0x6c] sm:$0xf] %vm3634_vm13, %v3566_v7  ;;  %v3588_v12 = vpop.permute.xlu2 %3587 }
 0x36d   : > { %3673 = vst.msk [vmem:[#allocation2 + $0x98] sm:$0xf] %vm3634_vm13, %v3588_v12  ;;  %v4409_v12 = vld [vmem:[%s8898_s4 + $0x50] sm:$0xff] }
 0x36e   : > { %3952 = vrot.lane.b32.xlu1 %v3863_v8, %s6289_s11 }
 0x370   : > { %v3574_v22 = vpop.permute.xlu1 %3573 }
 0x371   : > { %3950 = vrot.lane.b32.xlu0 %v3860_v17, %s6289_s11  ;;  %3666 = vst.msk [vmem:[#allocation2 + $0x7c] sm:$0xf] %vm3634_vm13, %v3574_v22 }
 0x372   : > { %3954 = vrot.lane.b32.xlu2 %v3866_v20, %s6289_s11 }
 0x373   : > { %v3572_v27 = vpop.permute.xlu0 %3571 }
 0x374   : > { %3665 = vst.msk [vmem:[#allocation2 + $0x78] sm:$0xf] %vm3634_vm13, %v3572_v27  ;;  %v3889_v32 = vpop.permute.xlu2 %3888 }
 0x375   : > { %4012 = vst.msk [vmem:[#allocation2] sm:$0xf] %vm4011_vm1, %v3889_v32 }
 0x376   : > { %3958 = vrot.lane.b32.xlu1 %v3872_v28, %s6289_s11 }
 0x378   : > { %v3580_v41 = vpop.permute.xlu1 %3579 }
 0x379   : > { %3956 = vrot.lane.b32.xlu0 %v3869_v36, %s6289_s11  ;;  %3669 = vst.msk [vmem:[#allocation2 + $0x88] sm:$0xf] %vm3634_vm13, %v3580_v41  ;;  %v4421_v41 = vld [vmem:[%s8898_s4 + $0xb0] sm:$0xff] }
 0x37a   : > { %3960 = vrot.lane.b32.xlu2 %v3875_v40, %s6289_s11 }
 0x37b   : > { %v3578_v44 = vpop.permute.xlu0 %3577 }
 0x37c   : > { %3668 = vst.msk [vmem:[#allocation2 + $0x84] sm:$0xf] %vm3634_vm13, %v3578_v44  ;;  %v3895_v15 = vpop.permute.xlu2 %3894 }
 0x37d   : > { %4015 = vst.msk [vmem:[#allocation2 + $0xc] sm:$0xf] %vm4011_vm1, %v3895_v15  ;;  %v4424_v15 = vld [vmem:[%s8898_s4 + $0xc8] sm:$0xff] }
 0x37e   : > { %3964 = vrot.lane.b32.xlu1 %v3881_v45, %s6289_s11  ;;  %v4422_v45 = vld [vmem:[%s8898_s4 + $0xb8] sm:$0xff] }
 0x380   : > { %v3586_v51 = vpop.permute.xlu1 %3585 }
 0x381   : > { %3962 = vrot.lane.b32.xlu0 %v3878_v48, %s6289_s11  ;;  %3672 = vst.msk [vmem:[#allocation2 + $0x94] sm:$0xf] %vm3634_vm13, %v3586_v51  ;;  %v4425_v51 = vld [vmem:[%s8898_s4 + $0xd0] sm:$0xff] }
 0x382   : > { %3966 = vrot.lane.b32.xlu2 %v3884_v50, %s6289_s11 }
 0x383   : > { %v3584_v54 = vpop.permute.xlu0 %3583 }
 0x384   : > { %3671 = vst.msk [vmem:[#allocation2 + $0x90] sm:$0xf] %vm3634_vm13, %v3584_v54  ;;  %v3901_v56 = vpop.permute.xlu2 %3900  ;;  %v4426_v54 = vld [vmem:[%s8898_s4 + $0xd8] sm:$0xff] }
 0x385   : > { %4018 = vst.msk [vmem:[#allocation2 + $0x18] sm:$0xf] %vm4011_vm1, %v3901_v56 }
 0x386   : > { %4442 = vperm.xlu1 %6268, %v4399_v55  }
 0x388   : > { %v3592_v59 = vpop.permute.xlu1 %3591 }
 0x389   : > { %3968 = vrot.lane.b32.xlu0 %v3887_v57, %s6289_s11  ;;  %3676 = vst.msk [vmem:[#allocation2 + $0xa0] sm:$0x3] %vm3675_vm3, %v3592_v59  ;;  %v4428_v59 = vld [vmem:[%s8898_s4 + $0xe8] sm:$0xff] }
 0x38a   : > { %4447 = vperm.xlu2 %6269, %v4400_v58  }
 0x38b   : > { %v3590_v60 = vpop.permute.xlu0 %3589 }
 0x38c   : > { %3674 = vst.msk [vmem:[#allocation2 + $0x9c] sm:$0xf] %vm3634_vm13, %v3590_v60  ;;  %v3907_v62 = vpop.permute.xlu2 %3906 }
 0x38d   : > { %4021 = vst.msk [vmem:[#allocation2 + $0x24] sm:$0xf] %vm4011_vm1, %v3907_v62  ;;  %v4429_v62 = vld [vmem:[%s8898_s4 + $0xf0] sm:$0xff] }
 0x38e   : > { %4457 = vperm.xlu1 %6268, %v4402_v61   ;;  %v4430_v61 = vld [vmem:[%s8898_s4 + $0xf8] sm:$0xff] }
 0x390   : > { %v3893_v63 = vpop.permute.xlu1 %3892 }
 0x391   : > { %4452 = vperm.xlu0 %6270, %v4401_v38   ;;  %4014 = vst.msk [vmem:[#allocation2 + $0x8] sm:$0xf] %vm4011_vm1, %v3893_v63 }
 0x392   : > { %4462 = vperm.xlu2 %6269, %v4403_v0  }
 0x393   : > { %v3891_v1 = vpop.permute.xlu0 %3890 }
 0x394   : > { %4013 = vst.msk [vmem:[#allocation2 + $0x4] sm:$0xf] %vm4011_vm1, %v3891_v1  ;;  %v3913_v3 = vpop.permute.xlu2 %3912  ;;  %v4431_v1 = vld [vmem:[%s8898_s4 + $0x100] sm:$0xff] }
 0x395   : > { %4024 = vst.msk [vmem:[#allocation2 + $0x30] sm:$0xf] %vm4011_vm1, %v3913_v3  ;;  %v4433_v3 = vld [vmem:[%s8898_s4 + $0x110] sm:$0xff] }
 0x396   : > { %4467 = vperm.xlu1 %6268, %v4404_v2  }
 0x398   : > { %v3899_v6 = vpop.permute.xlu1 %3898  ;;  %v6099_v22 = vld [vmem:[#allocation2 + $0x8] sm:$0xff] }
 0x399   : > { %4477 = vperm.xlu0 %6270, %v4406_v4   ;;  %4017 = vst.msk [vmem:[#allocation2 + $0x14] sm:$0xf] %vm4011_vm1, %v3899_v6  ;;  %v4432_v4 = vld [vmem:[%s8898_s4 + $0x108] sm:$0xff] }
 0x39a   : > { %4472 = vperm.xlu2 %6269, %v4405_v5  }
 0x39b   : > { %v3897_v7 = vpop.permute.xlu0 %3896  ;;  %v6098_v8 = vld [vmem:[#allocation2] sm:$0xff] }
 0x39c   : > { %4016 = vst.msk [vmem:[#allocation2 + $0x10] sm:$0xf] %vm4011_vm1, %v3897_v7  ;;  %v3919_v11 = vpop.permute.xlu2 %3918  ;;  %5946 = vmatmul.msk.bf16.vlgmr.msra.gmra.mxu0 %vm4218_vm4, %v6098_v8 }
 0x39d   : > { %4027 = vst.msk [vmem:[#allocation2 + $0x3c] sm:$0xf] %vm4011_vm1, %v3919_v11  ;;  %v4436_v11 = vld [vmem:[%s8898_s4 + $0x128] sm:$0xff] }
 0x39e   : > { %4482 = vperm.xlu1 %6268, %v4407_v10   ;;  %v4434_v10 = vld [vmem:[%s8898_s4 + $0x118] sm:$0xff] }
 0x3a0   : > { %v3905_v14 = vpop.permute.xlu1 %3904 }
 0x3a1   : > { %4492 = vperm.xlu0 %6270, %v4409_v12   ;;  %4020 = vst.msk [vmem:[#allocation2 + $0x20] sm:$0xf] %vm4011_vm1, %v3905_v14  ;;  %v4435_v12 = vld [vmem:[%s8898_s4 + $0x120] sm:$0xff] }
 0x3a2   : > { %4487 = vperm.xlu2 %6269, %v4408_v13  }
 0x3a3   : > { %v3903_v16 = vpop.permute.xlu0 %3902  ;;  %v6100_v37 = vld [vmem:[#allocation2 + $0x10] sm:$0xff] }
 0x3a4   : > { %4019 = vst.msk [vmem:[#allocation2 + $0x1c] sm:$0xf] %vm4011_vm1, %v3903_v16  ;;  %v3925_v17 = vpop.permute.xlu2 %3924  ;;  %v4437_v16 = vld [vmem:[%s8898_s4 + $0x130] sm:$0xff] }
 0x3a5   : > { %4030 = vst.msk [vmem:[#allocation2 + $0x48] sm:$0xf] %vm4011_vm1, %v3925_v17  ;;  %v4438_v17 = vld [vmem:[%s8898_s4 + $0x138] sm:$0xff] }
 0x3a6   : > { %4497 = vperm.xlu1 %6268, %v4410_v9   ;;  %v4439_v9 = vld [vmem:[%s8898_s4 + $0x140] sm:$0xf] }
 0x3a8   : > { %v3911_v20 = vpop.permute.xlu1 %3910  ;;  %v6102_v63 = vld [vmem:[#allocation2 + $0x20] sm:$0xff] }
 0x3a9   : > { %4507 = vperm.xlu0 %6270, %v4412_v18   ;;  %4023 = vst.msk [vmem:[#allocation2 + $0x2c] sm:$0xf] %vm4011_vm1, %v3911_v20 }
 0x3aa   : > { %4502 = vperm.xlu2 %6269, %v4411_v19  }
 0x3ab   : > { %v3909_v21 = vpop.permute.xlu0 %3908  ;;  %v6101_v50 = vld [vmem:[#allocation2 + $0x18] sm:$0xff] }
 0x3ac   : > { %4022 = vst.msk [vmem:[#allocation2 + $0x28] sm:$0xf] %vm4011_vm1, %v3909_v21  ;;  %v3931_v31 = vpop.permute.xlu2 %3930  ;;  %5947 = vmatmul.msk.bf16.gmra.mxu0 %vm4218_vm4, %v6099_v22 }
 0x3ad   : > { %4033 = vst.msk [vmem:[#allocation2 + $0x54] sm:$0xf] %vm4011_vm1, %v3931_v31 }
 0x3ae   : > { %4512 = vperm.xlu1 %6268, %v4413_v24  }
 0x3b0   : > { %v3917_v27 = vpop.permute.xlu1 %3916 }
 0x3b1   : > { %4522 = vperm.xlu0 %6270, %v4415_v25   ;;  %4026 = vst.msk [vmem:[#allocation2 + $0x38] sm:$0xf] %vm4011_vm1, %v3917_v27 }
 0x3b2   : > { %4517 = vperm.xlu2 %6269, %v4414_v26  }
 0x3b3   : > { %v3915_v28 = vpop.permute.xlu0 %3914  ;;  %v6103_v29 = vld [vmem:[#allocation2 + $0x28] sm:$0xff] }
 0x3b4   : > { %4025 = vst.msk [vmem:[#allocation2 + $0x34] sm:$0xf] %vm4011_vm1, %v3915_v28  ;;  %v3937_v32 = vpop.permute.xlu2 %3936  ;;  %5951 = vmatmul.msk.bf16.vlgmr.msra.gmra.mxu1 %vm4218_vm4, %v6103_v29 }
 0x3b5   : > { %4036 = vst.msk [vmem:[#allocation2 + $0x60] sm:$0xf] %vm4011_vm1, %v3937_v32 }
 0x3b6   : > { %4527 = vperm.xlu1 %6268, %v4416_v30  }
 0x3b8   : > { %v3923_v35 = vpop.permute.xlu1 %3922  ;;  %v6105_v57 = vld [vmem:[#allocation2 + $0x38] sm:$0xff] }
 0x3b9   : > { %4537 = vperm.xlu0 %6270, %v4418_v33   ;;  %4029 = vst.msk [vmem:[#allocation2 + $0x44] sm:$0xf] %vm4011_vm1, %v3923_v35 }
 0x3ba   : > { %4532 = vperm.xlu2 %6269, %v4417_v34  }
 0x3bb   : > { %v3921_v36 = vpop.permute.xlu0 %3920  ;;  %v6104_v44 = vld [vmem:[#allocation2 + $0x30] sm:$0xff] }
 0x3bc   : > { %4028 = vst.msk [vmem:[#allocation2 + $0x40] sm:$0xf] %vm4011_vm1, %v3921_v36  ;;  %v3943_v40 = vpop.permute.xlu2 %3942  ;;  %5948 = vmatmul.msk.bf16.gmra.mxu0 %vm4218_vm4, %v6100_v37 }
 0x3bd   : > { %4039 = vst.msk [vmem:[#allocation2 + $0x6c] sm:$0xf] %vm4011_vm1, %v3943_v40 }
 0x3be   : > { %4542 = vperm.xlu1 %6268, %v4419_v39  }
 0x3c0   : > { %v3929_v42 = vpop.permute.xlu1 %3928 }
 0x3c1   : > { %4552 = vperm.xlu0 %6270, %v4421_v41   ;;  %4032 = vst.msk [vmem:[#allocation2 + $0x50] sm:$0xf] %vm4011_vm1, %v3929_v42 }
 0x3c2   : > { %4547 = vperm.xlu2 %6269, %v4420_v23  }
 0x3c3   : > { %v3927_v43 = vpop.permute.xlu0 %3926  ;;  %v6106_v8 = vld [vmem:[#allocation2 + $0x40] sm:$0xff] }
 0x3c4   : > { %4031 = vst.msk [vmem:[#allocation2 + $0x4c] sm:$0xf] %vm4011_vm1, %v3927_v43  ;;  %v3949_v46 = vpop.permute.xlu2 %3948  ;;  %5952 = vmatmul.msk.bf16.gmra.mxu1 %vm4218_vm4, %v6104_v44 }
 0x3c5   : > { %4042 = vst.msk [vmem:[#allocation2 + $0x78] sm:$0xf] %vm4011_vm1, %v3949_v46 }
 0x3c6   : > { %4557 = vperm.xlu1 %6268, %v4422_v45  }
 0x3c8   : > { %v3935_v48 = vpop.permute.xlu1 %3934  ;;  %v6108_v25 = vld [vmem:[#allocation2 + $0x50] sm:$0xff] }
 0x3c9   : > { %4567 = vperm.xlu0 %6270, %v4424_v15   ;;  %4035 = vst.msk [vmem:[#allocation2 + $0x5c] sm:$0xf] %vm4011_vm1, %v3935_v48 }
 0x3ca   : > { %4562 = vperm.xlu2 %6269, %v4423_v47  }
 0x3cb   : > { %v3933_v49 = vpop.permute.xlu0 %3932  ;;  %v6107_v20 = vld [vmem:[#allocation2 + $0x48] sm:$0xff] }
 0x3cc   : > { %4034 = vst.msk [vmem:[#allocation2 + $0x58] sm:$0xf] %vm4011_vm1, %v3933_v49  ;;  %v3955_v52 = vpop.permute.xlu2 %3954  ;;  %5949 = vmatmul.msk.bf16.gmra.mxu0 %vm4218_vm4, %v6101_v50 }
 0x3cd   : > { %4045 = vst.msk [vmem:[#allocation2 + $0x84] sm:$0xf] %vm4011_vm1, %v3955_v52 }
 0x3ce   : > { %4572 = vperm.xlu1 %6268, %v4425_v51  }
 0x3d0   : > { %v3941_v55 = vpop.permute.xlu1 %3940 }
 0x3d1   : > { %4582 = vperm.xlu0 %6270, %v4427_v53   ;;  %4038 = vst.msk [vmem:[#allocation2 + $0x68] sm:$0xf] %vm4011_vm1, %v3941_v55 }
 0x3d2   : > { %4577 = vperm.xlu2 %6269, %v4426_v54  }
 0x3d3   : > { %v3939_v56 = vpop.permute.xlu0 %3938  ;;  %v6109_v58 = vld [vmem:[#allocation2 + $0x58] sm:$0xff] }
 0x3d4   : > { %4037 = vst.msk [vmem:[#allocation2 + $0x64] sm:$0xf] %vm4011_vm1, %v3939_v56  ;;  %v3961_v60 = vpop.permute.xlu2 %3960  ;;  %5953 = vmatmul.msk.bf16.gmra.mxu1 %vm4218_vm4, %v6105_v57  ;;  %5957 = vmatmul.msk.bf16.vlgmr.msra.gmra.mxu2 %vm4218_vm4, %v6109_v58 }
 0x3d5   : > { %4048 = vst.msk [vmem:[#allocation2 + $0x90] sm:$0xf] %vm4011_vm1, %v3961_v60 }
 0x3d6   : > { %4587 = vperm.xlu1 %6268, %v4428_v59  }
 0x3d8   : > { %v3947_v38 = vpop.permute.xlu1 %3946  ;;  %v6111_v21 = vld [vmem:[#allocation2 + $0x68] sm:$0xff] }
 0x3d9   : > { %4597 = vperm.xlu0 %6270, %v4430_v61   ;;  %4041 = vst.msk [vmem:[#allocation2 + $0x74] sm:$0xf] %vm4011_vm1, %v3947_v38 }
 0x3da   : > { %4592 = vperm.xlu2 %6269, %v4429_v62  }
 0x3db   : > { %v3945_v0 = vpop.permute.xlu0 %3944  ;;  %v6110_v6 = vld [vmem:[#allocation2 + $0x60] sm:$0xff] }
 0x3dc   : > { %4040 = vst.msk [vmem:[#allocation2 + $0x70] sm:$0xf] %vm4011_vm1, %v3945_v0  ;;  %v3967_v2 = vpop.permute.xlu2 %3966  ;;  %5950 = vmatmul.msk.bf16.gmra.mxu0 %vm4218_vm4, %v6102_v63 }
 0x3dd   : > { %4051 = vst.msk [vmem:[#allocation2 + $0x9c] sm:$0xf] %vm4011_vm1, %v3967_v2 }
 0x3de   : > { %4602 = vperm.xlu1 %6268, %v4431_v1  }
 0x3e0   : > { %v3953_v5 = vpop.permute.xlu1 %3952 }
 0x3e1   : > { %4612 = vperm.xlu0 %6270, %v4433_v3   ;;  %4044 = vst.msk [vmem:[#allocation2 + $0x80] sm:$0xf] %vm4011_vm1, %v3953_v5 }
 0x3e2   : > { %4607 = vperm.xlu2 %6269, %v4432_v4  }
 0x3e3   : > { %v3951_v7 = vpop.permute.xlu0 %3950  ;;  %v6112_v26 = vld [vmem:[#allocation2 + $0x70] sm:$0xff] }
 0x3e4   : > { %4043 = vst.msk [vmem:[#allocation2 + $0x7c] sm:$0xf] %vm4011_vm1, %v3951_v7  ;;  %5954 = vmatmul.msk.bf16.gmra.mxu1 %vm4218_vm4, %v6106_v8  ;;  %5958 = vmatmul.msk.bf16.gmra.mxu2 %vm4218_vm4, %v6110_v6  ;;  %v4448_v35 = vpop.permute.xlu2 %4447 }
 0x3e6   : > { %4617 = vperm.xlu1 %6268, %v4434_v10  }
 0x3e8   : > { %v3959_v13 = vpop.permute.xlu1 %3958  ;;  %v6114_v40 = vld [vmem:[#allocation2 + $0x80] sm:$0xff] }
 0x3e9   : > { %4627 = vperm.xlu0 %6270, %v4436_v11   ;;  %4047 = vst.msk [vmem:[#allocation2 + $0x8c] sm:$0xf] %vm4011_vm1, %v3959_v13 }
 0x3ea   : > { %4622 = vperm.xlu2 %6269, %v4435_v12  }
 0x3eb   : > { %v3957_v14 = vpop.permute.xlu0 %3956  ;;  %v6113_v28 = vld [vmem:[#allocation2 + $0x78] sm:$0xff] }
 0x3ec   : > { %4046 = vst.msk [vmem:[#allocation2 + $0x88] sm:$0xf] %vm4011_vm1, %v3957_v14  ;;  %v4463_v58 = vpop.permute.xlu2 %4462 }
 0x3ee   : > { %4632 = vperm.xlu1 %6268, %v4437_v16  }
 0x3f0   : > { %v3965_v18 = vpop.permute.xlu1 %3964 }
 0x3f1   : > { %4642 = vperm.xlu0 %6270, %v4439_v9   ;;  %4050 = vst.msk [vmem:[#allocation2 + $0x98] sm:$0xf] %vm4011_vm1, %v3965_v18 }
 0x3f2   : > { %4637 = vperm.xlu2 %6269, %v4438_v17  }
 0x3f3   : > { %v3963_v19 = vpop.permute.xlu0 %3962  ;;  %v6115_v22 = vld [vmem:[#allocation2 + $0x88] sm:$0xff] }
 0x3f4   : > { %4049 = vst.msk [vmem:[#allocation2 + $0x94] sm:$0xf] %vm4011_vm1, %v3963_v19  ;;  %5955 = vmatmul.msk.bf16.gmra.mxu1 %vm4218_vm4, %v6107_v20  ;;  %5959 = vmatmul.msk.bf16.gmra.mxu2 %vm4218_vm4, %v6111_v21  ;;  %v4473_v63 = vpop.permute.xlu2 %4472 }
 0x3f5   : > { %5963 = vmatmul.msk.bf16.vlgmr.msra.gmra.mxu3 %vm4218_vm4, %v6115_v22 }
 0x3f8   : > { %v6117_v27 = vld [vmem:[#allocation2 + $0x98] sm:$0xff]  ;;  %v4443_v33 = vpop.permute.xlu1 %4442 }
 0x3fb   : > { %v3969_v24 = vpop.permute.xlu0 %3968  ;;  %v6116_v31 = vld [vmem:[#allocation2 + $0x90] sm:$0xff] }
 0x3fc   : > { %4053 = vst.msk [vmem:[#allocation2 + $0xa0] sm:$0x3] %vm4052_vm5, %v3969_v24  ;;  %v4488_v6 = vpop.permute.xlu2 %4487 }
 0x400   : > { %v4458_v49 = vpop.permute.xlu1 %4457 }
 0x403   : > { %v4094_v30 = vld [vmem:[#allocation2 + $0xa0] sm:$0x3]  ;;  %v4453_v44 = vpop.permute.xlu0 %4452 }
 0x404   : > { %5956 = vmatmul.msk.bf16.gmra.mxu1 %vm4218_vm4, %v6108_v25  ;;  %5960 = vmatmul.msk.bf16.gmra.mxu2 %vm4218_vm4, %v6112_v26  ;;  %v4181_v32 = vunpack.c.l.b16 %v4094_v30  ;;  %v4503_v26 = vpop.permute.xlu2 %4502 }
 0x405   : > { %5964 = vmatmul.msk.bf16.gmra.mxu3 %vm4218_vm4, %v6116_v31 }
 0x406   : > { %v4202_v37 = vpack.c.b16 %v4181_v32, %v4181_v32 }
 0x408   : > { %v4468_v61 = vpop.permute.xlu1 %4467 }
 0x40b   : > { %v4478_v0 = vpop.permute.xlu0 %4477 }
 0x410   : > { %v4483_v3 = vpop.permute.xlu1 %4482 }
 0x413   : > { %v4493_v4 = vpop.permute.xlu0 %4492 }
 0x414   : > { %5961 = vmatmul.msk.bf16.gmra.mxu2 %vm4218_vm4, %v6113_v28 }
 0x415   : > { %5965 = vmatmul.msk.bf16.gmra.mxu3 %vm4218_vm4, %v6117_v27 }
 0x418   : > { %v4498_v21 = vpop.permute.xlu1 %4497 }
 0x419   : > { %v4295_v29 = vpop.f32.mrf.mxu0 }
 0x41a   : > { %4830 = vst [vmem:[%s8259_s13] sm:$0xff] %v4295_v29  ;;  %v4645_v34 = vmul.f32 %v4443_v33, %v4295_v29 }
 0x41b   : > { %v4508_v22 = vpop.permute.xlu0 %4507 }
 0x41c   : > { %v4738_v41 = vmul.f32 %v4645_v34, %v4645_v34 }
 0x421   : > { %v4297_v36 = vpop.f32.mrf.mxu0 }
 0x422   : > { %v4646_v39 = vmul.f32 %v4448_v35, %v4297_v36  ;;  %4831 = vst [vmem:[%s8259_s13 + $0x8] sm:$0xff] %v4297_v36 }
 0x424   : > { %v4687_v23 = vadd.f32 %v4646_v39, %v4645_v34  ;;  %v4739_v42 = vmul.f32 %v4646_v39, %v4646_v39  ;;  %5962 = vmatmul.msk.bf16.gmra.mxu2 %vm4218_vm4, %v6114_v40 }
 0x425   : > { %5966 = vmatmul.msk.bf16.gmra.mxu3 %vm4218_vm4, %v4202_v37 }
 0x426   : > { %v4779_v43 = vadd.f32 %v4739_v42, %v4738_v41 }
 0x429   : > { %v4300_v45 = vpop.f32.mrf.mxu0 }
 0x42a   : > { %v4647_v46 = vmul.f32 %v4453_v44, %v4300_v45  ;;  %4832 = vst [vmem:[%s8259_s13 + $0x10] sm:$0xff] %v4300_v45 }
 0x42c   : > { %v4688_v15 = vadd.f32 %v4687_v23, %v4647_v46  ;;  %v4740_v47 = vmul.f32 %v4647_v46, %v4647_v46  ;;  %v4513_v46 = vpop.permute.xlu1 %4512 }
 0x42e   : > { %v4780_v48 = vadd.f32 %v4779_v43, %v4740_v47  ;;  %v4523_v47 = vpop.permute.xlu0 %4522 }
 0x431   : > { %v4302_v50 = vpop.f32.mrf.mxu0  ;;  %v4320_v51 = vpop.f32.mrf.mxu1 }
 0x432   : > { %v4648_v52 = vmul.f32 %v4458_v49, %v4302_v50  ;;  %4833 = vst [vmem:[%s8259_s13 + $0x18] sm:$0xff] %v4302_v50  ;;  %v4655_v34 = vmul.f32 %v4493_v4, %v4320_v51 }
 0x433   : > { %4840 = vst [vmem:[%s8259_s13 + $0x50] sm:$0xff] %v4320_v51  ;;  %v4518_v51 = vpop.permute.xlu2 %4517 }
 0x434   : > { %v4689_v53 = vadd.f32 %v4688_v15, %v4648_v52  ;;  %v4741_v54 = vmul.f32 %v4648_v52, %v4648_v52  ;;  %v4748_v42 = vmul.f32 %v4655_v34, %v4655_v34 }
 0x436   : > { %v4781_v55 = vadd.f32 %v4780_v48, %v4741_v54 }
 0x439   : > { %v4305_v56 = vpop.f32.mrf.mxu0  ;;  %v4322_v57 = vpop.f32.mrf.mxu1 }
 0x43a   : > { %4834 = vst [vmem:[%s8259_s13 + $0x20] sm:$0xff] %v4305_v56  ;;  %v4649_v5 = vmul.f32 %v4463_v58, %v4305_v56  ;;  %v4656_v39 = vmul.f32 %v4498_v21, %v4322_v57 }
 0x43b   : > { %4841 = vst [vmem:[%s8259_s13 + $0x58] sm:$0xff] %v4322_v57 }
 0x43c   : > { %v4742_v10 = vmul.f32 %v4649_v5, %v4649_v5  ;;  %v4690_v14 = vadd.f32 %v4689_v53, %v4649_v5  ;;  %v4749_v48 = vmul.f32 %v4656_v39, %v4656_v39 }
 0x43e   : > { %v4782_v17 = vadd.f32 %v4781_v55, %v4742_v10 }
 0x441   : > { %v4307_v59 = vpop.f32.mrf.mxu0  ;;  %v4325_v60 = vpop.f32.mrf.mxu1 }
 0x442   : > { %4835 = vst [vmem:[%s8259_s13 + $0x28] sm:$0xff] %v4307_v59  ;;  %v4650_v7 = vmul.f32 %v4468_v61, %v4307_v59  ;;  %v4657_v43 = vmul.f32 %v4503_v26, %v4325_v60  ;;  %v4528_v59 = vpop.permute.xlu1 %4527  ;;  %v4538_v61 = vpop.permute.xlu0 %4537 }
 0x443   : > { %4842 = vst [vmem:[%s8259_s13 + $0x60] sm:$0xff] %v4325_v60 }
 0x444   : > { %v4743_v16 = vmul.f32 %v4650_v7, %v4650_v7  ;;  %v4691_v18 = vadd.f32 %v4690_v14, %v4650_v7  ;;  %v4750_v53 = vmul.f32 %v4657_v43, %v4657_v43 }
 0x446   : > { %v4783_v24 = vadd.f32 %v4782_v17, %v4743_v16 }
 0x449   : > { %v4310_v62 = vpop.f32.mrf.mxu0  ;;  %v8272_v38 = vpop.f32.mrf.mxu1 }
 0x44a   : > { %4836 = vst [vmem:[%s8259_s13 + $0x30] sm:$0xff] %v4310_v62  ;;  %v4651_v11 = vmul.f32 %v4473_v63, %v4310_v62  ;;  %v4658_v57 = vmul.f32 %v4508_v22, %v8272_v38  ;;  %v4543_v16 = vpop.permute.xlu1 %4542 }
 0x44b   : > { %4843 = vst [vmem:[%s8259_s13 + $0x68] sm:$0xff] %v8272_v38 }
 0x44c   : > { %v4744_v19 = vmul.f32 %v4651_v11, %v4651_v11  ;;  %v4692_v31 = vadd.f32 %v4691_v18, %v4651_v11  ;;  %v4751_v62 = vmul.f32 %v4658_v57, %v4658_v57 }
 0x44e   : > { %v4784_v28 = vadd.f32 %v4783_v24, %v4744_v19 }
 0x451   : > { %v4312_v1 = vpop.f32.mrf.mxu0  ;;  %v8277_v2 = vpop.f32.mrf.mxu1 }
 0x452   : > { %4837 = vst [vmem:[%s8259_s13 + $0x38] sm:$0xff] %v4312_v1  ;;  %v4652_v9 = vmul.f32 %v4478_v0, %v4312_v1  ;;  %v4659_v0 = vmul.f32 %v4513_v46, %v8277_v2  ;;  %v4533_v1 = vpop.permute.xlu2 %4532 }
 0x453   : > { %4844 = vst [vmem:[%s8259_s13 + $0x70] sm:$0xff] %v8277_v2 }
 0x454   : > { %v4745_v25 = vmul.f32 %v4652_v9, %v4652_v9  ;;  %v4693_v29 = vadd.f32 %v4692_v31, %v4652_v9  ;;  %v4752_v4 = vmul.f32 %v4659_v0, %v4659_v0  ;;  %v4553_v9 = vpop.permute.xlu0 %4552 }
 0x456   : > { %v4785_v35 = vadd.f32 %v4784_v28, %v4745_v25 }
 0x457   : > { %v8282_v8 = vpop.f32.mrf.mxu2 }
 0x458   : > { %4852 = vst [vmem:[%s8259_s13 + $0xb0] sm:$0xff] %v8282_v8 }
 0x459   : > { %v4315_v12 = vpop.f32.mrf.mxu0  ;;  %v8286_v13 = vpop.f32.mrf.mxu1 }
 0x45a   : > { %4838 = vst [vmem:[%s8259_s13 + $0x40] sm:$0xff] %v4315_v12  ;;  %v4653_v20 = vmul.f32 %v4483_v3, %v4315_v12  ;;  %v4660_v38 = vmul.f32 %v4518_v51, %v8286_v13  ;;  %v4548_v17 = vpop.permute.xlu2 %4547 }
 0x45b   : > { %4845 = vst [vmem:[%s8259_s13 + $0x78] sm:$0xff] %v8286_v13 }
 0x45c   : > { %v4746_v30 = vmul.f32 %v4653_v20, %v4653_v20  ;;  %v4694_v36 = vadd.f32 %v4693_v29, %v4653_v20  ;;  %v4753_v11 = vmul.f32 %v4660_v38, %v4660_v38 }
 0x45e   : > { %v4786_v40 = vadd.f32 %v4785_v35, %v4746_v30 }
 0x45f   : > { %v8291_v27 = vpop.f32.mrf.mxu2 }
 0x460   : > { %4853 = vst [vmem:[%s8259_s13 + $0xb8] sm:$0xff] %v8291_v27 }
 0x461   : > { %v4317_v32 = vpop.f32.mrf.mxu0  ;;  %v4335_v33 = vpop.f32.mrf.mxu1 }
 0x462   : > { %v4654_v37 = vmul.f32 %v4488_v6, %v4317_v32  ;;  %4839 = vst [vmem:[%s8259_s13 + $0x48] sm:$0xff] %v4317_v32  ;;  %v4661_v12 = vmul.f32 %v4523_v47, %v4335_v33 }
 0x463   : > { %4846 = vst [vmem:[%s8259_s13 + $0x80] sm:$0xff] %v4335_v33  ;;  %v4558_v33 = vpop.permute.xlu1 %4557 }
 0x464   : > { %v4695_v41 = vadd.f32 %v4694_v36, %v4654_v37  ;;  %v4747_v23 = vmul.f32 %v4654_v37, %v4654_v37  ;;  %v4754_v19 = vmul.f32 %v4661_v12, %v4661_v12 }
 0x466   : > { %v4696_v44 = vadd.f32 %v4695_v41, %v4655_v34  ;;  %v4787_v45 = vadd.f32 %v4786_v40, %v4747_v23  ;;  %v4568_v34 = vpop.permute.xlu0 %4567 }
 0x467   : > { %v8297_v15 = vpop.f32.mrf.mxu2 }
 0x468   : > { %v4697_v49 = vadd.f32 %v4696_v44, %v4656_v39  ;;  %v4788_v50 = vadd.f32 %v4787_v45, %v4748_v42  ;;  %4854 = vst [vmem:[%s8259_s13 + $0xc0] sm:$0xff] %v8297_v15  ;;  %v4563_v39 = vpop.permute.xlu2 %4562  ;;  %v4667_v45 = vmul.f32 %v4553_v9, %v8282_v8 }
 0x469   : > { %v4337_v52 = vpop.f32.mrf.mxu1  ;;  %v4669_v8 = vmul.f32 %v4563_v39, %v8297_v15 }
 0x46a   : > { %v4698_v54 = vadd.f32 %v4697_v49, %v4657_v43  ;;  %v4789_v55 = vadd.f32 %v4788_v50, %v4749_v48  ;;  %4847 = vst [vmem:[%s8259_s13 + $0x88] sm:$0xff] %v4337_v52  ;;  %v4662_v20 = vmul.f32 %v4528_v59, %v4337_v52  ;;  %v4668_v49 = vmul.f32 %v4558_v33, %v8291_v27 }
 0x46c   : > { %v4790_v56 = vadd.f32 %v4789_v55, %v4750_v53  ;;  %v4699_v63 = vadd.f32 %v4698_v54, %v4658_v57  ;;  %v4755_v26 = vmul.f32 %v4662_v20, %v4662_v20  ;;  %v4760_v53 = vmul.f32 %v4667_v45, %v4667_v45 }
 0x46e   : > { %v4791_v3 = vadd.f32 %v4790_v56, %v4751_v62  ;;  %v4700_v5 = vadd.f32 %v4699_v63, %v4659_v0  ;;  %v4573_v56 = vpop.permute.xlu1 %4572  ;;  %v4583_v59 = vpop.permute.xlu0 %4582 }
 0x46f   : > { %v8303_v58 = vpop.f32.mrf.mxu2 }
 0x470   : > { %4855 = vst [vmem:[%s8259_s13 + $0xc8] sm:$0xff] %v8303_v58  ;;  %v4792_v7 = vadd.f32 %v4791_v3, %v4752_v4  ;;  %v4701_v14 = vadd.f32 %v4700_v5, %v4660_v38  ;;  %v4578_v27 = vpop.permute.xlu2 %4577  ;;  %v4670_v3 = vmul.f32 %v4568_v34, %v8303_v58 }
 0x471   : > { %v4340_v60 = vpop.f32.mrf.mxu1 }
 0x472   : > { %4848 = vst [vmem:[%s8259_s13 + $0x90] sm:$0xff] %v4340_v60  ;;  %v4793_v13 = vadd.f32 %v4792_v7, %v4753_v11  ;;  %v4702_v18 = vadd.f32 %v4701_v14, %v4661_v12  ;;  %v4663_v28 = vmul.f32 %v4533_v1, %v4340_v60  ;;  %v4761_v60 = vmul.f32 %v4668_v49, %v4668_v49 }
 0x473   : > { %v4762_v1 = vmul.f32 %v4669_v8, %v4669_v8  ;;  %v4763_v7 = vmul.f32 %v4670_v3, %v4670_v3 }
 0x474   : > { %v4794_v22 = vadd.f32 %v4793_v13, %v4754_v19  ;;  %v4703_v25 = vadd.f32 %v4702_v18, %v4662_v20  ;;  %v4756_v36 = vmul.f32 %v4663_v28, %v4663_v28 }
 0x476   : > { %v4795_v30 = vadd.f32 %v4794_v22, %v4755_v26  ;;  %v4704_v35 = vadd.f32 %v4703_v25, %v4663_v28  ;;  %v4588_v12 = vpop.permute.xlu1 %4587  ;;  %v4598_v14 = vpop.permute.xlu0 %4597 }
 0x477   : > { %v8310_v6 = vpop.f32.mrf.mxu2 }
 0x478   : > { %4856 = vst [vmem:[%s8259_s13 + $0xd0] sm:$0xff] %v8310_v6  ;;  %v8314_v10 = vpop.f32.mrf.mxu3  ;;  %v4796_v41 = vadd.f32 %v4795_v30, %v4756_v36  ;;  %v4671_v15 = vmul.f32 %v4573_v56, %v8310_v6  ;;  %v4593_v9 = vpop.permute.xlu2 %4592 }
 0x479   : > { %4864 = vst [vmem:[%s8259_s13 + $0x110] sm:$0xff] %v8314_v10  ;;  %v4342_v2 = vpop.f32.mrf.mxu1 }
 0x47a   : > { %4849 = vst [vmem:[%s8259_s13 + $0x98] sm:$0xff] %v4342_v2  ;;  %v4664_v29 = vmul.f32 %v4538_v61, %v4342_v2  ;;  %v4764_v13 = vmul.f32 %v4671_v15, %v4671_v15 }
 0x47c   : > { %v4757_v37 = vmul.f32 %v4664_v29, %v4664_v29  ;;  %v4705_v23 = vadd.f32 %v4704_v35, %v4664_v29 }
 0x47e   : > { %v4797_v46 = vadd.f32 %v4796_v41, %v4757_v37  ;;  %v4603_v26 = vpop.permute.xlu1 %4602  ;;  %v4613_v28 = vpop.permute.xlu0 %4612 }
 0x47f   : > { %v8319_v21 = vpop.f32.mrf.mxu2 }
 0x480   : > { %4857 = vst [vmem:[%s8259_s13 + $0xd8] sm:$0xff] %v8319_v21  ;;  %v8323_v24 = vpop.f32.mrf.mxu3  ;;  %v4672_v58 = vmul.f32 %v4578_v27, %v8319_v21  ;;  %v4608_v33 = vpop.permute.xlu2 %4607 }
 0x481   : > { %4865 = vst [vmem:[%s8259_s13 + $0x118] sm:$0xff] %v8323_v24  ;;  %v4345_v31 = vpop.f32.mrf.mxu1 }
 0x482   : > { %4850 = vst [vmem:[%s8259_s13 + $0xa0] sm:$0xff] %v4345_v31  ;;  %v4665_v32 = vmul.f32 %v4543_v16, %v4345_v31  ;;  %v4765_v20 = vmul.f32 %v4672_v58, %v4672_v58 }
 0x484   : > { %v4758_v42 = vmul.f32 %v4665_v32, %v4665_v32  ;;  %v4706_v47 = vadd.f32 %v4705_v23, %v4665_v32 }
 0x486   : > { %v4798_v50 = vadd.f32 %v4797_v46, %v4758_v42  ;;  %v4618_v46 = vpop.permute.xlu1 %4617 }
 0x487   : > { %v4365_v40 = vpop.f32.mrf.mxu2 }
 0x488   : > { %4858 = vst [vmem:[%s8259_s13 + $0xe0] sm:$0xff] %v4365_v40  ;;  %v8329_v43 = vpop.f32.mrf.mxu3  ;;  %v4673_v6 = vmul.f32 %v4583_v59, %v4365_v40  ;;  %v4680_v59 = vmul.f32 %v4618_v46, %v8323_v24 }
 0x489   : > { %4866 = vst [vmem:[%s8259_s13 + $0x120] sm:$0xff] %v8329_v43  ;;  %v4347_v44 = vpop.f32.mrf.mxu1 }
 0x48a   : > { %v4666_v48 = vmul.f32 %v4548_v17, %v4347_v44  ;;  %4851 = vst [vmem:[%s8259_s13 + $0xa8] sm:$0xff] %v4347_v44  ;;  %v4766_v29 = vmul.f32 %v4673_v6, %v4673_v6 }
 0x48c   : > { %v4707_v51 = vadd.f32 %v4706_v47, %v4666_v48  ;;  %v4759_v52 = vmul.f32 %v4666_v48, %v4666_v48  ;;  %v4628_v47 = vpop.permute.xlu0 %4627 }
 0x48e   : > { %v4708_v54 = vadd.f32 %v4707_v51, %v4667_v45  ;;  %v4799_v55 = vadd.f32 %v4798_v50, %v4759_v52  ;;  %v4623_v51 = vpop.permute.xlu2 %4622 }
 0x48f   : > { %v4367_v57 = vpop.f32.mrf.mxu2  ;;  %v4681_v27 = vmul.f32 %v4623_v51, %v8329_v43 }
 0x490   : > { %v4709_v61 = vadd.f32 %v4708_v54, %v4668_v49  ;;  %v4800_v62 = vadd.f32 %v4799_v55, %v4760_v53  ;;  %4859 = vst [vmem:[%s8259_s13 + $0xe8] sm:$0xff] %v4367_v57  ;;  %v8338_v0 = vpop.f32.mrf.mxu3  ;;  %v4674_v30 = vmul.f32 %v4588_v12, %v4367_v57  ;;  %v4679_v53 = vmul.f32 %v4613_v28, %v8314_v10 }
 0x491   : > { %4867 = vst [vmem:[%s8259_s13 + $0x128] sm:$0xff] %v8338_v0 }
 0x492   : > { %v4801_v63 = vadd.f32 %v4800_v62, %v4761_v60  ;;  %v4710_v4 = vadd.f32 %v4709_v61, %v4669_v8  ;;  %v4767_v36 = vmul.f32 %v4674_v30, %v4674_v30  ;;  %v4772_v62 = vmul.f32 %v4679_v53, %v4679_v53 }
 0x494   : > { %v4802_v38 = vadd.f32 %v4801_v63, %v4762_v1  ;;  %v4711_v2 = vadd.f32 %v4710_v4, %v4670_v3  ;;  %v4773_v3 = vmul.f32 %v4680_v59, %v4680_v59  ;;  %v4682_v4 = vmul.f32 %v4628_v47, %v8338_v0 }
 0x496   : > { %v4803_v16 = vadd.f32 %v4802_v38, %v4763_v7  ;;  %v4712_v17 = vadd.f32 %v4711_v2, %v4671_v15  ;;  %v4643_v7 = vpop.permute.xlu0 %4642  ;;  %v4774_v15 = vmul.f32 %v4681_v27, %v4681_v27 }
 0x497   : > { %v4370_v5 = vpop.f32.mrf.mxu2 }
 0x498   : > { %4860 = vst [vmem:[%s8259_s13 + $0xf0] sm:$0xff] %v4370_v5  ;;  %v8345_v11 = vpop.f32.mrf.mxu3  ;;  %v4804_v18 = vadd.f32 %v4803_v16, %v4764_v13  ;;  %v4713_v22 = vadd.f32 %v4712_v17, %v4672_v58  ;;  %v4675_v37 = vmul.f32 %v4593_v9, %v4370_v5  ;;  %v4633_v5 = vpop.permute.xlu1 %4632  ;;  %v4775_v9 = vmul.f32 %v4682_v4, %v4682_v4 }
 0x499   : > { %4868 = vst [vmem:[%s8259_s13 + $0x130] sm:$0xff] %v8345_v11  ;;  %v4683_v2 = vmul.f32 %v4633_v5, %v8345_v11 }
 0x49a   : > { %v4805_v25 = vadd.f32 %v4804_v18, %v4765_v20  ;;  %v4714_v32 = vadd.f32 %v4713_v22, %v4673_v6  ;;  %v4768_v44 = vmul.f32 %v4675_v37, %v4675_v37 }
 0x49b   : > { %v4776_v17 = vmul.f32 %v4683_v2, %v4683_v2 }
 0x49c   : > { %v4806_v34 = vadd.f32 %v4805_v25, %v4766_v29  ;;  %v4715_v35 = vadd.f32 %v4714_v32, %v4674_v30 }
 0x49e   : > { %v4807_v41 = vadd.f32 %v4806_v34, %v4767_v36  ;;  %v4716_v42 = vadd.f32 %v4715_v35, %v4675_v37 }
 0x49f   : > { %v4372_v19 = vpop.f32.mrf.mxu2 }
 0x4a0   : > { %4861 = vst [vmem:[%s8259_s13 + $0xf8] sm:$0xff] %v4372_v19  ;;  %v4392_v31 = vpop.f32.mrf.mxu3  ;;  %v4676_v39 = vmul.f32 %v4598_v14, %v4372_v19  ;;  %v4808_v48 = vadd.f32 %v4807_v41, %v4768_v44  ;;  %v4638_v14 = vpop.permute.xlu2 %4637 }
 0x4a1   : > { %4869 = vst [vmem:[%s8259_s13 + $0x138] sm:$0xff] %v4392_v31  ;;  %v4684_v13 = vmul.f32 %v4638_v14, %v4392_v31 }
 0x4a2   : > { %v4769_v45 = vmul.f32 %v4676_v39, %v4676_v39  ;;  %v4717_v49 = vadd.f32 %v4716_v42, %v4676_v39  ;;  %v4686_v39 = vld [vmem:[#allocation4] sm:$0x1] }
 0x4a3   : > { %v4777_v20 = vmul.f32 %v4684_v13, %v4684_v13 }
 0x4a4   : > { %v4809_v54 = vadd.f32 %v4808_v48, %v4769_v45 }
 0x4a7   : > { %v4375_v21 = vpop.f32.mrf.mxu2 }
 0x4a8   : > { %4862 = vst [vmem:[%s8259_s13 + $0x100] sm:$0xff] %v4375_v21  ;;  %v4395_v40 = vpop.f32.mrf.mxu3  ;;  %v4677_v23 = vmul.f32 %v4603_v26, %v4375_v21 }
 0x4a9   : > { %4870 = vst [vmem:[%s8259_s13 + $0x140] sm:$0xf] %v4395_v40  ;;  %v4685_v16 = vmul.f32 %v4643_v7, %v4395_v40 }
 0x4aa   : > { %v4770_v50 = vmul.f32 %v4677_v23, %v4677_v23  ;;  %v4718_v55 = vadd.f32 %v4717_v49, %v4677_v23  ;;  %v4737_v23 = vld [vmem:[#allocation5] sm:$0x1] }
 0x4ab   : > { %v4778_v0 = vmul.f32 %v4685_v16, %v4685_v16  ;;  %v4727_v25 = vsel %vm4726_vm6, %v4685_v16, 0.0 }
 0x4ac   : > { %v4810_v60 = vadd.f32 %v4809_v54, %v4770_v50 }
 0x4ad   : > { %v4818_v11 = vsel %vm4726_vm6, %v4778_v0, 0.0 }
 0x4af   : > { %v4377_v52 = vpop.f32.mrf.mxu2 }
 0x4b0   : > { %v4678_v56 = vmul.f32 %v4608_v33, %v4377_v52  ;;  %4863 = vst [vmem:[%s8259_s13 + $0x108] sm:$0xff] %v4377_v52  ;;  %v4397_v57 = vpop.f32.mrf.mxu3 }
 0x4b2   : > { %v4719_v8 = vadd.f32 %v4718_v55, %v4678_v56  ;;  %v4771_v61 = vmul.f32 %v4678_v56, %v4678_v56 }
 0x4b4   : > { %v4720_v63 = vadd.f32 %v4719_v8, %v4679_v53  ;;  %v4811_v1 = vadd.f32 %v4810_v60, %v4771_v61 }
 0x4b6   : > { %v4721_v38 = vadd.f32 %v4720_v63, %v4680_v59  ;;  %v4812_v10 = vadd.f32 %v4811_v1, %v4772_v62 }
 0x4b8   : > { %v4722_v12 = vadd.f32 %v4721_v38, %v4681_v27  ;;  %v4813_v24 = vadd.f32 %v4812_v10, %v4773_v3 }
 0x4ba   : > { %v4723_v58 = vadd.f32 %v4722_v12, %v4682_v4  ;;  %v4814_v43 = vadd.f32 %v4813_v24, %v4774_v15 }
 0x4bc   : > { %v4724_v18 = vadd.f32 %v4723_v58, %v4683_v2  ;;  %v4815_v19 = vadd.f32 %v4814_v43, %v4775_v9 }
 0x4be   : > { %v4725_v6 = vadd.f32 %v4724_v18, %v4684_v13  ;;  %v4816_v22 = vadd.f32 %v4815_v19, %v4776_v17 }
 0x4c0   : > { %v4728_v26 = vadd.f32 %v4727_v25, %v4725_v6  ;;  %v4817_v28 = vadd.f32 %v4816_v22, %v4777_v20 }
 0x4c2   : > { %v4729_v29 = vrot.slane %v4728_v26, 4  ;;  %v4819_v30 = vadd.f32 %v4818_v11, %v4817_v28 }
 0x4c4   : > { %v4730_v32 = vadd.f32 %v4729_v29, %v4728_v26  ;;  %v4820_v33 = vrot.slane %v4819_v30, 4 }
 0x4c6   : > { %v4731_v34 = vrot.slane %v4730_v32, 2  ;;  %v4821_v31 = vadd.f32 %v4820_v33, %v4819_v30 }
 0x4c8   : > { %v4732_v21 = vadd.f32 %v4731_v34, %v4730_v32  ;;  %v4822_v35 = vrot.slane %v4821_v31, 2 }
 0x4ca   : > { %v4733_v36 = vrot.slane %v4732_v21, 1  ;;  %v4823_v37 = vadd.f32 %v4822_v35, %v4821_v31 }
 0x4cc   : > { %v4734_v40 = vadd.f32 %v4733_v36, %v4732_v21  ;;  %v4824_v41 = vrot.slane %v4823_v37, 1 }
 0x4ce   : > { %v4735_v42 = vadd.f32 %v4734_v40, %v4686_v39  ;;  %v4825_v44 = vadd.f32 %v4824_v41, %v4823_v37  ;;  %4874 = sbr.rel (%p5967_p5) target bundleno = 1641 (0x669), region = 52 }
 0x4d0   : > { %4736 = vst [vmem:[#allocation4] sm:$0x1] %v4735_v42  ;;  %v4826_v45 = vadd.f32 %v4825_v44, %v4737_v23 }
 0x4d2   : > { %4827 = vst [vmem:[#allocation5] sm:$0x1] %v4826_v45 }
 0x4d3   : > { %v4882_v60 = vld [vmem:[%s8896_s2] sm:$0x1]  ;;  %v4944_v63 = vld [vmem:[#allocation3 + $0x70] sm:$0xff]  ;;  %v4970_v3 = vld [vmem:[#allocation3 + $0x140] sm:$0xf]  ;;  %vm5241_vm10 = vcmask 556032  }
 0x4d4   : > { %v4895_v27 = vld [vmem:[%s8897_s3] sm:$0x1]  ;;  %v4942_v4 = vld [vmem:[#allocation3 + $0x60] sm:$0xff]  ;;  %v4943_v38 = vld [vmem:[#allocation3 + $0x68] sm:$0xff] }
 0x4d5   : > { %v4945_v1 = vld [vmem:[#allocation3 + $0x78] sm:$0xff]  ;;  %v4968_v7 = vld [vmem:[#allocation3 + $0x130] sm:$0xff]  ;;  %v4966_v24 = vld [vmem:[#allocation3 + $0x120] sm:$0xff] }
 0x4d6   : > { %v4969_v15 = vld [vmem:[#allocation3 + $0x138] sm:$0xff]  ;;  %v4940_v2 = vld [vmem:[#allocation3 + $0x50] sm:$0xff]  ;;  %v4967_v14 = vld [vmem:[#allocation3 + $0x128] sm:$0xff] }
 0x4d7   : > { %v4875_v46 = vld [vmem:[#allocation4] sm:$0x1]  ;;  %v4941_v12 = vld [vmem:[#allocation3 + $0x58] sm:$0xff]  ;;  %v4938_v43 = vld [vmem:[#allocation3 + $0x40] sm:$0xff] }
 0x4d8   : > { %v4876_v48 = vmul.f32 0.001953125, %v4875_v46  ;;  %v4939_v17 = vld [vmem:[#allocation3 + $0x48] sm:$0xff]  ;;  %v4964_v18 = vld [vmem:[#allocation3 + $0x110] sm:$0xff] }
 0x4d9   : > { %v4877_v47 = vld [vmem:[#allocation5] sm:$0x1] }
 0x4da   : > { %v4878_v49 = vmul.f32 0.001953125, %v4877_v47  ;;  %v4879_v50 = vmul.f32 %v4876_v48, %v4876_v48 }
 0x4dc   : > { %v4880_v51 = vsub.f32 %v4878_v49, %v4879_v50 }
 0x4de   : > { %v4881_v52 = vmax.f32 %v4880_v51, 0.0  ;;  %v4965_v51 = vld [vmem:[#allocation3 + $0x118] sm:$0xff] }
 0x4e0   : > { %v4883_v53 = vadd.f32 1e-05, %v4881_v52 }
 0x4e2   : > { %6271 = vrsqrt.f32 %v4883_v53  ;;  %vm4890_vm7 = vweird.f32 %v4883_v53 }
 0x4e8   : > { %v6272_v54 = vpop.eup %6271 }
 0x4e9   : > { %v4885_v55 = vmul.f32 %v6272_v54, %v4883_v53  ;;  %vm4891_vm8 = vweird.f32 %v6272_v54 }
 0x4ea   : > { %vm4892_vm9 = vmor %vm4890_vm7, %vm4891_vm8 }
 0x4eb   : > { %v4886_v56 = vmul.f32 %v6272_v54, %v4885_v55 }
 0x4ed   : > { %v4887_v57 = vmul.f32 0.5, %v4886_v56  ;;  %v4936_v56 = vld [vmem:[#allocation3 + $0x30] sm:$0xff] }
 0x4ef   : > { %v4888_v59 = vsub.f32 1.5, %v4887_v57  ;;  %v4937_v57 = vld [vmem:[#allocation3 + $0x38] sm:$0xff] }
 0x4f1   : > { %v4889_v8 = vmul.f32 %v6272_v54, %v4888_v59 }
 0x4f3   : > { %v4893_v61 = vsel %vm4892_vm9, %v6272_v54, %v4889_v8 }
 0x4f4   : > { %v4894_v62 = vmul.f32 %v4893_v61, %v4882_v60 }
 0x4f6   : > { %v4896_v10 = vmul.f32 %v4894_v62, %v4876_v48  ;;  %v8367_v5 = vperm.slane %v4894_v62, 0  ;;  %v4962_v62 = vld [vmem:[#allocation3 + $0x100] sm:$0xff] }
 0x4f8   : > { %v4897_v16 = vsub.f32 %v4895_v27, %v4896_v10  ;;  %v4988_v9 = vmul.f32 %v8367_v5, %v4944_v63  ;;  %v4989_v13 = vmul.f32 %v8367_v5, %v4945_v1  ;;  %v5014_v58 = vmul.f32 %v8367_v5, %v4970_v3 }
 0x4f9   : > { %v4986_v19 = vmul.f32 %v8367_v5, %v4942_v4  ;;  %v4987_v0 = vmul.f32 %v8367_v5, %v4943_v38  ;;  %v5012_v20 = vmul.f32 %v8367_v5, %v4968_v7  ;;  %v5013_v6 = vmul.f32 %v8367_v5, %v4969_v15  ;;  %v4963_v15 = vld [vmem:[#allocation3 + $0x108] sm:$0xff] }
 0x4fa   : > { %v8376_v22 = vperm.slane %v4897_v16, 0  ;;  %v4984_v25 = vmul.f32 %v8367_v5, %v4940_v2  ;;  %v4985_v26 = vmul.f32 %v8367_v5, %v4941_v12  ;;  %v5010_v28 = vmul.f32 %v8367_v5, %v4966_v24  ;;  %v4934_v2 = vld [vmem:[#allocation3 + $0x20] sm:$0xff]  ;;  %v4935_v16 = vld [vmem:[#allocation3 + $0x28] sm:$0xff] }
 0x4fb   : > { %v5011_v11 = vmul.f32 %v8367_v5, %v4967_v14  ;;  %v4982_v29 = vmul.f32 %v8367_v5, %v4938_v43  ;;  %v4983_v30 = vmul.f32 %v8367_v5, %v4939_v17  ;;  %v5008_v32 = vmul.f32 %v8367_v5, %v4964_v18 }
 0x4fc   : > { %v5032_v33 = vadd.f32 %v8376_v22, %v4988_v9  ;;  %v5033_v34 = vadd.f32 %v8376_v22, %v4989_v13  ;;  %v5058_v31 = vadd.f32 %v8376_v22, %v5014_v58  ;;  %v5030_v21 = vadd.f32 %v8376_v22, %v4986_v19  ;;  %v5479_v9 = vld [vmem:[#allocation3 + $0x238] sm:$0xff] }
 0x4fd   : > { %v5031_v35 = vadd.f32 %v8376_v22, %v4987_v0  ;;  %v5056_v36 = vadd.f32 %v8376_v22, %v5012_v20  ;;  %v5057_v37 = vadd.f32 %v8376_v22, %v5013_v6  ;;  %v5028_v39 = vadd.f32 %v8376_v22, %v4984_v25  ;;  %v5480_v6 = vld [vmem:[#allocation3 + $0x240] sm:$0xff] }
 0x4fe   : > { %v5073_v40 = vmax.f32 %v5032_v33, 0.0  ;;  %v5074_v41 = vmax.f32 %v5033_v34, 0.0  ;;  %v5099_v23 = vmax.f32 %v5058_v31, 0.0  ;;  %v5071_v42 = vmax.f32 %v5030_v21, 0.0  ;;  %v4933_v34 = vld [vmem:[#allocation3 + $0x18] sm:$0xff]  ;;  %v4930_v31 = vld [vmem:[#allocation3] sm:$0xff] }
 0x4ff   : > { %v5072_v44 = vmax.f32 %v5031_v35, 0.0  ;;  %v5097_v45 = vmax.f32 %v5056_v36, 0.0  ;;  %v5098_v46 = vmax.f32 %v5057_v37, 0.0  ;;  %v5029_v47 = vadd.f32 %v8376_v22, %v4985_v26 }
 0x500   : > { %v5107_v48 = vpack.c.bf16 %v5074_v41, %v5073_v40  ;;  %v5120_v49 = vpack.c.bf16 %v5099_v23, %v5099_v23  ;;  %v5054_v50 = vadd.f32 %v8376_v22, %v5010_v28  ;;  %v5069_v53 = vmax.f32 %v5028_v39, 0.0  ;;  %v4931_v39 = vld [vmem:[#allocation3 + $0x8] sm:$0xff] }
 0x501   : > { %v5106_v52 = vpack.c.bf16 %v5072_v44, %v5071_v42  ;;  %v5070_v54 = vmax.f32 %v5029_v47, 0.0  ;;  %v5055_v55 = vadd.f32 %v8376_v22, %v5011_v11  ;;  %v5026_v8 = vadd.f32 %v8376_v22, %v4982_v29  ;;  %v4932_v11 = vld [vmem:[#allocation3 + $0x10] sm:$0xff] }
 0x502   : > { %6236 = vmatpush.bf16.msra.mxu1 %v5107_v48  ;;  %v5267_v59 = vsel %vm2391_vm2, %v5120_v49, 0  ;;  %5269 = vmatpush.bf16.msra.mxu0 %v5107_v48  ;;  %v5095_v60 = vmax.f32 %v5054_v50, 0.0  ;;  %v5027_v61 = vadd.f32 %v8376_v22, %v4983_v30  ;;  %v5119_v27 = vpack.c.bf16 %v5098_v46, %v5097_v45  ;;  %v5477_v48 = vld [vmem:[#allocation3 + $0x228] sm:$0xff]  ;;  %v5478_v49 = vld [vmem:[#allocation3 + $0x230] sm:$0xff] }
 0x503   : > { %5370 = vmatpush.bf16.msra.mxu2 %v5267_v59  ;;  %v5096_v63 = vmax.f32 %v5055_v55, 0.0  ;;  %v5009_v1 = vmul.f32 %v8367_v5, %v4965_v51  ;;  %v5052_v3 = vadd.f32 %v8376_v22, %v5008_v32  ;;  %6244 = vmatpush.bf16.msra.mxu3 %v5267_v59  ;;  %v5067_v4 = vmax.f32 %v5026_v8, 0.0  ;;  %v5978_v51 = vld [vmem:[%s8899_s5 + $0x8] sm:$0xf]  ;;  %v6018_v8 = vld [vmem:[%s8899_s5 + $0x60] sm:$0xf] }
 0x504   : > { %v5068_v38 = vmax.f32 %v5027_v61, 0.0  ;;  %v4980_v10 = vmul.f32 %v8367_v5, %v4936_v56  ;;  %v4981_v7 = vmul.f32 %v8367_v5, %v4937_v57  ;;  %v5105_v12 = vpack.c.bf16 %v5070_v54, %v5069_v53  ;;  %v6133_v61 = vld [vmem:[%s8899_s5 + $0x68] sm:$0xf0] }
 0x505   : > { %v5053_v24 = vadd.f32 %v8376_v22, %v5009_v1  ;;  %v5006_v14 = vmul.f32 %v8367_v5, %v4962_v62  ;;  %v5118_v13 = vpack.c.bf16 %v5096_v63, %v5095_v60  ;;  %v5093_v58 = vmax.f32 %v5052_v3, 0.0  ;;  %v5970_v1 = vld [vmem:[%s8899_s5] sm:$0xf]  ;;  %v6121_v3 = vld [vmem:[%s8899_s5 + $0x8] sm:$0xf0] }
 0x506   : > { %6237 = vmatpush.bf16.msra.mxu1 %v5106_v52  ;;  %5270 = vmatpush.bf16.msra.mxu0 %v5106_v52  ;;  %v5024_v43 = vadd.f32 %v8376_v22, %v4980_v10  ;;  %v5025_v17 = vadd.f32 %v8376_v22, %v4981_v7  ;;  %v5007_v19 = vmul.f32 %v8367_v5, %v4963_v15  ;;  %v6122_v52 = vld [vmem:[%s8899_s5 + $0x10] sm:$0xf0]  ;;  %v5476_v15 = vld [vmem:[#allocation3 + $0x220] sm:$0xff] }
 0x507   : > { %5371 = vmatpush.bf16.msra.mxu2 %v5119_v27  ;;  %v5094_v18 = vmax.f32 %v5053_v24, 0.0  ;;  %v5050_v0 = vadd.f32 %v8376_v22, %v5006_v14  ;;  %v4978_v20 = vmul.f32 %v8367_v5, %v4934_v2  ;;  %6245 = vmatpush.bf16.msra.mxu3 %v5119_v27  ;;  %v5104_v25 = vpack.c.bf16 %v5068_v38, %v5067_v4  ;;  %v5475_v4 = vld [vmem:[#allocation3 + $0x218] sm:$0xff]  ;;  %v4960_v2 = vld [vmem:[#allocation3 + $0xf0] sm:$0xff] }
 0x508   : > { %v4979_v26 = vmul.f32 %v8367_v5, %v4935_v16  ;;  %v5520_v28 = vmul.f32 %v5479_v9, %v8367_v5  ;;  %v5065_v29 = vmax.f32 %v5024_v43, 0.0  ;;  %v5066_v30 = vmax.f32 %v5025_v17, 0.0 }
 0x509   : > { %v5051_v32 = vadd.f32 %v8376_v22, %v5007_v19  ;;  %v5022_v33 = vadd.f32 %v8376_v22, %v4978_v20  ;;  %v5117_v21 = vpack.c.bf16 %v5094_v18, %v5093_v58  ;;  %v5091_v35 = vmax.f32 %v5050_v0, 0.0  ;;  %v6137_v58 = vld [vmem:[%s8899_s5 + $0x88] sm:$0xf0] }
 0x50a   : > { %6238 = vmatpush.bf16.msra.mxu1 %v5105_v12  ;;  %5271 = vmatpush.bf16.msra.mxu0 %v5105_v12  ;;  %v5023_v36 = vadd.f32 %v8376_v22, %v4979_v26  ;;  %v5521_v37 = vmul.f32 %v5480_v6, %v8367_v5  ;;  %v5561_v23 = vadd.f32 %v5520_v28, %v8376_v22  ;;  %v4961_v12 = vld [vmem:[#allocation3 + $0xf8] sm:$0xff]  ;;  %v5489_v0 = vld [vmem:[#allocation3 + $0x288] sm:$0xf]  ;;  %v4958_v28 = vld [vmem:[#allocation3 + $0xe0] sm:$0xff] }
 0x50b   : > { %5372 = vmatpush.bf16.msra.mxu2 %v5118_v13  ;;  %v5092_v40 = vmax.f32 %v5051_v32, 0.0  ;;  %v5063_v41 = vmax.f32 %v5022_v33, 0.0  ;;  %v4976_v42 = vmul.f32 %v8367_v5, %v4932_v11  ;;  %6246 = vmatpush.bf16.msra.mxu3 %v5118_v13  ;;  %v4977_v46 = vmul.f32 %v8367_v5, %v4933_v34  ;;  %v6038_v13 = vld [vmem:[%s8899_s5 + $0x80] sm:$0xf]  ;;  %v4959_v33 = vld [vmem:[#allocation3 + $0xe8] sm:$0xff] }
 0x50c   : > { %v5064_v44 = vmax.f32 %v5023_v36, 0.0  ;;  %v5562_v45 = vadd.f32 %v5521_v37, %v8376_v22  ;;  %v4974_v47 = vmul.f32 %v8367_v5, %v4930_v31  ;;  %v5103_v50 = vpack.c.bf16 %v5066_v30, %v5065_v29  ;;  %v5473_v34 = vld [vmem:[#allocation3 + $0x208] sm:$0xff]  ;;  %v5474_v37 = vld [vmem:[#allocation3 + $0x210] sm:$0xff] }
 0x50d   : > { %v5602_v53 = vmax.f32 %v5561_v23, 0.0  ;;  %v5020_v54 = vadd.f32 %v8376_v22, %v4976_v42  ;;  %v4975_v55 = vmul.f32 %v8367_v5, %v4931_v39  ;;  %v5116_v56 = vpack.c.bf16 %v5092_v40, %v5091_v35  ;;  %v5990_v42 = vld [vmem:[%s8899_s5 + $0x20] sm:$0xf] }
 0x50e   : > { %6239 = vmatpush.bf16.msra.mxu1 %v5104_v25  ;;  %5272 = vmatpush.bf16.msra.mxu0 %v5104_v25  ;;  %v5603_v57 = vmax.f32 %v5562_v45, 0.0  ;;  %v5021_v59 = vadd.f32 %v8376_v22, %v4977_v46  ;;  %v8431_v60 = vadd.f32 %v8376_v22, %v4974_v47  ;;  %v5518_v27 = vmul.f32 %v5477_v48, %v8367_v5 }
 0x50f   : > { %5373 = vmatpush.bf16.msra.mxu2 %v5117_v21  ;;  %v8440_v62 = vadd.f32 %v8376_v22, %v4975_v55  ;;  %v5519_v63 = vmul.f32 %v5478_v49, %v8367_v5  ;;  %6247 = vmatpush.bf16.msra.mxu3 %v5117_v21  ;;  %v5102_v38 = vpack.c.bf16 %v5064_v44, %v5063_v41  ;;  %v5061_v24 = vmax.f32 %v5020_v54, 0.0  ;;  %v6125_v44 = vld [vmem:[%s8899_s5 + $0x28] sm:$0xf0] }
 0x510   : > { %v8450_v10 = vor.u32 %v6122_v52, %v5978_v51  ;;  %v5628_v7 = vpack.c.bf16 %v5603_v57, %v5602_v53  ;;  %v5062_v14 = vmax.f32 %v5021_v59, 0.0  ;;  %v5559_v16 = vadd.f32 %v5518_v27, %v8376_v22  ;;  %v5463_v57 = vld [vmem:[#allocation3 + $0x1b8] sm:$0xff]  ;;  %v5464_v59 = vld [vmem:[#allocation3 + $0x1c0] sm:$0xff] }
 0x511   : > { %v5560_v9 = vadd.f32 %v5519_v63, %v8376_v22  ;;  %v5059_v43 = vmax.f32 %v8431_v60, 0.0  ;;  %v5060_v17 = vmax.f32 %v8440_v62, 0.0  ;;  %v8462_v18 = vor.u32 %v6133_v61, %v6018_v8  ;;  %v5487_v60 = vld [vmem:[#allocation3 + $0x278] sm:$0xff]  ;;  %v5488_v63 = vld [vmem:[#allocation3 + $0x280] sm:$0xff] }
 0x512   : > { %6240 = vmatpush.bf16.msra.mxu1 %v5103_v50  ;;  %5273 = vmatpush.bf16.msra.mxu0 %v5103_v50  ;;  %v5516_v19 = vmul.f32 %v5475_v4, %v8367_v5  ;;  %v5600_v20 = vmax.f32 %v5559_v16, 0.0  ;;  %v8465_v25 = vor.u32 %v6121_v3, %v5970_v1  ;;  %v5517_v26 = vmul.f32 %v5476_v15, %v8367_v5  ;;  %v4956_v1 = vld [vmem:[#allocation3 + $0xd0] sm:$0xff] }
 0x513   : > { %5374 = vmatpush.bf16.msra.mxu2 %v5116_v56  ;;  %v5601_v6 = vmax.f32 %v5560_v9, 0.0  ;;  %6248 = vmatpush.bf16.msra.mxu3 %v5116_v56  ;;  %v5004_v29 = vmul.f32 %v8367_v5, %v4960_v2  ;;  %v5005_v30 = vmul.f32 %v8367_v5, %v4961_v12  ;;  %v8471_v32 = vor.u32 %v6137_v58, %v6038_v13 }
 0x514   : > { %v5557_v11 = vadd.f32 %v5516_v19, %v8376_v22  ;;  %v5101_v31 = vpack.c.bf16 %v5062_v14, %v5061_v24  ;;  %v5558_v35 = vadd.f32 %v5517_v26, %v8376_v22  ;;  %v5530_v36 = vmul.f32 %v5489_v0, %v8367_v5  ;;  %v4957_v14 = vld [vmem:[#allocation3 + $0xd8] sm:$0xff] }
 0x515   : > { %v5627_v21 = vpack.c.bf16 %v5601_v6, %v5600_v20  ;;  %v5048_v40 = vadd.f32 %v8376_v22, %v5004_v29  ;;  %v5049_v41 = vadd.f32 %v8376_v22, %v5005_v30  ;;  %v5002_v23 = vmul.f32 %v8367_v5, %v4958_v28  ;;  %v5462_v6 = vld [vmem:[#allocation3 + $0x1b0] sm:$0xff]  ;;  %v6140_v30 = vld [vmem:[%s8899_s5 + $0xa0] sm:$0xf0] }
 0x516   : > { %6241 = vmatpush.bf16.msra.mxu1 %v5102_v38  ;;  %6064 = vmatmul.msk.bf16.vlgmr.msra.gmra.mxu2 %vm5241_vm10, %v8450_v10  ;;  %v5598_v39 = vmax.f32 %v5557_v11, 0.0  ;;  %v5599_v45 = vmax.f32 %v5558_v35, 0.0  ;;  %v5571_v46 = vadd.f32 %v5530_v36, %v8376_v22  ;;  %v5003_v47 = vmul.f32 %v8367_v5, %v4959_v33  ;;  %v6050_v29 = vld [vmem:[%s8899_s5 + $0x98] sm:$0xf]  ;;  %v5471_v33 = vld [vmem:[#allocation3 + $0x1f8] sm:$0xff]  ;;  %v5472_v36 = vld [vmem:[#allocation3 + $0x200] sm:$0xff] }
 0x517   : > { %5686 = vmatpush.bf16.msrb.mxu2 %v5628_v7  ;;  %5274 = vmatpush.bf16.msra.mxu0 %v5102_v38  ;;  %v5514_v48 = vmul.f32 %v5473_v34, %v8367_v5  ;;  %v5089_v49 = vmax.f32 %v5048_v40, 0.0  ;;  %v5090_v50 = vmax.f32 %v5049_v41, 0.0  ;;  %v5046_v51 = vadd.f32 %v8376_v22, %v5002_v23  ;;  %v5459_v23 = vld [vmem:[#allocation3 + $0x198] sm:$0xff] }
 0x518   : > { %6069 = vmatmul.msk.bf16.vlgmr.msra.gmra.mxu3 %vm5241_vm10, %v8471_v32  ;;  %v5515_v52 = vmul.f32 %v5474_v37, %v8367_v5  ;;  %v5626_v53 = vpack.c.bf16 %v5599_v45, %v5598_v39  ;;  %v5612_v54 = vmax.f32 %v5571_v46, 0.0  ;;  %v5047_v55 = vadd.f32 %v8376_v22, %v5003_v47  ;;  %v5460_v47 = vld [vmem:[#allocation3 + $0x1a0] sm:$0xff] }
 0x519   : > { %v5555_v56 = vadd.f32 %v5514_v48, %v8376_v22  ;;  %v5100_v8 = vpack.c.bf16 %v5060_v17, %v5059_v43  ;;  %v8495_v61 = vor.u32 %v6125_v44, %v5990_v42  ;;  %v5087_v62 = vmax.f32 %v5046_v51, 0.0  ;;  %v5461_v43 = vld [vmem:[#allocation3 + $0x1a8] sm:$0xff] }
 0x51a   : > { %6242 = vmatpush.bf16.msra.mxu1 %v5101_v31  ;;  %v5556_v27 = vadd.f32 %v5515_v52, %v8376_v22  ;;  %v5115_v3 = vpack.c.bf16 %v5090_v50, %v5089_v49  ;;  %v5633_v4 = vpack.c.bf16 %v5612_v54, %v5612_v54  ;;  %v5088_v38 = vmax.f32 %v5047_v55, 0.0  ;;  %v4954_v52 = vld [vmem:[#allocation3 + $0xc0] sm:$0xff]  ;;  %v6030_v54 = vld [vmem:[%s8899_s5 + $0x78] sm:$0xf] }
 0x51b   : > { %5687 = vmatpush.bf16.msrb.mxu2 %v5627_v21  ;;  %5275 = vmatpush.bf16.msra.mxu0 %v5101_v31  ;;  %v5596_v7 = vmax.f32 %v5555_v56, 0.0  ;;  %v5504_v2 = vmul.f32 %v5463_v57, %v8367_v5  ;;  %v5505_v12 = vmul.f32 %v5464_v59, %v8367_v5  ;;  %v5528_v24 = vmul.f32 %v5487_v60, %v8367_v5  ;;  %v6136_v55 = vld [vmem:[%s8899_s5 + $0x80] sm:$0xf0]  ;;  %v5982_v60 = vld [vmem:[%s8899_s5 + $0x18] sm:$0xf] }
 0x51c   : > { %v5597_v15 = vmax.f32 %v5556_v27, 0.0  ;;  %v5635_v16 = vsel %vm2391_vm2, %v5633_v4, 0  ;;  %v5114_v9 = vpack.c.bf16 %v5088_v38, %v5087_v62  ;;  %v5529_v13 = vmul.f32 %v5488_v63, %v8367_v5 }
 0x51d   : > { %v5000_v58 = vmul.f32 %v8367_v5, %v4956_v1  ;;  %v5545_v19 = vadd.f32 %v5504_v2, %v8376_v22  ;;  %v5546_v0 = vadd.f32 %v5505_v12, %v8376_v22  ;;  %v5569_v20 = vadd.f32 %v5528_v24, %v8376_v22  ;;  %v5458_v2 = vld [vmem:[#allocation3 + $0x190] sm:$0xff] }
 0x51e   : > { %6243 = vmatpush.bf16.msra.mxu1 %v5100_v8  ;;  %v5625_v17 = vpack.c.bf16 %v5597_v15, %v5596_v7  ;;  %v5570_v26 = vadd.f32 %v5529_v13, %v8376_v22  ;;  %v5001_v28 = vmul.f32 %v8367_v5, %v4957_v14  ;;  %v5502_v35 = vmul.f32 %v5461_v43, %v8367_v5  ;;  %v5457_v15 = vld [vmem:[#allocation3 + $0x188] sm:$0xff]  ;;  %v5470_v13 = vld [vmem:[#allocation3 + $0x1f0] sm:$0xff] }
 0x51f   : > { %5688 = vmatpush.bf16.msrb.mxu2 %v5626_v53  ;;  %5276 = vmatpush.bf16.msra.mxu0 %v5100_v8  ;;  %v5044_v11 = vadd.f32 %v8376_v22, %v5000_v58  ;;  %v5586_v34 = vmax.f32 %v5545_v19, 0.0  ;;  %v5587_v31 = vmax.f32 %v5546_v0, 0.0  ;;  %v5610_v21 = vmax.f32 %v5569_v20, 0.0  ;;  %v4955_v53 = vld [vmem:[#allocation3 + $0xc8] sm:$0xff]  ;;  %v6124_v8 = vld [vmem:[%s8899_s5 + $0x20] sm:$0xf0] }
 0x520   : > { %v5611_v37 = vmax.f32 %v5570_v26, 0.0  ;;  %v5045_v39 = vadd.f32 %v8376_v22, %v5001_v28  ;;  %v5503_v41 = vmul.f32 %v5462_v6, %v8367_v5  ;;  %v5543_v44 = vadd.f32 %v5502_v35, %v8376_v22  ;;  %v5485_v0 = vld [vmem:[#allocation3 + $0x268] sm:$0xff] }
 0x521   : > { %5297 = vmatmul.bf16.vlgmr.msra.gmra.mxu1 %v8462_v18  ;;  %v5085_v40 = vmax.f32 %v5044_v11, 0.0  ;;  %v5620_v42 = vpack.c.bf16 %v5587_v31, %v5586_v34  ;;  %v8522_v45 = vor.u32 %v6140_v30, %v6050_v29  ;;  %v5512_v46 = vmul.f32 %v5471_v33, %v8367_v5  ;;  %v5486_v11 = vld [vmem:[#allocation3 + $0x270] sm:$0xff] }
 0x522   : > { %5318 = vmatpush.bf16.msrb.mxu1 %v5115_v3  ;;  %5277 = vmatmul.bf16.vlgmr.msra.gmra.mxu0 %v8465_v25  ;;  %v5632_v48 = vpack.c.bf16 %v5611_v37, %v5610_v21  ;;  %v5086_v49 = vmax.f32 %v5045_v39, 0.0  ;;  %v5544_v50 = vadd.f32 %v5503_v41, %v8376_v22  ;;  %v5513_v51 = vmul.f32 %v5472_v36, %v8367_v5  ;;  %v4952_v31 = vld [vmem:[#allocation3 + $0xb0] sm:$0xff]  ;;  %v4953_v39 = vld [vmem:[#allocation3 + $0xb8] sm:$0xff]  ;;  %v6128_v41 = vld [vmem:[%s8899_s5 + $0x40] sm:$0xf0] }
 0x523   : > { %5738 = vmatpush.bf16.msrb.mxu0 %v5635_v16  ;;  %5689 = vmatpush.bf16.msrb.mxu2 %v5625_v17  ;;  %v5584_v56 = vmax.f32 %v5543_v44, 0.0  ;;  %v5553_v57 = vadd.f32 %v5512_v46, %v8376_v22  ;;  %v5500_v59 = vmul.f32 %v5459_v23, %v8367_v5  ;;  %v5501_v1 = vmul.f32 %v5460_v47, %v8367_v5 }
 0x524   : > { %5637 = vmatpush.bf16.msrb.mxu3 %v5620_v42  ;;  %v5113_v62 = vpack.c.bf16 %v5086_v49, %v5085_v40  ;;  %v5585_v27 = vmax.f32 %v5544_v50, 0.0  ;;  %v5554_v63 = vadd.f32 %v5513_v51, %v8376_v22  ;;  %v4998_v38 = vmul.f32 %v8367_v5, %v4954_v52  ;;  %v6002_v40 = vld [vmem:[%s8899_s5 + $0x38] sm:$0xf]  ;;  %v6062_v51 = vld [vmem:[%s8899_s5 + $0xb0] sm:$0xf]  ;;  %v5455_v52 = vld [vmem:[#allocation3 + $0x178] sm:$0xff] }
 0x525   : > { %v5594_v3 = vmax.f32 %v5553_v57, 0.0  ;;  %v5541_v4 = vadd.f32 %v5500_v59, %v8376_v22  ;;  %v4999_v7 = vmul.f32 %v8367_v5, %v4955_v53  ;;  %v8548_v12 = vor.u32 %v6136_v55, %v6030_v54  ;;  %v6143_v57 = vld [vmem:[%s8899_s5 + $0xb8] sm:$0x10]  ;;  %v5456_v59 = vld [vmem:[#allocation3 + $0x180] sm:$0xff] }
 0x526   : > { %5319 = vmatpush.bf16.msrb.mxu1 %v5114_v9  ;;  %6065 = vmatmul.msk.bf16.gmra.mxu2 %vm5241_vm10, %v8495_v61  ;;  %v5619_v24 = vpack.c.bf16 %v5585_v27, %v5584_v56  ;;  %v5595_v14 = vmax.f32 %v5554_v63, 0.0  ;;  %v5542_v16 = vadd.f32 %v5501_v1, %v8376_v22  ;;  %v5469_v9 = vld [vmem:[#allocation3 + $0x1e8] sm:$0xff]  ;;  %v8553_v58 = vor.u32 %v6124_v8, %v5982_v60 }
 0x527   : > { %5739 = vmatpush.bf16.msrb.mxu0 %v5632_v48  ;;  %v5582_v43 = vmax.f32 %v5541_v4, 0.0  ;;  %v5042_v17 = vadd.f32 %v8376_v22, %v4998_v38  ;;  %v5043_v19 = vadd.f32 %v8376_v22, %v4999_v7  ;;  %v5498_v26 = vmul.f32 %v5457_v15, %v8367_v5  ;;  %v5453_v60 = vld [vmem:[#allocation3 + $0x168] sm:$0xff]  ;;  %v5454_v7 = vld [vmem:[#allocation3 + $0x170] sm:$0xff] }
 0x528   : > { %6070 = vmatmul.msk.bf16.gmra.mxu3 %vm5241_vm10, %v8522_v45  ;;  %v5624_v20 = vpack.c.bf16 %v5595_v14, %v5594_v3  ;;  %v5583_v6 = vmax.f32 %v5542_v16, 0.0  ;;  %v5499_v28 = vmul.f32 %v5458_v2, %v8367_v5  ;;  %v5510_v33 = vmul.f32 %v5469_v9, %v8367_v5  ;;  %v5467_v14 = vld [vmem:[#allocation3 + $0x1d8] sm:$0xff]  ;;  %v5468_v16 = vld [vmem:[#allocation3 + $0x1e0] sm:$0xff] }
 0x529   : > { %5638 = vmatpush.bf16.msrb.mxu3 %v5619_v24  ;;  %v5083_v29 = vmax.f32 %v5042_v17, 0.0  ;;  %v5084_v30 = vmax.f32 %v5043_v19, 0.0  ;;  %v5511_v34 = vmul.f32 %v5470_v13, %v8367_v5  ;;  %v5539_v35 = vadd.f32 %v5498_v26, %v8376_v22  ;;  %v4950_v13 = vld [vmem:[#allocation3 + $0xa0] sm:$0xff] }
 0x52a   : > { %5320 = vmatpush.bf16.msrb.mxu1 %v5113_v62  ;;  %5690 = vmatpush.bf16.msrb.mxu2 %v5624_v20  ;;  %v5618_v21 = vpack.c.bf16 %v5583_v6, %v5582_v43  ;;  %v5540_v36 = vadd.f32 %v5499_v28, %v8376_v22  ;;  %v5526_v37 = vmul.f32 %v5485_v0, %v8367_v5 }
 0x52b   : > { %v5112_v23 = vpack.c.bf16 %v5084_v30, %v5083_v29  ;;  %v5551_v42 = vadd.f32 %v5510_v33, %v8376_v22  ;;  %v5552_v44 = vadd.f32 %v5511_v34, %v8376_v22  ;;  %v5527_v46 = vmul.f32 %v5486_v11, %v8367_v5  ;;  %v4951_v11 = vld [vmem:[#allocation3 + $0xa8] sm:$0xff]  ;;  %v5483_v29 = vld [vmem:[#allocation3 + $0x258] sm:$0xff] }
 0x52c   : > { %v5580_v47 = vmax.f32 %v5539_v35, 0.0  ;;  %v5581_v48 = vmax.f32 %v5540_v36, 0.0  ;;  %v5567_v49 = vadd.f32 %v5526_v37, %v8376_v22  ;;  %v4996_v50 = vmul.f32 %v8367_v5, %v4952_v31  ;;  %v6042_v35 = vld [vmem:[%s8899_s5 + $0x90] sm:$0xf]  ;;  %v6139_v36 = vld [vmem:[%s8899_s5 + $0x98] sm:$0xf0] }
 0x52d   : > { %5639 = vmatpush.bf16.msrb.mxu3 %v5618_v21  ;;  %v5592_v53 = vmax.f32 %v5551_v42, 0.0  ;;  %v5593_v54 = vmax.f32 %v5552_v44, 0.0  ;;  %v5568_v55 = vadd.f32 %v5527_v46, %v8376_v22  ;;  %v4997_v56 = vmul.f32 %v8367_v5, %v4953_v39  ;;  %v5484_v21 = vld [vmem:[#allocation3 + $0x260] sm:$0xff]  ;;  %v6127_v42 = vld [vmem:[%s8899_s5 + $0x38] sm:$0xf0] }
 0x52e   : > { %5321 = vmatpush.bf16.msrb.mxu1 %v5112_v23  ;;  %v8583_v8 = vor.u32 %v6128_v41, %v6002_v40  ;;  %v5617_v62 = vpack.c.bf16 %v5581_v48, %v5580_v47  ;;  %v5608_v27 = vmax.f32 %v5567_v49, 0.0  ;;  %v5040_v63 = vadd.f32 %v8376_v22, %v4996_v50  ;;  %v5994_v23 = vld [vmem:[%s8899_s5 + $0x30] sm:$0xf] }
 0x52f   : > { %v5623_v1 = vpack.c.bf16 %v5593_v54, %v5592_v53  ;;  %v5609_v3 = vmax.f32 %v5568_v55, 0.0  ;;  %v5041_v4 = vadd.f32 %v8376_v22, %v4997_v56  ;;  %v5496_v38 = vmul.f32 %v5455_v52, %v8367_v5  ;;  %v5451_v53 = vld [vmem:[#allocation3 + $0x158] sm:$0xff]  ;;  %v5452_v54 = vld [vmem:[#allocation3 + $0x160] sm:$0xff] }
 0x530   : > { %v5081_v15 = vmax.f32 %v5040_v63, 0.0  ;;  %v8589_v2 = vor.u32 %v6143_v57, %v6062_v51  ;;  %v5497_v24 = vmul.f32 %v5456_v59, %v8367_v5  ;;  %v5494_v9 = vmul.f32 %v5453_v60, %v8367_v5  ;;  %v4948_v60 = vld [vmem:[#allocation3 + $0x90] sm:$0xff] }
 0x531   : > { %5302 = vmatmul.bf16.gmra.mxu1 %v8548_v12  ;;  %5640 = vmatpush.bf16.msrb.mxu3 %v5617_v62  ;;  %v5631_v43 = vpack.c.bf16 %v5609_v3, %v5608_v27  ;;  %v5082_v17 = vmax.f32 %v5041_v4, 0.0  ;;  %v5537_v19 = vadd.f32 %v5496_v38, %v8376_v22  ;;  %v5508_v0 = vmul.f32 %v5467_v14, %v8367_v5  ;;  %v4949_v62 = vld [vmem:[#allocation3 + $0x98] sm:$0xff]  ;;  %v5449_v27 = vld [vmem:[#allocation3 + $0x148] sm:$0xff]  ;;  %v5450_v38 = vld [vmem:[#allocation3 + $0x150] sm:$0xff] }
 0x532   : > { %5282 = vmatmul.bf16.gmra.mxu0 %v8553_v58  ;;  %5691 = vmatpush.bf16.msrb.mxu2 %v5623_v1  ;;  %v5538_v20 = vadd.f32 %v5497_v24, %v8376_v22  ;;  %v5509_v6 = vmul.f32 %v5468_v16, %v8367_v5  ;;  %v5495_v26 = vmul.f32 %v5454_v7, %v8367_v5 }
 0x533   : > { %v5535_v28 = vadd.f32 %v5494_v9, %v8376_v22  ;;  %5740 = vmatpush.bf16.msrb.mxu0 %v5631_v43  ;;  %v5111_v30 = vpack.c.bf16 %v5082_v17, %v5081_v15  ;;  %v5578_v33 = vmax.f32 %v5537_v19, 0.0  ;;  %v5549_v34 = vadd.f32 %v5508_v0, %v8376_v22  ;;  %v5465_v17 = vld [vmem:[#allocation3 + $0x1c8] sm:$0xff] }
 0x534   : > { %v4994_v31 = vmul.f32 %v8367_v5, %v4950_v13  ;;  %v5579_v37 = vmax.f32 %v5538_v20, 0.0  ;;  %v5550_v39 = vadd.f32 %v5509_v6, %v8376_v22  ;;  %v5536_v40 = vadd.f32 %v5495_v26, %v8376_v22  ;;  %v5466_v26 = vld [vmem:[#allocation3 + $0x1d0] sm:$0xff] }
 0x535   : > { %v5576_v41 = vmax.f32 %v5535_v28, 0.0  ;;  %5322 = vmatpush.bf16.msrb.mxu1 %v5111_v30  ;;  %v5590_v44 = vmax.f32 %v5549_v34, 0.0  ;;  %v4995_v46 = vmul.f32 %v8367_v5, %v4951_v11  ;;  %v5524_v48 = vmul.f32 %v5483_v29, %v8367_v5  ;;  %v6014_v28 = vld [vmem:[%s8899_s5 + $0x50] sm:$0xf]  ;;  %v4946_v34 = vld [vmem:[#allocation3 + $0x80] sm:$0xff] }
 0x536   : > { %6066 = vmatmul.msk.bf16.gmra.mxu2 %vm5241_vm10, %v8583_v8  ;;  %v5038_v47 = vadd.f32 %v8376_v22, %v4994_v31  ;;  %v5616_v49 = vpack.c.bf16 %v5579_v37, %v5578_v33  ;;  %v5591_v50 = vmax.f32 %v5550_v39, 0.0  ;;  %v5577_v51 = vmax.f32 %v5536_v40, 0.0  ;;  %v6131_v31 = vld [vmem:[%s8899_s5 + $0x58] sm:$0xf0]  ;;  %v4947_v39 = vld [vmem:[#allocation3 + $0x88] sm:$0xff] }
 0x537   : > { %v5525_v52 = vmul.f32 %v5484_v21, %v8367_v5  ;;  %v8624_v55 = vor.u32 %v6139_v36, %v6042_v35  ;;  %v5039_v56 = vadd.f32 %v8376_v22, %v4995_v46  ;;  %v5565_v59 = vadd.f32 %v5524_v48, %v8376_v22 }
 0x538   : > { %6071 = vmatmul.msk.bf16.gmra.mxu3 %vm5241_vm10, %v8589_v2  ;;  %v5079_v57 = vmax.f32 %v5038_v47, 0.0  ;;  %v8628_v63 = vor.u32 %v6127_v42, %v5994_v23  ;;  %v5622_v1 = vpack.c.bf16 %v5591_v50, %v5590_v44  ;;  %v5615_v3 = vpack.c.bf16 %v5577_v51, %v5576_v41  ;;  %v5481_v44 = vld [vmem:[#allocation3 + $0x248] sm:$0xff]  ;;  %v5482_v50 = vld [vmem:[#allocation3 + $0x250] sm:$0xff] }
 0x539   : > { %5641 = vmatpush.bf16.msrb.mxu3 %v5616_v49  ;;  %v5566_v4 = vadd.f32 %v5525_v52, %v8376_v22  ;;  %v5080_v7 = vmax.f32 %v5039_v56, 0.0  ;;  %v5606_v15 = vmax.f32 %v5565_v59, 0.0  ;;  %v5492_v24 = vmul.f32 %v5451_v53, %v8367_v5 }
 0x53a   : > { %v5493_v14 = vmul.f32 %v5452_v54, %v8367_v5  ;;  %5692 = vmatpush.bf16.msrb.mxu2 %v5622_v1  ;;  %v4992_v9 = vmul.f32 %v8367_v5, %v4948_v60  ;;  %v4993_v13 = vmul.f32 %v8367_v5, %v4949_v62  ;;  %v5490_v43 = vmul.f32 %v5449_v27, %v8367_v5 }
 0x53b   : > { %v5607_v16 = vmax.f32 %v5566_v4, 0.0  ;;  %v5110_v19 = vpack.c.bf16 %v5080_v7, %v5079_v57  ;;  %v5533_v0 = vadd.f32 %v5492_v24, %v8376_v22  ;;  %v5491_v6 = vmul.f32 %v5450_v38, %v8367_v5 }
 0x53c   : > { %v5534_v20 = vadd.f32 %v5493_v14, %v8376_v22  ;;  %v5036_v29 = vadd.f32 %v8376_v22, %v4992_v9  ;;  %v5037_v30 = vadd.f32 %v8376_v22, %v4993_v13  ;;  %v5531_v33 = vadd.f32 %v5490_v43, %v8376_v22  ;;  %v6006_v13 = vld [vmem:[%s8899_s5 + $0x48] sm:$0xf]  ;;  %v6130_v43 = vld [vmem:[%s8899_s5 + $0x50] sm:$0xf0] }
 0x53d   : > { %5642 = vmatpush.bf16.msrb.mxu3 %v5615_v3  ;;  %v5630_v11 = vpack.c.bf16 %v5607_v16, %v5606_v15  ;;  %5323 = vmatpush.bf16.msrb.mxu1 %v5110_v19  ;;  %v5574_v21 = vmax.f32 %v5533_v0, 0.0  ;;  %v5532_v36 = vadd.f32 %v5491_v6, %v8376_v22  ;;  %v5506_v37 = vmul.f32 %v5465_v17, %v8367_v5  ;;  %v6026_v19 = vld [vmem:[%s8899_s5 + $0x68] sm:$0xf]  ;;  %v6134_v0 = vld [vmem:[%s8899_s5 + $0x70] sm:$0xf0] }
 0x53e   : > { %v5575_v35 = vmax.f32 %v5534_v20, 0.0  ;;  %v5077_v40 = vmax.f32 %v5036_v29, 0.0  ;;  %v5078_v41 = vmax.f32 %v5037_v30, 0.0  ;;  %v5572_v23 = vmax.f32 %v5531_v33, 0.0  ;;  %v6120_v6 = vld [vmem:[%s8899_s5 + $0x4] sm:$0xf] }
 0x53f   : > { %5741 = vmatpush.bf16.msrb.mxu0 %v5630_v11  ;;  %v5507_v42 = vmul.f32 %v5466_v26, %v8367_v5  ;;  %v5573_v47 = vmax.f32 %v5532_v36, 0.0  ;;  %v5547_v48 = vadd.f32 %v5506_v37, %v8376_v22  ;;  %v4990_v49 = vmul.f32 %v8367_v5, %v4946_v34  ;;  %v5972_v26 = vld [vmem:[%s8899_s5 + $0xc] sm:$0xf0]  ;;  %v5984_v11 = vld [vmem:[%s8899_s5 + $0x24] sm:$0xf0] }
 0x540   : > { %v5614_v46 = vpack.c.bf16 %v5575_v35, %v5574_v21  ;;  %v8654_v51 = vor.u32 %v6131_v31, %v6014_v28  ;;  %v5109_v52 = vpack.c.bf16 %v5078_v41, %v5077_v40  ;;  %v4991_v54 = vmul.f32 %v8367_v5, %v4947_v39  ;;  %v6008_v33 = vld [vmem:[%s8899_s5 + $0x54] sm:$0xf0] }
 0x541   : > { %5307 = vmatmul.bf16.gmra.mxu1 %v8624_v55  ;;  %v5548_v53 = vadd.f32 %v5507_v42, %v8376_v22  ;;  %v5613_v56 = vpack.c.bf16 %v5573_v47, %v5572_v23  ;;  %v5588_v57 = vmax.f32 %v5547_v48, 0.0  ;;  %v5034_v59 = vadd.f32 %v8376_v22, %v4990_v49  ;;  %v6135_v42 = vld [vmem:[%s8899_s5 + $0x7c] sm:$0xf] }
 0x542   : > { %5287 = vmatmul.bf16.gmra.mxu0 %v8628_v63  ;;  %5643 = vmatpush.bf16.msrb.mxu3 %v5614_v46  ;;  %v5522_v60 = vmul.f32 %v5481_v44, %v8367_v5  ;;  %v5035_v27 = vadd.f32 %v8376_v22, %v4991_v54  ;;  %v5523_v1 = vmul.f32 %v5482_v50, %v8367_v5  ;;  %v6054_v5 = vld [vmem:[%s8899_s5 + $0xa8] sm:$0xf]  ;;  %v6138_v54 = vld [vmem:[%s8899_s5 + $0x94] sm:$0xf] }
 0x543   : > { %5324 = vmatpush.bf16.msrb.mxu1 %v5109_v52  ;;  %v5589_v62 = vmax.f32 %v5548_v53, 0.0  ;;  %v5075_v3 = vmax.f32 %v5034_v59, 0.0  ;;  %v6027_v20 = vor.u32 %v6134_v0, %v6026_v19  ;;  %v5975_v28 = vor.u32 %v6120_v6, %v5972_v26  ;;  %v6032_v44 = vld [vmem:[%s8899_s5 + $0x84] sm:$0xf0] }
 0x544   : > { %v5563_v4 = vadd.f32 %v5522_v60, %v8376_v22  ;;  %v5076_v7 = vmax.f32 %v5035_v27, 0.0  ;;  %v5564_v15 = vadd.f32 %v5523_v1, %v8376_v22  ;;  %v6142_v22 = vld [vmem:[%s8899_s5 + $0xb0] sm:$0x10]  ;;  %v6035_v47 = vor.u32 %v6135_v42, %v6032_v44 }
 0x545   : > { %v5621_v38 = vpack.c.bf16 %v5589_v62, %v5588_v57  ;;  %v8680_v17 = vor.u32 %v6142_v22, %v6054_v5 }
 0x546   : > { %6067 = vmatmul.msk.bf16.gmra.mxu2 %vm5241_vm10, %v8654_v51  ;;  %5644 = vmatpush.bf16.msrb.mxu3 %v5613_v56  ;;  %v5604_v24 = vmax.f32 %v5563_v4, 0.0  ;;  %v5108_v14 = vpack.c.bf16 %v5076_v7, %v5075_v3  ;;  %v5605_v16 = vmax.f32 %v5564_v15, 0.0  ;;  %v6044_v56 = vld [vmem:[%s8899_s5 + $0x9c] sm:$0xf0]  ;;  %v6056_v7 = vld [vmem:[%s8899_s5 + $0xb4] sm:$0x10] }
 0x547   : > { %5693 = vmatpush.bf16.msrb.mxu2 %v5621_v38  ;;  %v6141_v38 = vld [vmem:[%s8899_s5 + $0xac] sm:$0xf] }
 0x548   : > { %5325 = vmatpush.bf16.msrb.mxu1 %v5108_v14  ;;  %v5629_v9 = vpack.c.bf16 %v5605_v16, %v5604_v24  ;;  %v6059_v24 = vor.u32 %v6141_v38, %v6056_v7 }
 0x549   : > { %5645 = vmatmul.bf16.vlgmr.msrb.gmra.mxu3 %v8465_v25  ;;  %v6007_v25 = vor.u32 %v6130_v43, %v6006_v13 }
 0x54a   : > { %5742 = vmatpush.bf16.msrb.mxu0 %v5629_v9 }
 0x551   : > { %5312 = vmatmul.bf16.gmra.mxu1 %v8680_v17 }
 0x552   : > { %5292 = vmatmul.bf16.gmra.mxu0 %v6007_v25 }
 0x556   : > { %6068 = vmatmul.msk.bf16.gmra.mxu2 %vm5241_vm10, %v6027_v20 }
 0x559   : > { %5650 = vmatmul.bf16.gmra.mxu3 %v8553_v58  ;;  %v6123_v58 = vld [vmem:[%s8899_s5 + $0x1c] sm:$0xf] }
 0x55a   : > { %v5987_v29 = vor.u32 %v6123_v58, %v5984_v11 }
 0x561   : > { %5326 = vmatmul.bf16.vlgmr.msrb.gmra.mxu1 %v5975_v28 }
 0x562   : > { %6072 = vmatmul.msk.bf16.vlgmr.msrb.gmra.mxu0 %vm5241_vm10, %v8450_v10  ;;  %v6126_v10 = vld [vmem:[%s8899_s5 + $0x34] sm:$0xf] }
 0x566   : > { %5694 = vmatmul.bf16.vlgmr.msrb.gmra.mxu2 %v5975_v28 }
 0x569   : > { %5655 = vmatmul.bf16.gmra.mxu3 %v8628_v63  ;;  %v5996_v63 = vld [vmem:[%s8899_s5 + $0x3c] sm:$0xf0] }
 0x56a   : > { %v5999_v30 = vor.u32 %v6126_v10, %v5996_v63 }
 0x571   : > { %5331 = vmatmul.bf16.gmra.mxu1 %v5987_v29 }
 0x572   : > { %6073 = vmatmul.msk.bf16.gmra.mxu0 %vm5241_vm10, %v8495_v61  ;;  %v6129_v61 = vld [vmem:[%s8899_s5 + $0x4c] sm:$0xf] }
 0x573   : > { %v6011_v34 = vor.u32 %v6129_v61, %v6008_v33 }
 0x576   : > { %5699 = vmatmul.bf16.gmra.mxu2 %v5987_v29 }
 0x579   : > { %5660 = vmatmul.bf16.gmra.mxu3 %v6007_v25 }
 0x581   : > { %5336 = vmatmul.bf16.gmra.mxu1 %v5999_v30 }
 0x582   : > { %6074 = vmatmul.msk.bf16.gmra.mxu0 %vm5241_vm10, %v8583_v8  ;;  %v6020_v8 = vld [vmem:[%s8899_s5 + $0x6c] sm:$0xf0] }
 0x586   : > { %5704 = vmatmul.bf16.gmra.mxu2 %v5999_v30 }
 0x589   : > { %5665 = vmatmul.bf16.gmra.mxu3 %v8462_v18  ;;  %v6132_v18 = vld [vmem:[%s8899_s5 + $0x64] sm:$0xf] }
 0x58a   : > { %v6023_v35 = vor.u32 %v6132_v18, %v6020_v8 }
 0x591   : > { %5341 = vmatmul.bf16.gmra.mxu1 %v6011_v34 }
 0x592   : > { %6075 = vmatmul.msk.bf16.gmra.mxu0 %vm5241_vm10, %v8654_v51 }
 0x596   : > { %5709 = vmatmul.bf16.gmra.mxu2 %v6011_v34 }
 0x599   : > { %v8725_v31 = vpop.f32.mrf.mxu2  ;;  %5670 = vmatmul.bf16.gmra.mxu3 %v8548_v12 }
 0x59b   : > { %v8734_v21 = vpop.f32.mrf.mxu3 }
 0x59e   : > { %v8736_v36 = vpop.f32.mrf.mxu1 }
 0x59f   : > { %v5278_v37 = vpop.f32.mrf.mxu0 }
 0x5a1   : > { %5346 = vmatmul.bf16.gmra.mxu1 %v6023_v35  ;;  %v5378_v39 = vpop.f32.mrf.mxu2 }
 0x5a2   : > { %6076 = vmatmul.msk.bf16.gmra.mxu0 %vm5241_vm10, %v6027_v20 }
 0x5a3   : > { %v8739_v40 = vpop.f32.mrf.mxu3 }
 0x5a6   : > { %v8741_v12 = vpop.f32.mrf.mxu1  ;;  %5714 = vmatmul.bf16.gmra.mxu2 %v6023_v35 }
 0x5a7   : > { %v5280_v41 = vpop.f32.mrf.mxu0 }
 0x5a9   : > { %v8743_v23 = vpop.f32.mrf.mxu2  ;;  %5675 = vmatmul.bf16.gmra.mxu3 %v8624_v55 }
 0x5ab   : > { %v8752_v46 = vpop.f32.mrf.mxu3 }
 0x5ae   : > { %v8754_v48 = vpop.f32.mrf.mxu1 }
 0x5af   : > { %v5283_v49 = vpop.f32.mrf.mxu0 }
 0x5b1   : > { %5351 = vmatmul.bf16.gmra.mxu1 %v6035_v47  ;;  %v8756_v50 = vpop.f32.mrf.mxu2 }
 0x5b2   : > { %6077 = vmatmul.msk.bf16.gmra.mxu0 %vm5241_vm10, %v8471_v32  ;;  %v6047_v32 = vor.u32 %v6138_v54, %v6044_v56 }
 0x5b3   : > { %v8760_v55 = vpop.f32.mrf.mxu3 }
 0x5b6   : > { %v8762_v51 = vpop.f32.mrf.mxu1  ;;  %5719 = vmatmul.bf16.gmra.mxu2 %v6035_v47 }
 0x5b7   : > { %v5285_v52 = vpop.f32.mrf.mxu0 }
 0x5b9   : > { %v8764_v53 = vpop.f32.mrf.mxu2  ;;  %5680 = vmatmul.bf16.gmra.mxu3 %v8680_v17 }
 0x5bb   : > { %v8773_v57 = vpop.f32.mrf.mxu3 }
 0x5be   : > { %v8775_v59 = vpop.f32.mrf.mxu1 }
 0x5bf   : > { %v8777_v60 = vpop.f32.mrf.mxu0 }
 0x5c1   : > { %5356 = vmatmul.bf16.gmra.mxu1 %v6047_v32  ;;  %v8779_v62 = vpop.f32.mrf.mxu2 }
 0x5c2   : > { %6078 = vmatmul.msk.bf16.gmra.mxu0 %vm5241_vm10, %v8522_v45 }
 0x5c3   : > { %v8783_v27 = vpop.f32.mrf.mxu3 }
 0x5c6   : > { %v8785_v1 = vpop.f32.mrf.mxu1  ;;  %5724 = vmatmul.bf16.gmra.mxu2 %v6047_v32 }
 0x5c7   : > { %v5290_v3 = vpop.f32.mrf.mxu0 }
 0x5c9   : > { %v8787_v4 = vpop.f32.mrf.mxu2 }
 0x5cc   : > { %v5646_v15 = vpop.f32.mrf.mxu3 }
 0x5ce   : > { %v8795_v14 = vpop.f32.mrf.mxu1 }
 0x5cf   : > { %v8797_v45 = vpop.f32.mrf.mxu0 }
 0x5d1   : > { %5361 = vmatmul.bf16.gmra.mxu1 %v6059_v24  ;;  %v8799_v16 = vpop.f32.mrf.mxu2 }
 0x5d2   : > { %6079 = vmatmul.msk.bf16.gmra.mxu0 %vm5241_vm10, %v8589_v2 }
 0x5d4   : > { %v5648_v9 = vpop.f32.mrf.mxu3 }
 0x5d6   : > { %v8803_v5 = vpop.f32.mrf.mxu1  ;;  %5729 = vmatmul.bf16.gmra.mxu2 %v6059_v24 }
 0x5d7   : > { %v8805_v22 = vpop.f32.mrf.mxu0 }
 0x5d9   : > { %v8807_v13 = vpop.f32.mrf.mxu2 }
 0x5dc   : > { %v5651_v25 = vpop.f32.mrf.mxu3 }
 0x5de   : > { %v5327_v43 = vpop.f32.mrf.mxu1 }
 0x5df   : > { %v5744_v17 = vpop.f32.mrf.mxu0  ;;  %v5328_v0 = vadd.f32 %v5327_v43, %v5278_v37 }
 0x5e1   : > { %v8809_v19 = vpop.f32.mrf.mxu2  ;;  %v5377_v28 = vadd.f32 %v8725_v31, %v5328_v0 }
 0x5e4   : > { %v5653_v11 = vpop.f32.mrf.mxu3 }
 0x5e6   : > { %v5329_v20 = vpop.f32.mrf.mxu1 }
 0x5e7   : > { %v5330_v6 = vadd.f32 %v5329_v20, %v5280_v41  ;;  %v5746_v26 = vpop.f32.mrf.mxu0 }
 0x5e9   : > { %v5379_v2 = vadd.f32 %v5378_v39, %v5330_v6  ;;  %v5695_v58 = vpop.f32.mrf.mxu2 }
 0x5ea   : > { %v5696_v30 = vadd.f32 %v5695_v58, %v5646_v15 }
 0x5eb   : > { %v6147_v29 = vpack.c.bf16 %v5379_v2, %v5377_v28 }
 0x5ec   : > { %v5656_v34 = vpop.f32.mrf.mxu3  ;;  %v5745_v18 = vadd.f32 %v5744_v17, %v5696_v30 }
 0x5ed   : > { %6148 = vst [vmem:[%s8900_s6] sm:$0xff] %v6147_v29  }
 0x5ee   : > { %v5332_v10 = vpop.f32.mrf.mxu1 }
 0x5ef   : > { %v5749_v63 = vpop.f32.mrf.mxu0  ;;  %v5333_v35 = vadd.f32 %v5332_v10, %v5283_v49 }
 0x5f1   : > { %v5697_v61 = vpop.f32.mrf.mxu2  ;;  %v5382_v42 = vadd.f32 %v8743_v23, %v5333_v35 }
 0x5f2   : > { %v5698_v33 = vadd.f32 %v5697_v61, %v5648_v9 }
 0x5f4   : > { %v5747_v8 = vadd.f32 %v5746_v26, %v5698_v33  ;;  %v5658_v56 = vpop.f32.mrf.mxu3 }
 0x5f6   : > { %v6182_v37 = vpack.c.bf16 %v5747_v8, %v5745_v18  ;;  %v5334_v41 = vpop.f32.mrf.mxu1 }
 0x5f7   : > { %v5335_v31 = vadd.f32 %v5334_v41, %v5285_v52  ;;  %v5751_v39 = vpop.f32.mrf.mxu0 }
 0x5f8   : > { %6220 = vst [vmem:[%s8900_s6 + $0x40] sm:$0xff] %v6182_v37  }
 0x5f9   : > { %v5384_v44 = vadd.f32 %v8756_v50, %v5335_v31  ;;  %v5700_v47 = vpop.f32.mrf.mxu2 }
 0x5fa   : > { %v5701_v38 = vadd.f32 %v5700_v47, %v5651_v25 }
 0x5fb   : > { %v6152_v54 = vpack.c.bf16 %v5384_v44, %v5382_v42 }
 0x5fc   : > { %v5750_v15 = vadd.f32 %v5749_v63, %v5701_v38  ;;  %v5661_v0 = vpop.f32.mrf.mxu3 }
 0x5fd   : > { %6214 = vst [vmem:[%s8900_s6 + $0x8] sm:$0xff] %v6152_v54  }
 0x5fe   : > { %v5337_v49 = vpop.f32.mrf.mxu1 }
 0x5ff   : > { %v5754_v32 = vpop.f32.mrf.mxu0  ;;  %v5338_v9 = vadd.f32 %v5337_v49, %v8777_v60 }
 0x601   : > { %v5702_v52 = vpop.f32.mrf.mxu2  ;;  %v5387_v20 = vadd.f32 %v8764_v53, %v5338_v9 }
 0x602   : > { %v5703_v7 = vadd.f32 %v5702_v52, %v5653_v11 }
 0x604   : > { %v5752_v24 = vadd.f32 %v5751_v39, %v5703_v7  ;;  %v5663_v58 = vpop.f32.mrf.mxu3 }
 0x606   : > { %v6187_v43 = vpack.c.bf16 %v5752_v24, %v5750_v15  ;;  %v5339_v23 = vpop.f32.mrf.mxu1 }
 0x607   : > { %v5340_v17 = vadd.f32 %v5339_v23, %v5290_v3  ;;  %v5756_v50 = vpop.f32.mrf.mxu0 }
 0x608   : > { %6221 = vst [vmem:[%s8900_s6 + $0x48] sm:$0xff] %v6187_v43  }
 0x609   : > { %v5389_v6 = vadd.f32 %v8779_v62, %v5340_v17  ;;  %v5705_v25 = vpop.f32.mrf.mxu2 }
 0x60a   : > { %v5706_v2 = vadd.f32 %v5705_v25, %v5656_v34 }
 0x60b   : > { %v6157_v26 = vpack.c.bf16 %v5389_v6, %v5387_v20 }
 0x60c   : > { %v5755_v29 = vadd.f32 %v5754_v32, %v5706_v2  ;;  %v5666_v35 = vpop.f32.mrf.mxu3 }
 0x60d   : > { %6215 = vst [vmem:[%s8900_s6 + $0x10] sm:$0xff] %v6157_v26  }
 0x60e   : > { %v5342_v60 = vpop.f32.mrf.mxu1 }
 0x60f   : > { %v5759_v28 = vpop.f32.mrf.mxu0  ;;  %v5343_v63 = vadd.f32 %v5342_v60, %v8797_v45 }
 0x611   : > { %v5707_v3 = vpop.f32.mrf.mxu2  ;;  %v5392_v33 = vadd.f32 %v8787_v4, %v5343_v63 }
 0x612   : > { %v5708_v11 = vadd.f32 %v5707_v3, %v5658_v56 }
 0x614   : > { %v5757_v10 = vadd.f32 %v5756_v50, %v5708_v11  ;;  %v5668_v47 = vpop.f32.mrf.mxu3 }
 0x616   : > { %v6192_v30 = vpack.c.bf16 %v5757_v10, %v5755_v29  ;;  %v5344_v53 = vpop.f32.mrf.mxu1 }
 0x617   : > { %v5345_v62 = vadd.f32 %v5344_v53, %v8805_v22  ;;  %v5761_v61 = vpop.f32.mrf.mxu0 }
 0x618   : > { %6222 = vst [vmem:[%s8900_s6 + $0x50] sm:$0xff] %v6192_v30  }
 0x619   : > { %v5394_v34 = vadd.f32 %v8799_v16, %v5345_v62  ;;  %v5710_v18 = vpop.f32.mrf.mxu2 }
 0x61a   : > { %v5711_v41 = vadd.f32 %v5710_v18, %v5661_v0 }
 0x61b   : > { %v6162_v8 = vpack.c.bf16 %v5394_v34, %v5392_v33 }
 0x61c   : > { %v5760_v39 = vadd.f32 %v5759_v28, %v5711_v41  ;;  %v5671_v7 = vpop.f32.mrf.mxu3 }
 0x61d   : > { %6216 = vst [vmem:[%s8900_s6 + $0x18] sm:$0xff] %v6162_v8  }
 0x61e   : > { %v5347_v45 = vpop.f32.mrf.mxu1 }
 0x61f   : > { %v5764_v37 = vpop.f32.mrf.mxu0  ;;  %v5348_v44 = vadd.f32 %v5347_v45, %v8736_v36 }
 0x621   : > { %v5712_v22 = vpop.f32.mrf.mxu2  ;;  %v5397_v49 = vadd.f32 %v8807_v13, %v5348_v44 }
 0x622   : > { %v5713_v31 = vadd.f32 %v5712_v22, %v5663_v58 }
 0x624   : > { %v5762_v42 = vadd.f32 %v5761_v61, %v5713_v31  ;;  %v5673_v6 = vpop.f32.mrf.mxu3 }
 0x626   : > { %v6197_v4 = vpack.c.bf16 %v5762_v42, %v5760_v39  ;;  %v5349_v54 = vpop.f32.mrf.mxu1 }
 0x627   : > { %v5350_v16 = vadd.f32 %v5349_v54, %v8741_v12  ;;  %v5766_v56 = vpop.f32.mrf.mxu0 }
 0x628   : > { %6223 = vst [vmem:[%s8900_s6 + $0x58] sm:$0xff] %v6197_v4  }
 0x629   : > { %v5399_v32 = vadd.f32 %v8809_v19, %v5350_v16  ;;  %v5715_v38 = vpop.f32.mrf.mxu2 }
 0x62a   : > { %v5716_v15 = vadd.f32 %v5715_v38, %v5666_v35 }
 0x62b   : > { %v6167_v52 = vpack.c.bf16 %v5399_v32, %v5397_v49 }
 0x62c   : > { %v5765_v43 = vadd.f32 %v5764_v37, %v5716_v15  ;;  %v5676_v3 = vpop.f32.mrf.mxu3 }
 0x62d   : > { %6217 = vst [vmem:[%s8900_s6 + $0x20] sm:$0xff] %v6167_v52  }
 0x62e   : > { %v5352_v36 = vpop.f32.mrf.mxu1 }
 0x62f   : > { %v5769_v12 = vpop.f32.mrf.mxu0  ;;  %v5353_v17 = vadd.f32 %v5352_v36, %v8754_v48 }
 0x631   : > { %v5717_v24 = vpop.f32.mrf.mxu2  ;;  %v5402_v0 = vadd.f32 %v8734_v21, %v5353_v17 }
 0x632   : > { %v5718_v9 = vadd.f32 %v5717_v24, %v5668_v47 }
 0x634   : > { %v5767_v23 = vadd.f32 %v5766_v56, %v5718_v9 }
 0x636   : > { %v6202_v50 = vpack.c.bf16 %v5767_v23, %v5765_v43  ;;  %v5354_v13 = vpop.f32.mrf.mxu1 }
 0x637   : > { %v5355_v19 = vadd.f32 %v5354_v13, %v8762_v51  ;;  %v5771_v60 = vpop.f32.mrf.mxu0 }
 0x638   : > { %6224 = vst [vmem:[%s8900_s6 + $0x60] sm:$0xff] %v6202_v50  }
 0x639   : > { %v5404_v20 = vadd.f32 %v8739_v40, %v5355_v19  ;;  %v5720_v25 = vpop.f32.mrf.mxu2 }
 0x63a   : > { %v5721_v28 = vadd.f32 %v5720_v25, %v5671_v7 }
 0x63b   : > { %v6172_v26 = vpack.c.bf16 %v5404_v20, %v5402_v0 }
 0x63c   : > { %v5770_v58 = vadd.f32 %v5769_v12, %v5721_v28 }
 0x63d   : > { %6218 = vst [vmem:[%s8900_s6 + $0x28] sm:$0xff] %v6172_v26  }
 0x63e   : > { %v5357_v48 = vpop.f32.mrf.mxu1 }
 0x63f   : > { %v5358_v29 = vadd.f32 %v5357_v48, %v8775_v59  ;;  %v5774_v21 = vpop.f32.mrf.mxu0  ;;  %v5678_v59 = vpop.f32.mrf.mxu3 }
 0x641   : > { %v5722_v2 = vpop.f32.mrf.mxu2  ;;  %v5407_v30 = vadd.f32 %v8752_v46, %v5358_v29 }
 0x642   : > { %v5723_v51 = vadd.f32 %v5722_v2, %v5673_v6 }
 0x644   : > { %v5772_v11 = vadd.f32 %v5771_v60, %v5723_v51 }
 0x646   : > { %v6207_v10 = vpack.c.bf16 %v5772_v11, %v5770_v58  ;;  %v5359_v40 = vpop.f32.mrf.mxu1 }
 0x647   : > { %v5360_v63 = vadd.f32 %v5359_v40, %v8785_v1  ;;  %v5776_v34 = vpop.f32.mrf.mxu0  ;;  %v5681_v31 = vpop.f32.mrf.mxu3 }
 0x648   : > { %6225 = vst [vmem:[%s8900_s6 + $0x68] sm:$0xff] %v6207_v10  }
 0x649   : > { %v5409_v53 = vadd.f32 %v8760_v55, %v5360_v63  ;;  %v5725_v62 = vpop.f32.mrf.mxu2 }
 0x64a   : > { %v5726_v1 = vadd.f32 %v5725_v62, %v5676_v3 }
 0x64b   : > { %v6177_v61 = vpack.c.bf16 %v5409_v53, %v5407_v30 }
 0x64c   : > { %v5775_v46 = vadd.f32 %v5774_v21, %v5726_v1 }
 0x64d   : > { %6219 = vst [vmem:[%s8900_s6 + $0x30] sm:$0xff] %v6177_v61  }
 0x64e   : > { %v5362_v33 = vpop.f32.mrf.mxu1 }
 0x64f   : > { %v5363_v18 = vadd.f32 %v5362_v33, %v8795_v14  ;;  %v5779_v14 = vpop.f32.mrf.mxu0 }
 0x651   : > { %v5412_v8 = vadd.f32 %v8773_v57, %v5363_v18  ;;  %v5727_v35 = vpop.f32.mrf.mxu2 }
 0x652   : > { %v5728_v45 = vadd.f32 %v5727_v35, %v5678_v59 }
 0x653   : > { %v5430_v37 = vpack.c.bf16 %v5412_v8, %v5412_v8 }
 0x654   : > { %v5777_v41 = vadd.f32 %v5776_v34, %v5728_v45 }
 0x655   : > { %5446 = vst [vmem:[%s8900_s6 + $0x38] sm:$0xf] %v5430_v37 }
 0x656   : > { %v6212_v55 = vpack.c.bf16 %v5777_v41, %v5775_v46  ;;  %v5364_v22 = vpop.f32.mrf.mxu1 }
 0x657   : > { %v5365_v39 = vadd.f32 %v5364_v22, %v8803_v5  ;;  %v5683_v5 = vpop.f32.mrf.mxu3  ;;  %v5781_v49 = vpop.f32.mrf.mxu0 }
 0x658   : > { %6226 = vst [vmem:[%s8900_s6 + $0x70] sm:$0xff] %v6212_v55  }
 0x659   : > { %v5414_v57 = vadd.f32 %v8783_v27, %v5365_v39  ;;  %v5730_v42 = vpop.f32.mrf.mxu2 }
 0x65a   : > { %v5731_v44 = vadd.f32 %v5730_v42, %v5681_v31 }
 0x65b   : > { %v5431_v47 = vpack.c.bf16 %v5414_v57, %v5414_v57 }
 0x65c   : > { %v5780_v4 = vadd.f32 %v5779_v14, %v5731_v44 }
 0x65d   : > { %5447 = vst [vmem:[%s8900_s6 + $0x3c] sm:$0x1] %v5431_v47 }
 0x65e   : > { %v5798_v54 = vpack.c.bf16 %v5780_v4, %v5780_v4 }
 0x660   : > { %6094 = vst [vmem:[%s8900_s6 + $0x78] sm:$0xf] %v5798_v54 }
 0x661   : > { %v5732_v16 = vpop.f32.mrf.mxu2 }
 0x662   : > { %v5733_v56 = vadd.f32 %v5732_v16, %v5683_v5 }
 0x664   : > { %v5782_v32 = vadd.f32 %v5781_v49, %v5733_v56 }
 0x666   : > { %v5799_v38 = vpack.c.bf16 %v5782_v32, %v5782_v32 }
 0x668   : > { %6095 = vst [vmem:[%s8900_s6 + $0x7c] sm:$0x1] %v5799_v38 }
 0x669 PF: > { %s16_s21 = sadd.s32 1, %s6279_s21  }
 0x66a   : > { %p13_p6 = scmp.ge.s32.totalorder %s16_s21, 4  }
 0x66c   :  { %15 = sbr.rel (!%p13_p6) target bundleno = 1 (0x1), region = 81 }

</bundles_post_ra>
